<compile_context>
chip_gen: v6e
topology: v6e:2x2x1
jax: 0.10.0
libtpu: 0.0.40
codegen_flags: <defaults>
</compile_context>

<pallas_src>
import functools

import jax
import jax.numpy as jnp
from jax.experimental import pallas as pl
from jax.experimental.pallas import tpu as pltpu


_CPARAMS = pltpu.CompilerParams(
    dimension_semantics=("parallel",),
    vmem_limit_bytes=32 * 1024 * 1024,
)


# ---------------------------------------------------------------------------
# In-kernel helpers
# ---------------------------------------------------------------------------
def _patch_matmul(xs_ref, w_ref, ho, wo):
    """Stride-1 2x2 valid conv over a space-to-depth block as 4 accumulated
    matmuls (one per 2x2 tap) — the patch duplication happens in VMEM, never
    in HBM.  xs_ref: (B, ho+1, wo+1, c4) bf16; w_ref: (4*c4, cout) bf16 with
    rows ordered (p, q, u, v, cin).  Returns f32 (B*ho*wo, cout)."""
    btile, _, _, c4 = xs_ref.shape
    acc = None
    for idx, (p, q) in enumerate(((0, 0), (0, 1), (1, 0), (1, 1))):
        col = xs_ref[:, p:p + ho, q:q + wo, :]            # (B, ho, wo, c4)
        col = col.reshape(btile * ho * wo, c4)            # wo % 8 == 0 -> cheap
        wk = w_ref[idx * c4:(idx + 1) * c4, :]            # (c4, cout)
        part = jnp.dot(col, wk, preferred_element_type=jnp.float32)
        acc = part if acc is None else acc + part
    return acc


# ---------------------------------------------------------------------------
# Pallas kernels
# ---------------------------------------------------------------------------
def _conv_bias_lrelu_kernel(xs_ref, w_ref, b_ref, o_ref, *, ho, wo, slope):
    # Conv(4x4 / stride 2) + bias + LeakyReLU for `btile` images per grid step.
    btile = xs_ref.shape[0]
    cout = w_ref.shape[1]
    acc = _patch_matmul(xs_ref, w_ref, ho, wo) + b_ref[...]      # (B*M, cout) f32
    acc = jnp.where(acc >= 0.0, acc, slope * acc)
    o_ref[...] = acc.reshape(btile, ho * wo, cout).astype(o_ref.dtype)


def _conv_in_lrelu_kernel(xs_ref, w_ref, g_ref, b_ref, o_ref, *, ho, wo, eps, slope):
    # Conv(4x4 / stride 2, no bias) + InstanceNorm2d(affine) + LeakyReLU.
    btile = xs_ref.shape[0]
    cout = w_ref.shape[1]
    acc = _patch_matmul(xs_ref, w_ref, ho, wo).reshape(btile, ho * wo, cout)
    mean = jnp.mean(acc, axis=1, keepdims=True)                  # per (image, chan)
    var = jnp.mean(acc * acc, axis=1, keepdims=True) - mean * mean
    y = (acc - mean) * jax.lax.rsqrt(var + eps) * g_ref[...] + b_ref[...]
    o_ref[...] = jnp.where(y >= 0.0, y, slope * y).astype(o_ref.dtype)


def _conv_in_lrelu_conv5_kernel(p_ref, w_ref, g_ref, b_ref, w5_ref, b5_ref,
                                o_ref, *, eps, slope):
    # b3 block (Conv + IN + LeakyReLU) fused with conv5: the 4x4x8F map the
    # block produces is exactly what conv5 (4x4/s2/p0 -> 1x1) consumes, so the
    # critic score is an elementwise mul + full reduce (VPU/XLU) against the
    # flattened conv5 weight.  p_ref: (B, 16, K) bf16 patches; o_ref: (B,1,1).
    btile, m, k = p_ref.shape
    cout = w_ref.shape[1]
    pat = p_ref[...].reshape(btile * m, k)
    acc = jnp.dot(pat, w_ref[...], preferred_element_type=jnp.float32)
    acc = acc.reshape(btile, m, cout)
    mean = jnp.mean(acc, axis=1, keepdims=True)
    var = jnp.mean(acc * acc, axis=1, keepdims=True) - mean * mean
    y = (acc - mean) * jax.lax.rsqrt(var + eps) * g_ref[...] + b_ref[...]
    y = jnp.where(y >= 0.0, y, slope * y)                        # (B, 16, cout) f32
    s = jnp.sum(y * w5_ref[...], axis=2, keepdims=True)          # lane reduce
    s = jnp.sum(s, axis=1, keepdims=True)                        # sublane reduce
    o_ref[...] = (s + b5_ref[...]).astype(o_ref.dtype)           # (B, 1, 1)


# ---------------------------------------------------------------------------
# XLA-side glue: space-to-depth layout, weight repack, btile choice
# ---------------------------------------------------------------------------
def _space_to_depth(x_nhwc, pad):
    """(N,H,W,C) -> (N,(H+2p)/2,(W+2p)/2,4C); channel order (u, v, c)."""
    if pad:
        x_nhwc = jnp.pad(x_nhwc, ((0, 0), (pad, pad), (pad, pad), (0, 0)))
    n, h, w, c = x_nhwc.shape
    assert h % 2 == 0 and w % 2 == 0
    x = x_nhwc.reshape(n, h // 2, 2, w // 2, 2, c)     # (n, a, u, b, v, c)
    x = jnp.transpose(x, (0, 1, 3, 2, 4, 5))           # (n, a, b, u, v, c)
    return x.reshape(n, h // 2, w // 2, 4 * c)


def _patches_k2(xs, ho, wo):
    """Stride-1 2x2 valid-conv patches: (N, ho*wo, 4*c4); cols (p,q,u,v,c)."""
    n, _, _, c4 = xs.shape
    cols = [xs[:, p:p + ho, q:q + wo, :] for p in range(2) for q in range(2)]
    pt = jnp.stack(cols, axis=3)                       # (N, ho, wo, 4, c4)
    return pt.reshape(n, ho * wo, 4 * c4)


def _conv_weight_to_k2_matrix(w):
    """PyTorch (Cout, Cin, 4, 4) -> (16*Cin, Cout), rows ordered (p,q,u,v,c)
    to match the space-to-depth + 2x2-window patch column order."""
    cout, cin, kh, kw = w.shape
    assert kh == 4 and kw == 4
    wr = w.reshape(cout, cin, 2, 2, 2, 2)              # (co, c, p, u, q, v)
    wr = jnp.transpose(wr, (2, 4, 3, 5, 1, 0))         # (p, q, u, v, c, co)
    return wr.reshape(16 * cin, cout)


def _pick_btile(n, cap=8):
    """Largest divisor of n (<= cap) that still leaves >= 2 grid steps."""
    best = 1
    for d in range(2, min(cap, n) + 1):
        if n % d == 0 and n // d >= 2:
            best = d
    return best


# ---------------------------------------------------------------------------
# Layer wrappers (pallas_call plumbing)
# ---------------------------------------------------------------------------
def conv_bias_lrelu_pallas(x_nhwc, w2, b2, *, padding, slope=0.2,
                           out_dtype=jnp.bfloat16, btile=1):
    """4x4/stride-2 conv + bias + LeakyReLU. x: (N,H,W,Cin) -> (N,Ho,Wo,Cout)."""
    xs = _space_to_depth(x_nhwc.astype(jnp.bfloat16), padding)   # (N,hs,ws,4Cin)
    n, hs, ws, c4 = xs.shape
    ho, wo = hs - 1, ws - 1
    assert wo % 8 == 0, "in-kernel patch extraction needs wo % 8 == 0"
    cout = w2.shape[1]
    kernel = functools.partial(_conv_bias_lrelu_kernel, ho=ho, wo=wo, slope=slope)
    out = pl.pallas_call(
        kernel,
        out_shape=jax.ShapeDtypeStruct((n, ho * wo, cout), out_dtype),
        grid=(n // btile,),
        in_specs=[pl.BlockSpec((btile, hs, ws, c4), lambda i: (i, 0, 0, 0)),
                  pl.BlockSpec((4 * c4, cout), lambda i: (0, 0)),
                  pl.BlockSpec((1, cout), lambda i: (0, 0))],
        out_specs=pl.BlockSpec((btile, ho * wo, cout), lambda i: (i, 0, 0)),
        compiler_params=_CPARAMS,
    )(xs, w2, b2)
    return out.reshape(n, ho, wo, cout)


def conv_in_lrelu_pallas(x_nhwc, w2, g2, b2, *, eps=1e-5, slope=0.2,
                         out_dtype=jnp.bfloat16, btile=1):
    """Fused 4x4/stride-2/pad-1 conv (no bias) + InstanceNorm2d(affine) + LeakyReLU."""
    xs = _space_to_depth(x_nhwc.astype(jnp.bfloat16), 1)
    n, hs, ws, c4 = xs.shape
    ho, wo = hs - 1, ws - 1
    assert wo % 8 == 0, "in-kernel patch extraction needs wo % 8 == 0"
    cout = w2.shape[1]
    kernel = functools.partial(_conv_in_lrelu_kernel, ho=ho, wo=wo, eps=eps, slope=slope)
    out = pl.pallas_call(
        kernel,
        out_shape=jax.ShapeDtypeStruct((n, ho * wo, cout), out_dtype),
        grid=(n // btile,),
        in_specs=[pl.BlockSpec((btile, hs, ws, c4), lambda i: (i, 0, 0, 0)),
                  pl.BlockSpec((4 * c4, cout), lambda i: (0, 0)),
                  pl.BlockSpec((1, cout), lambda i: (0, 0)),
                  pl.BlockSpec((1, cout), lambda i: (0, 0))],
        out_specs=pl.BlockSpec((btile, ho * wo, cout), lambda i: (i, 0, 0)),
        compiler_params=_CPARAMS,
    )(xs, w2, g2, b2)
    return out.reshape(n, ho, wo, cout)


def conv_in_lrelu_conv5_pallas(x_nhwc, w2, g2, b2, w5, b5, *, eps=1e-5,
                               slope=0.2, btile=1):
    """b3 block fused with conv5.  x: (N, 8, 8, 4F) -> (N, 1, 1) f32 score."""
    xs = _space_to_depth(x_nhwc.astype(jnp.bfloat16), 1)        # (N, 5, 5, 16F)
    n, hs, ws, c4 = xs.shape
    ho, wo = hs - 1, ws - 1
    assert ho == 4 and wo == 4, "conv5 fusion assumes a 4x4 b3 feature map"
    cout = w2.shape[1]
    # wo=4 is below the sublane tile -> build this tiny (16-row) patch tensor in XLA.
    patches = _patches_k2(xs, ho, wo)                           # (N, 16, 4*c4)
    m, k = patches.shape[1], patches.shape[2]
    kernel = functools.partial(_conv_in_lrelu_conv5_kernel, eps=eps, slope=slope)
    out = pl.pallas_call(
        kernel,
        out_shape=jax.ShapeDtypeStruct((n, 1, 1), jnp.float32),
        grid=(n // btile,),
        in_specs=[pl.BlockSpec((btile, m, k), lambda i: (i, 0, 0)),
                  pl.BlockSpec((k, cout), lambda i: (0, 0)),
                  pl.BlockSpec((1, cout), lambda i: (0, 0)),
                  pl.BlockSpec((1, cout), lambda i: (0, 0)),
                  pl.BlockSpec((m, cout), lambda i: (0, 0)),
                  pl.BlockSpec((1, 1), lambda i: (0, 0))],
        out_specs=pl.BlockSpec((btile, 1, 1), lambda i: (i, 0, 0)),
        compiler_params=_CPARAMS,
    )(patches, w2, g2, b2, w5, b5)
    return out


# ---------------------------------------------------------------------------
# Parameters (PyTorch layout) + one-time kernel-ready repack
# ---------------------------------------------------------------------------
def init_critic_params(key, channel_images, features_d, n_classes, image_size):
    ks = jax.random.split(key, 8)
    f = features_d
    p = {}
    p["conv1_w"] = jax.random.normal(ks[0], (f, channel_images + 1, 4, 4), jnp.float32) * 0.05
    p["conv1_b"] = jnp.zeros((f,), jnp.float32)
    p["b1_w"] = jax.random.normal(ks[1], (2 * f, f, 4, 4), jnp.float32) * 0.05
    p["b1_g"] = jnp.ones((2 * f,), jnp.float32)
    p["b1_b"] = jnp.zeros((2 * f,), jnp.float32)
    p["b2_w"] = jax.random.normal(ks[2], (4 * f, 2 * f, 4, 4), jnp.float32) * 0.05
    p["b2_g"] = jnp.ones((4 * f,), jnp.float32)
    p["b2_b"] = jnp.zeros((4 * f,), jnp.float32)
    p["b3_w"] = jax.random.normal(ks[3], (8 * f, 4 * f, 4, 4), jnp.float32) * 0.05
    p["b3_g"] = jnp.ones((8 * f,), jnp.float32)
    p["b3_b"] = jnp.zeros((8 * f,), jnp.float32)
    p["conv5_w"] = jax.random.normal(ks[4], (1, 8 * f, 4, 4), jnp.float32) * 0.05
    p["conv5_b"] = jnp.zeros((1,), jnp.float32)
    p["embed"] = jax.random.normal(ks[5], (n_classes, image_size * image_size), jnp.float32)
    return p


def prepare_critic_params(p):
    """One-time repack of PyTorch-layout params into kernel-ready matrices."""
    q = {"embed": p["embed"]}
    q["conv1_w"] = _conv_weight_to_k2_matrix(p["conv1_w"]).astype(jnp.bfloat16)
    q["conv1_b"] = p["conv1_b"].reshape(1, -1).astype(jnp.float32)
    for name in ("b1", "b2", "b3"):
        q[f"{name}_w"] = _conv_weight_to_k2_matrix(p[f"{name}_w"]).astype(jnp.bfloat16)
        q[f"{name}_g"] = p[f"{name}_g"].reshape(1, -1).astype(jnp.float32)
        q[f"{name}_b"] = p[f"{name}_b"].reshape(1, -1).astype(jnp.float32)
    # conv5 (1, 8F, 4, 4) -> (16, 8F) f32 with row m = kh*4 + kw, matching the
    # b3 activation's (ho*4 + wo) row order inside the fused kernel.
    w5 = p["conv5_w"][0]                                     # (8F, 4, 4)
    q["conv5_w"] = jnp.transpose(w5, (1, 2, 0)).reshape(16, w5.shape[0]).astype(jnp.float32)
    q["conv5_b"] = p["conv5_b"].reshape(1, 1).astype(jnp.float32)
    return q


# ---------------------------------------------------------------------------
# Critic forward
# ---------------------------------------------------------------------------
def critic_forward(kp, x, labels, image_size):
    n = x.shape[0]
    # Embedding lookup + channel concat: plain-JAX boundary glue.
    emb = kp["embed"][labels].reshape(n, 1, image_size, image_size)
    h = jnp.concatenate([x, emb], axis=1)              # NCHW
    h = jnp.transpose(h, (0, 2, 3, 1))                 # -> NHWC once, at the boundary

    bt = _pick_btile(n)
    # Conv2d(C+1, F, 4, 2, 1) + LeakyReLU(0.2)
    h = conv_bias_lrelu_pallas(h, kp["conv1_w"], kp["conv1_b"], padding=1, btile=bt)
    # _block(F, 2F), _block(2F, 4F): fused Conv + InstanceNorm + LeakyReLU
    h = conv_in_lrelu_pallas(h, kp["b1_w"], kp["b1_g"], kp["b1_b"], btile=bt)
    h = conv_in_lrelu_pallas(h, kp["b2_w"], kp["b2_g"], kp["b2_b"], btile=bt)
    # _block(4F, 8F) fused with Conv2d(8F, 1, 4, 2, 0) -> (N, 1, 1) score
    score = conv_in_lrelu_conv5_pallas(h, kp["b3_w"], kp["b3_g"], kp["b3_b"],
                                       kp["conv5_w"], kp["conv5_b"], btile=bt)
    return score.reshape(n, 1, 1, 1)


if __name__ == "__main__":
    CHANNEL_IMAGES = 3
    FEATURES_D = 8
    N_CLASSES = 4
    IMAGE_SIZE = 64   # architecture requires 64 to reach the final 1x1 output
    BATCH = 2

    key = jax.random.PRNGKey(0)
    k_params, k_x = jax.random.split(key)
    params = init_critic_params(k_params, CHANNEL_IMAGES, FEATURES_D,
                                N_CLASSES, IMAGE_SIZE)
    kparams = prepare_critic_params(params)            # one-time weight repack

    x = jax.random.normal(k_x, (BATCH, CHANNEL_IMAGES, IMAGE_SIZE, IMAGE_SIZE),
                          jnp.float32)
    labels = jnp.array([1, 3], dtype=jnp.int32)

    fwd = jax.jit(functools.partial(critic_forward, image_size=IMAGE_SIZE))
    out = jax.block_until_ready(fwd(kparams, x, labels))

    assert out.shape == (BATCH, 1, 1, 1), out.shape
    assert bool(jnp.all(jnp.isfinite(out)))
    print("KERNEL_OK")
</pallas_src>

<mosaic_0001>
module attributes {stable_mosaic.version = 11 : i64} {
  func.func @_conv_bias_lrelu_kernel(%arg0: i32, %arg1: memref<1x33x33x16xbf16, #tpu.memory_space<vmem>>, %arg2: memref<64x8xbf16, #tpu.memory_space<vmem>>, %arg3: memref<1x8xf32, #tpu.memory_space<vmem>>, %arg4: memref<1x1024x8xbf16, #tpu.memory_space<vmem>>) attributes {dimension_semantics = [#tpu.dimension_semantics<parallel>], iteration_bounds = array<i64: 2>, scalar_prefetch = 0 : i64, scratch_operands = 0 : i64, tpu.core_type = #tpu.core_type<tc>, window_params = [{transform_indices = @transform_0, window_bounds = array<i64: 1, 33, 33, 16>}, {pipeline_mode = #tpu.pipeline_mode<synchronous>, transform_indices = @transform_1, window_bounds = array<i64: 64, 8>}, {pipeline_mode = #tpu.pipeline_mode<synchronous>, transform_indices = @transform_2, window_bounds = array<i64: 1, 8>}, {transform_indices = @transform_3, window_bounds = array<i64: 1, 1024, 8>}]} {
    %c0 = arith.constant 0 : index
    %c0_0 = arith.constant 0 : index
    %c0_1 = arith.constant 0 : index
    %c0_2 = arith.constant 0 : index
    %0 = vector.load %arg1[%c0, %c0_0, %c0_1, %c0_2] : memref<1x33x33x16xbf16, #tpu.memory_space<vmem>>, vector<1x32x32x16xbf16>
    %1 = vector.shape_cast %0 : vector<1x32x32x16xbf16> to vector<1024x16xbf16>
    %c0_3 = arith.constant 0 : index
    %c0_4 = arith.constant 0 : index
    %2 = vector.load %arg2[%c0_3, %c0_4] : memref<64x8xbf16, #tpu.memory_space<vmem>>, vector<16x8xbf16>
    %cst = arith.constant dense<0.000000e+00> : vector<1024x8xf32>
    %3 = tpu.matmul %1, %2, %cst {dimension_numbers = #tpu.dot_dimension_numbers<[1], [0], [0], [1], [0, 0, 1, 1], [], []>} : vector<1024x16xbf16>, vector<16x8xbf16>, vector<1024x8xf32> -> vector<1024x8xf32>
    %c0_5 = arith.constant 0 : index
    %c0_6 = arith.constant 0 : index
    %c1 = arith.constant 1 : index
    %c0_7 = arith.constant 0 : index
    %4 = vector.load %arg1[%c0_5, %c0_6, %c1, %c0_7] : memref<1x33x33x16xbf16, #tpu.memory_space<vmem>>, vector<1x32x32x16xbf16>
    %5 = vector.shape_cast %4 : vector<1x32x32x16xbf16> to vector<1024x16xbf16>
    %c16 = arith.constant 16 : index
    %c0_8 = arith.constant 0 : index
    %6 = vector.load %arg2[%c16, %c0_8] : memref<64x8xbf16, #tpu.memory_space<vmem>>, vector<16x8xbf16>
    %cst_9 = arith.constant dense<0.000000e+00> : vector<1024x8xf32>
    %7 = tpu.matmul %5, %6, %cst_9 {dimension_numbers = #tpu.dot_dimension_numbers<[1], [0], [0], [1], [0, 0, 1, 1], [], []>} : vector<1024x16xbf16>, vector<16x8xbf16>, vector<1024x8xf32> -> vector<1024x8xf32>
    %8 = arith.addf %3, %7 : vector<1024x8xf32>
    %c0_10 = arith.constant 0 : index
    %c1_11 = arith.constant 1 : index
    %c0_12 = arith.constant 0 : index
    %c0_13 = arith.constant 0 : index
    %9 = vector.load %arg1[%c0_10, %c1_11, %c0_12, %c0_13] : memref<1x33x33x16xbf16, #tpu.memory_space<vmem>>, vector<1x32x32x16xbf16>
    %10 = vector.shape_cast %9 : vector<1x32x32x16xbf16> to vector<1024x16xbf16>
    %c32 = arith.constant 32 : index
    %c0_14 = arith.constant 0 : index
    %11 = vector.load %arg2[%c32, %c0_14] : memref<64x8xbf16, #tpu.memory_space<vmem>>, vector<16x8xbf16>
    %cst_15 = arith.constant dense<0.000000e+00> : vector<1024x8xf32>
    %12 = tpu.matmul %10, %11, %cst_15 {dimension_numbers = #tpu.dot_dimension_numbers<[1], [0], [0], [1], [0, 0, 1, 1], [], []>} : vector<1024x16xbf16>, vector<16x8xbf16>, vector<1024x8xf32> -> vector<1024x8xf32>
    %13 = arith.addf %8, %12 : vector<1024x8xf32>
    %c0_16 = arith.constant 0 : index
    %c1_17 = arith.constant 1 : index
    %c1_18 = arith.constant 1 : index
    %c0_19 = arith.constant 0 : index
    %14 = vector.load %arg1[%c0_16, %c1_17, %c1_18, %c0_19] : memref<1x33x33x16xbf16, #tpu.memory_space<vmem>>, vector<1x32x32x16xbf16>
    %15 = vector.shape_cast %14 : vector<1x32x32x16xbf16> to vector<1024x16xbf16>
    %c48 = arith.constant 48 : index
    %c0_20 = arith.constant 0 : index
    %16 = vector.load %arg2[%c48, %c0_20] : memref<64x8xbf16, #tpu.memory_space<vmem>>, vector<16x8xbf16>
    %cst_21 = arith.constant dense<0.000000e+00> : vector<1024x8xf32>
    %17 = tpu.matmul %15, %16, %cst_21 {dimension_numbers = #tpu.dot_dimension_numbers<[1], [0], [0], [1], [0, 0, 1, 1], [], []>} : vector<1024x16xbf16>, vector<16x8xbf16>, vector<1024x8xf32> -> vector<1024x8xf32>
    %18 = arith.addf %13, %17 : vector<1024x8xf32>
    %c0_22 = arith.constant 0 : index
    %c0_23 = arith.constant 0 : index
    %19 = vector.load %arg3[%c0_22, %c0_23] : memref<1x8xf32, #tpu.memory_space<vmem>>, vector<1x8xf32>
    %20 = vector.broadcast %19 : vector<1x8xf32> to vector<1024x8xf32>
    %21 = arith.addf %18, %20 : vector<1024x8xf32>
    %cst_24 = arith.constant 0.000000e+00 : f32
    %22 = vector.broadcast %cst_24 : f32 to vector<1024x8xf32>
    %23 = arith.cmpf oge, %21, %22 : vector<1024x8xf32>
    %cst_25 = arith.constant 2.000000e-01 : f32
    %24 = vector.broadcast %cst_25 : f32 to vector<1024x8xf32>
    %25 = arith.mulf %24, %21 : vector<1024x8xf32>
    %26 = arith.select %23, %21, %25 : vector<1024x8xi1>, vector<1024x8xf32>
    %27 = vector.shape_cast %26 : vector<1024x8xf32> to vector<1x1024x8xf32>
    %28 = arith.truncf %27 : vector<1x1024x8xf32> to vector<1x1024x8xbf16>
    %c0_26 = arith.constant 0 : index
    %c0_27 = arith.constant 0 : index
    %c0_28 = arith.constant 0 : index
    %29 = vector.load %arg4[%c0_26, %c0_27, %c0_28] : memref<1x1024x8xbf16, #tpu.memory_space<vmem>>, vector<1x1024x8xbf16>
    tpu.vector_store %arg4[%c0_26, %c0_27, %c0_28], %28 {strides = array<i32>} : memref<1x1024x8xbf16, #tpu.memory_space<vmem>>, vector<1x1024x8xbf16>,
    return
  }
  func.func @transform_0(%arg0: i32) -> (i32, i32, i32, i32) {
    %c0_i32 = arith.constant 0 : i32
    %c0_i32_0 = arith.constant 0 : i32
    %c0_i32_1 = arith.constant 0 : i32
    %c0_i32_2 = arith.constant 0 : i32
    return %arg0, %c0_i32, %c0_i32_0, %c0_i32_1 : i32, i32, i32, i32
  }
  func.func @transform_1(%arg0: i32) -> (i32, i32) {
    %c0_i32 = arith.constant 0 : i32
    %c0_i32_0 = arith.constant 0 : i32
    %c0_i32_1 = arith.constant 0 : i32
    return %c0_i32, %c0_i32_0 : i32, i32
  }
  func.func @transform_2(%arg0: i32) -> (i32, i32) {
    %c0_i32 = arith.constant 0 : i32
    %c0_i32_0 = arith.constant 0 : i32
    %c0_i32_1 = arith.constant 0 : i32
    return %c0_i32, %c0_i32_0 : i32, i32
  }
  func.func @transform_3(%arg0: i32) -> (i32, i32, i32) {
    %c0_i32 = arith.constant 0 : i32
    %c0_i32_0 = arith.constant 0 : i32
    %c0_i32_1 = arith.constant 0 : i32
    return %arg0, %c0_i32, %c0_i32_0 : i32, i32, i32
  }
}

module attributes {stable_mosaic.version = 11 : i64} {
  func.func @_conv_in_lrelu_kernel(%arg0: i32, %arg1: memref<1x17x17x32xbf16, #tpu.memory_space<vmem>>, %arg2: memref<128x16xbf16, #tpu.memory_space<vmem>>, %arg3: memref<1x16xf32, #tpu.memory_space<vmem>>, %arg4: memref<1x16xf32, #tpu.memory_space<vmem>>, %arg5: memref<1x256x16xbf16, #tpu.memory_space<vmem>>) attributes {dimension_semantics = [#tpu.dimension_semantics<parallel>], iteration_bounds = array<i64: 2>, scalar_prefetch = 0 : i64, scratch_operands = 0 : i64, tpu.core_type = #tpu.core_type<tc>, window_params = [{transform_indices = @transform_0, window_bounds = array<i64: 1, 17, 17, 32>}, {pipeline_mode = #tpu.pipeline_mode<synchronous>, transform_indices = @transform_1, window_bounds = array<i64: 128, 16>}, {pipeline_mode = #tpu.pipeline_mode<synchronous>, transform_indices = @transform_2, window_bounds = array<i64: 1, 16>}, {pipeline_mode = #tpu.pipeline_mode<synchronous>, transform_indices = @transform_3, window_bounds = array<i64: 1, 16>}, {transform_indices = @transform_4, window_bounds = array<i64: 1, 256, 16>}]} {
    %c0 = arith.constant 0 : index
    %c0_0 = arith.constant 0 : index
    %c0_1 = arith.constant 0 : index
    %c0_2 = arith.constant 0 : index
    %0 = vector.load %arg1[%c0, %c0_0, %c0_1, %c0_2] : memref<1x17x17x32xbf16, #tpu.memory_space<vmem>>, vector<1x16x16x32xbf16>
    %1 = vector.shape_cast %0 : vector<1x16x16x32xbf16> to vector<256x32xbf16>
    %c0_3 = arith.constant 0 : index
    %c0_4 = arith.constant 0 : index
    %2 = vector.load %arg2[%c0_3, %c0_4] : memref<128x16xbf16, #tpu.memory_space<vmem>>, vector<32x16xbf16>
    %cst = arith.constant dense<0.000000e+00> : vector<256x16xf32>
    %3 = tpu.matmul %1, %2, %cst {dimension_numbers = #tpu.dot_dimension_numbers<[1], [0], [0], [1], [0, 0, 1, 1], [], []>} : vector<256x32xbf16>, vector<32x16xbf16>, vector<256x16xf32> -> vector<256x16xf32>
    %c0_5 = arith.constant 0 : index
    %c0_6 = arith.constant 0 : index
    %c1 = arith.constant 1 : index
    %c0_7 = arith.constant 0 : index
    %4 = vector.load %arg1[%c0_5, %c0_6, %c1, %c0_7] : memref<1x17x17x32xbf16, #tpu.memory_space<vmem>>, vector<1x16x16x32xbf16>
    %5 = vector.shape_cast %4 : vector<1x16x16x32xbf16> to vector<256x32xbf16>
    %c32 = arith.constant 32 : index
    %c0_8 = arith.constant 0 : index
    %6 = vector.load %arg2[%c32, %c0_8] : memref<128x16xbf16, #tpu.memory_space<vmem>>, vector<32x16xbf16>
    %cst_9 = arith.constant dense<0.000000e+00> : vector<256x16xf32>
    %7 = tpu.matmul %5, %6, %cst_9 {dimension_numbers = #tpu.dot_dimension_numbers<[1], [0], [0], [1], [0, 0, 1, 1], [], []>} : vector<256x32xbf16>, vector<32x16xbf16>, vector<256x16xf32> -> vector<256x16xf32>
    %8 = arith.addf %3, %7 : vector<256x16xf32>
    %c0_10 = arith.constant 0 : index
    %c1_11 = arith.constant 1 : index
    %c0_12 = arith.constant 0 : index
    %c0_13 = arith.constant 0 : index
    %9 = vector.load %arg1[%c0_10, %c1_11, %c0_12, %c0_13] : memref<1x17x17x32xbf16, #tpu.memory_space<vmem>>, vector<1x16x16x32xbf16>
    %10 = vector.shape_cast %9 : vector<1x16x16x32xbf16> to vector<256x32xbf16>
    %c64 = arith.constant 64 : index
    %c0_14 = arith.constant 0 : index
    %11 = vector.load %arg2[%c64, %c0_14] : memref<128x16xbf16, #tpu.memory_space<vmem>>, vector<32x16xbf16>
    %cst_15 = arith.constant dense<0.000000e+00> : vector<256x16xf32>
    %12 = tpu.matmul %10, %11, %cst_15 {dimension_numbers = #tpu.dot_dimension_numbers<[1], [0], [0], [1], [0, 0, 1, 1], [], []>} : vector<256x32xbf16>, vector<32x16xbf16>, vector<256x16xf32> -> vector<256x16xf32>
    %13 = arith.addf %8, %12 : vector<256x16xf32>
    %c0_16 = arith.constant 0 : index
    %c1_17 = arith.constant 1 : index
    %c1_18 = arith.constant 1 : index
    %c0_19 = arith.constant 0 : index
    %14 = vector.load %arg1[%c0_16, %c1_17, %c1_18, %c0_19] : memref<1x17x17x32xbf16, #tpu.memory_space<vmem>>, vector<1x16x16x32xbf16>
    %15 = vector.shape_cast %14 : vector<1x16x16x32xbf16> to vector<256x32xbf16>
    %c96 = arith.constant 96 : index
    %c0_20 = arith.constant 0 : index
    %16 = vector.load %arg2[%c96, %c0_20] : memref<128x16xbf16, #tpu.memory_space<vmem>>, vector<32x16xbf16>
    %cst_21 = arith.constant dense<0.000000e+00> : vector<256x16xf32>
    %17 = tpu.matmul %15, %16, %cst_21 {dimension_numbers = #tpu.dot_dimension_numbers<[1], [0], [0], [1], [0, 0, 1, 1], [], []>} : vector<256x32xbf16>, vector<32x16xbf16>, vector<256x16xf32> -> vector<256x16xf32>
    %18 = arith.addf %13, %17 : vector<256x16xf32>
    %19 = vector.shape_cast %18 : vector<256x16xf32> to vector<1x256x16xf32>
    %cst_22 = arith.constant dense<0.000000e+00> : vector<1x16xf32>
    %20 = vector.multi_reduction <add>, %19, %cst_22 [1] : vector<1x256x16xf32> to vector<1x16xf32>
    %21 = vector.shape_cast %20 : vector<1x16xf32> to vector<1x1x16xf32>
    %cst_23 = arith.constant 2.560000e+02 : f32
    %22 = vector.broadcast %cst_23 : f32 to vector<1x1x16xf32>
    %23 = arith.divf %21, %22 : vector<1x1x16xf32>
    %24 = arith.mulf %19, %19 : vector<1x256x16xf32>
    %cst_24 = arith.constant dense<0.000000e+00> : vector<1x16xf32>
    %25 = vector.multi_reduction <add>, %24, %cst_24 [1] : vector<1x256x16xf32> to vector<1x16xf32>
    %26 = vector.shape_cast %25 : vector<1x16xf32> to vector<1x1x16xf32>
    %cst_25 = arith.constant 2.560000e+02 : f32
    %27 = vector.broadcast %cst_25 : f32 to vector<1x1x16xf32>
    %28 = arith.divf %26, %27 : vector<1x1x16xf32>
    %29 = arith.mulf %23, %23 : vector<1x1x16xf32>
    %30 = arith.subf %28, %29 : vector<1x1x16xf32>
    %31 = vector.broadcast %23 : vector<1x1x16xf32> to vector<1x256x16xf32>
    %32 = arith.subf %19, %31 : vector<1x256x16xf32>
    %cst_26 = arith.constant 9.99999974E-6 : f32
    %33 = vector.broadcast %cst_26 : f32 to vector<1x1x16xf32>
    %34 = arith.addf %30, %33 : vector<1x1x16xf32>
    %35 = math.rsqrt %34 : vector<1x1x16xf32>
    %36 = vector.broadcast %35 : vector<1x1x16xf32> to vector<1x256x16xf32>
    %37 = arith.mulf %32, %36 : vector<1x256x16xf32>
    %c0_27 = arith.constant 0 : index
    %c0_28 = arith.constant 0 : index
    %38 = vector.load %arg3[%c0_27, %c0_28] : memref<1x16xf32, #tpu.memory_space<vmem>>, vector<1x16xf32>
    %39 = vector.shape_cast %38 : vector<1x16xf32> to vector<1x1x16xf32>
    %40 = vector.broadcast %39 : vector<1x1x16xf32> to vector<1x256x16xf32>
    %41 = arith.mulf %37, %40 : vector<1x256x16xf32>
    %c0_29 = arith.constant 0 : index
    %c0_30 = arith.constant 0 : index
    %42 = vector.load %arg4[%c0_29, %c0_30] : memref<1x16xf32, #tpu.memory_space<vmem>>, vector<1x16xf32>
    %43 = vector.shape_cast %42 : vector<1x16xf32> to vector<1x1x16xf32>
    %44 = vector.broadcast %43 : vector<1x1x16xf32> to vector<1x256x16xf32>
    %45 = arith.addf %41, %44 : vector<1x256x16xf32>
    %cst_31 = arith.constant 0.000000e+00 : f32
    %46 = vector.broadcast %cst_31 : f32 to vector<1x256x16xf32>
    %47 = arith.cmpf oge, %45, %46 : vector<1x256x16xf32>
    %cst_32 = arith.constant 2.000000e-01 : f32
    %48 = vector.broadcast %cst_32 : f32 to vector<1x256x16xf32>
    %49 = arith.mulf %48, %45 : vector<1x256x16xf32>
    %50 = arith.select %47, %45, %49 : vector<1x256x16xi1>, vector<1x256x16xf32>
    %51 = arith.truncf %50 : vector<1x256x16xf32> to vector<1x256x16xbf16>
    %c0_33 = arith.constant 0 : index
    %c0_34 = arith.constant 0 : index
    %c0_35 = arith.constant 0 : index
    %52 = vector.load %arg5[%c0_33, %c0_34, %c0_35] : memref<1x256x16xbf16, #tpu.memory_space<vmem>>, vector<1x256x16xbf16>
    tpu.vector_store %arg5[%c0_33, %c0_34, %c0_35], %51 {strides = array<i32>} : memref<1x256x16xbf16, #tpu.memory_space<vmem>>, vector<1x256x16xbf16>,
    return
  }
  func.func @transform_0(%arg0: i32) -> (i32, i32, i32, i32) {
    %c0_i32 = arith.constant 0 : i32
    %c0_i32_0 = arith.constant 0 : i32
    %c0_i32_1 = arith.constant 0 : i32
    %c0_i32_2 = arith.constant 0 : i32
    return %arg0, %c0_i32, %c0_i32_0, %c0_i32_1 : i32, i32, i32, i32
  }
  func.func @transform_1(%arg0: i32) -> (i32, i32) {
    %c0_i32 = arith.constant 0 : i32
    %c0_i32_0 = arith.constant 0 : i32
    %c0_i32_1 = arith.constant 0 : i32
    return %c0_i32, %c0_i32_0 : i32, i32
  }
  func.func @transform_2(%arg0: i32) -> (i32, i32) {
    %c0_i32 = arith.constant 0 : i32
    %c0_i32_0 = arith.constant 0 : i32
    %c0_i32_1 = arith.constant 0 : i32
    return %c0_i32, %c0_i32_0 : i32, i32
  }
  func.func @transform_3(%arg0: i32) -> (i32, i32) {
    %c0_i32 = arith.constant 0 : i32
    %c0_i32_0 = arith.constant 0 : i32
    %c0_i32_1 = arith.constant 0 : i32
    return %c0_i32, %c0_i32_0 : i32, i32
  }
  func.func @transform_4(%arg0: i32) -> (i32, i32, i32) {
    %c0_i32 = arith.constant 0 : i32
    %c0_i32_0 = arith.constant 0 : i32
    %c0_i32_1 = arith.constant 0 : i32
    return %arg0, %c0_i32, %c0_i32_0 : i32, i32, i32
  }
}

module attributes {stable_mosaic.version = 11 : i64} {
  func.func @_conv_in_lrelu_kernel(%arg0: i32, %arg1: memref<1x9x9x64xbf16, #tpu.memory_space<vmem>>, %arg2: memref<256x32xbf16, #tpu.memory_space<vmem>>, %arg3: memref<1x32xf32, #tpu.memory_space<vmem>>, %arg4: memref<1x32xf32, #tpu.memory_space<vmem>>, %arg5: memref<1x64x32xbf16, #tpu.memory_space<vmem>>) attributes {dimension_semantics = [#tpu.dimension_semantics<parallel>], iteration_bounds = array<i64: 2>, scalar_prefetch = 0 : i64, scratch_operands = 0 : i64, tpu.core_type = #tpu.core_type<tc>, window_params = [{transform_indices = @transform_0, window_bounds = array<i64: 1, 9, 9, 64>}, {pipeline_mode = #tpu.pipeline_mode<synchronous>, transform_indices = @transform_1, window_bounds = array<i64: 256, 32>}, {pipeline_mode = #tpu.pipeline_mode<synchronous>, transform_indices = @transform_2, window_bounds = array<i64: 1, 32>}, {pipeline_mode = #tpu.pipeline_mode<synchronous>, transform_indices = @transform_3, window_bounds = array<i64: 1, 32>}, {transform_indices = @transform_4, window_bounds = array<i64: 1, 64, 32>}]} {
    %c0 = arith.constant 0 : index
    %c0_0 = arith.constant 0 : index
    %c0_1 = arith.constant 0 : index
    %c0_2 = arith.constant 0 : index
    %0 = vector.load %arg1[%c0, %c0_0, %c0_1, %c0_2] : memref<1x9x9x64xbf16, #tpu.memory_space<vmem>>, vector<1x8x8x64xbf16>
    %1 = vector.shape_cast %0 : vector<1x8x8x64xbf16> to vector<64x64xbf16>
    %c0_3 = arith.constant 0 : index
    %c0_4 = arith.constant 0 : index
    %2 = vector.load %arg2[%c0_3, %c0_4] : memref<256x32xbf16, #tpu.memory_space<vmem>>, vector<64x32xbf16>
    %cst = arith.constant dense<0.000000e+00> : vector<64x32xf32>
    %3 = tpu.matmul %1, %2, %cst {dimension_numbers = #tpu.dot_dimension_numbers<[1], [0], [0], [1], [0, 0, 1, 1], [], []>} : vector<64x64xbf16>, vector<64x32xbf16>, vector<64x32xf32> -> vector<64x32xf32>
    %c0_5 = arith.constant 0 : index
    %c0_6 = arith.constant 0 : index
    %c1 = arith.constant 1 : index
    %c0_7 = arith.constant 0 : index
    %4 = vector.load %arg1[%c0_5, %c0_6, %c1, %c0_7] : memref<1x9x9x64xbf16, #tpu.memory_space<vmem>>, vector<1x8x8x64xbf16>
    %5 = vector.shape_cast %4 : vector<1x8x8x64xbf16> to vector<64x64xbf16>
    %c64 = arith.constant 64 : index
    %c0_8 = arith.constant 0 : index
    %6 = vector.load %arg2[%c64, %c0_8] : memref<256x32xbf16, #tpu.memory_space<vmem>>, vector<64x32xbf16>
    %cst_9 = arith.constant dense<0.000000e+00> : vector<64x32xf32>
    %7 = tpu.matmul %5, %6, %cst_9 {dimension_numbers = #tpu.dot_dimension_numbers<[1], [0], [0], [1], [0, 0, 1, 1], [], []>} : vector<64x64xbf16>, vector<64x32xbf16>, vector<64x32xf32> -> vector<64x32xf32>
    %8 = arith.addf %3, %7 : vector<64x32xf32>
    %c0_10 = arith.constant 0 : index
    %c1_11 = arith.constant 1 : index
    %c0_12 = arith.constant 0 : index
    %c0_13 = arith.constant 0 : index
    %9 = vector.load %arg1[%c0_10, %c1_11, %c0_12, %c0_13] : memref<1x9x9x64xbf16, #tpu.memory_space<vmem>>, vector<1x8x8x64xbf16>
    %10 = vector.shape_cast %9 : vector<1x8x8x64xbf16> to vector<64x64xbf16>
    %c128 = arith.constant 128 : index
    %c0_14 = arith.constant 0 : index
    %11 = vector.load %arg2[%c128, %c0_14] : memref<256x32xbf16, #tpu.memory_space<vmem>>, vector<64x32xbf16>
    %cst_15 = arith.constant dense<0.000000e+00> : vector<64x32xf32>
    %12 = tpu.matmul %10, %11, %cst_15 {dimension_numbers = #tpu.dot_dimension_numbers<[1], [0], [0], [1], [0, 0, 1, 1], [], []>} : vector<64x64xbf16>, vector<64x32xbf16>, vector<64x32xf32> -> vector<64x32xf32>
    %13 = arith.addf %8, %12 : vector<64x32xf32>
    %c0_16 = arith.constant 0 : index
    %c1_17 = arith.constant 1 : index
    %c1_18 = arith.constant 1 : index
    %c0_19 = arith.constant 0 : index
    %14 = vector.load %arg1[%c0_16, %c1_17, %c1_18, %c0_19] : memref<1x9x9x64xbf16, #tpu.memory_space<vmem>>, vector<1x8x8x64xbf16>
    %15 = vector.shape_cast %14 : vector<1x8x8x64xbf16> to vector<64x64xbf16>
    %c192 = arith.constant 192 : index
    %c0_20 = arith.constant 0 : index
    %16 = vector.load %arg2[%c192, %c0_20] : memref<256x32xbf16, #tpu.memory_space<vmem>>, vector<64x32xbf16>
    %cst_21 = arith.constant dense<0.000000e+00> : vector<64x32xf32>
    %17 = tpu.matmul %15, %16, %cst_21 {dimension_numbers = #tpu.dot_dimension_numbers<[1], [0], [0], [1], [0, 0, 1, 1], [], []>} : vector<64x64xbf16>, vector<64x32xbf16>, vector<64x32xf32> -> vector<64x32xf32>
    %18 = arith.addf %13, %17 : vector<64x32xf32>
    %19 = vector.shape_cast %18 : vector<64x32xf32> to vector<1x64x32xf32>
    %cst_22 = arith.constant dense<0.000000e+00> : vector<1x32xf32>
    %20 = vector.multi_reduction <add>, %19, %cst_22 [1] : vector<1x64x32xf32> to vector<1x32xf32>
    %21 = vector.shape_cast %20 : vector<1x32xf32> to vector<1x1x32xf32>
    %cst_23 = arith.constant 6.400000e+01 : f32
    %22 = vector.broadcast %cst_23 : f32 to vector<1x1x32xf32>
    %23 = arith.divf %21, %22 : vector<1x1x32xf32>
    %24 = arith.mulf %19, %19 : vector<1x64x32xf32>
    %cst_24 = arith.constant dense<0.000000e+00> : vector<1x32xf32>
    %25 = vector.multi_reduction <add>, %24, %cst_24 [1] : vector<1x64x32xf32> to vector<1x32xf32>
    %26 = vector.shape_cast %25 : vector<1x32xf32> to vector<1x1x32xf32>
    %cst_25 = arith.constant 6.400000e+01 : f32
    %27 = vector.broadcast %cst_25 : f32 to vector<1x1x32xf32>
    %28 = arith.divf %26, %27 : vector<1x1x32xf32>
    %29 = arith.mulf %23, %23 : vector<1x1x32xf32>
    %30 = arith.subf %28, %29 : vector<1x1x32xf32>
    %31 = vector.broadcast %23 : vector<1x1x32xf32> to vector<1x64x32xf32>
    %32 = arith.subf %19, %31 : vector<1x64x32xf32>
    %cst_26 = arith.constant 9.99999974E-6 : f32
    %33 = vector.broadcast %cst_26 : f32 to vector<1x1x32xf32>
    %34 = arith.addf %30, %33 : vector<1x1x32xf32>
    %35 = math.rsqrt %34 : vector<1x1x32xf32>
    %36 = vector.broadcast %35 : vector<1x1x32xf32> to vector<1x64x32xf32>
    %37 = arith.mulf %32, %36 : vector<1x64x32xf32>
    %c0_27 = arith.constant 0 : index
    %c0_28 = arith.constant 0 : index
    %38 = vector.load %arg3[%c0_27, %c0_28] : memref<1x32xf32, #tpu.memory_space<vmem>>, vector<1x32xf32>
    %39 = vector.shape_cast %38 : vector<1x32xf32> to vector<1x1x32xf32>
    %40 = vector.broadcast %39 : vector<1x1x32xf32> to vector<1x64x32xf32>
    %41 = arith.mulf %37, %40 : vector<1x64x32xf32>
    %c0_29 = arith.constant 0 : index
    %c0_30 = arith.constant 0 : index
    %42 = vector.load %arg4[%c0_29, %c0_30] : memref<1x32xf32, #tpu.memory_space<vmem>>, vector<1x32xf32>
    %43 = vector.shape_cast %42 : vector<1x32xf32> to vector<1x1x32xf32>
    %44 = vector.broadcast %43 : vector<1x1x32xf32> to vector<1x64x32xf32>
    %45 = arith.addf %41, %44 : vector<1x64x32xf32>
    %cst_31 = arith.constant 0.000000e+00 : f32
    %46 = vector.broadcast %cst_31 : f32 to vector<1x64x32xf32>
    %47 = arith.cmpf oge, %45, %46 : vector<1x64x32xf32>
    %cst_32 = arith.constant 2.000000e-01 : f32
    %48 = vector.broadcast %cst_32 : f32 to vector<1x64x32xf32>
    %49 = arith.mulf %48, %45 : vector<1x64x32xf32>
    %50 = arith.select %47, %45, %49 : vector<1x64x32xi1>, vector<1x64x32xf32>
    %51 = arith.truncf %50 : vector<1x64x32xf32> to vector<1x64x32xbf16>
    %c0_33 = arith.constant 0 : index
    %c0_34 = arith.constant 0 : index
    %c0_35 = arith.constant 0 : index
    %52 = vector.load %arg5[%c0_33, %c0_34, %c0_35] : memref<1x64x32xbf16, #tpu.memory_space<vmem>>, vector<1x64x32xbf16>
    tpu.vector_store %arg5[%c0_33, %c0_34, %c0_35], %51 {strides = array<i32>} : memref<1x64x32xbf16, #tpu.memory_space<vmem>>, vector<1x64x32xbf16>,
    return
  }
  func.func @transform_0(%arg0: i32) -> (i32, i32, i32, i32) {
    %c0_i32 = arith.constant 0 : i32
    %c0_i32_0 = arith.constant 0 : i32
    %c0_i32_1 = arith.constant 0 : i32
    %c0_i32_2 = arith.constant 0 : i32
    return %arg0, %c0_i32, %c0_i32_0, %c0_i32_1 : i32, i32, i32, i32
  }
  func.func @transform_1(%arg0: i32) -> (i32, i32) {
    %c0_i32 = arith.constant 0 : i32
    %c0_i32_0 = arith.constant 0 : i32
    %c0_i32_1 = arith.constant 0 : i32
    return %c0_i32, %c0_i32_0 : i32, i32
  }
  func.func @transform_2(%arg0: i32) -> (i32, i32) {
    %c0_i32 = arith.constant 0 : i32
    %c0_i32_0 = arith.constant 0 : i32
    %c0_i32_1 = arith.constant 0 : i32
    return %c0_i32, %c0_i32_0 : i32, i32
  }
  func.func @transform_3(%arg0: i32) -> (i32, i32) {
    %c0_i32 = arith.constant 0 : i32
    %c0_i32_0 = arith.constant 0 : i32
    %c0_i32_1 = arith.constant 0 : i32
    return %c0_i32, %c0_i32_0 : i32, i32
  }
  func.func @transform_4(%arg0: i32) -> (i32, i32, i32) {
    %c0_i32 = arith.constant 0 : i32
    %c0_i32_0 = arith.constant 0 : i32
    %c0_i32_1 = arith.constant 0 : i32
    return %arg0, %c0_i32, %c0_i32_0 : i32, i32, i32
  }
}

module attributes {stable_mosaic.version = 11 : i64} {
  func.func @_conv_in_lrelu_conv5_kernel(%arg0: i32, %arg1: memref<1x16x512xbf16, #tpu.memory_space<vmem>>, %arg2: memref<512x64xbf16, #tpu.memory_space<vmem>>, %arg3: memref<1x64xf32, #tpu.memory_space<vmem>>, %arg4: memref<1x64xf32, #tpu.memory_space<vmem>>, %arg5: memref<16x64xf32, #tpu.memory_space<vmem>>, %arg6: memref<1x1xf32, #tpu.memory_space<vmem>>, %arg7: memref<1x1x1xf32, #tpu.memory_space<vmem>>) attributes {dimension_semantics = [#tpu.dimension_semantics<parallel>], iteration_bounds = array<i64: 2>, scalar_prefetch = 0 : i64, scratch_operands = 0 : i64, tpu.core_type = #tpu.core_type<tc>, window_params = [{transform_indices = @transform_0, window_bounds = array<i64: 1, 16, 512>}, {pipeline_mode = #tpu.pipeline_mode<synchronous>, transform_indices = @transform_1, window_bounds = array<i64: 512, 64>}, {pipeline_mode = #tpu.pipeline_mode<synchronous>, transform_indices = @transform_2, window_bounds = array<i64: 1, 64>}, {pipeline_mode = #tpu.pipeline_mode<synchronous>, transform_indices = @transform_3, window_bounds = array<i64: 1, 64>}, {pipeline_mode = #tpu.pipeline_mode<synchronous>, transform_indices = @transform_4, window_bounds = array<i64: 16, 64>}, {pipeline_mode = #tpu.pipeline_mode<synchronous>, transform_indices = @transform_5, window_bounds = array<i64: 1, 1>}, {transform_indices = @transform_6, window_bounds = array<i64: 1, 1, 1>}]} {
    %c0 = arith.constant 0 : index
    %c0_0 = arith.constant 0 : index
    %c0_1 = arith.constant 0 : index
    %0 = vector.load %arg1[%c0, %c0_0, %c0_1] : memref<1x16x512xbf16, #tpu.memory_space<vmem>>, vector<1x16x512xbf16>
    %1 = vector.shape_cast %0 : vector<1x16x512xbf16> to vector<16x512xbf16>
    %c0_2 = arith.constant 0 : index
    %c0_3 = arith.constant 0 : index
    %2 = vector.load %arg2[%c0_2, %c0_3] : memref<512x64xbf16, #tpu.memory_space<vmem>>, vector<512x64xbf16>
    %cst = arith.constant dense<0.000000e+00> : vector<16x64xf32>
    %3 = tpu.matmul %1, %2, %cst {dimension_numbers = #tpu.dot_dimension_numbers<[1], [0], [0], [1], [0, 0, 1, 1], [], []>} : vector<16x512xbf16>, vector<512x64xbf16>, vector<16x64xf32> -> vector<16x64xf32>
    %4 = vector.shape_cast %3 : vector<16x64xf32> to vector<1x16x64xf32>
    %cst_4 = arith.constant dense<0.000000e+00> : vector<1x64xf32>
    %5 = vector.multi_reduction <add>, %4, %cst_4 [1] : vector<1x16x64xf32> to vector<1x64xf32>
    %6 = vector.shape_cast %5 : vector<1x64xf32> to vector<1x1x64xf32>
    %cst_5 = arith.constant 1.600000e+01 : f32
    %7 = vector.broadcast %cst_5 : f32 to vector<1x1x64xf32>
    %8 = arith.divf %6, %7 : vector<1x1x64xf32>
    %9 = arith.mulf %4, %4 : vector<1x16x64xf32>
    %cst_6 = arith.constant dense<0.000000e+00> : vector<1x64xf32>
    %10 = vector.multi_reduction <add>, %9, %cst_6 [1] : vector<1x16x64xf32> to vector<1x64xf32>
    %11 = vector.shape_cast %10 : vector<1x64xf32> to vector<1x1x64xf32>
    %cst_7 = arith.constant 1.600000e+01 : f32
    %12 = vector.broadcast %cst_7 : f32 to vector<1x1x64xf32>
    %13 = arith.divf %11, %12 : vector<1x1x64xf32>
    %14 = arith.mulf %8, %8 : vector<1x1x64xf32>
    %15 = arith.subf %13, %14 : vector<1x1x64xf32>
    %16 = vector.broadcast %8 : vector<1x1x64xf32> to vector<1x16x64xf32>
    %17 = arith.subf %4, %16 : vector<1x16x64xf32>
    %cst_8 = arith.constant 9.99999974E-6 : f32
    %18 = vector.broadcast %cst_8 : f32 to vector<1x1x64xf32>
    %19 = arith.addf %15, %18 : vector<1x1x64xf32>
    %20 = math.rsqrt %19 : vector<1x1x64xf32>
    %21 = vector.broadcast %20 : vector<1x1x64xf32> to vector<1x16x64xf32>
    %22 = arith.mulf %17, %21 : vector<1x16x64xf32>
    %c0_9 = arith.constant 0 : index
    %c0_10 = arith.constant 0 : index
    %23 = vector.load %arg3[%c0_9, %c0_10] : memref<1x64xf32, #tpu.memory_space<vmem>>, vector<1x64xf32>
    %24 = vector.shape_cast %23 : vector<1x64xf32> to vector<1x1x64xf32>
    %25 = vector.broadcast %24 : vector<1x1x64xf32> to vector<1x16x64xf32>
    %26 = arith.mulf %22, %25 : vector<1x16x64xf32>
    %c0_11 = arith.constant 0 : index
    %c0_12 = arith.constant 0 : index
    %27 = vector.load %arg4[%c0_11, %c0_12] : memref<1x64xf32, #tpu.memory_space<vmem>>, vector<1x64xf32>
    %28 = vector.shape_cast %27 : vector<1x64xf32> to vector<1x1x64xf32>
    %29 = vector.broadcast %28 : vector<1x1x64xf32> to vector<1x16x64xf32>
    %30 = arith.addf %26, %29 : vector<1x16x64xf32>
    %cst_13 = arith.constant 0.000000e+00 : f32
    %31 = vector.broadcast %cst_13 : f32 to vector<1x16x64xf32>
    %32 = arith.cmpf oge, %30, %31 : vector<1x16x64xf32>
    %cst_14 = arith.constant 2.000000e-01 : f32
    %33 = vector.broadcast %cst_14 : f32 to vector<1x16x64xf32>
    %34 = arith.mulf %33, %30 : vector<1x16x64xf32>
    %35 = arith.select %32, %30, %34 : vector<1x16x64xi1>, vector<1x16x64xf32>
    %c0_15 = arith.constant 0 : index
    %c0_16 = arith.constant 0 : index
    %36 = vector.load %arg5[%c0_15, %c0_16] : memref<16x64xf32, #tpu.memory_space<vmem>>, vector<16x64xf32>
    %37 = vector.shape_cast %36 : vector<16x64xf32> to vector<1x16x64xf32>
    %38 = arith.mulf %35, %37 : vector<1x16x64xf32>
    %cst_17 = arith.constant dense<0.000000e+00> : vector<1x16xf32>
    %39 = vector.multi_reduction <add>, %38, %cst_17 [2] : vector<1x16x64xf32> to vector<1x16xf32>
    %40 = vector.shape_cast %39 : vector<1x16xf32> to vector<1x16x1xf32>
    %cst_18 = arith.constant dense<0.000000e+00> : vector<1x1xf32>
    %41 = vector.multi_reduction <add>, %40, %cst_18 [1] : vector<1x16x1xf32> to vector<1x1xf32>
    %42 = vector.shape_cast %41 : vector<1x1xf32> to vector<1x1x1xf32>
    %c0_19 = arith.constant 0 : index
    %c0_20 = arith.constant 0 : index
    %43 = vector.load %arg6[%c0_19, %c0_20] : memref<1x1xf32, #tpu.memory_space<vmem>>, vector<1x1xf32>
    %44 = vector.shape_cast %43 : vector<1x1xf32> to vector<1x1x1xf32>
    %45 = arith.addf %42, %44 : vector<1x1x1xf32>
    %c0_21 = arith.constant 0 : index
    %c0_22 = arith.constant 0 : index
    %c0_23 = arith.constant 0 : index
    %46 = vector.load %arg7[%c0_21, %c0_22, %c0_23] : memref<1x1x1xf32, #tpu.memory_space<vmem>>, vector<1x1x1xf32>
    tpu.vector_store %arg7[%c0_21, %c0_22, %c0_23], %45 {strides = array<i32>} : memref<1x1x1xf32, #tpu.memory_space<vmem>>, vector<1x1x1xf32>,
    return
  }
  func.func @transform_0(%arg0: i32) -> (i32, i32, i32) {
    %c0_i32 = arith.constant 0 : i32
    %c0_i32_0 = arith.constant 0 : i32
    %c0_i32_1 = arith.constant 0 : i32
    return %arg0, %c0_i32, %c0_i32_0 : i32, i32, i32
  }
  func.func @transform_1(%arg0: i32) -> (i32, i32) {
    %c0_i32 = arith.constant 0 : i32
    %c0_i32_0 = arith.constant 0 : i32
    %c0_i32_1 = arith.constant 0 : i32
    return %c0_i32, %c0_i32_0 : i32, i32
  }
  func.func @transform_2(%arg0: i32) -> (i32, i32) {
    %c0_i32 = arith.constant 0 : i32
    %c0_i32_0 = arith.constant 0 : i32
    %c0_i32_1 = arith.constant 0 : i32
    return %c0_i32, %c0_i32_0 : i32, i32
  }
  func.func @transform_3(%arg0: i32) -> (i32, i32) {
    %c0_i32 = arith.constant 0 : i32
    %c0_i32_0 = arith.constant 0 : i32
    %c0_i32_1 = arith.constant 0 : i32
    return %c0_i32, %c0_i32_0 : i32, i32
  }
  func.func @transform_4(%arg0: i32) -> (i32, i32) {
    %c0_i32 = arith.constant 0 : i32
    %c0_i32_0 = arith.constant 0 : i32
    %c0_i32_1 = arith.constant 0 : i32
    return %c0_i32, %c0_i32_0 : i32, i32
  }
  func.func @transform_5(%arg0: i32) -> (i32, i32) {
    %c0_i32 = arith.constant 0 : i32
    %c0_i32_0 = arith.constant 0 : i32
    %c0_i32_1 = arith.constant 0 : i32
    return %c0_i32, %c0_i32_0 : i32, i32
  }
  func.func @transform_6(%arg0: i32) -> (i32, i32, i32) {
    %c0_i32 = arith.constant 0 : i32
    %c0_i32_0 = arith.constant 0 : i32
    %c0_i32_1 = arith.constant 0 : i32
    return %arg0, %c0_i32, %c0_i32_0 : i32, i32, i32
  }
}

</mosaic_0001>

<bundles_post_ra>
// kernel: critic_forward.4
= control target key start
LH: loop header
LB: loop body
LE: loop exit
PB: predicated region body
PF: predicated region fallthrough
CT: control target
= control target key end

     0   :  { %s10940_s12 = smov 0   ;;  %s14233_s0 = inlined_call_operand.vmem [shape: bf16[2,33,33,16], index: 0, kind: input, shape index: {}]   ;;  %s14234_s1 = inlined_call_operand.vmem [shape: bf16[64,8], index: 1, kind: input, shape index: {}]   ;;  %s14235_s2 = inlined_call_operand.vmem [shape: f32[1,8], index: 2, kind: input, shape index: {}]   ;;  %s14236_s3 = inlined_call_operand.vmem [shape: bf16[2,1024,8], index: 3, kind: output, shape index: {}]  }
   0x1 LB: > { %s8916_s13 = sadd.s32 4294967295, %s10918_s12   ;;  %p8920_p0 = scmp.ge.s32.totalorder %s10918_s12, 1  ;;  %s10918_s12 = sphi %s10940_s12, %s13_s12  }
   0x2   : > { %p137_p1 = scmp.lt.s32.totalorder %s10918_s12, 3 }
   0x4   : > { %p138_p2 = pnand %p8920_p0, %p137_p1 }
   0x6   : > { %141 = sbr.rel (%p138_p2) target bundleno = 840 (0x348), region = 32 }
   0xb   : > { %v10777_v0 = vld [vmem:[%s14234_s1] sm:$0xff]   ;;  %p161_p3 = scmp.lt.s32.totalorder %s8916_s13, 1  ;;  %v10778_v1 = vld [vmem:[%s14234_s1 + $0x8] sm:$0xff]   ;;  %v10959_v2 = vld [vmem:[%s14234_s1 + $0x10] sm:$0xff]   ;;  %vm1945_vm0 = vcmask 130048   ;;  %vm8732_vm4 = vcmask 60416  }
   0xc   : > { %10378 = vmatprep.subr.bf16.mxu1 %v10777_v0  ;;  %10248 = vmatprep.subr.bf16.mxu0 %v10778_v1  ;;  %v10782_v3 = vld [vmem:[%s14234_s1 + $0x18] sm:$0xff]   ;;  %vm334_vm1 = vsmask.f32 3328  ;;  %vm335_vm2 = vsmask.f32 7440 }
   0xd   : > { %s14526_s13 = smov (!%p161_p3, %s8916_s13), 1  ;;  %10379 = vmatpush3.bf16.msra.mxu1 %v10777_v0  ;;  %10249 = vmatpush3.bf16.msra.mxu0 %v10778_v1  ;;  %vm10982_vm3 = vmor %vm334_vm1, %vm335_vm2 }
   0xe   : > { %s10768_s20 = smul.u32 660, %s14526_s13  ;;  %10508 = vmatprep.subr.bf16.mxu0 %v10959_v2  ;;  %10638 = vmatprep.subr.bf16.mxu1 %v10782_v3  ;;  %s9859_s28 = sshll.u32 %s14526_s13, 9 }
   0xf   : > { %s12994_s4 = scalar_lea.vmem %s14236_s3, %s9859_s28 }
  0x10   : > { %s10969_s25 = scalar_lea.vmem %s14233_s0, %s10768_s20 }
  0x11   : > { %v172_v4 = vld [vmem:[%s10969_s25] sm:$0xf]  ;;  %v173_v5 = vld [vmem:[%s10969_s25 + $0x4] sm:$0xf]  ;;  %v174_v6 = vld [vmem:[%s10969_s25 + $0x8] sm:$0xf] }
  0x12   : > { %v338_v7 = vshrl.u32 %v172_v4, 16  ;;  %v341_v8 = vshll.u32 %v172_v4, 16  ;;  %v347_v9 = vshll.u32 %v173_v5, 16  ;;  %v351_v10 = vshrl.u32 %v173_v5, 16  ;;  %v175_v11 = vld [vmem:[%s10969_s25 + $0xc] sm:$0xf] }
  0x13   : > { %v9053_v12 = vcombine.low %v172_v4, %v173_v5  ;;  %v367_v13 = vshll.u32 %v175_v11, 16  ;;  %v371_v14 = vshrl.u32 %v175_v11, 16  ;;  %v9054_v15 = vcombine.low %v174_v6, %v175_v11  ;;  %v302_v16 = vld [vmem:[%s10969_s25 + $0x10] sm:$0x1]  ;;  %v176_v17 = vld [vmem:[%s10969_s25 + $0x14] sm:$0xf] }
  0x14   : > { %v340_v18 = vrot.slane %v338_v7, 4  ;;  %v343_v19 = vrot.slane %v341_v8, 5  ;;  %v349_v20 = vrot.slane %v347_v9, 5  ;;  %v353_v21 = vrot.slane %v351_v10, 4  ;;  %v177_v29 = vld [vmem:[%s10969_s25 + $0x18] sm:$0xf] }
  0x15   : > { %10380 = vmatprep.mubr.msk.bf16.mxu1 %vm1945_vm0, %v9053_v12  ;;  %v369_v22 = vrot.slane %v367_v13, 5  ;;  %v373_v23 = vrot.slane %v371_v14, 4  ;;  %v357_v24 = vshll.u32 %v174_v6, 16  ;;  %v361_v25 = vshrl.u32 %v174_v6, 16  ;;  %v178_v40 = vld [vmem:[%s10969_s25 + $0x1c] sm:$0xf] }
  0x16   : > { %10381 = vmatmul.mubr.msk.bf16.vlgmr.msra.gmra.mxu1 %vm1945_vm0, %v9054_v15  ;;  %v344_v26 = vor.u32 %v343_v19, %v340_v18  ;;  %v354_v27 = vor.u32 %v353_v21, %v349_v20  ;;  %v377_v28 = vshll.u32 %v302_v16, 16  ;;  %v382_v30 = vshrl.u32 %v176_v17, 16  ;;  %v179_v45 = vld [vmem:[%s10969_s25 + $0x20] sm:$0xf]  ;;  %v303_v58 = vld [vmem:[%s10969_s25 + $0x24] sm:$0x1] }
  0x17   : > { %v359_v32 = vrot.slane %v357_v24, 5  ;;  %v363_v33 = vrot.slane %v361_v25, 4  ;;  %v374_v34 = vor.u32 %v373_v23, %v369_v22  ;;  %10639 = vmatpush3.bf16.msra.mxu1 %v10782_v3  ;;  %v385_v35 = vshll.u32 %v176_v17, 16  ;;  %v180_v63 = vld [vmem:[%s10969_s25 + $0x28] sm:$0xf] }
  0x18   : > { %v345_v36 = vrot.slane %v344_v26, 4  ;;  %v355_v37 = vrot.slane %v354_v27, 4  ;;  %v379_v38 = vrot.slane %v377_v28, 5  ;;  %v384_v39 = vrot.slane %v382_v30, 4  ;;  %v181_v0 = vld [vmem:[%s10969_s25 + $0x2c] sm:$0xf] }
  0x19   : > { %v364_v41 = vor.u32 %v363_v33, %v359_v32  ;;  %v375_v42 = vrot.slane %v374_v34, 4  ;;  %v387_v43 = vrot.slane %v385_v35, 5  ;;  %v391_v44 = vshll.u32 %v177_v29, 16  ;;  %v182_v18 = vld [vmem:[%s10969_s25 + $0x30] sm:$0xf] }
  0x1a   : > { %v350_v46 = vsel %vm10982_vm3, %v345_v36, %v349_v20  ;;  %v360_v47 = vsel %vm10982_vm3, %v355_v37, %v359_v32  ;;  %v395_v48 = vshrl.u32 %v177_v29, 16  ;;  %v9055_v49 = vcombine.low %v176_v17, %v177_v29  ;;  %v183_v23 = vld [vmem:[%s10969_s25 + $0x34] sm:$0xf]  ;;  %v304_v32 = vld [vmem:[%s10969_s25 + $0x38] sm:$0x1] }
  0x1b   : > { %v365_v50 = vrot.slane %v364_v41, 4  ;;  %v8924_v51 = vcombine.low %v350_v46, %v360_v47  ;;  %v380_v52 = vsel %vm10982_vm3, %v375_v42, %v379_v38  ;;  %v393_v53 = vrot.slane %v391_v44, 5  ;;  %v184_v37 = vld [vmem:[%s10969_s25 + $0x3c] sm:$0xf]  ;;  %v185_v42 = vld [vmem:[%s10969_s25 + $0x40] sm:$0xf] }
  0x1c   : > { %v397_v54 = vrot.slane %v395_v48, 4  ;;  %10384 = vmatprep.mubr.msk.bf16.mxu1 %vm1945_vm0, %v9055_v49  ;;  %v401_v55 = vshll.u32 %v178_v40, 16  ;;  %v405_v56 = vshrl.u32 %v178_v40, 16  ;;  %v411_v57 = vshll.u32 %v179_v45, 16 }
  0x1d   : > { %10250 = vmatprep.mubr.msk.bf16.mxu0 %vm1945_vm0, %v8924_v51  ;;  %v370_v59 = vsel %vm10982_vm3, %v365_v50, %v369_v22  ;;  %v415_v60 = vshrl.u32 %v179_v45, 16  ;;  %v9056_v61 = vcombine.low %v178_v40, %v179_v45  ;;  %v388_v62 = vor.u32 %v387_v43, %v384_v39 }
  0x1e   : > { %v8925_v1 = vcombine.low %v370_v59, %v380_v52  ;;  %v403_v3 = vrot.slane %v401_v55, 5  ;;  %v407_v4 = vrot.slane %v405_v56, 4  ;;  %v413_v5 = vrot.slane %v411_v57, 5  ;;  %v186_v55 = vld [vmem:[%s10969_s25 + $0x44] sm:$0xf] }
  0x1f   : > { %v417_v6 = vrot.slane %v415_v60, 4  ;;  %10385 = vmatmul.mubr.msk.bf16.gmra.mxu1 %vm1945_vm0, %v9056_v61  ;;  %v389_v7 = vrot.slane %v388_v62, 4  ;;  %v398_v8 = vor.u32 %v397_v54, %v393_v53  ;;  %v421_v9 = vshll.u32 %v303_v58, 16  ;;  %v187_v60 = vld [vmem:[%s10969_s25 + $0x48] sm:$0xf] }
  0x20   : > { %10251 = vmatmul.mubr.msk.bf16.vlgmr.msra.gmra.mxu0 %vm1945_vm0, %v8925_v1  ;;  %v408_v10 = vor.u32 %v407_v4, %v403_v3  ;;  %v426_v11 = vshrl.u32 %v180_v63, 16  ;;  %v429_v12 = vshll.u32 %v180_v63, 16  ;;  %v435_v13 = vshll.u32 %v181_v0, 16 }
  0x21   : > { %10509 = vmatpush3.bf16.msra.mxu0 %v10959_v2  ;;  %v394_v14 = vsel %vm10982_vm3, %v389_v7, %v393_v53  ;;  %v399_v15 = vrot.slane %v398_v8, 4  ;;  %v418_v16 = vor.u32 %v417_v6, %v413_v5  ;;  %v423_v17 = vrot.slane %v421_v9, 5  ;;  %v305_v6 = vld [vmem:[%s10969_s25 + $0x4c] sm:$0x1] }
  0x22   : > { %v409_v19 = vrot.slane %v408_v10, 4  ;;  %v428_v20 = vrot.slane %v426_v11, 4  ;;  %v431_v21 = vrot.slane %v429_v12, 5  ;;  %v437_v22 = vrot.slane %v435_v13, 5  ;;  %v188_v11 = vld [vmem:[%s10969_s25 + $0x50] sm:$0xf] }
  0x23   : > { %v404_v24 = vsel %vm10982_vm3, %v399_v15, %v403_v3  ;;  %v419_v25 = vrot.slane %v418_v16, 4  ;;  %v439_v26 = vshrl.u32 %v181_v0, 16  ;;  %v9057_v2 = vcombine.low %v180_v63, %v181_v0  ;;  %v189_v16 = vld [vmem:[%s10969_s25 + $0x54] sm:$0xf] }
  0x24   : > { %v8926_v27 = vcombine.low %v394_v14, %v404_v24  ;;  %v414_v28 = vsel %vm10982_vm3, %v409_v19, %v413_v5  ;;  %v445_v29 = vshll.u32 %v182_v18, 16  ;;  %v449_v30 = vshrl.u32 %v182_v18, 16 }
  0x25   : > { %v424_v33 = vsel %vm10982_vm3, %v419_v25, %v423_v17  ;;  %v441_v34 = vrot.slane %v439_v26, 4  ;;  %10388 = vmatprep.mubr.msk.bf16.mxu1 %vm1945_vm0, %v9057_v2  ;;  %v455_v35 = vshll.u32 %v183_v23, 16  ;;  %v459_v36 = vshrl.u32 %v183_v23, 16 }
  0x26   : > { %10254 = vmatprep.mubr.msk.bf16.mxu0 %vm1945_vm0, %v8926_v27  ;;  %v8927_v38 = vcombine.low %v414_v28, %v424_v33  ;;  %v447_v39 = vrot.slane %v445_v29, 5  ;;  %v451_v40 = vrot.slane %v449_v30, 4  ;;  %v9058_v41 = vcombine.low %v182_v18, %v183_v23  ;;  %v190_v33 = vld [vmem:[%s10969_s25 + $0x58] sm:$0xf] }
  0x27   : > { %v457_v43 = vrot.slane %v455_v35, 5  ;;  %v461_v44 = vrot.slane %v459_v36, 4  ;;  %v432_v45 = vor.u32 %v431_v21, %v428_v20  ;;  %v442_v46 = vor.u32 %v441_v34, %v437_v22 }
  0x28   : > { %10255 = vmatmul.mubr.msk.bf16.gmra.mxu0 %vm1945_vm0, %v8927_v38  ;;  %10389 = vmatmul.mubr.msk.bf16.gmra.mxu1 %vm1945_vm0, %v9058_v41  ;;  %v452_v47 = vor.u32 %v451_v40, %v447_v39  ;;  %v465_v48 = vshll.u32 %v304_v32, 16  ;;  %v470_v49 = vshrl.u32 %v184_v37, 16  ;;  %v473_v50 = vshll.u32 %v184_v37, 16  ;;  %v191_v38 = vld [vmem:[%s10969_s25 + $0x5c] sm:$0xf] }
  0x29   : > { %v433_v51 = vrot.slane %v432_v45, 4  ;;  %v443_v52 = vrot.slane %v442_v46, 4  ;;  %v462_v53 = vor.u32 %v461_v44, %v457_v43  ;;  %v479_v54 = vshll.u32 %v185_v42, 16 }
  0x2a   : > { %v453_v56 = vrot.slane %v452_v47, 4  ;;  %v467_v57 = vrot.slane %v465_v48, 5  ;;  %v472_v58 = vrot.slane %v470_v49, 4  ;;  %v475_v59 = vrot.slane %v473_v50, 5  ;;  %v306_v47 = vld [vmem:[%s10969_s25 + $0x60] sm:$0x1] }
  0x2b   : > { %v438_v61 = vsel %vm10982_vm3, %v433_v51, %v437_v22  ;;  %v448_v62 = vsel %vm10982_vm3, %v443_v52, %v447_v39  ;;  %v463_v63 = vrot.slane %v462_v53, 4  ;;  %v481_v0 = vrot.slane %v479_v54, 5  ;;  %v192_v52 = vld [vmem:[%s10969_s25 + $0x64] sm:$0xf] }
  0x2c   : > { %v8928_v1 = vcombine.low %v438_v61, %v448_v62  ;;  %v458_v3 = vsel %vm10982_vm3, %v453_v56, %v457_v43  ;;  %v483_v4 = vshrl.u32 %v185_v42, 16  ;;  %v9059_v5 = vcombine.low %v184_v37, %v185_v42 }
  0x2d   : > { %v468_v7 = vsel %vm10982_vm3, %v463_v63, %v467_v57  ;;  %v489_v8 = vshll.u32 %v186_v55, 16  ;;  %v493_v9 = vshrl.u32 %v186_v55, 16  ;;  %v499_v10 = vshll.u32 %v187_v60, 16  ;;  %v193_v57 = vld [vmem:[%s10969_s25 + $0x68] sm:$0xf] }
  0x2e   : > { %10258 = vmatprep.mubr.msk.bf16.mxu0 %vm1945_vm0, %v8928_v1  ;;  %v8929_v12 = vcombine.low %v458_v3, %v468_v7  ;;  %v485_v13 = vrot.slane %v483_v4, 4  ;;  %10392 = vmatprep.mubr.msk.bf16.mxu1 %vm1945_vm0, %v9059_v5  ;;  %v503_v14 = vshrl.u32 %v187_v60, 16  ;;  %v9060_v15 = vcombine.low %v186_v55, %v187_v60  ;;  %v194_v7 = vld [vmem:[%s10969_s25 + $0x6c] sm:$0xf] }
  0x2f   : > { %v491_v17 = vrot.slane %v489_v8, 5  ;;  %v495_v18 = vrot.slane %v493_v9, 4  ;;  %v501_v19 = vrot.slane %v499_v10, 5  ;;  %v476_v20 = vor.u32 %v475_v59, %v472_v58 }
  0x30   : > { %10259 = vmatmul.mubr.msk.bf16.gmra.mxu0 %vm1945_vm0, %v8929_v12  ;;  %v505_v21 = vrot.slane %v503_v14, 4  ;;  %10393 = vmatmul.mubr.msk.bf16.gmra.mxu1 %vm1945_vm0, %v9060_v15  ;;  %v486_v22 = vor.u32 %v485_v13, %v481_v0  ;;  %v509_v23 = vshll.u32 %v305_v6, 16  ;;  %v514_v24 = vshrl.u32 %v188_v11, 16  ;;  %v195_v12 = vld [vmem:[%s10969_s25 + $0x70] sm:$0xf] }
  0x31   : > { %v477_v25 = vrot.slane %v476_v20, 4  ;;  %v496_v26 = vor.u32 %v495_v18, %v491_v17  ;;  %v517_v2 = vshll.u32 %v188_v11, 16  ;;  %v523_v27 = vshll.u32 %v189_v16, 16 }
  0x32   : > { %v487_v28 = vrot.slane %v486_v22, 4  ;;  %v506_v29 = vor.u32 %v505_v21, %v501_v19  ;;  %v511_v30 = vrot.slane %v509_v23, 5  ;;  %v516_v32 = vrot.slane %v514_v24, 4  ;;  %v307_v21 = vld [vmem:[%s10969_s25 + $0x74] sm:$0x1] }
  0x33   : > { %v482_v34 = vsel %vm10982_vm3, %v477_v25, %v481_v0  ;;  %v497_v35 = vrot.slane %v496_v26, 4  ;;  %v519_v36 = vrot.slane %v517_v2, 5  ;;  %v525_v37 = vrot.slane %v523_v27, 5  ;;  %v196_v26 = vld [vmem:[%s10969_s25 + $0x78] sm:$0xf] }
  0x34   : > { %v492_v39 = vsel %vm10982_vm3, %v487_v28, %v491_v17  ;;  %v507_v40 = vrot.slane %v506_v29, 4  ;;  %v527_v41 = vshrl.u32 %v189_v16, 16  ;;  %v9061_v42 = vcombine.low %v188_v11, %v189_v16 }
  0x35   : > { %v8930_v43 = vcombine.low %v482_v34, %v492_v39  ;;  %v502_v44 = vsel %vm10982_vm3, %v497_v35, %v501_v19  ;;  %v533_v45 = vshll.u32 %v190_v33, 16  ;;  %v537_v46 = vshrl.u32 %v190_v33, 16 }
  0x36   : > { %v512_v48 = vsel %vm10982_vm3, %v507_v40, %v511_v30  ;;  %v529_v49 = vrot.slane %v527_v41, 4  ;;  %10396 = vmatprep.mubr.msk.bf16.mxu1 %vm1945_vm0, %v9061_v42  ;;  %v543_v50 = vshll.u32 %v191_v38, 16  ;;  %v547_v51 = vshrl.u32 %v191_v38, 16  ;;  %v197_v30 = vld [vmem:[%s10969_s25 + $0x7c] sm:$0xf] }
  0x37   : > { %10262 = vmatprep.mubr.msk.bf16.mxu0 %vm1945_vm0, %v8930_v43  ;;  %v8931_v53 = vcombine.low %v502_v44, %v512_v48  ;;  %v535_v54 = vrot.slane %v533_v45, 5  ;;  %v539_v55 = vrot.slane %v537_v46, 4  ;;  %v9062_v56 = vcombine.low %v190_v33, %v191_v38  ;;  %v198_v48 = vld [vmem:[%s10969_s25 + $0x80] sm:$0xf] }
  0x38   : > { %v545_v58 = vrot.slane %v543_v50, 5  ;;  %v549_v59 = vrot.slane %v547_v51, 4  ;;  %v520_v60 = vor.u32 %v519_v36, %v516_v32  ;;  %v530_v61 = vor.u32 %v529_v49, %v525_v37 }
  0x39   : > { %10263 = vmatmul.mubr.msk.bf16.gmra.mxu0 %vm1945_vm0, %v8931_v53  ;;  %10397 = vmatmul.mubr.msk.bf16.gmra.mxu1 %vm1945_vm0, %v9062_v56  ;;  %v540_v62 = vor.u32 %v539_v55, %v535_v54  ;;  %v553_v63 = vshll.u32 %v306_v47, 16  ;;  %v558_v0 = vshrl.u32 %v192_v52, 16  ;;  %v561_v1 = vshll.u32 %v192_v52, 16  ;;  %v199_v53 = vld [vmem:[%s10969_s25 + $0x84] sm:$0xf] }
  0x3a   : > { %v521_v3 = vrot.slane %v520_v60, 4  ;;  %v531_v4 = vrot.slane %v530_v61, 4  ;;  %v550_v5 = vor.u32 %v549_v59, %v545_v58  ;;  %v567_v6 = vshll.u32 %v193_v57, 16 }
  0x3b   : > { %v541_v8 = vrot.slane %v540_v62, 4  ;;  %v555_v9 = vrot.slane %v553_v63, 5  ;;  %v560_v10 = vrot.slane %v558_v0, 4  ;;  %v563_v11 = vrot.slane %v561_v1, 5  ;;  %v308_v62 = vld [vmem:[%s10969_s25 + $0x88] sm:$0x1] }
  0x3c   : > { %v526_v13 = vsel %vm10982_vm3, %v521_v3, %v525_v37  ;;  %v536_v14 = vsel %vm10982_vm3, %v531_v4, %v535_v54  ;;  %v551_v15 = vrot.slane %v550_v5, 4  ;;  %v569_v16 = vrot.slane %v567_v6, 5  ;;  %v200_v4 = vld [vmem:[%s10969_s25 + $0x8c] sm:$0xf] }
  0x3d   : > { %v8932_v17 = vcombine.low %v526_v13, %v536_v14  ;;  %v546_v18 = vsel %vm10982_vm3, %v541_v8, %v545_v58  ;;  %v571_v19 = vshrl.u32 %v193_v57, 16  ;;  %v9063_v20 = vcombine.low %v192_v52, %v193_v57 }
  0x3e   : > { %v556_v22 = vsel %vm10982_vm3, %v551_v15, %v555_v9  ;;  %v577_v23 = vshll.u32 %v194_v7, 16  ;;  %v581_v24 = vshrl.u32 %v194_v7, 16  ;;  %v587_v25 = vshll.u32 %v195_v12, 16  ;;  %v201_v9 = vld [vmem:[%s10969_s25 + $0x90] sm:$0xf] }
  0x3f   : > { %10266 = vmatprep.mubr.msk.bf16.mxu0 %vm1945_vm0, %v8932_v17  ;;  %v8933_v2 = vcombine.low %v546_v18, %v556_v22  ;;  %v573_v27 = vrot.slane %v571_v19, 4  ;;  %10400 = vmatprep.mubr.msk.bf16.mxu1 %vm1945_vm0, %v9063_v20  ;;  %v591_v28 = vshrl.u32 %v195_v12, 16  ;;  %v9064_v29 = vcombine.low %v194_v7, %v195_v12  ;;  %v202_v22 = vld [vmem:[%s10969_s25 + $0x94] sm:$0xf] }
  0x40   : > { %v579_v32 = vrot.slane %v577_v23, 5  ;;  %v583_v33 = vrot.slane %v581_v24, 4  ;;  %v589_v34 = vrot.slane %v587_v25, 5  ;;  %v564_v35 = vor.u32 %v563_v11, %v560_v10 }
  0x41   : > { %10267 = vmatmul.mubr.msk.bf16.gmra.mxu0 %vm1945_vm0, %v8933_v2  ;;  %v593_v36 = vrot.slane %v591_v28, 4  ;;  %10401 = vmatmul.mubr.msk.bf16.gmra.mxu1 %vm1945_vm0, %v9064_v29  ;;  %v574_v37 = vor.u32 %v573_v27, %v569_v16  ;;  %v597_v38 = vshll.u32 %v307_v21, 16  ;;  %v602_v39 = vshrl.u32 %v196_v26, 16  ;;  %v203_v2 = vld [vmem:[%s10969_s25 + $0x98] sm:$0xf] }
  0x42   : > { %v565_v40 = vrot.slane %v564_v35, 4  ;;  %v584_v41 = vor.u32 %v583_v33, %v579_v32  ;;  %v605_v42 = vshll.u32 %v196_v26, 16  ;;  %v611_v43 = vshll.u32 %v197_v30, 16 }
  0x43   : > { %v575_v44 = vrot.slane %v574_v37, 4  ;;  %v594_v45 = vor.u32 %v593_v36, %v589_v34  ;;  %v599_v46 = vrot.slane %v597_v38, 5  ;;  %v604_v47 = vrot.slane %v602_v39, 4  ;;  %v309_v36 = vld [vmem:[%s10969_s25 + $0x9c] sm:$0x1] }
  0x44   : > { %v570_v49 = vsel %vm10982_vm3, %v565_v40, %v569_v16  ;;  %v585_v50 = vrot.slane %v584_v41, 4  ;;  %v607_v51 = vrot.slane %v605_v42, 5  ;;  %v613_v52 = vrot.slane %v611_v43, 5  ;;  %v204_v41 = vld [vmem:[%s10969_s25 + $0xa0] sm:$0xf] }
  0x45   : > { %v580_v54 = vsel %vm10982_vm3, %v575_v44, %v579_v32  ;;  %v595_v55 = vrot.slane %v594_v45, 4  ;;  %v615_v56 = vshrl.u32 %v197_v30, 16  ;;  %v9065_v57 = vcombine.low %v196_v26, %v197_v30 }
  0x46   : > { %v8934_v58 = vcombine.low %v570_v49, %v580_v54  ;;  %v590_v59 = vsel %vm10982_vm3, %v585_v50, %v589_v34  ;;  %v621_v60 = vshll.u32 %v198_v48, 16  ;;  %v625_v61 = vshrl.u32 %v198_v48, 16 }
  0x47   : > { %v600_v63 = vsel %vm10982_vm3, %v595_v55, %v599_v46  ;;  %v617_v0 = vrot.slane %v615_v56, 4  ;;  %10404 = vmatprep.mubr.msk.bf16.mxu1 %vm1945_vm0, %v9065_v57  ;;  %v631_v1 = vshll.u32 %v199_v53, 16  ;;  %v635_v3 = vshrl.u32 %v199_v53, 16  ;;  %v205_v46 = vld [vmem:[%s10969_s25 + $0xa4] sm:$0xf] }
  0x48   : > { %10270 = vmatprep.mubr.msk.bf16.mxu0 %vm1945_vm0, %v8934_v58  ;;  %v8935_v5 = vcombine.low %v590_v59, %v600_v63  ;;  %v623_v6 = vrot.slane %v621_v60, 5  ;;  %v627_v7 = vrot.slane %v625_v61, 4  ;;  %v9066_v8 = vcombine.low %v198_v48, %v199_v53  ;;  %v206_v63 = vld [vmem:[%s10969_s25 + $0xa8] sm:$0xf] }
  0x49   : > { %v633_v10 = vrot.slane %v631_v1, 5  ;;  %v637_v11 = vrot.slane %v635_v3, 4  ;;  %v608_v12 = vor.u32 %v607_v51, %v604_v47  ;;  %v618_v13 = vor.u32 %v617_v0, %v613_v52 }
  0x4a   : > { %10271 = vmatmul.mubr.msk.bf16.gmra.mxu0 %vm1945_vm0, %v8935_v5  ;;  %10405 = vmatmul.mubr.msk.bf16.gmra.mxu1 %vm1945_vm0, %v9066_v8  ;;  %v628_v14 = vor.u32 %v627_v7, %v623_v6  ;;  %v641_v15 = vshll.u32 %v308_v62, 16  ;;  %v646_v16 = vshrl.u32 %v200_v4, 16  ;;  %v649_v17 = vshll.u32 %v200_v4, 16  ;;  %v207_v5 = vld [vmem:[%s10969_s25 + $0xac] sm:$0xf] }
  0x4b   : > { %v609_v18 = vrot.slane %v608_v12, 4  ;;  %v619_v19 = vrot.slane %v618_v13, 4  ;;  %v638_v20 = vor.u32 %v637_v11, %v633_v10  ;;  %v655_v21 = vshll.u32 %v201_v9, 16 }
  0x4c   : > { %v629_v23 = vrot.slane %v628_v14, 4  ;;  %v643_v24 = vrot.slane %v641_v15, 5  ;;  %v648_v25 = vrot.slane %v646_v16, 4  ;;  %v651_v26 = vrot.slane %v649_v17, 5  ;;  %v310_v14 = vld [vmem:[%s10969_s25 + $0xb0] sm:$0x1] }
  0x4d   : > { %v614_v27 = vsel %vm10982_vm3, %v609_v18, %v613_v52  ;;  %v624_v28 = vsel %vm10982_vm3, %v619_v19, %v623_v6  ;;  %v639_v29 = vrot.slane %v638_v20, 4  ;;  %v657_v30 = vrot.slane %v655_v21, 5  ;;  %v208_v19 = vld [vmem:[%s10969_s25 + $0xb4] sm:$0xf] }
  0x4e   : > { %v8936_v32 = vcombine.low %v614_v27, %v624_v28  ;;  %v634_v33 = vsel %vm10982_vm3, %v629_v23, %v633_v10  ;;  %v659_v34 = vshrl.u32 %v201_v9, 16  ;;  %v9067_v35 = vcombine.low %v200_v4, %v201_v9 }
  0x4f   : > { %v644_v37 = vsel %vm10982_vm3, %v639_v29, %v643_v24  ;;  %v665_v38 = vshll.u32 %v202_v22, 16  ;;  %v669_v39 = vshrl.u32 %v202_v22, 16  ;;  %v675_v40 = vshll.u32 %v203_v2, 16  ;;  %v209_v24 = vld [vmem:[%s10969_s25 + $0xb8] sm:$0xf] }
  0x50   : > { %10274 = vmatprep.mubr.msk.bf16.mxu0 %vm1945_vm0, %v8936_v32  ;;  %v8937_v42 = vcombine.low %v634_v33, %v644_v37  ;;  %v661_v43 = vrot.slane %v659_v34, 4  ;;  %10408 = vmatprep.mubr.msk.bf16.mxu1 %vm1945_vm0, %v9067_v35  ;;  %v679_v44 = vshrl.u32 %v203_v2, 16  ;;  %v9068_v45 = vcombine.low %v202_v22, %v203_v2  ;;  %v210_v37 = vld [vmem:[%s10969_s25 + $0xbc] sm:$0xf] }
  0x51   : > { %v667_v47 = vrot.slane %v665_v38, 5  ;;  %v671_v48 = vrot.slane %v669_v39, 4  ;;  %v677_v49 = vrot.slane %v675_v40, 5  ;;  %v652_v50 = vor.u32 %v651_v26, %v648_v25 }
  0x52   : > { %10275 = vmatmul.mubr.msk.bf16.gmra.mxu0 %vm1945_vm0, %v8937_v42  ;;  %v681_v51 = vrot.slane %v679_v44, 4  ;;  %10409 = vmatmul.mubr.msk.bf16.gmra.mxu1 %vm1945_vm0, %v9068_v45  ;;  %v662_v52 = vor.u32 %v661_v43, %v657_v30  ;;  %v685_v53 = vshll.u32 %v309_v36, 16  ;;  %v690_v54 = vshrl.u32 %v204_v41, 16  ;;  %v211_v42 = vld [vmem:[%s10969_s25 + $0xc0] sm:$0xf] }
  0x53   : > { %v653_v55 = vrot.slane %v652_v50, 4  ;;  %v672_v56 = vor.u32 %v671_v48, %v667_v47  ;;  %v693_v57 = vshll.u32 %v204_v41, 16  ;;  %v699_v58 = vshll.u32 %v205_v46, 16 }
  0x54   : > { %v663_v59 = vrot.slane %v662_v52, 4  ;;  %v682_v60 = vor.u32 %v681_v51, %v677_v49  ;;  %v687_v61 = vrot.slane %v685_v53, 5  ;;  %v692_v62 = vrot.slane %v690_v54, 4  ;;  %v311_v51 = vld [vmem:[%s10969_s25 + $0xc4] sm:$0x1] }
  0x55   : > { %v658_v0 = vsel %vm10982_vm3, %v653_v55, %v657_v30  ;;  %v673_v1 = vrot.slane %v672_v56, 4  ;;  %v695_v3 = vrot.slane %v693_v57, 5  ;;  %v701_v4 = vrot.slane %v699_v58, 5  ;;  %v212_v56 = vld [vmem:[%s10969_s25 + $0xc8] sm:$0xf] }
  0x56   : > { %v668_v6 = vsel %vm10982_vm3, %v663_v59, %v667_v47  ;;  %v683_v7 = vrot.slane %v682_v60, 4  ;;  %v703_v8 = vshrl.u32 %v205_v46, 16  ;;  %v9069_v9 = vcombine.low %v204_v41, %v205_v46 }
  0x57   : > { %v8938_v10 = vcombine.low %v658_v0, %v668_v6  ;;  %v678_v11 = vsel %vm10982_vm3, %v673_v1, %v677_v49  ;;  %v709_v12 = vshll.u32 %v206_v63, 16  ;;  %v713_v13 = vshrl.u32 %v206_v63, 16 }
  0x58   : > { %v688_v15 = vsel %vm10982_vm3, %v683_v7, %v687_v61  ;;  %v705_v16 = vrot.slane %v703_v8, 4  ;;  %10412 = vmatprep.mubr.msk.bf16.mxu1 %vm1945_vm0, %v9069_v9  ;;  %v719_v17 = vshll.u32 %v207_v5, 16  ;;  %v723_v18 = vshrl.u32 %v207_v5, 16  ;;  %v213_v61 = vld [vmem:[%s10969_s25 + $0xcc] sm:$0xf] }
  0x59   : > { %10278 = vmatprep.mubr.msk.bf16.mxu0 %vm1945_vm0, %v8938_v10  ;;  %v8939_v20 = vcombine.low %v678_v11, %v688_v15  ;;  %v711_v21 = vrot.slane %v709_v12, 5  ;;  %v715_v22 = vrot.slane %v713_v13, 4  ;;  %v9070_v23 = vcombine.low %v206_v63, %v207_v5  ;;  %v214_v15 = vld [vmem:[%s10969_s25 + $0xd0] sm:$0xf] }
  0x5a   : > { %v721_v25 = vrot.slane %v719_v17, 5  ;;  %v725_v26 = vrot.slane %v723_v18, 4  ;;  %v696_v2 = vor.u32 %v695_v3, %v692_v62  ;;  %v706_v27 = vor.u32 %v705_v16, %v701_v4 }
  0x5b   : > { %10279 = vmatmul.mubr.msk.bf16.gmra.mxu0 %vm1945_vm0, %v8939_v20  ;;  %10413 = vmatmul.mubr.msk.bf16.gmra.mxu1 %vm1945_vm0, %v9070_v23  ;;  %v716_v28 = vor.u32 %v715_v22, %v711_v21  ;;  %v729_v29 = vshll.u32 %v310_v14, 16  ;;  %v734_v30 = vshrl.u32 %v208_v19, 16  ;;  %v737_v32 = vshll.u32 %v208_v19, 16  ;;  %v215_v20 = vld [vmem:[%s10969_s25 + $0xd4] sm:$0xf] }
  0x5c   : > { %v697_v33 = vrot.slane %v696_v2, 4  ;;  %v707_v34 = vrot.slane %v706_v27, 4  ;;  %v726_v35 = vor.u32 %v725_v26, %v721_v25  ;;  %v743_v36 = vshll.u32 %v209_v24, 16 }
  0x5d   : > { %v717_v38 = vrot.slane %v716_v28, 4  ;;  %v731_v39 = vrot.slane %v729_v29, 5  ;;  %v736_v40 = vrot.slane %v734_v30, 4  ;;  %v739_v41 = vrot.slane %v737_v32, 5  ;;  %v312_v28 = vld [vmem:[%s10969_s25 + $0xd8] sm:$0x1] }
  0x5e   : > { %v702_v43 = vsel %vm10982_vm3, %v697_v33, %v701_v4  ;;  %v712_v44 = vsel %vm10982_vm3, %v707_v34, %v711_v21  ;;  %v727_v45 = vrot.slane %v726_v35, 4  ;;  %v745_v46 = vrot.slane %v743_v36, 5  ;;  %v216_v34 = vld [vmem:[%s10969_s25 + $0xdc] sm:$0xf] }
  0x5f   : > { %v8940_v47 = vcombine.low %v702_v43, %v712_v44  ;;  %v722_v48 = vsel %vm10982_vm3, %v717_v38, %v721_v25  ;;  %v747_v49 = vshrl.u32 %v209_v24, 16  ;;  %v9071_v50 = vcombine.low %v208_v19, %v209_v24 }
  0x60   : > { %v732_v52 = vsel %vm10982_vm3, %v727_v45, %v731_v39  ;;  %v753_v53 = vshll.u32 %v210_v37, 16  ;;  %v757_v54 = vshrl.u32 %v210_v37, 16  ;;  %v763_v55 = vshll.u32 %v211_v42, 16  ;;  %v217_v39 = vld [vmem:[%s10969_s25 + $0xe0] sm:$0xf] }
  0x61   : > { %10282 = vmatprep.mubr.msk.bf16.mxu0 %vm1945_vm0, %v8940_v47  ;;  %v8941_v57 = vcombine.low %v722_v48, %v732_v52  ;;  %v749_v58 = vrot.slane %v747_v49, 4  ;;  %10416 = vmatprep.mubr.msk.bf16.mxu1 %vm1945_vm0, %v9071_v50  ;;  %v767_v59 = vshrl.u32 %v211_v42, 16  ;;  %v9072_v60 = vcombine.low %v210_v37, %v211_v42  ;;  %v218_v48 = vld [vmem:[%s10969_s25 + $0xe4] sm:$0xf] }
  0x62   : > { %v755_v62 = vrot.slane %v753_v53, 5  ;;  %v759_v63 = vrot.slane %v757_v54, 4  ;;  %v765_v0 = vrot.slane %v763_v55, 5  ;;  %v740_v1 = vor.u32 %v739_v41, %v736_v40  ;;  %v219_v53 = vld [vmem:[%s10969_s25 + $0xe8] sm:$0xf] }
  0x63   : > { %10283 = vmatmul.mubr.msk.bf16.gmra.mxu0 %vm1945_vm0, %v8941_v57  ;;  %v769_v3 = vrot.slane %v767_v59, 4  ;;  %10417 = vmatmul.mubr.msk.bf16.gmra.mxu1 %vm1945_vm0, %v9072_v60  ;;  %v750_v4 = vor.u32 %v749_v58, %v745_v46  ;;  %v773_v5 = vshll.u32 %v311_v51, 16  ;;  %v778_v6 = vshrl.u32 %v212_v56, 16 }
  0x64   : > { %v741_v7 = vrot.slane %v740_v1, 4  ;;  %v760_v8 = vor.u32 %v759_v63, %v755_v62  ;;  %v781_v9 = vshll.u32 %v212_v56, 16  ;;  %v787_v10 = vshll.u32 %v213_v61, 16 }
  0x65   : > { %v751_v11 = vrot.slane %v750_v4, 4  ;;  %v770_v12 = vor.u32 %v769_v3, %v765_v0  ;;  %v775_v13 = vrot.slane %v773_v5, 5  ;;  %v780_v14 = vrot.slane %v778_v6, 4  ;;  %v313_v3 = vld [vmem:[%s10969_s25 + $0xec] sm:$0x1] }
  0x66   : > { %v746_v16 = vsel %vm10982_vm3, %v741_v7, %v745_v46  ;;  %v761_v17 = vrot.slane %v760_v8, 4  ;;  %v783_v18 = vrot.slane %v781_v9, 5  ;;  %v789_v19 = vrot.slane %v787_v10, 5  ;;  %v220_v8 = vld [vmem:[%s10969_s25 + $0xf0] sm:$0xf] }
  0x67   : > { %v756_v21 = vsel %vm10982_vm3, %v751_v11, %v755_v62  ;;  %v771_v22 = vrot.slane %v770_v12, 4  ;;  %v791_v23 = vshrl.u32 %v213_v61, 16  ;;  %v9073_v24 = vcombine.low %v212_v56, %v213_v61 }
  0x68   : > { %v8942_v25 = vcombine.low %v746_v16, %v756_v21  ;;  %v766_v26 = vsel %vm10982_vm3, %v761_v17, %v765_v0  ;;  %v797_v2 = vshll.u32 %v214_v15, 16  ;;  %v801_v27 = vshrl.u32 %v214_v15, 16 }
  0x69   : > { %v776_v29 = vsel %vm10982_vm3, %v771_v22, %v775_v13  ;;  %v793_v30 = vrot.slane %v791_v23, 4  ;;  %10420 = vmatprep.mubr.msk.bf16.mxu1 %vm1945_vm0, %v9073_v24  ;;  %v807_v32 = vshll.u32 %v215_v20, 16  ;;  %v811_v33 = vshrl.u32 %v215_v20, 16  ;;  %v221_v13 = vld [vmem:[%s10969_s25 + $0xf4] sm:$0xf] }
  0x6a   : > { %10286 = vmatprep.mubr.msk.bf16.mxu0 %vm1945_vm0, %v8942_v25  ;;  %v8943_v35 = vcombine.low %v766_v26, %v776_v29  ;;  %v799_v36 = vrot.slane %v797_v2, 5  ;;  %v803_v37 = vrot.slane %v801_v27, 4  ;;  %v9074_v38 = vcombine.low %v214_v15, %v215_v20  ;;  %v222_v22 = vld [vmem:[%s10969_s25 + $0xf8] sm:$0xf] }
  0x6b   : > { %v809_v40 = vrot.slane %v807_v32, 5  ;;  %v813_v41 = vrot.slane %v811_v33, 4  ;;  %v784_v42 = vor.u32 %v783_v18, %v780_v14  ;;  %v794_v43 = vor.u32 %v793_v30, %v789_v19  ;;  %v223_v30 = vld [vmem:[%s10969_s25 + $0xfc] sm:$0xf] }
  0x6c   : > { %10287 = vmatmul.mubr.msk.bf16.gmra.mxu0 %vm1945_vm0, %v8943_v35  ;;  %10421 = vmatmul.mubr.msk.bf16.gmra.mxu1 %vm1945_vm0, %v9074_v38  ;;  %v804_v44 = vor.u32 %v803_v37, %v799_v36  ;;  %v817_v45 = vshll.u32 %v312_v28, 16  ;;  %v822_v46 = vshrl.u32 %v216_v34, 16  ;;  %v825_v47 = vshll.u32 %v216_v34, 16 }
  0x6d   : > { %v785_v49 = vrot.slane %v784_v42, 4  ;;  %v795_v50 = vrot.slane %v794_v43, 4  ;;  %v814_v51 = vor.u32 %v813_v41, %v809_v40  ;;  %v831_v52 = vshll.u32 %v217_v39, 16 }
  0x6e   : > { %v805_v54 = vrot.slane %v804_v44, 4  ;;  %v819_v55 = vrot.slane %v817_v45, 5  ;;  %v824_v56 = vrot.slane %v822_v46, 4  ;;  %v827_v57 = vrot.slane %v825_v47, 5  ;;  %v314_v44 = vld [vmem:[%s10969_s25 + $0x100] sm:$0x1] }
  0x6f   : > { %v790_v58 = vsel %vm10982_vm3, %v785_v49, %v789_v19  ;;  %v800_v59 = vsel %vm10982_vm3, %v795_v50, %v799_v36  ;;  %v815_v60 = vrot.slane %v814_v51, 4  ;;  %v833_v61 = vrot.slane %v831_v52, 5  ;;  %v224_v49 = vld [vmem:[%s10969_s25 + $0x104] sm:$0xf] }
  0x70   : > { %v8944_v62 = vcombine.low %v790_v58, %v800_v59  ;;  %v810_v63 = vsel %vm10982_vm3, %v805_v54, %v809_v40  ;;  %v835_v0 = vshrl.u32 %v217_v39, 16  ;;  %v9075_v1 = vcombine.low %v216_v34, %v217_v39  ;;  %v225_v54 = vld [vmem:[%s10969_s25 + $0x108] sm:$0xf] }
  0x71   : > { %v820_v4 = vsel %vm10982_vm3, %v815_v60, %v819_v55  ;;  %v841_v5 = vshll.u32 %v218_v48, 16  ;;  %v845_v6 = vshrl.u32 %v218_v48, 16  ;;  %v851_v7 = vshll.u32 %v219_v53, 16 }
  0x72   : > { %10290 = vmatprep.mubr.msk.bf16.mxu0 %vm1945_vm0, %v8944_v62  ;;  %v8945_v9 = vcombine.low %v810_v63, %v820_v4  ;;  %v837_v10 = vrot.slane %v835_v0, 4  ;;  %10424 = vmatprep.mubr.msk.bf16.mxu1 %vm1945_vm0, %v9075_v1  ;;  %v855_v11 = vshrl.u32 %v219_v53, 16  ;;  %v9076_v12 = vcombine.low %v218_v48, %v219_v53  ;;  %v226_v63 = vld [vmem:[%s10969_s25 + $0x10c] sm:$0xf]  ;;  %v227_v0 = vld [vmem:[%s10969_s25 + $0x110] sm:$0xf] }
  0x73   : > { %v843_v14 = vrot.slane %v841_v5, 5  ;;  %v847_v15 = vrot.slane %v845_v6, 4  ;;  %v853_v16 = vrot.slane %v851_v7, 5  ;;  %v828_v17 = vor.u32 %v827_v57, %v824_v56 }
  0x74   : > { %10291 = vmatmul.mubr.msk.bf16.gmra.mxu0 %vm1945_vm0, %v8945_v9  ;;  %v857_v18 = vrot.slane %v855_v11, 4  ;;  %10425 = vmatmul.mubr.msk.bf16.gmra.mxu1 %vm1945_vm0, %v9076_v12  ;;  %v838_v19 = vor.u32 %v837_v10, %v833_v61  ;;  %v861_v20 = vshll.u32 %v313_v3, 16  ;;  %v866_v21 = vshrl.u32 %v220_v8, 16 }
  0x75   : > { %v829_v23 = vrot.slane %v828_v17, 4  ;;  %v848_v24 = vor.u32 %v847_v15, %v843_v14  ;;  %v869_v25 = vshll.u32 %v220_v8, 16  ;;  %v875_v26 = vshll.u32 %v221_v13, 16  ;;  %v228_v15 = vld [vmem:[%s10969_s25 + $0x118] sm:$0xf] }
  0x76   : > { %v839_v2 = vrot.slane %v838_v19, 4  ;;  %v858_v27 = vor.u32 %v857_v18, %v853_v16  ;;  %v863_v28 = vrot.slane %v861_v20, 5  ;;  %v868_v29 = vrot.slane %v866_v21, 4 }
  0x77   : > { %v834_v32 = vsel %vm10982_vm3, %v829_v23, %v833_v61  ;;  %v849_v33 = vrot.slane %v848_v24, 4  ;;  %v871_v34 = vrot.slane %v869_v25, 5  ;;  %v877_v35 = vrot.slane %v875_v26, 5 }
  0x78   : > { %v844_v36 = vsel %vm10982_vm3, %v839_v2, %v843_v14  ;;  %v859_v37 = vrot.slane %v858_v27, 4  ;;  %v879_v38 = vshrl.u32 %v221_v13, 16  ;;  %v9077_v39 = vcombine.low %v220_v8, %v221_v13  ;;  %v315_v14 = vld [vmem:[%s10969_s25 + $0x114] sm:$0x1]  ;;  %v229_v27 = vld [vmem:[%s10969_s25 + $0x11c] sm:$0xf] }
  0x79   : > { %v8946_v40 = vcombine.low %v834_v32, %v844_v36  ;;  %v854_v41 = vsel %vm10982_vm3, %v849_v33, %v853_v16  ;;  %v885_v42 = vshll.u32 %v222_v22, 16  ;;  %v889_v43 = vshrl.u32 %v222_v22, 16 }
  0x7a   : > { %v864_v45 = vsel %vm10982_vm3, %v859_v37, %v863_v28  ;;  %v881_v46 = vrot.slane %v879_v38, 4  ;;  %10428 = vmatprep.mubr.msk.bf16.mxu1 %vm1945_vm0, %v9077_v39  ;;  %v895_v47 = vshll.u32 %v223_v30, 16  ;;  %v899_v48 = vshrl.u32 %v223_v30, 16  ;;  %v230_v37 = vld [vmem:[%s10969_s25 + $0x120] sm:$0xf] }
  0x7b   : > { %10294 = vmatprep.mubr.msk.bf16.mxu0 %vm1945_vm0, %v8946_v40  ;;  %v8947_v50 = vcombine.low %v854_v41, %v864_v45  ;;  %v887_v51 = vrot.slane %v885_v42, 5  ;;  %v891_v52 = vrot.slane %v889_v43, 4  ;;  %v9078_v53 = vcombine.low %v222_v22, %v223_v30  ;;  %v231_v42 = vld [vmem:[%s10969_s25 + $0x124] sm:$0xf] }
  0x7c   : > { %v897_v55 = vrot.slane %v895_v47, 5  ;;  %v901_v56 = vrot.slane %v899_v48, 4  ;;  %v872_v57 = vor.u32 %v871_v34, %v868_v29  ;;  %v882_v58 = vor.u32 %v881_v46, %v877_v35 }
  0x7d   : > { %10295 = vmatmul.mubr.msk.bf16.gmra.mxu0 %vm1945_vm0, %v8947_v50  ;;  %10429 = vmatmul.mubr.msk.bf16.gmra.mxu1 %vm1945_vm0, %v9078_v53  ;;  %v892_v59 = vor.u32 %v891_v52, %v887_v51  ;;  %v905_v60 = vshll.u32 %v314_v44, 16  ;;  %v910_v61 = vshrl.u32 %v224_v49, 16  ;;  %v913_v62 = vshll.u32 %v224_v49, 16 }
  0x7e   : > { %v873_v1 = vrot.slane %v872_v57, 4  ;;  %v883_v3 = vrot.slane %v882_v58, 4  ;;  %v902_v4 = vor.u32 %v901_v56, %v897_v55  ;;  %v919_v5 = vshll.u32 %v225_v54, 16  ;;  %v232_v56 = vld [vmem:[%s10969_s25 + $0x12c] sm:$0xf] }
  0x7f   : > { %v893_v6 = vrot.slane %v892_v59, 4  ;;  %v907_v7 = vrot.slane %v905_v60, 5  ;;  %v912_v8 = vrot.slane %v910_v61, 4  ;;  %v915_v9 = vrot.slane %v913_v62, 5  ;;  %v233_v61 = vld [vmem:[%s10969_s25 + $0x130] sm:$0xf] }
  0x80   : > { %v878_v10 = vsel %vm10982_vm3, %v873_v1, %v877_v35  ;;  %v888_v11 = vsel %vm10982_vm3, %v883_v3, %v887_v51  ;;  %v903_v12 = vrot.slane %v902_v4, 4  ;;  %v921_v13 = vrot.slane %v919_v5, 5 }
  0x81   : > { %v8948_v16 = vcombine.low %v878_v10, %v888_v11  ;;  %v898_v17 = vsel %vm10982_vm3, %v893_v6, %v897_v55  ;;  %v923_v18 = vshrl.u32 %v225_v54, 16  ;;  %v9079_v19 = vcombine.low %v224_v49, %v225_v54  ;;  %v316_v55 = vld [vmem:[%s10969_s25 + $0x128] sm:$0x1] }
  0x82   : > { %v908_v20 = vsel %vm10982_vm3, %v903_v12, %v907_v7  ;;  %v929_v21 = vshll.u32 %v226_v63, 16  ;;  %v933_v22 = vshrl.u32 %v226_v63, 16  ;;  %v939_v23 = vshll.u32 %v227_v0, 16 }
  0x83   : > { %10298 = vmatprep.mubr.msk.bf16.mxu0 %vm1945_vm0, %v8948_v16  ;;  %v8949_v24 = vcombine.low %v898_v17, %v908_v20  ;;  %v925_v25 = vrot.slane %v923_v18, 4  ;;  %10432 = vmatprep.mubr.msk.bf16.mxu1 %vm1945_vm0, %v9079_v19  ;;  %v943_v26 = vshrl.u32 %v227_v0, 16  ;;  %v9080_v2 = vcombine.low %v226_v63, %v227_v0  ;;  %v235_v20 = vld [vmem:[%s10969_s25 + $0x138] sm:$0xf] }
  0x84   : > { %v931_v28 = vrot.slane %v929_v21, 5  ;;  %v935_v29 = vrot.slane %v933_v22, 4  ;;  %v941_v30 = vrot.slane %v939_v23, 5  ;;  %v916_v32 = vor.u32 %v915_v9, %v912_v8 }
  0x85   : > { %10299 = vmatmul.mubr.msk.bf16.gmra.mxu0 %vm1945_vm0, %v8949_v24  ;;  %v945_v33 = vrot.slane %v943_v26, 4  ;;  %10433 = vmatmul.mubr.msk.bf16.gmra.mxu1 %vm1945_vm0, %v9080_v2  ;;  %v926_v34 = vor.u32 %v925_v25, %v921_v13  ;;  %v949_v35 = vshll.u32 %v315_v14, 16  ;;  %v954_v36 = vshrl.u32 %v228_v15, 16 }
  0x86   : > { %v917_v38 = vrot.slane %v916_v32, 4  ;;  %v936_v39 = vor.u32 %v935_v29, %v931_v28  ;;  %v957_v40 = vshll.u32 %v228_v15, 16  ;;  %v963_v41 = vshll.u32 %v229_v27, 16  ;;  %v236_v29 = vld [vmem:[%s10969_s25 + $0x140] sm:$0xf] }
  0x87   : > { %v927_v43 = vrot.slane %v926_v34, 4  ;;  %v946_v44 = vor.u32 %v945_v33, %v941_v30  ;;  %v951_v45 = vrot.slane %v949_v35, 5  ;;  %v956_v46 = vrot.slane %v954_v36, 4 }
  0x88   : > { %v922_v47 = vsel %vm10982_vm3, %v917_v38, %v921_v13  ;;  %v937_v48 = vrot.slane %v936_v39, 4  ;;  %v959_v49 = vrot.slane %v957_v40, 5  ;;  %v965_v50 = vrot.slane %v963_v41, 5 }
  0x89   : > { %v932_v51 = vsel %vm10982_vm3, %v927_v43, %v931_v28  ;;  %v947_v52 = vrot.slane %v946_v44, 4  ;;  %v967_v53 = vshrl.u32 %v229_v27, 16  ;;  %v9081_v54 = vcombine.low %v228_v15, %v229_v27  ;;  %v234_v15 = vld [vmem:[%s10969_s25 + $0x134] sm:$0xf]  ;;  %v317_v28 = vld [vmem:[%s10969_s25 + $0x13c] sm:$0x1] }
  0x8a   : > { %v8950_v57 = vcombine.low %v922_v47, %v932_v51  ;;  %v942_v58 = vsel %vm10982_vm3, %v937_v48, %v941_v30  ;;  %v973_v59 = vshll.u32 %v230_v37, 16  ;;  %v977_v60 = vshrl.u32 %v230_v37, 16  ;;  %v237_v43 = vld [vmem:[%s10969_s25 + $0x144] sm:$0xf] }
  0x8b   : > { %v952_v62 = vsel %vm10982_vm3, %v947_v52, %v951_v45  ;;  %v969_v63 = vrot.slane %v967_v53, 4  ;;  %10436 = vmatprep.mubr.msk.bf16.mxu1 %vm1945_vm0, %v9081_v54  ;;  %v983_v0 = vshll.u32 %v231_v42, 16  ;;  %v987_v1 = vshrl.u32 %v231_v42, 16 }
  0x8c   : > { %10302 = vmatprep.mubr.msk.bf16.mxu0 %vm1945_vm0, %v8950_v57  ;;  %v8951_v3 = vcombine.low %v942_v58, %v952_v62  ;;  %v975_v4 = vrot.slane %v973_v59, 5  ;;  %v979_v5 = vrot.slane %v977_v60, 4  ;;  %v9082_v6 = vcombine.low %v230_v37, %v231_v42  ;;  %v238_v60 = vld [vmem:[%s10969_s25 + $0x148] sm:$0xf] }
  0x8d   : > { %v985_v7 = vrot.slane %v983_v0, 5  ;;  %v989_v8 = vrot.slane %v987_v1, 4  ;;  %v960_v9 = vor.u32 %v959_v49, %v956_v46  ;;  %v970_v10 = vor.u32 %v969_v63, %v965_v50  ;;  %v239_v1 = vld [vmem:[%s10969_s25 + $0x14c] sm:$0xf] }
  0x8e   : > { %10303 = vmatmul.mubr.msk.bf16.gmra.mxu0 %vm1945_vm0, %v8951_v3  ;;  %10437 = vmatmul.mubr.msk.bf16.gmra.mxu1 %vm1945_vm0, %v9082_v6  ;;  %v980_v11 = vor.u32 %v979_v5, %v975_v4  ;;  %v993_v12 = vshll.u32 %v316_v55, 16  ;;  %v998_v13 = vshrl.u32 %v232_v56, 16  ;;  %v1001_v14 = vshll.u32 %v232_v56, 16 }
  0x8f   : > { %v961_v16 = vrot.slane %v960_v9, 4  ;;  %v971_v17 = vrot.slane %v970_v10, 4  ;;  %v990_v18 = vor.u32 %v989_v8, %v985_v7  ;;  %v1007_v19 = vshll.u32 %v233_v61, 16  ;;  %v240_v8 = vld [vmem:[%s10969_s25 + $0x154] sm:$0xf] }
  0x90   : > { %v981_v21 = vrot.slane %v980_v11, 4  ;;  %v995_v22 = vrot.slane %v993_v12, 5  ;;  %v1000_v23 = vrot.slane %v998_v13, 4  ;;  %v1003_v24 = vrot.slane %v1001_v14, 5  ;;  %v241_v13 = vld [vmem:[%s10969_s25 + $0x158] sm:$0xf] }
  0x91   : > { %v966_v25 = vsel %vm10982_vm3, %v961_v16, %v965_v50  ;;  %v976_v26 = vsel %vm10982_vm3, %v971_v17, %v975_v4  ;;  %v991_v2 = vrot.slane %v990_v18, 4  ;;  %v1009_v27 = vrot.slane %v1007_v19, 5 }
  0x92   : > { %v8952_v30 = vcombine.low %v966_v25, %v976_v26  ;;  %v986_v32 = vsel %vm10982_vm3, %v981_v21, %v985_v7  ;;  %v1011_v33 = vshrl.u32 %v233_v61, 16  ;;  %v9083_v34 = vcombine.low %v232_v56, %v233_v61  ;;  %v318_v7 = vld [vmem:[%s10969_s25 + $0x150] sm:$0x1] }
  0x93   : > { %v996_v35 = vsel %vm10982_vm3, %v991_v2, %v995_v22  ;;  %v1017_v36 = vshll.u32 %v234_v15, 16  ;;  %v1021_v37 = vshrl.u32 %v234_v15, 16  ;;  %v1027_v38 = vshll.u32 %v235_v20, 16 }
  0x94   : > { %10306 = vmatprep.mubr.msk.bf16.mxu0 %vm1945_vm0, %v8952_v30  ;;  %v8953_v39 = vcombine.low %v986_v32, %v996_v35  ;;  %v1013_v40 = vrot.slane %v1011_v33, 4  ;;  %10440 = vmatprep.mubr.msk.bf16.mxu1 %vm1945_vm0, %v9083_v34  ;;  %v1031_v41 = vshrl.u32 %v235_v20, 16  ;;  %v9084_v42 = vcombine.low %v234_v15, %v235_v20 }
  0x95   : > { %v1019_v44 = vrot.slane %v1017_v36, 5  ;;  %v1023_v45 = vrot.slane %v1021_v37, 4  ;;  %v1029_v46 = vrot.slane %v1027_v38, 5  ;;  %v1004_v47 = vor.u32 %v1003_v24, %v1000_v23 }
  0x96   : > { %10307 = vmatmul.mubr.msk.bf16.gmra.mxu0 %vm1945_vm0, %v8953_v39  ;;  %v1033_v48 = vrot.slane %v1031_v41, 4  ;;  %10441 = vmatmul.mubr.msk.bf16.gmra.mxu1 %vm1945_vm0, %v9084_v42  ;;  %v1014_v49 = vor.u32 %v1013_v40, %v1009_v27  ;;  %v1037_v50 = vshll.u32 %v317_v28, 16  ;;  %v1042_v51 = vshrl.u32 %v236_v29, 16  ;;  %v243_v39 = vld [vmem:[%s10969_s25 + $0x160] sm:$0xf] }
  0x97   : > { %v1005_v52 = vrot.slane %v1004_v47, 4  ;;  %v1024_v53 = vor.u32 %v1023_v45, %v1019_v44  ;;  %v1045_v54 = vshll.u32 %v236_v29, 16  ;;  %v1051_v55 = vshll.u32 %v237_v43, 16  ;;  %v244_v45 = vld [vmem:[%s10969_s25 + $0x168] sm:$0xf] }
  0x98   : > { %v1015_v56 = vrot.slane %v1014_v49, 4  ;;  %v1034_v57 = vor.u32 %v1033_v48, %v1029_v46  ;;  %v1039_v58 = vrot.slane %v1037_v50, 5  ;;  %v1044_v59 = vrot.slane %v1042_v51, 4  ;;  %v245_v50 = vld [vmem:[%s10969_s25 + $0x16c] sm:$0xf] }
  0x99   : > { %v1010_v61 = vsel %vm10982_vm3, %v1005_v52, %v1009_v27  ;;  %v1025_v62 = vrot.slane %v1024_v53, 4  ;;  %v1047_v63 = vrot.slane %v1045_v54, 5  ;;  %v1053_v0 = vrot.slane %v1051_v55, 5 }
  0x9a   : > { %v1020_v3 = vsel %vm10982_vm3, %v1015_v56, %v1019_v44  ;;  %v1035_v4 = vrot.slane %v1034_v57, 4  ;;  %v1055_v5 = vshrl.u32 %v237_v43, 16  ;;  %v9085_v6 = vcombine.low %v236_v29, %v237_v43  ;;  %v242_v29 = vld [vmem:[%s10969_s25 + $0x15c] sm:$0xf]  ;;  %v319_v44 = vld [vmem:[%s10969_s25 + $0x164] sm:$0x1] }
  0x9b   : > { %v8954_v9 = vcombine.low %v1010_v61, %v1020_v3  ;;  %v1030_v10 = vsel %vm10982_vm3, %v1025_v62, %v1029_v46  ;;  %v1061_v11 = vshll.u32 %v238_v60, 16  ;;  %v1065_v12 = vshrl.u32 %v238_v60, 16 }
  0x9c   : > { %v1040_v14 = vsel %vm10982_vm3, %v1035_v4, %v1039_v58  ;;  %v1057_v15 = vrot.slane %v1055_v5, 4  ;;  %10444 = vmatprep.mubr.msk.bf16.mxu1 %vm1945_vm0, %v9085_v6  ;;  %v1071_v16 = vshll.u32 %v239_v1, 16  ;;  %v1075_v17 = vshrl.u32 %v239_v1, 16 }
  0x9d   : > { %10310 = vmatprep.mubr.msk.bf16.mxu0 %vm1945_vm0, %v8954_v9  ;;  %v8955_v18 = vcombine.low %v1030_v10, %v1040_v14  ;;  %v1063_v19 = vrot.slane %v1061_v11, 5  ;;  %v1067_v20 = vrot.slane %v1065_v12, 4  ;;  %v9086_v21 = vcombine.low %v238_v60, %v239_v1  ;;  %v246_v12 = vld [vmem:[%s10969_s25 + $0x170] sm:$0xf] }
  0x9e   : > { %v1073_v22 = vrot.slane %v1071_v16, 5  ;;  %v1077_v23 = vrot.slane %v1075_v17, 4  ;;  %v1048_v24 = vor.u32 %v1047_v63, %v1044_v59  ;;  %v1058_v25 = vor.u32 %v1057_v15, %v1053_v0  ;;  %v247_v17 = vld [vmem:[%s10969_s25 + $0x174] sm:$0xf] }
  0x9f   : > { %10311 = vmatmul.mubr.msk.bf16.gmra.mxu0 %vm1945_vm0, %v8955_v18  ;;  %10445 = vmatmul.mubr.msk.bf16.gmra.mxu1 %vm1945_vm0, %v9086_v21  ;;  %v1068_v26 = vor.u32 %v1067_v20, %v1063_v19  ;;  %v1081_v2 = vshll.u32 %v318_v7, 16  ;;  %v1086_v27 = vshrl.u32 %v240_v8, 16  ;;  %v1089_v28 = vshll.u32 %v240_v8, 16 }
  0xa0   : > { %v1049_v30 = vrot.slane %v1048_v24, 4  ;;  %v1059_v32 = vrot.slane %v1058_v25, 4  ;;  %v1078_v33 = vor.u32 %v1077_v23, %v1073_v22  ;;  %v1095_v34 = vshll.u32 %v241_v13, 16  ;;  %v248_v23 = vld [vmem:[%s10969_s25 + $0x17c] sm:$0xf] }
  0xa1   : > { %v1069_v35 = vrot.slane %v1068_v26, 4  ;;  %v1083_v36 = vrot.slane %v1081_v2, 5  ;;  %v1088_v37 = vrot.slane %v1086_v27, 4  ;;  %v1091_v38 = vrot.slane %v1089_v28, 5  ;;  %v249_v27 = vld [vmem:[%s10969_s25 + $0x180] sm:$0xf] }
  0xa2   : > { %v1054_v40 = vsel %vm10982_vm3, %v1049_v30, %v1053_v0  ;;  %v1064_v41 = vsel %vm10982_vm3, %v1059_v32, %v1063_v19  ;;  %v1079_v42 = vrot.slane %v1078_v33, 4  ;;  %v1097_v43 = vrot.slane %v1095_v34, 5 }
  0xa3   : > { %v8956_v46 = vcombine.low %v1054_v40, %v1064_v41  ;;  %v1074_v47 = vsel %vm10982_vm3, %v1069_v35, %v1073_v22  ;;  %v1099_v48 = vshrl.u32 %v241_v13, 16  ;;  %v9087_v49 = vcombine.low %v240_v8, %v241_v13  ;;  %v320_v22 = vld [vmem:[%s10969_s25 + $0x178] sm:$0x1] }
  0xa4   : > { %v1084_v51 = vsel %vm10982_vm3, %v1079_v42, %v1083_v36  ;;  %v1105_v52 = vshll.u32 %v242_v29, 16  ;;  %v1109_v53 = vshrl.u32 %v242_v29, 16  ;;  %v1115_v54 = vshll.u32 %v243_v39, 16 }
  0xa5   : > { %10314 = vmatprep.mubr.msk.bf16.mxu0 %vm1945_vm0, %v8956_v46  ;;  %v8957_v55 = vcombine.low %v1074_v47, %v1084_v51  ;;  %v1101_v56 = vrot.slane %v1099_v48, 4  ;;  %10448 = vmatprep.mubr.msk.bf16.mxu1 %vm1945_vm0, %v9087_v49  ;;  %v1119_v57 = vshrl.u32 %v243_v39, 16  ;;  %v9088_v58 = vcombine.low %v242_v29, %v243_v39 }
  0xa6   : > { %v1107_v59 = vrot.slane %v1105_v52, 5  ;;  %v1111_v60 = vrot.slane %v1109_v53, 4  ;;  %v1117_v61 = vrot.slane %v1115_v54, 5  ;;  %v1092_v62 = vor.u32 %v1091_v38, %v1088_v37  ;;  %v251_v54 = vld [vmem:[%s10969_s25 + $0x188] sm:$0xf] }
  0xa7   : > { %10315 = vmatmul.mubr.msk.bf16.gmra.mxu0 %vm1945_vm0, %v8957_v55  ;;  %v1121_v63 = vrot.slane %v1119_v57, 4  ;;  %10449 = vmatmul.mubr.msk.bf16.gmra.mxu1 %vm1945_vm0, %v9088_v58  ;;  %v1102_v0 = vor.u32 %v1101_v56, %v1097_v43  ;;  %v1125_v1 = vshll.u32 %v319_v44, 16  ;;  %v1130_v3 = vshrl.u32 %v244_v45, 16 }
  0xa8   : > { %v1093_v4 = vrot.slane %v1092_v62, 4  ;;  %v1112_v5 = vor.u32 %v1111_v60, %v1107_v59  ;;  %v1133_v6 = vshll.u32 %v244_v45, 16  ;;  %v1139_v7 = vshll.u32 %v245_v50, 16  ;;  %v252_v60 = vld [vmem:[%s10969_s25 + $0x190] sm:$0xf] }
  0xa9   : > { %v1103_v8 = vrot.slane %v1102_v0, 4  ;;  %v1122_v9 = vor.u32 %v1121_v63, %v1117_v61  ;;  %v1127_v10 = vrot.slane %v1125_v1, 5  ;;  %v1132_v11 = vrot.slane %v1130_v3, 4  ;;  %v253_v1 = vld [vmem:[%s10969_s25 + $0x194] sm:$0xf] }
  0xaa   : > { %v1098_v13 = vsel %vm10982_vm3, %v1093_v4, %v1097_v43  ;;  %v1113_v14 = vrot.slane %v1112_v5, 4  ;;  %v1135_v15 = vrot.slane %v1133_v6, 5  ;;  %v1141_v16 = vrot.slane %v1139_v7, 5 }
  0xab   : > { %v1108_v18 = vsel %vm10982_vm3, %v1103_v8, %v1107_v59  ;;  %v1123_v19 = vrot.slane %v1122_v9, 4  ;;  %v1143_v20 = vshrl.u32 %v245_v50, 16  ;;  %v9089_v21 = vcombine.low %v244_v45, %v245_v50  ;;  %v250_v45 = vld [vmem:[%s10969_s25 + $0x184] sm:$0xf]  ;;  %v321_v59 = vld [vmem:[%s10969_s25 + $0x18c] sm:$0x1] }
  0xac   : > { %v8958_v24 = vcombine.low %v1098_v13, %v1108_v18  ;;  %v1118_v25 = vsel %vm10982_vm3, %v1113_v14, %v1117_v61  ;;  %v1149_v26 = vshll.u32 %v246_v12, 16  ;;  %v1153_v2 = vshrl.u32 %v246_v12, 16 }
  0xad   : > { %v1128_v28 = vsel %vm10982_vm3, %v1123_v19, %v1127_v10  ;;  %v1145_v29 = vrot.slane %v1143_v20, 4  ;;  %10452 = vmatprep.mubr.msk.bf16.mxu1 %vm1945_vm0, %v9089_v21  ;;  %v1159_v30 = vshll.u32 %v247_v17, 16  ;;  %v1163_v32 = vshrl.u32 %v247_v17, 16  ;;  %v254_v19 = vld [vmem:[%s10969_s25 + $0x198] sm:$0xf] }
  0xae   : > { %10318 = vmatprep.mubr.msk.bf16.mxu0 %vm1945_vm0, %v8958_v24  ;;  %v8959_v33 = vcombine.low %v1118_v25, %v1128_v28  ;;  %v1151_v34 = vrot.slane %v1149_v26, 5  ;;  %v1155_v35 = vrot.slane %v1153_v2, 4  ;;  %v9090_v36 = vcombine.low %v246_v12, %v247_v17  ;;  %v255_v24 = vld [vmem:[%s10969_s25 + $0x19c] sm:$0xf] }
  0xaf   : > { %v1161_v37 = vrot.slane %v1159_v30, 5  ;;  %v1165_v38 = vrot.slane %v1163_v32, 4  ;;  %v1136_v39 = vor.u32 %v1135_v15, %v1132_v11  ;;  %v1146_v40 = vor.u32 %v1145_v29, %v1141_v16 }
  0xb0   : > { %10319 = vmatmul.mubr.msk.bf16.gmra.mxu0 %vm1945_vm0, %v8959_v33  ;;  %10453 = vmatmul.mubr.msk.bf16.gmra.mxu1 %vm1945_vm0, %v9090_v36  ;;  %v1156_v41 = vor.u32 %v1155_v35, %v1151_v34  ;;  %v1169_v42 = vshll.u32 %v320_v22, 16  ;;  %v1174_v43 = vshrl.u32 %v248_v23, 16  ;;  %v1177_v44 = vshll.u32 %v248_v23, 16 }
  0xb1   : > { %v1137_v46 = vrot.slane %v1136_v39, 4  ;;  %v1147_v47 = vrot.slane %v1146_v40, 4  ;;  %v1166_v48 = vor.u32 %v1165_v38, %v1161_v37  ;;  %v1183_v49 = vshll.u32 %v249_v27, 16 }
  0xb2   : > { %v1157_v50 = vrot.slane %v1156_v41, 4  ;;  %v1171_v51 = vrot.slane %v1169_v42, 5  ;;  %v1176_v52 = vrot.slane %v1174_v43, 4  ;;  %v1179_v53 = vrot.slane %v1177_v44, 5  ;;  %v256_v42 = vld [vmem:[%s10969_s25 + $0x1a4] sm:$0xf] }
  0xb3   : > { %v1142_v55 = vsel %vm10982_vm3, %v1137_v46, %v1141_v16  ;;  %v1152_v56 = vsel %vm10982_vm3, %v1147_v47, %v1151_v34  ;;  %v1167_v57 = vrot.slane %v1166_v48, 4  ;;  %v1185_v58 = vrot.slane %v1183_v49, 5  ;;  %v257_v43 = vld [vmem:[%s10969_s25 + $0x1a8] sm:$0xf] }
  0xb4   : > { %v8960_v61 = vcombine.low %v1142_v55, %v1152_v56  ;;  %v1162_v62 = vsel %vm10982_vm3, %v1157_v50, %v1161_v37  ;;  %v1187_v63 = vshrl.u32 %v249_v27, 16  ;;  %v9091_v0 = vcombine.low %v248_v23, %v249_v27  ;;  %v322_v37 = vld [vmem:[%s10969_s25 + $0x1a0] sm:$0x1] }
  0xb5   : > { %v1172_v3 = vsel %vm10982_vm3, %v1167_v57, %v1171_v51  ;;  %v1193_v4 = vshll.u32 %v250_v45, 16  ;;  %v1197_v5 = vshrl.u32 %v250_v45, 16  ;;  %v1203_v6 = vshll.u32 %v251_v54, 16 }
  0xb6   : > { %10322 = vmatprep.mubr.msk.bf16.mxu0 %vm1945_vm0, %v8960_v61  ;;  %v8961_v7 = vcombine.low %v1162_v62, %v1172_v3  ;;  %v1189_v8 = vrot.slane %v1187_v63, 4  ;;  %10456 = vmatprep.mubr.msk.bf16.mxu1 %vm1945_vm0, %v9091_v0  ;;  %v1207_v9 = vshrl.u32 %v251_v54, 16  ;;  %v9092_v10 = vcombine.low %v250_v45, %v251_v54 }
  0xb7   : > { %v1195_v11 = vrot.slane %v1193_v4, 5  ;;  %v1199_v12 = vrot.slane %v1197_v5, 4  ;;  %v1205_v13 = vrot.slane %v1203_v6, 5  ;;  %v1180_v14 = vor.u32 %v1179_v53, %v1176_v52 }
  0xb8   : > { %10323 = vmatmul.mubr.msk.bf16.gmra.mxu0 %vm1945_vm0, %v8961_v7  ;;  %v1209_v15 = vrot.slane %v1207_v9, 4  ;;  %10457 = vmatmul.mubr.msk.bf16.gmra.mxu1 %vm1945_vm0, %v9092_v10  ;;  %v1190_v16 = vor.u32 %v1189_v8, %v1185_v58  ;;  %v1213_v17 = vshll.u32 %v321_v59, 16  ;;  %v1218_v18 = vshrl.u32 %v252_v60, 16 }
  0xb9   : > { %v1181_v20 = vrot.slane %v1180_v14, 4  ;;  %v1200_v21 = vor.u32 %v1199_v12, %v1195_v11  ;;  %v1221_v22 = vshll.u32 %v252_v60, 16  ;;  %v1227_v23 = vshll.u32 %v253_v1, 16 }
  0xba   : > { %v1191_v25 = vrot.slane %v1190_v16, 4  ;;  %v1210_v26 = vor.u32 %v1209_v15, %v1205_v13  ;;  %v1215_v2 = vrot.slane %v1213_v17, 5  ;;  %v1220_v27 = vrot.slane %v1218_v18, 4  ;;  %v260_v16 = vld [vmem:[%s10969_s25 + $0x1b8] sm:$0xf] }
  0xbb   : > { %v1186_v28 = vsel %vm10982_vm3, %v1181_v20, %v1185_v58  ;;  %v1201_v29 = vrot.slane %v1200_v21, 4  ;;  %v1223_v30 = vrot.slane %v1221_v22, 5  ;;  %v1229_v32 = vrot.slane %v1227_v23, 5  ;;  %v261_v17 = vld [vmem:[%s10969_s25 + $0x1bc] sm:$0xf] }
  0xbc   : > { %v1196_v33 = vsel %vm10982_vm3, %v1191_v25, %v1195_v11  ;;  %v1211_v34 = vrot.slane %v1210_v26, 4  ;;  %v1231_v35 = vshrl.u32 %v253_v1, 16  ;;  %v9093_v36 = vcombine.low %v252_v60, %v253_v1  ;;  %v258_v60 = vld [vmem:[%s10969_s25 + $0x1ac] sm:$0xf]  ;;  %v259_v1 = vld [vmem:[%s10969_s25 + $0x1b0] sm:$0xf] }
  0xbd   : > { %v8962_v38 = vcombine.low %v1186_v28, %v1196_v33  ;;  %v1206_v39 = vsel %vm10982_vm3, %v1201_v29, %v1205_v13  ;;  %v1237_v40 = vshll.u32 %v254_v19, 16  ;;  %v1241_v41 = vshrl.u32 %v254_v19, 16  ;;  %v323_v11 = vld [vmem:[%s10969_s25 + $0x1b4] sm:$0x1] }
  0xbe   : > { %v1216_v44 = vsel %vm10982_vm3, %v1211_v34, %v1215_v2  ;;  %v1233_v45 = vrot.slane %v1231_v35, 4  ;;  %10460 = vmatprep.mubr.msk.bf16.mxu1 %vm1945_vm0, %v9093_v36  ;;  %v1247_v46 = vshll.u32 %v255_v24, 16  ;;  %v1251_v47 = vshrl.u32 %v255_v24, 16  ;;  %v262_v34 = vld [vmem:[%s10969_s25 + $0x1c0] sm:$0xf] }
  0xbf   : > { %10326 = vmatprep.mubr.msk.bf16.mxu0 %vm1945_vm0, %v8962_v38  ;;  %v8963_v48 = vcombine.low %v1206_v39, %v1216_v44  ;;  %v1239_v49 = vrot.slane %v1237_v40, 5  ;;  %v1243_v50 = vrot.slane %v1241_v41, 4  ;;  %v9094_v51 = vcombine.low %v254_v19, %v255_v24  ;;  %v263_v39 = vld [vmem:[%s10969_s25 + $0x1c4] sm:$0xf] }
  0xc0   : > { %v1249_v52 = vrot.slane %v1247_v46, 5  ;;  %v1253_v53 = vrot.slane %v1251_v47, 4  ;;  %v1224_v54 = vor.u32 %v1223_v30, %v1220_v27  ;;  %v1234_v55 = vor.u32 %v1233_v45, %v1229_v32 }
  0xc1   : > { %10327 = vmatmul.mubr.msk.bf16.gmra.mxu0 %vm1945_vm0, %v8963_v48  ;;  %10461 = vmatmul.mubr.msk.bf16.gmra.mxu1 %vm1945_vm0, %v9094_v51  ;;  %v1244_v56 = vor.u32 %v1243_v50, %v1239_v49  ;;  %v1257_v57 = vshll.u32 %v322_v37, 16  ;;  %v1262_v58 = vshrl.u32 %v256_v42, 16  ;;  %v1265_v59 = vshll.u32 %v256_v42, 16 }
  0xc2   : > { %v1225_v61 = vrot.slane %v1224_v54, 4  ;;  %v1235_v62 = vrot.slane %v1234_v55, 4  ;;  %v1254_v63 = vor.u32 %v1253_v53, %v1249_v52  ;;  %v1271_v0 = vshll.u32 %v257_v43, 16 }
  0xc3   : > { %v1245_v3 = vrot.slane %v1244_v56, 4  ;;  %v1259_v4 = vrot.slane %v1257_v57, 5  ;;  %v1264_v5 = vrot.slane %v1262_v58, 4  ;;  %v1267_v6 = vrot.slane %v1265_v59, 5  ;;  %v324_v56 = vld [vmem:[%s10969_s25 + $0x1c8] sm:$0x1] }
  0xc4   : > { %v1230_v7 = vsel %vm10982_vm3, %v1225_v61, %v1229_v32  ;;  %v1240_v8 = vsel %vm10982_vm3, %v1235_v62, %v1239_v49  ;;  %v1255_v9 = vrot.slane %v1254_v63, 4  ;;  %v1273_v10 = vrot.slane %v1271_v0, 5  ;;  %v264_v61 = vld [vmem:[%s10969_s25 + $0x1cc] sm:$0xf] }
  0xc5   : > { %v8964_v12 = vcombine.low %v1230_v7, %v1240_v8  ;;  %v1250_v13 = vsel %vm10982_vm3, %v1245_v3, %v1249_v52  ;;  %v1275_v14 = vshrl.u32 %v257_v43, 16  ;;  %v9095_v15 = vcombine.low %v256_v42, %v257_v43  ;;  %v265_v3 = vld [vmem:[%s10969_s25 + $0x1d0] sm:$0xf] }
  0xc6   : > { %v1260_v18 = vsel %vm10982_vm3, %v1255_v9, %v1259_v4  ;;  %v1281_v19 = vshll.u32 %v258_v60, 16  ;;  %v1285_v20 = vshrl.u32 %v258_v60, 16  ;;  %v1291_v21 = vshll.u32 %v259_v1, 16 }
  0xc7   : > { %10330 = vmatprep.mubr.msk.bf16.mxu0 %vm1945_vm0, %v8964_v12  ;;  %v8965_v22 = vcombine.low %v1250_v13, %v1260_v18  ;;  %v1277_v23 = vrot.slane %v1275_v14, 4  ;;  %10464 = vmatprep.mubr.msk.bf16.mxu1 %vm1945_vm0, %v9095_v15  ;;  %v1295_v24 = vshrl.u32 %v259_v1, 16  ;;  %v9096_v25 = vcombine.low %v258_v60, %v259_v1 }
  0xc8   : > { %v1283_v26 = vrot.slane %v1281_v19, 5  ;;  %v1287_v2 = vrot.slane %v1285_v20, 4  ;;  %v1293_v27 = vrot.slane %v1291_v21, 5  ;;  %v1268_v28 = vor.u32 %v1267_v6, %v1264_v5  ;;  %v267_v21 = vld [vmem:[%s10969_s25 + $0x1d8] sm:$0xf] }
  0xc9   : > { %10331 = vmatmul.mubr.msk.bf16.gmra.mxu0 %vm1945_vm0, %v8965_v22  ;;  %v1297_v29 = vrot.slane %v1295_v24, 4  ;;  %10465 = vmatmul.mubr.msk.bf16.gmra.mxu1 %vm1945_vm0, %v9096_v25  ;;  %v1278_v30 = vor.u32 %v1277_v23, %v1273_v10  ;;  %v1301_v32 = vshll.u32 %v323_v11, 16  ;;  %v1306_v33 = vshrl.u32 %v260_v16, 16 }
  0xca   : > { %v1269_v35 = vrot.slane %v1268_v28, 4  ;;  %v1288_v36 = vor.u32 %v1287_v2, %v1283_v26  ;;  %v1309_v37 = vshll.u32 %v260_v16, 16  ;;  %v1315_v38 = vshll.u32 %v261_v17, 16 }
  0xcb   : > { %v1279_v40 = vrot.slane %v1278_v30, 4  ;;  %v1298_v41 = vor.u32 %v1297_v29, %v1293_v27  ;;  %v1303_v42 = vrot.slane %v1301_v32, 5  ;;  %v1308_v43 = vrot.slane %v1306_v33, 4  ;;  %v325_v29 = vld [vmem:[%s10969_s25 + $0x1dc] sm:$0x1] }
  0xcc   : > { %v1274_v44 = vsel %vm10982_vm3, %v1269_v35, %v1273_v10  ;;  %v1289_v45 = vrot.slane %v1288_v36, 4  ;;  %v1311_v46 = vrot.slane %v1309_v37, 5  ;;  %v1317_v47 = vrot.slane %v1315_v38, 5  ;;  %v268_v36 = vld [vmem:[%s10969_s25 + $0x1e0] sm:$0xf] }
  0xcd   : > { %v1284_v48 = vsel %vm10982_vm3, %v1279_v40, %v1283_v26  ;;  %v1299_v49 = vrot.slane %v1298_v41, 4  ;;  %v1319_v50 = vshrl.u32 %v261_v17, 16  ;;  %v9097_v51 = vcombine.low %v260_v16, %v261_v17  ;;  %v266_v16 = vld [vmem:[%s10969_s25 + $0x1d4] sm:$0xf]  ;;  %v269_v41 = vld [vmem:[%s10969_s25 + $0x1e4] sm:$0xf] }
  0xce   : > { %v8966_v52 = vcombine.low %v1274_v44, %v1284_v48  ;;  %v1294_v53 = vsel %vm10982_vm3, %v1289_v45, %v1293_v27  ;;  %v1325_v54 = vshll.u32 %v262_v34, 16  ;;  %v1329_v55 = vshrl.u32 %v262_v34, 16 }
  0xcf   : > { %v1304_v57 = vsel %vm10982_vm3, %v1299_v49, %v1303_v42  ;;  %v1321_v58 = vrot.slane %v1319_v50, 4  ;;  %10468 = vmatprep.mubr.msk.bf16.mxu1 %vm1945_vm0, %v9097_v51  ;;  %v1335_v59 = vshll.u32 %v263_v39, 16  ;;  %v1339_v60 = vshrl.u32 %v263_v39, 16 }
  0xd0   : > { %10334 = vmatprep.mubr.msk.bf16.mxu0 %vm1945_vm0, %v8966_v52  ;;  %v8967_v62 = vcombine.low %v1294_v53, %v1304_v57  ;;  %v1327_v63 = vrot.slane %v1325_v54, 5  ;;  %v1331_v0 = vrot.slane %v1329_v55, 4  ;;  %v9098_v1 = vcombine.low %v262_v34, %v263_v39 }
  0xd1   : > { %v1337_v4 = vrot.slane %v1335_v59, 5  ;;  %v1341_v5 = vrot.slane %v1339_v60, 4  ;;  %v1312_v6 = vor.u32 %v1311_v46, %v1308_v43  ;;  %v1322_v7 = vor.u32 %v1321_v58, %v1317_v47 }
  0xd2   : > { %10335 = vmatmul.mubr.msk.bf16.gmra.mxu0 %vm1945_vm0, %v8967_v62  ;;  %10469 = vmatmul.mubr.msk.bf16.gmra.mxu1 %vm1945_vm0, %v9098_v1  ;;  %v1332_v8 = vor.u32 %v1331_v0, %v1327_v63  ;;  %v1345_v9 = vshll.u32 %v324_v56, 16  ;;  %v1350_v10 = vshrl.u32 %v264_v61, 16  ;;  %v1353_v11 = vshll.u32 %v264_v61, 16  ;;  %v270_v56 = vld [vmem:[%s10969_s25 + $0x1e8] sm:$0xf] }
  0xd3   : > { %v1313_v12 = vrot.slane %v1312_v6, 4  ;;  %v1323_v13 = vrot.slane %v1322_v7, 4  ;;  %v1342_v14 = vor.u32 %v1341_v5, %v1337_v4  ;;  %v1359_v15 = vshll.u32 %v265_v3, 16 }
  0xd4   : > { %v1333_v17 = vrot.slane %v1332_v8, 4  ;;  %v1347_v18 = vrot.slane %v1345_v9, 5  ;;  %v1352_v19 = vrot.slane %v1350_v10, 4  ;;  %v1355_v20 = vrot.slane %v1353_v11, 5 }
  0xd5   : > { %v1318_v22 = vsel %vm10982_vm3, %v1313_v12, %v1317_v47  ;;  %v1328_v23 = vsel %vm10982_vm3, %v1323_v13, %v1327_v63  ;;  %v1343_v24 = vrot.slane %v1342_v14, 4  ;;  %v1361_v25 = vrot.slane %v1359_v15, 5 }
  0xd6   : > { %v8968_v26 = vcombine.low %v1318_v22, %v1328_v23  ;;  %v1338_v2 = vsel %vm10982_vm3, %v1333_v17, %v1337_v4  ;;  %v1363_v27 = vshrl.u32 %v265_v3, 16  ;;  %v9099_v28 = vcombine.low %v264_v61, %v265_v3  ;;  %v11370_v30 = vpop.f32.mrf.mxu1  ;;  %v271_v61 = vld [vmem:[%s10969_s25 + $0x1ec] sm:$0xf]  ;;  %v272_v23 = vld [vmem:[%s10969_s25 + $0x1f4] sm:$0xf] }
  0xd7   : > { %v1348_v32 = vsel %vm10982_vm3, %v1343_v24, %v1347_v18  ;;  %v1369_v33 = vshll.u32 %v266_v16, 16  ;;  %v1373_v34 = vshrl.u32 %v266_v16, 16  ;;  %v1379_v35 = vshll.u32 %v267_v21, 16  ;;  %v326_v18 = vld [vmem:[%s10969_s25 + $0x1f0] sm:$0x1] }
  0xd8   : > { %10338 = vmatprep.mubr.msk.bf16.mxu0 %vm1945_vm0, %v8968_v26  ;;  %v8969_v37 = vcombine.low %v1338_v2, %v1348_v32  ;;  %v1365_v38 = vrot.slane %v1363_v27, 4  ;;  %10472 = vmatprep.mubr.msk.bf16.mxu1 %vm1945_vm0, %v9099_v28  ;;  %v1383_v39 = vshrl.u32 %v267_v21, 16  ;;  %v9100_v40 = vcombine.low %v266_v16, %v267_v21  ;;  %v3235_v42 = vpop.f32.mrf.mxu1 }
  0xd9   : > { %v1371_v43 = vrot.slane %v1369_v33, 5  ;;  %v1375_v44 = vrot.slane %v1373_v34, 4  ;;  %v1381_v45 = vrot.slane %v1379_v35, 5  ;;  %v1356_v46 = vor.u32 %v1355_v20, %v1352_v19 }
  0xda   : > { %10339 = vmatmul.mubr.msk.bf16.gmra.mxu0 %vm1945_vm0, %v8969_v37  ;;  %v1385_v47 = vrot.slane %v1383_v39, 4  ;;  %10473 = vmatmul.mubr.msk.bf16.gmra.mxu1 %vm1945_vm0, %v9100_v40  ;;  %v1366_v48 = vor.u32 %v1365_v38, %v1361_v25  ;;  %v1389_v49 = vshll.u32 %v325_v29, 16  ;;  %v1394_v50 = vshrl.u32 %v268_v36, 16  ;;  %v11380_v51 = vpop.f32.mrf.mxu1  ;;  %v273_v29 = vld [vmem:[%s10969_s25 + $0x1f8] sm:$0xf] }
  0xdb   : > { %v1357_v52 = vrot.slane %v1356_v46, 4  ;;  %v1376_v53 = vor.u32 %v1375_v44, %v1371_v43  ;;  %v1397_v54 = vshll.u32 %v268_v36, 16  ;;  %v1403_v55 = vshll.u32 %v269_v41, 16 }
  0xdc   : > { %v1367_v57 = vrot.slane %v1366_v48, 4  ;;  %v1386_v58 = vor.u32 %v1385_v47, %v1381_v45  ;;  %v1391_v59 = vrot.slane %v1389_v49, 5  ;;  %v1396_v60 = vrot.slane %v1394_v50, 4  ;;  %v11384_v62 = vpop.f32.mrf.mxu1  ;;  %v274_v47 = vld [vmem:[%s10969_s25 + $0x1fc] sm:$0xf] }
  0xdd   : > { %v1362_v63 = vsel %vm10982_vm3, %v1357_v52, %v1361_v25  ;;  %v1377_v0 = vrot.slane %v1376_v53, 4  ;;  %v1399_v1 = vrot.slane %v1397_v54, 5  ;;  %v1405_v3 = vrot.slane %v1403_v55, 5  ;;  %v275_v52 = vld [vmem:[%s10969_s25 + $0x200] sm:$0xf] }
  0xde   : > { %v1372_v4 = vsel %vm10982_vm3, %v1367_v57, %v1371_v43  ;;  %v1387_v5 = vrot.slane %v1386_v58, 4  ;;  %v1407_v6 = vshrl.u32 %v269_v41, 16  ;;  %v9101_v7 = vcombine.low %v268_v36, %v269_v41 }
  0xdf   : > { %v8970_v8 = vcombine.low %v1362_v63, %v1372_v4  ;;  %v1382_v9 = vsel %vm10982_vm3, %v1377_v0, %v1381_v45  ;;  %v1413_v10 = vshll.u32 %v270_v56, 16  ;;  %v1417_v11 = vshrl.u32 %v270_v56, 16  ;;  %v11392_v12 = vpop.f32.mrf.mxu1  ;;  %v327_v0 = vld [vmem:[%s10969_s25 + $0x204] sm:$0x1] }
  0xe0   : > { %v1392_v13 = vsel %vm10982_vm3, %v1387_v5, %v1391_v59  ;;  %v1409_v14 = vrot.slane %v1407_v6, 4  ;;  %10476 = vmatprep.mubr.msk.bf16.mxu1 %vm1945_vm0, %v9101_v7  ;;  %v1423_v15 = vshll.u32 %v271_v61, 16  ;;  %v1427_v16 = vshrl.u32 %v271_v61, 16  ;;  %v10252_v17 = vpop.f32.mrf.mxu0  ;;  %v276_v7 = vld [vmem:[%s10969_s25 + $0x208] sm:$0xf] }
  0xe1   : > { %10342 = vmatprep.mubr.msk.bf16.mxu0 %vm1945_vm0, %v8970_v8  ;;  %v8971_v19 = vcombine.low %v1382_v9, %v1392_v13  ;;  %v1415_v20 = vrot.slane %v1413_v10, 5  ;;  %v1419_v21 = vrot.slane %v1417_v11, 4  ;;  %v9102_v22 = vcombine.low %v270_v56, %v271_v61  ;;  %v11400_v24 = vpop.f32.mrf.mxu1  ;;  %v277_v13 = vld [vmem:[%s10969_s25 + $0x20c] sm:$0xf] }
  0xe2   : > { %v1425_v25 = vrot.slane %v1423_v15, 5  ;;  %v1429_v26 = vrot.slane %v1427_v16, 4  ;;  %v1400_v2 = vor.u32 %v1399_v1, %v1396_v60  ;;  %v1410_v27 = vor.u32 %v1409_v14, %v1405_v3  ;;  %v2172_v28 = vpop.f32.mrf.mxu0 }
  0xe3   : > { %10343 = vmatmul.mubr.msk.bf16.gmra.mxu0 %vm1945_vm0, %v8971_v19  ;;  %10477 = vmatmul.mubr.msk.bf16.gmra.mxu1 %vm1945_vm0, %v9102_v22  ;;  %v11406_v32 = vadd.f32 %v11370_v30, %v10252_v17  ;;  %v1420_v33 = vor.u32 %v1419_v21, %v1415_v20  ;;  %v1433_v34 = vshll.u32 %v326_v18, 16  ;;  %v11408_v35 = vadd.f32 %v3235_v42, %v2172_v28  ;;  %v11410_v36 = vpop.f32.mrf.mxu1  ;;  %v278_v28 = vld [vmem:[%s10969_s25 + $0x210] sm:$0xf] }
  0xe4   : > { %v1401_v37 = vrot.slane %v1400_v2, 4  ;;  %v1411_v38 = vrot.slane %v1410_v27, 4  ;;  %v1430_v39 = vor.u32 %v1429_v26, %v1425_v25  ;;  %v1438_v40 = vshrl.u32 %v272_v23, 16  ;;  %v10253_v41 = vpop.f32.mrf.mxu0 }
  0xe5   : > { %v1421_v43 = vrot.slane %v1420_v33, 4  ;;  %v1435_v44 = vrot.slane %v1433_v34, 5  ;;  %v1441_v45 = vshll.u32 %v272_v23, 16  ;;  %v1447_v46 = vshll.u32 %v273_v29, 16  ;;  %v11413_v48 = vpop.f32.mrf.mxu1 }
  0xe6   : > { %v1406_v30 = vsel %vm10982_vm3, %v1401_v37, %v1405_v3  ;;  %v1416_v42 = vsel %vm10982_vm3, %v1411_v38, %v1415_v20  ;;  %v1431_v49 = vrot.slane %v1430_v39, 4  ;;  %v1440_v50 = vrot.slane %v1438_v40, 4  ;;  %v2175_v53 = vpop.f32.mrf.mxu0  ;;  %v279_v38 = vld [vmem:[%s10969_s25 + $0x214] sm:$0xf] }
  0xe7   : > { %v8972_v54 = vcombine.low %v1406_v30, %v1416_v42  ;;  %v1426_v55 = vsel %vm10982_vm3, %v1421_v43, %v1425_v25  ;;  %v1443_v56 = vrot.slane %v1441_v45, 5  ;;  %v1449_v57 = vrot.slane %v1447_v46, 5 }
  0xe8   : > { %v1436_v58 = vsel %vm10982_vm3, %v1431_v49, %v1435_v44  ;;  %v1451_v59 = vshrl.u32 %v273_v29, 16  ;;  %v9103_v60 = vcombine.low %v272_v23, %v273_v29  ;;  %v11425_v61 = vadd.f32 %v11380_v51, %v10253_v41  ;;  %v10256_v63 = vpop.f32.mrf.mxu0  ;;  %v11428_v1 = vpop.f32.mrf.mxu1 }
  0xe9   : > { %10346 = vmatprep.mubr.msk.bf16.mxu0 %vm1945_vm0, %v8972_v54  ;;  %v8973_v3 = vcombine.low %v1426_v55, %v1436_v58  ;;  %v1457_v4 = vshll.u32 %v274_v47, 16  ;;  %v1461_v5 = vshrl.u32 %v274_v47, 16  ;;  %v1467_v6 = vshll.u32 %v275_v52, 16  ;;  %v328_v58 = vld [vmem:[%s10969_s25 + $0x218] sm:$0x1] }
  0xea   : > { %v1453_v8 = vrot.slane %v1451_v59, 4  ;;  %10480 = vmatprep.mubr.msk.bf16.mxu1 %vm1945_vm0, %v9103_v60  ;;  %v1471_v9 = vshrl.u32 %v275_v52, 16  ;;  %v9104_v10 = vcombine.low %v274_v47, %v275_v52  ;;  %v11434_v51 = vadd.f32 %v11384_v62, %v2175_v53  ;;  %v2188_v11 = vpop.f32.mrf.mxu0  ;;  %v11437_v14 = vpop.f32.mrf.mxu1 }
  0xeb   : > { %10347 = vmatmul.mubr.msk.bf16.gmra.mxu0 %vm1945_vm0, %v8973_v3  ;;  %v1459_v15 = vrot.slane %v1457_v4, 5  ;;  %v1463_v16 = vrot.slane %v1461_v5, 4  ;;  %v1469_v17 = vrot.slane %v1467_v6, 5  ;;  %v1444_v18 = vor.u32 %v1443_v56, %v1440_v50  ;;  %v280_v5 = vld [vmem:[%s10969_s25 + $0x21c] sm:$0xf] }
  0xec   : > { %v1473_v19 = vrot.slane %v1471_v9, 4  ;;  %10481 = vmatmul.mubr.msk.bf16.gmra.mxu1 %vm1945_vm0, %v9104_v10  ;;  %v1454_v20 = vor.u32 %v1453_v8, %v1449_v57  ;;  %v11442_v21 = vadd.f32 %v11392_v12, %v10256_v63  ;;  %v1477_v62 = vshll.u32 %v327_v0, 16  ;;  %v10257_v22 = vpop.f32.mrf.mxu0  ;;  %v11444_v23 = vpop.f32.mrf.mxu1  ;;  %v281_v9 = vld [vmem:[%s10969_s25 + $0x220] sm:$0xf] }
  0xed   : > { %v1445_v25 = vrot.slane %v1444_v18, 4  ;;  %v1464_v26 = vor.u32 %v1463_v16, %v1459_v15  ;;  %v11447_v2 = vadd.f32 %v11400_v24, %v2188_v11  ;;  %v1482_v27 = vshrl.u32 %v276_v7, 16 }
  0xee   : > { %v1455_v29 = vrot.slane %v1454_v20, 4  ;;  %v1474_v33 = vor.u32 %v1473_v19, %v1469_v17  ;;  %v1479_v34 = vrot.slane %v1477_v62, 5  ;;  %v1485_v37 = vshll.u32 %v276_v7, 16  ;;  %v2191_v39 = vpop.f32.mrf.mxu0  ;;  %v11451_v40 = vpop.f32.mrf.mxu1 }
  0xef   : > { %v1450_v12 = vsel %vm10982_vm3, %v1445_v25, %v1449_v57  ;;  %v1465_v41 = vrot.slane %v1464_v26, 4  ;;  %v1484_v43 = vrot.slane %v1482_v27, 4  ;;  %v1491_v44 = vshll.u32 %v277_v13, 16 }
  0xf0   : > { %v1460_v24 = vsel %vm10982_vm3, %v1455_v29, %v1459_v15  ;;  %v1475_v45 = vrot.slane %v1474_v33, 4  ;;  %v1487_v46 = vrot.slane %v1485_v37, 5  ;;  %v1495_v47 = vshrl.u32 %v277_v13, 16  ;;  %v10260_v30 = vpop.f32.mrf.mxu0  ;;  %v11457_v42 = vpop.f32.mrf.mxu1  ;;  %v282_v29 = vld [vmem:[%s10969_s25 + $0x224] sm:$0xf] }
  0xf1   : > { %v8974_v49 = vcombine.low %v1450_v12, %v1460_v24  ;;  %v1470_v50 = vsel %vm10982_vm3, %v1465_v41, %v1469_v17  ;;  %v1493_v52 = vrot.slane %v1491_v44, 5  ;;  %v9105_v53 = vcombine.low %v276_v7, %v277_v13 }
  0xf2   : > { %v1480_v54 = vsel %vm10982_vm3, %v1475_v45, %v1479_v34  ;;  %v1497_v55 = vrot.slane %v1495_v47, 4  ;;  %v11464_v56 = vadd.f32 %v11410_v36, %v10257_v22  ;;  %v1501_v57 = vshll.u32 %v278_v28, 16  ;;  %v2204_v59 = vpop.f32.mrf.mxu0  ;;  %v11467_v60 = vpop.f32.mrf.mxu1  ;;  %v283_v47 = vld [vmem:[%s10969_s25 + $0x228] sm:$0xf] }
  0xf3   : > { %10350 = vmatprep.mubr.msk.bf16.mxu0 %vm1945_vm0, %v8974_v49  ;;  %v8975_v63 = vcombine.low %v1470_v50, %v1480_v54  ;;  %10484 = vmatprep.mubr.msk.bf16.mxu1 %vm1945_vm0, %v9105_v53  ;;  %v1505_v0 = vshrl.u32 %v278_v28, 16  ;;  %v1511_v3 = vshll.u32 %v279_v38, 16  ;;  %v1515_v4 = vshrl.u32 %v279_v38, 16  ;;  %v329_v53 = vld [vmem:[%s10969_s25 + $0x22c] sm:$0x1] }
  0xf4   : > { %v1503_v6 = vrot.slane %v1501_v57, 5  ;;  %v9106_v7 = vcombine.low %v278_v28, %v279_v38  ;;  %v11473_v36 = vadd.f32 %v11413_v48, %v2191_v39  ;;  %v1488_v8 = vor.u32 %v1487_v46, %v1484_v43  ;;  %v10261_v10 = vpop.f32.mrf.mxu0  ;;  %v11476_v11 = vpop.f32.mrf.mxu1 }
  0xf5   : > { %10351 = vmatmul.mubr.msk.bf16.gmra.mxu0 %vm1945_vm0, %v8975_v63  ;;  %v1507_v13 = vrot.slane %v1505_v0, 4  ;;  %v1513_v15 = vrot.slane %v1511_v3, 5  ;;  %v1517_v16 = vrot.slane %v1515_v4, 4  ;;  %v1498_v17 = vor.u32 %v1497_v55, %v1493_v52  ;;  %v284_v0 = vld [vmem:[%s10969_s25 + $0x230] sm:$0xf] }
  0xf6   : > { %10485 = vmatmul.mubr.msk.bf16.gmra.mxu1 %vm1945_vm0, %v9106_v7  ;;  %v1489_v18 = vrot.slane %v1488_v8, 4  ;;  %v11481_v19 = vadd.f32 %v11428_v1, %v10260_v30  ;;  %v1521_v48 = vshll.u32 %v328_v58, 16  ;;  %v11484_v20 = vadd.f32 %v11437_v14, %v2204_v59  ;;  %v2207_v62 = vpop.f32.mrf.mxu0  ;;  %v11486_v22 = vpop.f32.mrf.mxu1 }
  0xf7   : > { %v1499_v25 = vrot.slane %v1498_v17, 4  ;;  %v1508_v26 = vor.u32 %v1507_v13, %v1503_v6  ;;  %v1518_v27 = vor.u32 %v1517_v16, %v1513_v15  ;;  %v1526_v28 = vshrl.u32 %v280_v5, 16 }
  0xf8   : > { %v1494_v33 = vsel %vm10982_vm3, %v1489_v18, %v1493_v52  ;;  %v1523_v34 = vrot.slane %v1521_v48, 5  ;;  %v1529_v37 = vshll.u32 %v280_v5, 16  ;;  %v1535_v1 = vshll.u32 %v281_v9, 16  ;;  %v285_v48 = vld [vmem:[%s10969_s25 + $0x234] sm:$0xf] }
  0xf9   : > { %v1504_v14 = vsel %vm10982_vm3, %v1499_v25, %v1503_v6  ;;  %v1509_v38 = vrot.slane %v1508_v26, 4  ;;  %v1519_v39 = vrot.slane %v1518_v27, 4  ;;  %v1528_v12 = vrot.slane %v1526_v28, 4  ;;  %v10264_v41 = vpop.f32.mrf.mxu0  ;;  %v11493_v43 = vpop.f32.mrf.mxu1 }
  0xfa   : > { %v8976_v44 = vcombine.low %v1494_v33, %v1504_v14  ;;  %v1531_v24 = vrot.slane %v1529_v37, 5  ;;  %v1537_v45 = vrot.slane %v1535_v1, 5  ;;  %v1539_v46 = vshrl.u32 %v281_v9, 16 }
  0xfb   : > { %v1514_v30 = vsel %vm10982_vm3, %v1509_v38, %v1513_v15  ;;  %v1524_v49 = vsel %vm10982_vm3, %v1519_v39, %v1523_v34  ;;  %v9107_v50 = vcombine.low %v280_v5, %v281_v9  ;;  %v11501_v52 = vadd.f32 %v11444_v23, %v10261_v10  ;;  %v2220_v54 = vpop.f32.mrf.mxu0  ;;  %v11504_v55 = vpop.f32.mrf.mxu1 }
  0xfc   : > { %10354 = vmatprep.mubr.msk.bf16.mxu0 %vm1945_vm0, %v8976_v44  ;;  %v8977_v57 = vcombine.low %v1514_v30, %v1524_v49  ;;  %v1541_v58 = vrot.slane %v1539_v46, 4  ;;  %v1545_v59 = vshll.u32 %v282_v29, 16  ;;  %v1549_v63 = vshrl.u32 %v282_v29, 16  ;;  %v287_v44 = vld [vmem:[%s10969_s25 + $0x23c] sm:$0xf] }
  0xfd   : > { %10488 = vmatprep.mubr.msk.bf16.mxu1 %vm1945_vm0, %v9107_v50  ;;  %v1555_v3 = vshll.u32 %v283_v47, 16  ;;  %v1559_v4 = vshrl.u32 %v283_v47, 16  ;;  %v9108_v5 = vcombine.low %v282_v29, %v283_v47  ;;  %v11510_v23 = vadd.f32 %v11451_v40, %v2207_v62  ;;  %v10265_v6 = vpop.f32.mrf.mxu0  ;;  %v11512_v7 = vpop.f32.mrf.mxu1 }
  0xfe   : > { %10355 = vmatmul.mubr.msk.bf16.gmra.mxu0 %vm1945_vm0, %v8977_v57  ;;  %v1547_v8 = vrot.slane %v1545_v59, 5  ;;  %v1551_v9 = vrot.slane %v1549_v63, 4  ;;  %v1532_v10 = vor.u32 %v1531_v24, %v1528_v12  ;;  %v1542_v13 = vor.u32 %v1541_v58, %v1537_v45 }
  0xff   : > { %v1557_v15 = vrot.slane %v1555_v3, 5  ;;  %v1561_v16 = vrot.slane %v1559_v4, 4  ;;  %10489 = vmatmul.mubr.msk.bf16.gmra.mxu1 %vm1945_vm0, %v9108_v5  ;;  %v11517_v17 = vadd.f32 %v11457_v42, %v10264_v41  ;;  %v1565_v18 = vshll.u32 %v329_v53, 16  ;;  %v2223_v40 = vpop.f32.mrf.mxu0  ;;  %v11520_v62 = vpop.f32.mrf.mxu1  ;;  %v286_v41 = vld [vmem:[%s10969_s25 + $0x238] sm:$0xf] }
 0x100   : > { %v1533_v25 = vrot.slane %v1532_v10, 4  ;;  %v1543_v26 = vrot.slane %v1542_v13, 4  ;;  %v1552_v27 = vor.u32 %v1551_v9, %v1547_v8  ;;  %v11523_v28 = vadd.f32 %v11467_v60, %v2220_v54  ;;  %v330_v10 = vld [vmem:[%s10969_s25 + $0x240] sm:$0x1] }
 0x101   : > { %v1562_v29 = vor.u32 %v1561_v16, %v1557_v15  ;;  %v1567_v33 = vrot.slane %v1565_v18, 5  ;;  %v1570_v34 = vshrl.u32 %v284_v0, 16  ;;  %v1573_v37 = vshll.u32 %v284_v0, 16  ;;  %v10268_v1 = vpop.f32.mrf.mxu0  ;;  %v11525_v42 = vpop.f32.mrf.mxu1 }
 0x102   : > { %v1538_v14 = vsel %vm10982_vm3, %v1533_v25, %v1537_v45  ;;  %v1548_v38 = vsel %vm10982_vm3, %v1543_v26, %v1547_v8  ;;  %v1553_v39 = vrot.slane %v1552_v27, 4  ;;  %v1579_v12 = vshll.u32 %v285_v48, 16 }
 0x103   : > { %v8978_v24 = vcombine.low %v1538_v14, %v1548_v38  ;;  %v1563_v60 = vrot.slane %v1562_v29, 4  ;;  %v1572_v46 = vrot.slane %v1570_v34, 4  ;;  %v1575_v47 = vrot.slane %v1573_v37, 5  ;;  %v2236_v30 = vpop.f32.mrf.mxu0  ;;  %v11533_v49 = vpop.f32.mrf.mxu1 }
 0x104   : > { %v1558_v50 = vsel %vm10982_vm3, %v1553_v39, %v1557_v15  ;;  %v1581_v53 = vrot.slane %v1579_v12, 5  ;;  %v1583_v45 = vshrl.u32 %v285_v48, 16  ;;  %v9109_v54 = vcombine.low %v284_v0, %v285_v48 }
 0x105   : > { %10358 = vmatprep.mubr.msk.bf16.mxu0 %vm1945_vm0, %v8978_v24  ;;  %v1568_v57 = vsel %vm10982_vm3, %v1563_v60, %v1567_v33  ;;  %v11541_v58 = vadd.f32 %v11476_v11, %v10265_v6  ;;  %v1593_v59 = vshrl.u32 %v286_v41, 16  ;;  %v1599_v63 = vshll.u32 %v287_v44, 16  ;;  %v10269_v3 = vpop.f32.mrf.mxu0  ;;  %v11543_v4 = vpop.f32.mrf.mxu1  ;;  %v288_v6 = vld [vmem:[%s10969_s25 + $0x244] sm:$0xf]  ;;  %v289_v33 = vld [vmem:[%s10969_s25 + $0x248] sm:$0xf] }
 0x106   : > { %v8979_v5 = vcombine.low %v1558_v50, %v1568_v57  ;;  %v1585_v8 = vrot.slane %v1583_v45, 4  ;;  %10492 = vmatprep.mubr.msk.bf16.mxu1 %vm1945_vm0, %v9109_v54  ;;  %v1603_v9 = vshrl.u32 %v287_v44, 16  ;;  %v9110_v0 = vcombine.low %v286_v41, %v287_v44  ;;  %v291_v45 = vld [vmem:[%s10969_s25 + $0x250] sm:$0xf] }
 0x107   : > { %14239 = vst [vmem:[#allocation2_spill] sm:$0xff] %v11541_v58  ;;  %v1601_v13 = vrot.slane %v1599_v63, 5  ;;  %v11548_v15 = vadd.f32 %v11486_v22, %v2223_v40  ;;  %v1576_v16 = vor.u32 %v1575_v47, %v1572_v46  ;;  %v1589_v11 = vshll.u32 %v286_v41, 16  ;;  %v2239_v18 = vpop.f32.mrf.mxu0  ;;  %v11551_v48 = vpop.f32.mrf.mxu1  ;;  %v290_v46 = vld [vmem:[%s10969_s25 + $0x24c] sm:$0xf] }
 0x108   : > { %10359 = vmatmul.mubr.msk.bf16.gmra.mxu0 %vm1945_vm0, %v8979_v5  ;;  %v1605_v25 = vrot.slane %v1603_v9, 4  ;;  %10493 = vmatmul.mubr.msk.bf16.gmra.mxu1 %vm1945_vm0, %v9110_v0  ;;  %v1586_v26 = vor.u32 %v1585_v8, %v1581_v53  ;;  %v1595_v27 = vrot.slane %v1593_v59, 4  ;;  %v11556_v29 = vadd.f32 %v11493_v43, %v10268_v1  ;;  %v9508_v58 = vld [vmem:[%s10969_s25 + $0x128] sm:$0x1] }
 0x109   : > { %14240 = vst [vmem:[#allocation3_spill] sm:$0xff] %v11548_v15  ;;  %v1577_v22 = vrot.slane %v1576_v16, 4  ;;  %v1591_v40 = vrot.slane %v1589_v11, 5  ;;  %v1609_v34 = vshll.u32 %v330_v10, 16  ;;  %v11560_v37 = vadd.f32 %v11504_v55, %v2236_v30 }
 0x10a   : > { %14241 = vst [vmem:[#allocation4_spill] sm:$0xff] %v11556_v29  ;;  %v1587_v14 = vrot.slane %v1586_v26, 4  ;;  %v1606_v38 = vor.u32 %v1605_v25, %v1601_v13  ;;  %v1614_v39 = vshrl.u32 %v288_v6, 16  ;;  %v1617_v12 = vshll.u32 %v288_v6, 16  ;;  %v10272_v41 = vpop.f32.mrf.mxu0  ;;  %v11562_v44 = vpop.f32.mrf.mxu1 }
 0x10b   : > { %14242 = vst [vmem:[#allocation5_spill] sm:$0xff] %v11560_v37  ;;  %v1582_v43 = vsel %vm10982_vm3, %v1577_v22, %v1581_v53  ;;  %v1596_v1 = vor.u32 %v1595_v27, %v1591_v40  ;;  %v1611_v24 = vrot.slane %v1609_v34, 5  ;;  %v1623_v60 = vshll.u32 %v289_v33, 16 }
 0x10c   : > { %v1592_v47 = vsel %vm10982_vm3, %v1587_v14, %v1591_v40  ;;  %v1607_v55 = vrot.slane %v1606_v38, 4  ;;  %v1616_v30 = vrot.slane %v1614_v39, 4  ;;  %v1619_v50 = vrot.slane %v1617_v12, 5  ;;  %v2252_v54 = vpop.f32.mrf.mxu0  ;;  %v11570_v57 = vpop.f32.mrf.mxu1  ;;  %v331_v40 = vld [vmem:[%s10969_s25 + $0x254] sm:$0x1] }
 0x10d   : > { %v1597_v59 = vrot.slane %v1596_v1, 4  ;;  %v8980_v63 = vcombine.low %v1582_v43, %v1592_v47  ;;  %v1625_v5 = vrot.slane %v1623_v60, 5  ;;  %v1627_v8 = vshrl.u32 %v289_v33, 16  ;;  %v292_v43 = vld [vmem:[%s10969_s25 + $0x258] sm:$0xf] }
 0x10e   : > { %v1612_v53 = vsel %vm10982_vm3, %v1607_v55, %v1611_v24  ;;  %v9111_v9 = vcombine.low %v288_v6, %v289_v33  ;;  %v11575_v0 = vadd.f32 %v11512_v7, %v10269_v3  ;;  %v1637_v10 = vshrl.u32 %v290_v46, 16  ;;  %v10273_v16 = vpop.f32.mrf.mxu0  ;;  %v11577_v11 = vpop.f32.mrf.mxu1 }
 0x10f   : > { %10362 = vmatprep.mubr.msk.bf16.mxu0 %vm1945_vm0, %v8980_v63  ;;  %v1602_v25 = vsel %vm10982_vm3, %v1597_v59, %v1601_v13  ;;  %v1629_v26 = vrot.slane %v1627_v8, 4  ;;  %v1643_v27 = vshll.u32 %v291_v45, 16  ;;  %v1647_v22 = vshrl.u32 %v291_v45, 16 }
 0x110   : > { %14243 = vst [vmem:[#allocation6_spill] sm:$0xff] %v11575_v0  ;;  %v8981_v34 = vcombine.low %v1602_v25, %v1612_v53  ;;  %10496 = vmatprep.mubr.msk.bf16.mxu1 %vm1945_vm0, %v9111_v9  ;;  %v9112_v6 = vcombine.low %v290_v46, %v291_v45  ;;  %v11585_v7 = vadd.f32 %v11520_v62, %v2239_v18  ;;  %v2255_v33 = vpop.f32.mrf.mxu0  ;;  %v11587_v14 = vpop.f32.mrf.mxu1  ;;  %v1633_v12 = vshll.u32 %v290_v46, 16  ;;  %v293_v18 = vld [vmem:[%s10969_s25 + $0x25c] sm:$0xf] }
 0x111   : > { %v1620_v3 = vor.u32 %v1619_v50, %v1616_v30  ;;  %v1645_v38 = vrot.slane %v1643_v27, 5  ;;  %v1649_v39 = vrot.slane %v1647_v22, 4  ;;  %v1630_v13 = vor.u32 %v1629_v26, %v1625_v5  ;;  %v294_v27 = vld [vmem:[%s10969_s25 + $0x260] sm:$0xf]  ;;  %v295_v22 = vld [vmem:[%s10969_s25 + $0x264] sm:$0xf] }
 0x112   : > { %14244 = vst [vmem:[#allocation7_spill] sm:$0xff] %v11585_v7  ;;  %10363 = vmatmul.mubr.msk.bf16.gmra.mxu0 %vm1945_vm0, %v8981_v34  ;;  %10497 = vmatmul.mubr.msk.bf16.gmra.mxu1 %vm1945_vm0, %v9112_v6  ;;  %v1639_v24 = vrot.slane %v1637_v10, 4  ;;  %v11593_v60 = vadd.f32 %v11525_v42, %v10272_v41  ;;  %v1653_v62 = vshll.u32 %v331_v40, 16  ;;  %v10276_v47 = vpop.f32.mrf.mxu0  ;;  %v11596_v55 = vpop.f32.mrf.mxu1  ;;  %v1635_v50 = vrot.slane %v1633_v12, 5 }
 0x113   : > { %v1621_v1 = vrot.slane %v1620_v3, 4  ;;  %v1631_v30 = vrot.slane %v1630_v13, 4  ;;  %v1650_v46 = vor.u32 %v1649_v39, %v1645_v38  ;;  %v11599_v45 = vadd.f32 %v11533_v49, %v2252_v54 }
 0x114   : > { %14245 = vst [vmem:[#allocation8_spill] sm:$0xff] %v11593_v60  ;;  %v1655_v63 = vrot.slane %v1653_v62, 5  ;;  %v1658_v8 = vshrl.u32 %v292_v43, 16  ;;  %v1661_v42 = vshll.u32 %v292_v43, 16  ;;  %v2268_v41 = vpop.f32.mrf.mxu0  ;;  %v11603_v53 = vpop.f32.mrf.mxu1  ;;  %v1640_v10 = vor.u32 %v1639_v24, %v1635_v50 }
 0x115   : > { %14246 = vst [vmem:[#allocation9_spill] sm:$0xff] %v11599_v45  ;;  %v1626_v59 = vsel %vm10982_vm3, %v1621_v1, %v1625_v5  ;;  %v1636_v9 = vsel %vm10982_vm3, %v1631_v30, %v1635_v50  ;;  %v1651_v25 = vrot.slane %v1650_v46, 4  ;;  %v1667_v26 = vshll.u32 %v293_v18, 16 }
 0x116   : > { %v8982_v40 = vcombine.low %v1626_v59, %v1636_v9  ;;  %v1660_v49 = vrot.slane %v1658_v8, 4  ;;  %v1663_v54 = vrot.slane %v1661_v42, 5  ;;  %v1671_v34 = vshrl.u32 %v293_v18, 16  ;;  %v10277_v6 = vpop.f32.mrf.mxu0  ;;  %v11609_v5 = vpop.f32.mrf.mxu1  ;;  %v332_v8 = vld [vmem:[%s10969_s25 + $0x268] sm:$0x1] }
 0x117   : > { %v1641_v3 = vrot.slane %v1640_v10, 4  ;;  %v1656_v39 = vsel %vm10982_vm3, %v1651_v25, %v1655_v63  ;;  %v1669_v13 = vrot.slane %v1667_v26, 5  ;;  %v9113_v12 = vcombine.low %v292_v43, %v293_v18  ;;  %v296_v10 = vld [vmem:[%s10969_s25 + $0x26c] sm:$0xf] }
 0x118   : > { %10366 = vmatprep.mubr.msk.bf16.mxu0 %vm1945_vm0, %v8982_v40  ;;  %v1673_v1 = vrot.slane %v1671_v34, 4  ;;  %v11615_v24 = vadd.f32 %v11543_v4, %v10273_v16  ;;  %v1681_v62 = vshrl.u32 %v294_v27, 16  ;;  %v1687_v30 = vshll.u32 %v295_v22, 16  ;;  %v2271_v50 = vpop.f32.mrf.mxu0  ;;  %v11617_v46 = vpop.f32.mrf.mxu1  ;;  %v297_v34 = vld [vmem:[%s10969_s25 + $0x270] sm:$0xf] }
 0x119   : > { %v1646_v59 = vsel %vm10982_vm3, %v1641_v3, %v1645_v38  ;;  %10500 = vmatprep.mubr.msk.bf16.mxu1 %vm1945_vm0, %v9113_v12  ;;  %v1691_v63 = vshrl.u32 %v295_v22, 16  ;;  %v9114_v43 = vcombine.low %v294_v27, %v295_v22  ;;  %v11623_v18 = vadd.f32 %v11551_v48, %v2255_v33 }
 0x11a   : > { %14247 = vst [vmem:[#allocation10_spill] sm:$0xff] %v11615_v24  ;;  %v8983_v42 = vcombine.low %v1646_v59, %v1656_v39  ;;  %v1689_v4 = vrot.slane %v1687_v30, 5  ;;  %v1664_v16 = vor.u32 %v1663_v54, %v1660_v49  ;;  %v1674_v9 = vor.u32 %v1673_v1, %v1669_v13 }
 0x11b   : > { %14248 = vst [vmem:[#allocation11_spill] sm:$0xff] %v11623_v18  ;;  %v1693_v25 = vrot.slane %v1691_v63, 4  ;;  %10501 = vmatmul.mubr.msk.bf16.gmra.mxu1 %vm1945_vm0, %v9114_v43  ;;  %v1677_v26 = vshll.u32 %v294_v27, 16  ;;  %v1683_v40 = vrot.slane %v1681_v62, 4  ;;  %v11629_v38 = vadd.f32 %v11562_v44, %v10276_v47  ;;  %v10280_v3 = vpop.f32.mrf.mxu0  ;;  %v11632_v22 = vpop.f32.mrf.mxu1 }
 0x11c   : > { %10367 = vmatmul.mubr.msk.bf16.gmra.mxu0 %vm1945_vm0, %v8983_v42  ;;  %v1665_v48 = vrot.slane %v1664_v16, 4  ;;  %v1675_v33 = vrot.slane %v1674_v9, 4  ;;  %v1697_v39 = vshll.u32 %v332_v8, 16  ;;  %v11636_v49 = vadd.f32 %v11570_v57, %v2268_v41  ;;  %v298_v42 = vld [vmem:[%s10969_s25 + $0x274] sm:$0xf] }
 0x11d   : > { %14249 = vst [vmem:[#allocation12_spill] sm:$0xff] %v11629_v38  ;;  %v1679_v54 = vrot.slane %v1677_v26, 5  ;;  %v1694_v27 = vor.u32 %v1693_v25, %v1689_v4  ;;  %v1702_v12 = vshrl.u32 %v296_v10, 16  ;;  %v1705_v1 = vshll.u32 %v296_v10, 16  ;;  %v2284_v44 = vpop.f32.mrf.mxu0  ;;  %v11638_v47 = vpop.f32.mrf.mxu1  ;;  %v299_v16 = vld [vmem:[%s10969_s25 + $0x278] sm:$0xf] }
 0x11e   : > { %14250 = vst [vmem:[#allocation13_spill] sm:$0xff] %v11636_v49  ;;  %v1670_v62 = vsel %vm10982_vm3, %v1665_v48, %v1669_v13  ;;  %v1699_v30 = vrot.slane %v1697_v39, 5  ;;  %v1711_v59 = vshll.u32 %v297_v34, 16  ;;  %v1715_v63 = vshrl.u32 %v297_v34, 16 }
 0x11f   : > { %v1680_v43 = vsel %vm10982_vm3, %v1675_v33, %v1679_v54  ;;  %v1684_v8 = vor.u32 %v1683_v40, %v1679_v54  ;;  %v1695_v57 = vrot.slane %v1694_v27, 4  ;;  %v1704_v41 = vrot.slane %v1702_v12, 4  ;;  %v11646_v9 = vpop.f32.mrf.mxu0  ;;  %v11648_v25 = vpop.f32.mrf.mxu1 }
 0x120   : > { %v8984_v26 = vcombine.low %v1670_v62, %v1680_v43  ;;  %v1707_v49 = vrot.slane %v1705_v1, 5  ;;  %v1713_v38 = vrot.slane %v1711_v59, 5  ;;  %v1717_v18 = vrot.slane %v1715_v63, 4 }
 0x121   : > { %v1685_v13 = vrot.slane %v1684_v8, 4  ;;  %v1700_v48 = vsel %vm10982_vm3, %v1695_v57, %v1699_v30  ;;  %v9115_v33 = vcombine.low %v296_v10, %v297_v34  ;;  %v11653_v40 = vadd.f32 %v11577_v11, %v10277_v6  ;;  %v11655_v39 = vpop.f32.mrf.mxu0  ;;  %v11657_v54 = vpop.f32.mrf.mxu1  ;;  %v333_v34 = vld [vmem:[%s10969_s25 + $0x27c] sm:$0x1]  ;;  %v9439_v30 = vld [vmem:[%s10969_s25 + $0x14] sm:$0xf] }
 0x122   : > { %10370 = vmatprep.mubr.msk.bf16.mxu0 %vm1945_vm0, %v8984_v26  ;;  %v1725_v27 = vshrl.u32 %v298_v42, 16  ;;  %v1731_v12 = vshll.u32 %v299_v16, 16  ;;  %v1735_v1 = vshrl.u32 %v299_v16, 16  ;;  %v9116_v62 = vcombine.low %v298_v42, %v299_v16  ;;  %v9440_v16 = vld [vmem:[%s10969_s25 + $0x18] sm:$0xf] }
 0x123   : > { %14251 = vst [vmem:[#allocation14_spill] sm:$0xff] %v11653_v40  ;;  %v1690_v59 = vsel %vm10982_vm3, %v1685_v13, %v1689_v4  ;;  %10504 = vmatprep.mubr.msk.bf16.mxu1 %vm1945_vm0, %v9115_v33  ;;  %v11664_v10 = vadd.f32 %v11587_v14, %v2271_v50  ;;  %v1708_v11 = vor.u32 %v1707_v49, %v1704_v41  ;;  %v11668_v63 = vpop.f32.mrf.mxu0  ;;  %v11670_v43 = vpop.f32.mrf.mxu1  ;;  %v1721_v4 = vshll.u32 %v298_v42, 16 }
 0x124   : > { %v1718_v6 = vor.u32 %v1717_v18, %v1713_v38  ;;  %v8985_v8 = vcombine.low %v1690_v59, %v1700_v48  ;;  %v1733_v57 = vrot.slane %v1731_v12, 5  ;;  %v1737_v26 = vrot.slane %v1735_v1, 4  ;;  %10505 = vmatmul.mubr.msk.bf16.gmra.mxu1 %vm1945_vm0, %v9116_v62  ;;  %v9441_v1 = vld [vmem:[%s10969_s25 + $0x1c] sm:$0xf] }
 0x125   : > { %14252 = vst [vmem:[#allocation15_spill] sm:$0xff] %v11664_v10  ;;  %v1709_v13 = vrot.slane %v1708_v11, 4  ;;  %v1727_v14 = vrot.slane %v1725_v27, 4  ;;  %v11675_v50 = vadd.f32 %v11596_v55, %v10280_v3  ;;  %v11677_v18 = vpop.f32.mrf.mxu0  ;;  %v11679_v49 = vpop.f32.mrf.mxu1  ;;  %v1723_v41 = vrot.slane %v1721_v4, 5  ;;  %v9442_v4 = vld [vmem:[%s10969_s25 + $0x20] sm:$0xf] }
 0x126   : > { %v1719_v33 = vrot.slane %v1718_v6, 4  ;;  %10371 = vmatmul.mubr.msk.bf16.gmra.mxu0 %vm1945_vm0, %v8985_v8  ;;  %v1738_v48 = vor.u32 %v1737_v26, %v1733_v57  ;;  %v1741_v12 = vshll.u32 %v333_v34, 16  ;;  %v11683_v42 = vadd.f32 %v11603_v53, %v2284_v44  ;;  %v9443_v44 = vld [vmem:[%s10969_s25 + $0x24] sm:$0x1] }
 0x127   : > { %14253 = vst [vmem:[#allocation16_spill] sm:$0xff] %v11675_v50  ;;  %v1714_v27 = vsel %vm10982_vm3, %v1709_v13, %v1713_v38  ;;  %v5229_v55 = vshrl.u32 %v9439_v30, 16  ;;  %v5232_v3 = vshll.u32 %v9439_v30, 16  ;;  %v5238_v62 = vshll.u32 %v9440_v16, 16  ;;  %v11688_v59 = vpop.f32.mrf.mxu0  ;;  %v11690_v11 = vpop.f32.mrf.mxu1 }
 0x128   : > { %14254 = vst [vmem:[#allocation17_spill] sm:$0xff] %v11683_v42  ;;  %v1724_v6 = vsel %vm10982_vm3, %v1719_v33, %v1723_v41  ;;  %v1728_v8 = vor.u32 %v1727_v14, %v1723_v41  ;;  %v1739_v26 = vrot.slane %v1738_v48, 4  ;;  %v1743_v34 = vrot.slane %v1741_v12, 5 }
 0x129   : > { %v8986_v53 = vcombine.low %v1714_v27, %v1724_v6  ;;  %v5231_v42 = vrot.slane %v5229_v55, 4  ;;  %v5234_v50 = vrot.slane %v5232_v3, 5  ;;  %v5240_v38 = vrot.slane %v5238_v62, 5  ;;  %v11696_v13 = vpop.f32.mrf.mxu0  ;;  %v11698_v30 = vpop.f32.mrf.mxu1  ;;  %v10845_v6 = vld [vmem:[%s10969_s25 + $0x14] sm:$0xff]  }
 0x12a   : > { %v1729_v10 = vrot.slane %v1728_v8, 4  ;;  %v1744_v40 = vsel %vm10982_vm3, %v1739_v26, %v1743_v34  ;;  %v5242_v24 = vshrl.u32 %v9440_v16, 16  ;;  %v5248_v33 = vshll.u32 %v9441_v1, 16 }
 0x12b   : > { %10374 = vmatprep.mubr.msk.bf16.mxu0 %vm1945_vm0, %v8986_v53  ;;  %v5235_v14 = vor.u32 %v5234_v50, %v5231_v42  ;;  %v5252_v41 = vshrl.u32 %v9441_v1, 16  ;;  %v5258_v48 = vshll.u32 %v9442_v4, 16  ;;  %v5262_v12 = vshrl.u32 %v9442_v4, 16  ;;  %v9444_v42 = vld [vmem:[%s10969_s25 + $0x28] sm:$0xf] }
 0x12c   : > { %v1734_v27 = vsel %vm10982_vm3, %v1729_v10, %v1733_v57  ;;  %v5244_v55 = vrot.slane %v5242_v24, 4  ;;  %v5250_v3 = vrot.slane %v5248_v33, 5  ;;  %v5268_v62 = vshll.u32 %v9443_v44, 16  ;;  %v11706_v8 = vpop.f32.mrf.mxu0  ;;  %v11708_v26 = vpop.f32.mrf.mxu1  ;;  %v9445_v24 = vld [vmem:[%s10969_s25 + $0x2c] sm:$0xf] }
 0x12d   : > { %v8987_v16 = vcombine.low %v1734_v27, %v1744_v40  ;;  %v5236_v34 = vrot.slane %v5235_v14, 4  ;;  %v5254_v53 = vrot.slane %v5252_v41, 4  ;;  %v5260_v50 = vrot.slane %v5258_v48, 5 }
 0x12e   : > { %v5245_v1 = vor.u32 %v5244_v55, %v5240_v38  ;;  %v5264_v4 = vrot.slane %v5262_v12, 4  ;;  %v5270_v45 = vrot.slane %v5268_v62, 5  ;;  %v11713_v10 = vadd.f32 %v11609_v5, %v11646_v9  ;;  %v11716_v57 = vpop.f32.mrf.mxu0  ;;  %v11718_v44 = vpop.f32.mrf.mxu1  ;;  %v9446_v5 = vld [vmem:[%s10969_s25 + $0x30] sm:$0xf] }
 0x12f   : > { %10375 = vmatmul.mubr.msk.bf16.gmra.mxu0 %vm1945_vm0, %v8987_v16  ;;  %v5241_v40 = vsel %vm10982_vm3, %v5236_v34, %v5240_v38  ;;  %v5255_v33 = vor.u32 %v5254_v53, %v5250_v3  ;;  %v11725_v14 = vadd.f32 %v11617_v46, %v11655_v39  ;;  %v11729_v41 = vadd.f32 %v11632_v22, %v11668_v63 }
 0x130   : > { %14255 = vst [vmem:[#allocation18_spill] sm:$0xff] %v11713_v10  ;;  %v5246_v9 = vrot.slane %v5245_v1, 4  ;;  %v5265_v48 = vor.u32 %v5264_v4, %v5260_v50  ;;  %10510 = vmatprep.mubr.msk.bf16.mxu0 %vm1945_vm0, %v10845_v6  ;;  %v11735_v12 = vadd.f32 %v11638_v47, %v11677_v18  ;;  %v5273_v38 = vshrl.u32 %v9444_v42, 16  ;;  %v11737_v27 = vpop.f32.mrf.mxu0  ;;  %v11739_v46 = vpop.f32.mrf.mxu1  ;;  %v9447_v47 = vld [vmem:[%s10969_s25 + $0x34] sm:$0xf] }
 0x131   : > { %14256 = vst [vmem:[#allocation19_spill] sm:$0xff] %v11725_v14  ;;  %14257 = vst [vmem:[#allocation20_spill] sm:$0xff] %v11729_v41  ;;  %v5256_v39 = vrot.slane %v5255_v33, 4  ;;  %v5276_v22 = vshll.u32 %v9444_v42, 16  ;;  %v5282_v63 = vshll.u32 %v9445_v24, 16  ;;  %v5286_v55 = vshrl.u32 %v9445_v24, 16 }
 0x132   : > { %14258 = vst [vmem:[#allocation21_spill] sm:$0xff] %v11735_v12  ;;  %v5251_v62 = vsel %vm10982_vm3, %v5246_v9, %v5250_v3  ;;  %v5266_v16 = vrot.slane %v5265_v48, 4  ;;  %v5275_v6 = vrot.slane %v5273_v38, 4  ;;  %v5292_v34 = vshll.u32 %v9446_v5, 16  ;;  %v11744_v18 = vpop.f32.mrf.mxu0  ;;  %v11746_v53 = vpop.f32.mrf.mxu1  ;;  %v10846_v33 = vld [vmem:[%s10969_s25 + $0x1c] sm:$0xff]   ;;  %v10847_v41 = vld [vmem:[%s10969_s25 + $0x28] sm:$0xff]  }
 0x133   : > { %v5261_v1 = vsel %vm10982_vm3, %v5256_v39, %v5260_v50  ;;  %v9599_v4 = vcombine.low %v5241_v40, %v5251_v62  ;;  %v5278_v42 = vrot.slane %v5276_v22, 5  ;;  %v5284_v12 = vrot.slane %v5282_v63, 5  ;;  %v9448_v24 = vld [vmem:[%s10969_s25 + $0x38] sm:$0x1] }
 0x134   : > { %v5271_v3 = vsel %vm10982_vm3, %v5266_v16, %v5270_v45  ;;  %v5288_v9 = vrot.slane %v5286_v55, 4  ;;  %v5294_v48 = vrot.slane %v5292_v34, 5  ;;  %v5296_v38 = vshrl.u32 %v9446_v5, 16  ;;  %v11755_v14 = vpop.f32.mrf.mxu0  ;;  %v11757_v10 = vpop.f32.mrf.mxu1  ;;  %v9449_v5 = vld [vmem:[%s10969_s25 + $0x3c] sm:$0xf] }
 0x135   : > { %v9600_v60 = vcombine.low %v5261_v1, %v5271_v3  ;;  %10640 = vmatprep.mubr.msk.bf16.mxu1 %vm1945_vm0, %v9599_v4  ;;  %v5279_v50 = vor.u32 %v5278_v42, %v5275_v6  ;;  %v11762_v40 = vadd.f32 %v11648_v25, %v11688_v59  ;;  %v5302_v39 = vshll.u32 %v9447_v47, 16 }
 0x136   : > { %v5289_v45 = vor.u32 %v5288_v9, %v5284_v12  ;;  %v5298_v22 = vrot.slane %v5296_v38, 4  ;;  %v5306_v63 = vshrl.u32 %v9447_v47, 16  ;;  %v5312_v55 = vshll.u32 %v9448_v24, 16  ;;  %v11765_v62 = vpop.f32.mrf.mxu0  ;;  %v11767_v16 = vpop.f32.mrf.mxu1  ;;  %v9450_v47 = vld [vmem:[%s10969_s25 + $0x40] sm:$0xf] }
 0x137   : > { %14259 = vst [vmem:[#allocation22_spill] sm:$0xff] %v11762_v40  ;;  %10641 = vmatmul.mubr.msk.bf16.vlgmr.msra.gmra.mxu1 %vm1945_vm0, %v9600_v60  ;;  %10511 = vmatmul.mubr.msk.bf16.vlgmr.msra.gmra.mxu0 %vm1945_vm0, %v10846_v33  ;;  %v5280_v6 = vrot.slane %v5279_v50, 4  ;;  %v5304_v34 = vrot.slane %v5302_v39, 5  ;;  %v11773_v25 = vadd.f32 %v11657_v54, %v11696_v13  ;;  %v11777_v59 = vadd.f32 %v11670_v43, %v11706_v8  ;;  %v9451_v13 = vld [vmem:[%s10969_s25 + $0x44] sm:$0xf] }
 0x138   : > { %v5290_v1 = vrot.slane %v5289_v45, 4  ;;  %v5299_v4 = vor.u32 %v5298_v22, %v5294_v48  ;;  %v5308_v42 = vrot.slane %v5306_v63, 4  ;;  %v5314_v24 = vrot.slane %v5312_v55, 5  ;;  %10514 = vmatprep.mubr.msk.bf16.mxu0 %vm1945_vm0, %v10847_v41  ;;  %v11781_v60 = vpop.f32.mrf.mxu0  ;;  %v11783_v33 = vpop.f32.mrf.mxu1  ;;  %v10848_v22 = vld [vmem:[%s10969_s25 + $0x30] sm:$0xff]   ;;  %v9452_v55 = vld [vmem:[%s10969_s25 + $0x48] sm:$0xf] }
 0x139   : > { %14260 = vst [vmem:[#allocation23_spill] sm:$0xff] %v11773_v25  ;;  %14261 = vst [vmem:[#allocation24_spill] sm:$0xff] %v11777_v59  ;;  %v5285_v54 = vsel %vm10982_vm3, %v5280_v6, %v5284_v12  ;;  %v11789_v43 = vadd.f32 %v11679_v49, %v11716_v57  ;;  %v5317_v8 = vshrl.u32 %v9449_v5, 16  ;;  %v5320_v3 = vshll.u32 %v9449_v5, 16 }
 0x13a   : > { %v5295_v9 = vsel %vm10982_vm3, %v5290_v1, %v5294_v48  ;;  %v5300_v41 = vrot.slane %v5299_v4, 4  ;;  %v5309_v38 = vor.u32 %v5308_v42, %v5304_v34  ;;  %v5326_v50 = vshll.u32 %v9450_v47, 16  ;;  %v11794_v39 = vpop.f32.mrf.mxu0  ;;  %v11796_v45 = vpop.f32.mrf.mxu1  ;;  %v10849_v4 = vld [vmem:[%s10969_s25 + $0x3c] sm:$0xff]  }
 0x13b   : > { %14262 = vst [vmem:[#allocation25_spill] sm:$0xff] %v11789_v43  ;;  %v9601_v12 = vcombine.low %v5285_v54, %v5295_v9  ;;  %v5319_v63 = vrot.slane %v5317_v8, 4  ;;  %v5322_v49 = vrot.slane %v5320_v3, 5  ;;  %v5330_v57 = vshrl.u32 %v9450_v47, 16  ;;  %v9453_v8 = vld [vmem:[%s10969_s25 + $0x4c] sm:$0x1] }
 0x13c   : > { %v5305_v5 = vsel %vm10982_vm3, %v5300_v41, %v5304_v34  ;;  %v5310_v6 = vrot.slane %v5309_v38, 4  ;;  %v5328_v48 = vrot.slane %v5326_v50, 5  ;;  %v5336_v1 = vshll.u32 %v9451_v13, 16 }
 0x13d   : > { %10644 = vmatprep.mubr.msk.bf16.mxu1 %vm1945_vm0, %v9601_v12  ;;  %v5323_v42 = vor.u32 %v5322_v49, %v5319_v63  ;;  %v5332_v43 = vrot.slane %v5330_v57, 4  ;;  %v5340_v59 = vshrl.u32 %v9451_v13, 16  ;;  %v11806_v54 = vadd.f32 %v11690_v11, %v11737_v27  ;;  %v11809_v47 = vpop.f32.mrf.mxu0  ;;  %v11811_v3 = vpop.f32.mrf.mxu1  ;;  %v9454_v11 = vld [vmem:[%s10969_s25 + $0x50] sm:$0xf] }
 0x13e   : > { %v5315_v34 = vsel %vm10982_vm3, %v5310_v6, %v5314_v24  ;;  %v5338_v9 = vrot.slane %v5336_v1, 5  ;;  %v5346_v41 = vshll.u32 %v9452_v55, 16  ;;  %v5350_v38 = vshrl.u32 %v9452_v55, 16 }
 0x13f   : > { %14263 = vst [vmem:[#allocation26_spill] sm:$0xff] %v11806_v54  ;;  %v9602_v50 = vcombine.low %v5305_v5, %v5315_v34  ;;  %10515 = vmatmul.mubr.msk.bf16.gmra.mxu0 %vm1945_vm0, %v10848_v22  ;;  %v5324_v13 = vrot.slane %v5323_v42, 4  ;;  %v5333_v12 = vor.u32 %v5332_v43, %v5328_v48  ;;  %v5342_v63 = vrot.slane %v5340_v59, 4  ;;  %v11817_v27 = vpop.f32.mrf.mxu0  ;;  %v11819_v49 = vpop.f32.mrf.mxu1  ;;  %v9455_v22 = vld [vmem:[%s10969_s25 + $0x54] sm:$0xf] }
 0x140   : > { %v5348_v57 = vrot.slane %v5346_v41, 5  ;;  %v5352_v54 = vrot.slane %v5350_v38, 4  ;;  %v5356_v25 = vshll.u32 %v9453_v8, 16  ;;  %v11823_v24 = vadd.f32 %v11698_v30, %v11744_v18  ;;  %10518 = vmatprep.mubr.msk.bf16.mxu0 %vm1945_vm0, %v10849_v4  ;;  %v9456_v42 = vld [vmem:[%s10969_s25 + $0x58] sm:$0xf] }
 0x141   : > { %10645 = vmatmul.mubr.msk.bf16.gmra.mxu1 %vm1945_vm0, %v9602_v50  ;;  %v5329_v59 = vsel %vm10982_vm3, %v5324_v13, %v5328_v48  ;;  %v5334_v43 = vrot.slane %v5333_v12, 4  ;;  %v5343_v55 = vor.u32 %v5342_v63, %v5338_v9  ;;  %v11832_v5 = vadd.f32 %v11708_v26, %v11755_v14  ;;  %v11834_v6 = vpop.f32.mrf.mxu0  ;;  %v11836_v1 = vpop.f32.mrf.mxu1  ;;  %v10850_v26 = vld [vmem:[%s10969_s25 + $0x44] sm:$0xff]  }
 0x142   : > { %14264 = vst [vmem:[#allocation27_spill] sm:$0xff] %v11823_v24  ;;  %v5353_v30 = vor.u32 %v5352_v54, %v5348_v57  ;;  %v5358_v18 = vrot.slane %v5356_v25, 5  ;;  %v11840_v4 = vadd.f32 %v11718_v44, %v11765_v62  ;;  %v5361_v48 = vshrl.u32 %v9454_v11, 16  ;;  %v9457_v44 = vld [vmem:[%s10969_s25 + $0x5c] sm:$0xf]  ;;  %v10851_v62 = vld [vmem:[%s10969_s25 + $0x50] sm:$0xff]  }
 0x143   : > { %14265 = vst [vmem:[#allocation28_spill] sm:$0xff] %v11832_v5  ;;  %v5339_v8 = vsel %vm10982_vm3, %v5334_v43, %v5338_v9  ;;  %v5344_v34 = vrot.slane %v5343_v55, 4  ;;  %v5364_v14 = vshll.u32 %v9454_v11, 16  ;;  %v5370_v41 = vshll.u32 %v9455_v22, 16  ;;  %v11846_v38 = vpop.f32.mrf.mxu0  ;;  %v11848_v54 = vpop.f32.mrf.mxu1  ;;  %v9458_v55 = vld [vmem:[%s10969_s25 + $0x60] sm:$0x1] }
 0x144   : > { %14266 = vst [vmem:[#allocation29_spill] sm:$0xff] %v11840_v4  ;;  %v9603_v25 = vcombine.low %v5329_v59, %v5339_v8  ;;  %v5354_v50 = vrot.slane %v5353_v30, 4  ;;  %v5363_v13 = vrot.slane %v5361_v48, 4  ;;  %v5374_v12 = vshrl.u32 %v9455_v22, 16 }
 0x145   : > { %v5349_v63 = vsel %vm10982_vm3, %v5344_v34, %v5348_v57  ;;  %v5366_v4 = vrot.slane %v5364_v14, 5  ;;  %v5372_v9 = vrot.slane %v5370_v41, 5  ;;  %v5380_v43 = vshll.u32 %v9456_v42, 16  ;;  %v11855_v5 = vpop.f32.mrf.mxu0  ;;  %v11857_v11 = vpop.f32.mrf.mxu1 }
 0x146   : > { %10648 = vmatprep.mubr.msk.bf16.mxu1 %vm1945_vm0, %v9603_v25  ;;  %v5359_v59 = vsel %vm10982_vm3, %v5354_v50, %v5358_v18  ;;  %v5376_v22 = vrot.slane %v5374_v12, 4  ;;  %v5384_v30 = vshrl.u32 %v9456_v42, 16  ;;  %v11864_v48 = vadd.f32 %v11739_v46, %v11781_v60  ;;  %v9459_v46 = vld [vmem:[%s10969_s25 + $0x64] sm:$0xf] }
 0x147   : > { %v9604_v57 = vcombine.low %v5349_v63, %v5359_v59  ;;  %10519 = vmatmul.mubr.msk.bf16.gmra.mxu0 %vm1945_vm0, %v10850_v26  ;;  %v5367_v8 = vor.u32 %v5366_v4, %v5363_v13  ;;  %v5382_v34 = vrot.slane %v5380_v43, 5  ;;  %v5390_v14 = vshll.u32 %v9457_v44, 16  ;;  %v11867_v41 = vpop.f32.mrf.mxu0  ;;  %v11869_v25 = vpop.f32.mrf.mxu1  ;;  %v9460_v13 = vld [vmem:[%s10969_s25 + $0x68] sm:$0xf] }
 0x148   : > { %14267 = vst [vmem:[#allocation30_spill] sm:$0xff] %v11864_v48  ;;  %v5377_v24 = vor.u32 %v5376_v22, %v5372_v9  ;;  %v5386_v18 = vrot.slane %v5384_v30, 4  ;;  %v5394_v50 = vshrl.u32 %v9457_v44, 16  ;;  %v5400_v12 = vshll.u32 %v9458_v55, 16  ;;  %10522 = vmatprep.mubr.msk.bf16.mxu0 %vm1945_vm0, %v10851_v62  ;;  %v10852_v30 = vld [vmem:[%s10969_s25 + $0x58] sm:$0xff]  }
 0x149   : > { %10649 = vmatmul.mubr.msk.bf16.gmra.mxu1 %vm1945_vm0, %v9604_v57  ;;  %v5368_v60 = vrot.slane %v5367_v8, 4  ;;  %v5392_v4 = vrot.slane %v5390_v14, 5  ;;  %v11876_v42 = vadd.f32 %v11746_v53, %v11794_v39  ;;  %v11880_v26 = vadd.f32 %v11757_v10, %v11809_v47  ;;  %v11883_v44 = vpop.f32.mrf.mxu0  ;;  %v11885_v63 = vpop.f32.mrf.mxu1  ;;  %v9461_v10 = vld [vmem:[%s10969_s25 + $0x6c] sm:$0xf] }
 0x14a   : > { %v5378_v62 = vrot.slane %v5377_v24, 4  ;;  %v5387_v43 = vor.u32 %v5386_v18, %v5382_v34  ;;  %v5396_v55 = vrot.slane %v5394_v50, 4  ;;  %v5402_v59 = vrot.slane %v5400_v12, 5 }
 0x14b   : > { %14268 = vst [vmem:[#allocation31_spill] sm:$0xff] %v11876_v42  ;;  %14269 = vst [vmem:[#allocation32_spill] sm:$0xff] %v11880_v26  ;;  %v5373_v22 = vsel %vm10982_vm3, %v5368_v60, %v5372_v9  ;;  %v11892_v53 = vadd.f32 %v11767_v16, %v11817_v27  ;;  %v5405_v39 = vshrl.u32 %v9459_v46, 16  ;;  %v5408_v47 = vshll.u32 %v9459_v46, 16  ;;  %v11895_v57 = vpop.f32.mrf.mxu0  ;;  %v11897_v8 = vpop.f32.mrf.mxu1  ;;  %v10853_v9 = vld [vmem:[%s10969_s25 + $0x64] sm:$0xff]  }
 0x14c   : > { %v5383_v24 = vsel %vm10982_vm3, %v5378_v62, %v5382_v34  ;;  %v5388_v14 = vrot.slane %v5387_v43, 4  ;;  %v5397_v18 = vor.u32 %v5396_v55, %v5392_v4  ;;  %v5414_v50 = vshll.u32 %v9460_v13, 16  ;;  %v9462_v27 = vld [vmem:[%s10969_s25 + $0x70] sm:$0xf] }
 0x14d   : > { %14270 = vst [vmem:[#allocation33_spill] sm:$0xff] %v11892_v53  ;;  %v9605_v12 = vcombine.low %v5373_v22, %v5383_v24  ;;  %v5407_v60 = vrot.slane %v5405_v39, 4  ;;  %v5410_v26 = vrot.slane %v5408_v47, 5  ;;  %v5418_v16 = vshrl.u32 %v9460_v13, 16 }
 0x14e   : > { %v5393_v46 = vsel %vm10982_vm3, %v5388_v14, %v5392_v4  ;;  %v5398_v53 = vrot.slane %v5397_v18, 4  ;;  %v5416_v42 = vrot.slane %v5414_v50, 5  ;;  %v5424_v48 = vshll.u32 %v9461_v10, 16  ;;  %v11905_v40 = vpop.f32.mrf.mxu0  ;;  %v11907_v7 = vpop.f32.mrf.mxu1  ;;  %v9463_v4 = vld [vmem:[%s10969_s25 + $0x74] sm:$0x1] }
 0x14f   : > { %10652 = vmatprep.mubr.msk.bf16.mxu1 %vm1945_vm0, %v9605_v12  ;;  %10523 = vmatmul.mubr.msk.bf16.gmra.mxu0 %vm1945_vm0, %v10852_v30  ;;  %v5411_v34 = vor.u32 %v5410_v26, %v5407_v60  ;;  %v5420_v62 = vrot.slane %v5418_v16, 4  ;;  %v5428_v43 = vshrl.u32 %v9461_v10, 16  ;;  %v11913_v13 = vadd.f32 %v11783_v33, %v11834_v6  ;;  %v9464_v6 = vld [vmem:[%s10969_s25 + $0x78] sm:$0xf] }
 0x150   : > { %v5403_v55 = vsel %vm10982_vm3, %v5398_v53, %v5402_v59  ;;  %v5426_v22 = vrot.slane %v5424_v48, 5  ;;  %v5434_v39 = vshll.u32 %v9462_v27, 16  ;;  %v5438_v47 = vshrl.u32 %v9462_v27, 16  ;;  %10526 = vmatprep.mubr.msk.bf16.mxu0 %vm1945_vm0, %v10853_v9  ;;  %v11919_v24 = vpop.f32.mrf.mxu0  ;;  %v11921_v26 = vpop.f32.mrf.mxu1  ;;  %v9465_v53 = vld [vmem:[%s10969_s25 + $0x7c] sm:$0xf] }
 0x151   : > { %14271 = vst [vmem:[#allocation34_spill] sm:$0xff] %v11913_v13  ;;  %v9606_v30 = vcombine.low %v5393_v46, %v5403_v55  ;;  %v5412_v10 = vrot.slane %v5411_v34, 4  ;;  %v5421_v14 = vor.u32 %v5420_v62, %v5416_v42  ;;  %v5430_v33 = vrot.slane %v5428_v43, 4  ;;  %v10854_v34 = vld [vmem:[%s10969_s25 + $0x6c] sm:$0xff]   ;;  %v9466_v43 = vld [vmem:[%s10969_s25 + $0x80] sm:$0xf] }
 0x152   : > { %v5436_v18 = vrot.slane %v5434_v39, 5  ;;  %v5440_v50 = vrot.slane %v5438_v47, 4  ;;  %v5444_v59 = vshll.u32 %v9463_v4, 16  ;;  %v11926_v48 = vadd.f32 %v11796_v45, %v11846_v38  ;;  %v11929_v9 = vpop.f32.mrf.mxu0  ;;  %v11931_v12 = vpop.f32.mrf.mxu1  ;;  %v10855_v55 = vld [vmem:[%s10969_s25 + $0x78] sm:$0xff]  }
 0x153   : > { %10653 = vmatmul.mubr.msk.bf16.gmra.mxu1 %vm1945_vm0, %v9606_v30  ;;  %v5417_v60 = vsel %vm10982_vm3, %v5412_v10, %v5416_v42  ;;  %v5422_v16 = vrot.slane %v5421_v14, 4  ;;  %v5431_v27 = vor.u32 %v5430_v33, %v5426_v22  ;;  %v11938_v46 = vadd.f32 %v11811_v3, %v11855_v5 }
 0x154   : > { %14272 = vst [vmem:[#allocation35_spill] sm:$0xff] %v11926_v48  ;;  %v5441_v62 = vor.u32 %v5440_v50, %v5436_v18  ;;  %v5446_v45 = vrot.slane %v5444_v59, 5  ;;  %v11943_v38 = vadd.f32 %v11819_v49, %v11867_v41  ;;  %v5449_v4 = vshrl.u32 %v9464_v6, 16  ;;  %v11947_v39 = vpop.f32.mrf.mxu0  ;;  %v11949_v42 = vpop.f32.mrf.mxu1  ;;  %v9467_v49 = vld [vmem:[%s10969_s25 + $0x84] sm:$0xf] }
 0x155   : > { %14273 = vst [vmem:[#allocation36_spill] sm:$0xff] %v11938_v46  ;;  %v5427_v47 = vsel %vm10982_vm3, %v5422_v16, %v5426_v22  ;;  %v5432_v3 = vrot.slane %v5431_v27, 4  ;;  %v5452_v5 = vshll.u32 %v9464_v6, 16  ;;  %v5458_v30 = vshll.u32 %v9465_v53, 16  ;;  %v9468_v27 = vld [vmem:[%s10969_s25 + $0x88] sm:$0x1] }
 0x156   : > { %14274 = vst [vmem:[#allocation37_spill] sm:$0xff] %v11943_v38  ;;  %v9607_v10 = vcombine.low %v5417_v60, %v5427_v47  ;;  %v5442_v14 = vrot.slane %v5441_v62, 4  ;;  %v5451_v33 = vrot.slane %v5449_v4, 4  ;;  %v5462_v50 = vshrl.u32 %v9465_v53, 16  ;;  %v11954_v41 = vpop.f32.mrf.mxu0  ;;  %v11956_v59 = vpop.f32.mrf.mxu1 }
 0x157   : > { %v5437_v38 = vsel %vm10982_vm3, %v5432_v3, %v5436_v18  ;;  %10527 = vmatmul.mubr.msk.bf16.gmra.mxu0 %vm1945_vm0, %v10854_v34  ;;  %v5454_v46 = vrot.slane %v5452_v5, 5  ;;  %v5460_v22 = vrot.slane %v5458_v30, 5  ;;  %v5468_v16 = vshll.u32 %v9466_v43, 16 }
 0x158   : > { %10656 = vmatprep.mubr.msk.bf16.mxu1 %vm1945_vm0, %v9607_v10  ;;  %v5447_v6 = vsel %vm10982_vm3, %v5442_v14, %v5446_v45  ;;  %v5464_v53 = vrot.slane %v5462_v50, 4  ;;  %v5472_v60 = vshrl.u32 %v9466_v43, 16  ;;  %v11967_v62 = vadd.f32 %v11836_v1, %v11883_v44  ;;  %10530 = vmatprep.mubr.msk.bf16.mxu0 %vm1945_vm0, %v10855_v55  ;;  %v11970_v18 = vpop.f32.mrf.mxu0  ;;  %v11972_v34 = vpop.f32.mrf.mxu1  ;;  %v9469_v14 = vld [vmem:[%s10969_s25 + $0x8c] sm:$0xf]  ;;  %v10856_v50 = vld [vmem:[%s10969_s25 + $0x80] sm:$0xff]  }
 0x159   : > { %v9608_v4 = vcombine.low %v5437_v38, %v5447_v6  ;;  %v5455_v47 = vor.u32 %v5454_v46, %v5451_v33  ;;  %v5470_v3 = vrot.slane %v5468_v16, 5  ;;  %v5478_v5 = vshll.u32 %v9467_v49, 16 }
 0x15a   : > { %14275 = vst [vmem:[#allocation38_spill] sm:$0xff] %v11967_v62  ;;  %v5465_v30 = vor.u32 %v5464_v53, %v5460_v22  ;;  %v5474_v45 = vrot.slane %v5472_v60, 4  ;;  %v5482_v10 = vshrl.u32 %v9467_v49, 16  ;;  %v5488_v43 = vshll.u32 %v9468_v27, 16  ;;  %v11975_v1 = vpop.f32.mrf.mxu0  ;;  %v11977_v44 = vpop.f32.mrf.mxu1  ;;  %v9470_v49 = vld [vmem:[%s10969_s25 + $0x90] sm:$0xf] }
 0x15b   : > { %10657 = vmatmul.mubr.msk.bf16.gmra.mxu1 %vm1945_vm0, %v9608_v4  ;;  %v5456_v55 = vrot.slane %v5455_v47, 4  ;;  %v5480_v38 = vrot.slane %v5478_v5, 5  ;;  %v11982_v46 = vadd.f32 %v11848_v54, %v11895_v57  ;;  %v11986_v33 = vadd.f32 %v11857_v11, %v11905_v40  ;;  %v10857_v60 = vld [vmem:[%s10969_s25 + $0x8c] sm:$0xff]   ;;  %v9471_v40 = vld [vmem:[%s10969_s25 + $0x94] sm:$0xf] }
 0x15c   : > { %v5466_v16 = vrot.slane %v5465_v30, 4  ;;  %v5475_v27 = vor.u32 %v5474_v45, %v5470_v3  ;;  %v5484_v6 = vrot.slane %v5482_v10, 4  ;;  %v5490_v53 = vrot.slane %v5488_v43, 5  ;;  %v11991_v62 = vpop.f32.mrf.mxu0  ;;  %v11993_v4 = vpop.f32.mrf.mxu1 }
 0x15d   : > { %14276 = vst [vmem:[#allocation39_spill] sm:$0xff] %v11982_v46  ;;  %14277 = vst [vmem:[#allocation40_spill] sm:$0xff] %v11986_v33  ;;  %v5461_v54 = vsel %vm10982_vm3, %v5456_v55, %v5460_v22  ;;  %v11999_v57 = vadd.f32 %v11869_v25, %v11919_v24  ;;  %v5493_v11 = vshrl.u32 %v9469_v14, 16  ;;  %v5496_v47 = vshll.u32 %v9469_v14, 16  ;;  %v9472_v55 = vld [vmem:[%s10969_s25 + $0x98] sm:$0xf] }
 0x15e   : > { %v5471_v5 = vsel %vm10982_vm3, %v5466_v16, %v5470_v3  ;;  %v5476_v30 = vrot.slane %v5475_v27, 4  ;;  %v5485_v45 = vor.u32 %v5484_v6, %v5480_v38  ;;  %v5502_v10 = vshll.u32 %v9470_v49, 16 }
 0x15f   : > { %14278 = vst [vmem:[#allocation41_spill] sm:$0xff] %v11999_v57  ;;  %v9609_v43 = vcombine.low %v5461_v54, %v5471_v5  ;;  %10531 = vmatmul.mubr.msk.bf16.gmra.mxu0 %vm1945_vm0, %v10856_v50  ;;  %v5495_v33 = vrot.slane %v5493_v11, 4  ;;  %v5498_v46 = vrot.slane %v5496_v47, 5  ;;  %v5506_v22 = vshrl.u32 %v9470_v49, 16  ;;  %v12006_v48 = vpop.f32.mrf.mxu0  ;;  %v12008_v25 = vpop.f32.mrf.mxu1  ;;  %v9473_v54 = vld [vmem:[%s10969_s25 + $0x9c] sm:$0x1] }
 0x160   : > { %v5481_v24 = vsel %vm10982_vm3, %v5476_v30, %v5480_v38  ;;  %v5486_v14 = vrot.slane %v5485_v45, 4  ;;  %v5504_v3 = vrot.slane %v5502_v10, 5  ;;  %v5512_v16 = vshll.u32 %v9471_v40, 16  ;;  %10534 = vmatprep.mubr.msk.bf16.mxu0 %vm1945_vm0, %v10857_v60  ;;  %v10858_v10 = vld [vmem:[%s10969_s25 + $0x94] sm:$0xff]  }
 0x161   : > { %10660 = vmatprep.mubr.msk.bf16.mxu1 %vm1945_vm0, %v9609_v43  ;;  %v5499_v50 = vor.u32 %v5498_v46, %v5495_v33  ;;  %v5508_v27 = vrot.slane %v5506_v22, 4  ;;  %v5516_v49 = vshrl.u32 %v9471_v40, 16  ;;  %v12016_v6 = vadd.f32 %v11885_v63, %v11929_v9  ;;  %v12019_v11 = vpop.f32.mrf.mxu0  ;;  %v12021_v38 = vpop.f32.mrf.mxu1  ;;  %v9474_v63 = vld [vmem:[%s10969_s25 + $0xa0] sm:$0xf] }
 0x162   : > { %v5491_v47 = vsel %vm10982_vm3, %v5486_v14, %v5490_v53  ;;  %v5514_v60 = vrot.slane %v5512_v16, 5  ;;  %v5522_v5 = vshll.u32 %v9472_v55, 16  ;;  %v5526_v46 = vshrl.u32 %v9472_v55, 16  ;;  %v9475_v14 = vld [vmem:[%s10969_s25 + $0xa4] sm:$0xf] }
 0x163   : > { %14279 = vst [vmem:[#allocation42_spill] sm:$0xff] %v12016_v6  ;;  %v9610_v33 = vcombine.low %v5481_v24, %v5491_v47  ;;  %v5500_v30 = vrot.slane %v5499_v50, 4  ;;  %v5509_v40 = vor.u32 %v5508_v27, %v5504_v3  ;;  %v5518_v45 = vrot.slane %v5516_v49, 4  ;;  %v12027_v9 = vpop.f32.mrf.mxu0  ;;  %v12029_v43 = vpop.f32.mrf.mxu1  ;;  %v10859_v55 = vld [vmem:[%s10969_s25 + $0xa0] sm:$0xff]  }
 0x164   : > { %v5524_v22 = vrot.slane %v5522_v5, 5  ;;  %v5528_v6 = vrot.slane %v5526_v46, 4  ;;  %v5532_v57 = vshll.u32 %v9473_v54, 16  ;;  %v12033_v53 = vadd.f32 %v11897_v8, %v11947_v39  ;;  %v9476_v5 = vld [vmem:[%s10969_s25 + $0xa8] sm:$0xf] }
 0x165   : > { %10661 = vmatmul.mubr.msk.bf16.gmra.mxu1 %vm1945_vm0, %v9610_v33  ;;  %v5505_v24 = vsel %vm10982_vm3, %v5500_v30, %v5504_v3  ;;  %v5510_v16 = vrot.slane %v5509_v40, 4  ;;  %v5519_v50 = vor.u32 %v5518_v45, %v5514_v60  ;;  %v12042_v27 = vadd.f32 %v11907_v7, %v11954_v41  ;;  %v12044_v49 = vpop.f32.mrf.mxu0  ;;  %v12046_v54 = vpop.f32.mrf.mxu1 }
 0x166   : > { %14280 = vst [vmem:[#allocation43_spill] sm:$0xff] %v12033_v53  ;;  %v5529_v47 = vor.u32 %v5528_v6, %v5524_v22  ;;  %v5534_v8 = vrot.slane %v5532_v57, 5  ;;  %v12050_v39 = vadd.f32 %v11921_v26, %v11970_v18  ;;  %v5537_v46 = vshrl.u32 %v9474_v63, 16  ;;  %v9477_v18 = vld [vmem:[%s10969_s25 + $0xac] sm:$0xf] }
 0x167   : > { %14281 = vst [vmem:[#allocation44_spill] sm:$0xff] %v12042_v27  ;;  %v5515_v3 = vsel %vm10982_vm3, %v5510_v16, %v5514_v60  ;;  %v5520_v33 = vrot.slane %v5519_v50, 4  ;;  %10535 = vmatmul.mubr.msk.bf16.gmra.mxu0 %vm1945_vm0, %v10858_v10  ;;  %v5540_v7 = vshll.u32 %v9474_v63, 16  ;;  %v5546_v41 = vshll.u32 %v9475_v14, 16  ;;  %v12056_v30 = vpop.f32.mrf.mxu0  ;;  %v12058_v6 = vpop.f32.mrf.mxu1  ;;  %v9478_v63 = vld [vmem:[%s10969_s25 + $0xb0] sm:$0x1] }
 0x168   : > { %14282 = vst [vmem:[#allocation45_spill] sm:$0xff] %v12050_v39  ;;  %v9611_v57 = vcombine.low %v5505_v24, %v5515_v3  ;;  %v5530_v40 = vrot.slane %v5529_v47, 4  ;;  %v5539_v45 = vrot.slane %v5537_v46, 4  ;;  %v5550_v26 = vshrl.u32 %v9475_v14, 16  ;;  %10538 = vmatprep.mubr.msk.bf16.mxu0 %vm1945_vm0, %v10859_v55 }
 0x169   : > { %v5525_v60 = vsel %vm10982_vm3, %v5520_v33, %v5524_v22  ;;  %v5542_v16 = vrot.slane %v5540_v7, 5  ;;  %v5548_v50 = vrot.slane %v5546_v41, 5  ;;  %v5556_v10 = vshll.u32 %v9476_v5, 16  ;;  %v12065_v39 = vpop.f32.mrf.mxu0  ;;  %v12067_v27 = vpop.f32.mrf.mxu1  ;;  %v10860_v7 = vld [vmem:[%s10969_s25 + $0xa8] sm:$0xff]  }
 0x16a   : > { %10664 = vmatprep.mubr.msk.bf16.mxu1 %vm1945_vm0, %v9611_v57  ;;  %v5535_v14 = vsel %vm10982_vm3, %v5530_v40, %v5534_v8  ;;  %v5552_v55 = vrot.slane %v5550_v26, 4  ;;  %v5560_v24 = vshrl.u32 %v9476_v5, 16  ;;  %v12074_v22 = vadd.f32 %v11931_v12, %v11975_v1  ;;  %v9479_v26 = vld [vmem:[%s10969_s25 + $0xb4] sm:$0xf] }
 0x16b   : > { %v9612_v47 = vcombine.low %v5525_v60, %v5535_v14  ;;  %v5543_v46 = vor.u32 %v5542_v16, %v5539_v45  ;;  %v5558_v3 = vrot.slane %v5556_v10, 5  ;;  %v5566_v33 = vshll.u32 %v9477_v18, 16  ;;  %v12077_v41 = vpop.f32.mrf.mxu0  ;;  %v12079_v57 = vpop.f32.mrf.mxu1  ;;  %v10861_v5 = vld [vmem:[%s10969_s25 + $0xb4] sm:$0xff]  }
 0x16c   : > { %14283 = vst [vmem:[#allocation46_spill] sm:$0xff] %v12074_v22  ;;  %v5553_v53 = vor.u32 %v5552_v55, %v5548_v50  ;;  %v5562_v13 = vrot.slane %v5560_v24, 4  ;;  %v5570_v8 = vshrl.u32 %v9477_v18, 16  ;;  %v5576_v40 = vshll.u32 %v9478_v63, 16  ;;  %v9480_v16 = vld [vmem:[%s10969_s25 + $0xb8] sm:$0xf] }
 0x16d   : > { %10665 = vmatmul.mubr.msk.bf16.gmra.mxu1 %vm1945_vm0, %v9612_v47  ;;  %v5544_v12 = vrot.slane %v5543_v46, 4  ;;  %v5568_v1 = vrot.slane %v5566_v33, 5  ;;  %v12086_v45 = vadd.f32 %v11949_v42, %v11991_v62  ;;  %v12090_v60 = vadd.f32 %v11956_v59, %v12006_v48  ;;  %v12093_v10 = vpop.f32.mrf.mxu0  ;;  %v12095_v18 = vpop.f32.mrf.mxu1  ;;  %v9481_v48 = vld [vmem:[%s10969_s25 + $0xbc] sm:$0xf] }
 0x16e   : > { %v5554_v63 = vrot.slane %v5553_v53, 4  ;;  %v5563_v14 = vor.u32 %v5562_v13, %v5558_v3  ;;  %v5572_v55 = vrot.slane %v5570_v8, 4  ;;  %v5578_v24 = vrot.slane %v5576_v40, 5 }
 0x16f   : > { %14284 = vst [vmem:[#allocation47_spill] sm:$0xff] %v12086_v45  ;;  %14285 = vst [vmem:[#allocation48_spill] sm:$0xff] %v12090_v60  ;;  %v5549_v47 = vsel %vm10982_vm3, %v5544_v12, %v5548_v50  ;;  %10539 = vmatmul.mubr.msk.bf16.gmra.mxu0 %vm1945_vm0, %v10860_v7  ;;  %v12102_v42 = vadd.f32 %v11972_v34, %v12019_v11  ;;  %v5581_v59 = vshrl.u32 %v9479_v26, 16  ;;  %v5584_v62 = vshll.u32 %v9479_v26, 16  ;;  %v9482_v12 = vld [vmem:[%s10969_s25 + $0xc0] sm:$0xf] }
 0x170   : > { %v5559_v46 = vsel %vm10982_vm3, %v5554_v63, %v5558_v3  ;;  %v5564_v53 = vrot.slane %v5563_v14, 4  ;;  %v5573_v13 = vor.u32 %v5572_v55, %v5568_v1  ;;  %v5590_v33 = vshll.u32 %v9480_v16, 16  ;;  %10542 = vmatprep.mubr.msk.bf16.mxu0 %vm1945_vm0, %v10861_v5  ;;  %v12108_v8 = vpop.f32.mrf.mxu0  ;;  %v12110_v50 = vpop.f32.mrf.mxu1  ;;  %v10863_v60 = vld [vmem:[%s10969_s25 + $0xc8] sm:$0xff]  }
 0x171   : > { %14286 = vst [vmem:[#allocation49_spill] sm:$0xff] %v12102_v42  ;;  %v9613_v7 = vcombine.low %v5549_v47, %v5559_v46  ;;  %v5583_v40 = vrot.slane %v5581_v59, 4  ;;  %v5586_v34 = vrot.slane %v5584_v62, 5  ;;  %v5594_v11 = vshrl.u32 %v9480_v16, 16  ;;  %v9483_v62 = vld [vmem:[%s10969_s25 + $0xc4] sm:$0x1] }
 0x172   : > { %v5569_v26 = vsel %vm10982_vm3, %v5564_v53, %v5568_v1  ;;  %v5574_v3 = vrot.slane %v5573_v13, 4  ;;  %v5592_v63 = vrot.slane %v5590_v33, 5  ;;  %v5600_v14 = vshll.u32 %v9481_v48, 16  ;;  %v12115_v55 = vpop.f32.mrf.mxu0  ;;  %v12117_v5 = vpop.f32.mrf.mxu1  ;;  %v10862_v1 = vld [vmem:[%s10969_s25 + $0xbc] sm:$0xff]  }
 0x173   : > { %10668 = vmatprep.mubr.msk.bf16.mxu1 %vm1945_vm0, %v9613_v7  ;;  %v5587_v47 = vor.u32 %v5586_v34, %v5583_v40  ;;  %v5596_v46 = vrot.slane %v5594_v11, 4  ;;  %v5604_v59 = vshrl.u32 %v9481_v48, 16  ;;  %v12122_v16 = vadd.f32 %v11977_v44, %v12027_v9  ;;  %v9484_v44 = vld [vmem:[%s10969_s25 + $0xc8] sm:$0xf] }
 0x174   : > { %v5579_v53 = vsel %vm10982_vm3, %v5574_v3, %v5578_v24  ;;  %v5602_v13 = vrot.slane %v5600_v14, 5  ;;  %v5610_v33 = vshll.u32 %v9482_v12, 16  ;;  %v5614_v42 = vshrl.u32 %v9482_v12, 16  ;;  %v12129_v45 = vpop.f32.mrf.mxu0  ;;  %v12131_v7 = vpop.f32.mrf.mxu1  ;;  %v9485_v3 = vld [vmem:[%s10969_s25 + $0xcc] sm:$0xf] }
 0x175   : > { %14287 = vst [vmem:[#allocation50_spill] sm:$0xff] %v12122_v16  ;;  %v9614_v40 = vcombine.low %v5569_v26, %v5579_v53  ;;  %v5588_v48 = vrot.slane %v5587_v47, 4  ;;  %v5597_v34 = vor.u32 %v5596_v46, %v5592_v63  ;;  %v5606_v11 = vrot.slane %v5604_v59, 4 }
 0x176   : > { %v5612_v9 = vrot.slane %v5610_v33, 5  ;;  %v5616_v16 = vrot.slane %v5614_v42, 4  ;;  %v5620_v22 = vshll.u32 %v9483_v62, 16  ;;  %v12136_v24 = vadd.f32 %v11993_v4, %v12044_v49  ;;  %v12139_v12 = vpop.f32.mrf.mxu0  ;;  %v12141_v14 = vpop.f32.mrf.mxu1  ;;  %v9486_v62 = vld [vmem:[%s10969_s25 + $0xd0] sm:$0xf] }
 0x177   : > { %10669 = vmatmul.mubr.msk.bf16.gmra.mxu1 %vm1945_vm0, %v9614_v40  ;;  %v5593_v26 = vsel %vm10982_vm3, %v5588_v48, %v5592_v63  ;;  %v5598_v47 = vrot.slane %v5597_v34, 4  ;;  %v5607_v46 = vor.u32 %v5606_v11, %v5602_v13  ;;  %v12148_v42 = vadd.f32 %v12008_v25, %v12056_v30  ;;  %10543 = vmatmul.mubr.msk.bf16.gmra.mxu0 %vm1945_vm0, %v10862_v1  ;;  %v9487_v48 = vld [vmem:[%s10969_s25 + $0xd4] sm:$0xf] }
 0x178   : > { %14288 = vst [vmem:[#allocation51_spill] sm:$0xff] %v12136_v24  ;;  %v5617_v4 = vor.u32 %v5616_v16, %v5612_v9  ;;  %v5622_v49 = vrot.slane %v5620_v22, 5  ;;  %v12153_v59 = vadd.f32 %v12021_v38, %v12065_v39  ;;  %v5625_v53 = vshrl.u32 %v9484_v44, 16  ;;  %10546 = vmatprep.mubr.msk.bf16.mxu0 %vm1945_vm0, %v10863_v60  ;;  %v12157_v63 = vpop.f32.mrf.mxu0  ;;  %v12159_v33 = vpop.f32.mrf.mxu1 }
 0x179   : > { %14289 = vst [vmem:[#allocation52_spill] sm:$0xff] %v12148_v42  ;;  %v5603_v25 = vsel %vm10982_vm3, %v5598_v47, %v5602_v13  ;;  %v5608_v30 = vrot.slane %v5607_v46, 4  ;;  %v5628_v16 = vshll.u32 %v9484_v44, 16  ;;  %v5634_v22 = vshll.u32 %v9485_v3, 16  ;;  %v9488_v47 = vld [vmem:[%s10969_s25 + $0xd8] sm:$0x1] }
 0x17a   : > { %14290 = vst [vmem:[#allocation53_spill] sm:$0xff] %v12153_v59  ;;  %v9615_v1 = vcombine.low %v5593_v26, %v5603_v25  ;;  %v5618_v40 = vrot.slane %v5617_v4, 4  ;;  %v5627_v38 = vrot.slane %v5625_v53, 4  ;;  %v5638_v39 = vshrl.u32 %v9485_v3, 16  ;;  %v12164_v34 = vpop.f32.mrf.mxu0  ;;  %v12166_v60 = vpop.f32.mrf.mxu1  ;;  %v10864_v46 = vld [vmem:[%s10969_s25 + $0xd0] sm:$0xff]   ;;  %v10865_v53 = vld [vmem:[%s10969_s25 + $0xdc] sm:$0xff]  }
 0x17b   : > { %v5613_v11 = vsel %vm10982_vm3, %v5608_v30, %v5612_v9  ;;  %v5630_v59 = vrot.slane %v5628_v16, 5  ;;  %v5636_v42 = vrot.slane %v5634_v22, 5  ;;  %v5644_v13 = vshll.u32 %v9486_v62, 16 }
 0x17c   : > { %10672 = vmatprep.mubr.msk.bf16.mxu1 %vm1945_vm0, %v9615_v1  ;;  %v5623_v44 = vsel %vm10982_vm3, %v5618_v40, %v5622_v49  ;;  %v5640_v3 = vrot.slane %v5638_v39, 4  ;;  %v5648_v26 = vshrl.u32 %v9486_v62, 16  ;;  %v12177_v4 = vadd.f32 %v12029_v43, %v12077_v41  ;;  %v12180_v25 = vpop.f32.mrf.mxu0  ;;  %v12182_v9 = vpop.f32.mrf.mxu1  ;;  %v9489_v40 = vld [vmem:[%s10969_s25 + $0xdc] sm:$0xf] }
 0x17d   : > { %v9616_v30 = vcombine.low %v5613_v11, %v5623_v44  ;;  %v5631_v16 = vor.u32 %v5630_v59, %v5627_v38  ;;  %v5646_v22 = vrot.slane %v5644_v13, 5  ;;  %v5654_v1 = vshll.u32 %v9487_v48, 16 }
 0x17e   : > { %14291 = vst [vmem:[#allocation54_spill] sm:$0xff] %v12177_v4  ;;  %v5641_v24 = vor.u32 %v5640_v3, %v5636_v42  ;;  %v5650_v0 = vrot.slane %v5648_v26, 4  ;;  %v5658_v37 = vshrl.u32 %v9487_v48, 16  ;;  %v5664_v49 = vshll.u32 %v9488_v47, 16  ;;  %v12185_v62 = vpop.f32.mrf.mxu0  ;;  %v12187_v43 = vpop.f32.mrf.mxu1  ;;  %v9490_v48 = vld [vmem:[%s10969_s25 + $0xe0] sm:$0xf] }
 0x17f   : > { %10673 = vmatmul.mubr.msk.bf16.gmra.mxu1 %vm1945_vm0, %v9616_v30  ;;  %v5632_v41 = vrot.slane %v5631_v16, 4  ;;  %v5656_v39 = vrot.slane %v5654_v1, 5  ;;  %v12192_v59 = vadd.f32 %v12046_v54, %v12093_v10  ;;  %v12196_v38 = vadd.f32 %v12058_v6, %v12108_v8  ;;  %10547 = vmatmul.mubr.msk.bf16.gmra.mxu0 %vm1945_vm0, %v10864_v46  ;;  %v9491_v6 = vld [vmem:[%s10969_s25 + $0xe4] sm:$0xf] }
 0x180   : > { %v5642_v11 = vrot.slane %v5641_v24, 4  ;;  %v5651_v13 = vor.u32 %v5650_v0, %v5646_v22  ;;  %v5660_v47 = vrot.slane %v5658_v37, 4  ;;  %v5666_v44 = vrot.slane %v5664_v49, 5  ;;  %10550 = vmatprep.mubr.msk.bf16.mxu0 %vm1945_vm0, %v10865_v53  ;;  %v10866_v1 = vld [vmem:[%s10969_s25 + $0xe4] sm:$0xff]  }
 0x181   : > { %14292 = vst [vmem:[#allocation55_spill] sm:$0xff] %v12192_v59  ;;  %14293 = vst [vmem:[#allocation56_spill] sm:$0xff] %v12196_v38  ;;  %v5637_v3 = vsel %vm10982_vm3, %v5632_v41, %v5636_v42  ;;  %v12205_v54 = vadd.f32 %v12067_v27, %v12115_v55  ;;  %v5669_v10 = vshrl.u32 %v9489_v40, 16  ;;  %v5672_v8 = vshll.u32 %v9489_v40, 16  ;;  %v12208_v46 = vpop.f32.mrf.mxu0  ;;  %v12210_v24 = vpop.f32.mrf.mxu1  ;;  %v9492_v55 = vld [vmem:[%s10969_s25 + $0xe8] sm:$0xf] }
 0x182   : > { %v5647_v37 = vsel %vm10982_vm3, %v5642_v11, %v5646_v22  ;;  %v5652_v0 = vrot.slane %v5651_v13, 4  ;;  %v5661_v26 = vor.u32 %v5660_v47, %v5656_v39  ;;  %v5678_v53 = vshll.u32 %v9490_v48, 16  ;;  %v10867_v13 = vld [vmem:[%s10969_s25 + $0xf0] sm:$0xff]  }
 0x183   : > { %14294 = vst [vmem:[#allocation57_spill] sm:$0xff] %v12205_v54  ;;  %v9617_v42 = vcombine.low %v5637_v3, %v5647_v37  ;;  %v5671_v30 = vrot.slane %v5669_v10, 4  ;;  %v5674_v16 = vrot.slane %v5672_v8, 5  ;;  %v5682_v27 = vshrl.u32 %v9490_v48, 16  ;;  %v12216_v49 = vpop.f32.mrf.mxu0  ;;  %v12218_v40 = vpop.f32.mrf.mxu1  ;;  %v9493_v8 = vld [vmem:[%s10969_s25 + $0xec] sm:$0x1] }
 0x184   : > { %v5657_v41 = vsel %vm10982_vm3, %v5652_v0, %v5656_v39  ;;  %v5662_v54 = vrot.slane %v5661_v26, 4  ;;  %v5680_v22 = vrot.slane %v5678_v53, 5  ;;  %v5688_v11 = vshll.u32 %v9491_v6, 16 }
 0x185   : > { %10676 = vmatprep.mubr.msk.bf16.mxu1 %vm1945_vm0, %v9617_v42  ;;  %v5675_v47 = vor.u32 %v5674_v16, %v5671_v30  ;;  %v5684_v3 = vrot.slane %v5682_v27, 4  ;;  %v5692_v10 = vshrl.u32 %v9491_v6, 16  ;;  %v12226_v48 = vadd.f32 %v12079_v57, %v12129_v45  ;;  %v12229_v37 = vpop.f32.mrf.mxu0  ;;  %v12231_v38 = vpop.f32.mrf.mxu1  ;;  %v9494_v57 = vld [vmem:[%s10969_s25 + $0xf0] sm:$0xf] }
 0x186   : > { %v5667_v39 = vsel %vm10982_vm3, %v5662_v54, %v5666_v44  ;;  %v5690_v0 = vrot.slane %v5688_v11, 5  ;;  %v5698_v26 = vshll.u32 %v9492_v55, 16  ;;  %v5702_v53 = vshrl.u32 %v9492_v55, 16  ;;  %v9495_v54 = vld [vmem:[%s10969_s25 + $0xf4] sm:$0xf] }
 0x187   : > { %14295 = vst [vmem:[#allocation58_spill] sm:$0xff] %v12226_v48  ;;  %v9618_v42 = vcombine.low %v5657_v41, %v5667_v39  ;;  %v5676_v30 = vrot.slane %v5675_v47, 4  ;;  %v5685_v16 = vor.u32 %v5684_v3, %v5680_v22  ;;  %v5694_v6 = vrot.slane %v5692_v10, 4  ;;  %10551 = vmatmul.mubr.msk.bf16.gmra.mxu0 %vm1945_vm0, %v10866_v1  ;;  %v12237_v45 = vpop.f32.mrf.mxu0  ;;  %v12239_v27 = vpop.f32.mrf.mxu1  ;;  %v9496_v10 = vld [vmem:[%s10969_s25 + $0xf8] sm:$0xf] }
 0x188   : > { %v5700_v48 = vrot.slane %v5698_v26, 5  ;;  %v5704_v59 = vrot.slane %v5702_v53, 4  ;;  %v5708_v4 = vshll.u32 %v9493_v8, 16  ;;  %v12243_v44 = vadd.f32 %v12095_v18, %v12139_v12  ;;  %10554 = vmatprep.mubr.msk.bf16.mxu0 %vm1945_vm0, %v10867_v13  ;;  %v10868_v26 = vld [vmem:[%s10969_s25 + $0xf8] sm:$0xff]  }
 0x189   : > { %10677 = vmatmul.mubr.msk.bf16.gmra.mxu1 %vm1945_vm0, %v9618_v42  ;;  %v5681_v55 = vsel %vm10982_vm3, %v5676_v30, %v5680_v22  ;;  %v5686_v1 = vrot.slane %v5685_v16, 4  ;;  %v5695_v41 = vor.u32 %v5694_v6, %v5690_v0  ;;  %v12252_v11 = vadd.f32 %v12110_v50, %v12157_v63  ;;  %v12254_v47 = vpop.f32.mrf.mxu0  ;;  %v12256_v3 = vpop.f32.mrf.mxu1 }
 0x18a   : > { %14296 = vst [vmem:[#allocation59_spill] sm:$0xff] %v12243_v44  ;;  %v5705_v18 = vor.u32 %v5704_v59, %v5700_v48  ;;  %v5710_v12 = vrot.slane %v5708_v4, 5  ;;  %v12260_v13 = vadd.f32 %v12117_v5, %v12164_v34  ;;  %v5713_v22 = vshrl.u32 %v9494_v57, 16  ;;  %v9497_v5 = vld [vmem:[%s10969_s25 + $0xfc] sm:$0xf]  ;;  %v10869_v34 = vld [vmem:[%s10969_s25 + $0x104] sm:$0xff]  }
 0x18b   : > { %14297 = vst [vmem:[#allocation60_spill] sm:$0xff] %v12252_v11  ;;  %v5691_v8 = vsel %vm10982_vm3, %v5686_v1, %v5690_v0  ;;  %v5696_v39 = vrot.slane %v5695_v41, 4  ;;  %v5716_v50 = vshll.u32 %v9494_v57, 16  ;;  %v5722_v63 = vshll.u32 %v9495_v54, 16  ;;  %v12266_v53 = vpop.f32.mrf.mxu0  ;;  %v12268_v59 = vpop.f32.mrf.mxu1  ;;  %v9498_v41 = vld [vmem:[%s10969_s25 + $0x100] sm:$0x1] }
 0x18c   : > { %14298 = vst [vmem:[#allocation61_spill] sm:$0xff] %v12260_v13  ;;  %v9619_v4 = vcombine.low %v5681_v55, %v5691_v8  ;;  %v5706_v42 = vrot.slane %v5705_v18, 4  ;;  %v5715_v30 = vrot.slane %v5713_v22, 4  ;;  %v5726_v16 = vshrl.u32 %v9495_v54, 16 }
 0x18d   : > { %v5701_v6 = vsel %vm10982_vm3, %v5696_v39, %v5700_v48  ;;  %v5718_v13 = vrot.slane %v5716_v50, 5  ;;  %v5724_v0 = vrot.slane %v5722_v63, 5  ;;  %v5732_v1 = vshll.u32 %v9496_v10, 16  ;;  %v12275_v57 = vpop.f32.mrf.mxu0  ;;  %v12277_v11 = vpop.f32.mrf.mxu1 }
 0x18e   : > { %10680 = vmatprep.mubr.msk.bf16.mxu1 %vm1945_vm0, %v9619_v4  ;;  %v5711_v55 = vsel %vm10982_vm3, %v5706_v42, %v5710_v12  ;;  %v5728_v54 = vrot.slane %v5726_v16, 4  ;;  %v5736_v18 = vshrl.u32 %v9496_v10, 16  ;;  %v12284_v22 = vadd.f32 %v12131_v7, %v12180_v25  ;;  %v9499_v10 = vld [vmem:[%s10969_s25 + $0x104] sm:$0xf] }
 0x18f   : > { %v9620_v48 = vcombine.low %v5701_v6, %v5711_v55  ;;  %v5719_v8 = vor.u32 %v5718_v13, %v5715_v30  ;;  %v5734_v39 = vrot.slane %v5732_v1, 5  ;;  %v5742_v50 = vshll.u32 %v9497_v5, 16  ;;  %10555 = vmatmul.mubr.msk.bf16.gmra.mxu0 %vm1945_vm0, %v10868_v26  ;;  %v12287_v63 = vpop.f32.mrf.mxu0  ;;  %v12289_v4 = vpop.f32.mrf.mxu1  ;;  %v9500_v30 = vld [vmem:[%s10969_s25 + $0x108] sm:$0xf] }
 0x190   : > { %14299 = vst [vmem:[#allocation62_spill] sm:$0xff] %v12284_v22  ;;  %v5729_v44 = vor.u32 %v5728_v54, %v5724_v0  ;;  %v5738_v29 = vrot.slane %v5736_v18, 4  ;;  %v5746_v12 = vshrl.u32 %v9497_v5, 16  ;;  %v5752_v42 = vshll.u32 %v9498_v41, 16  ;;  %10558 = vmatprep.mubr.msk.bf16.mxu0 %vm1945_vm0, %v10869_v34 }
 0x191   : > { %10681 = vmatmul.mubr.msk.bf16.gmra.mxu1 %vm1945_vm0, %v9620_v48  ;;  %v5720_v7 = vrot.slane %v5719_v8, 4  ;;  %v5744_v25 = vrot.slane %v5742_v50, 5  ;;  %v12296_v13 = vadd.f32 %v12141_v14, %v12185_v62  ;;  %v12300_v26 = vadd.f32 %v12159_v33, %v12208_v46  ;;  %v9501_v33 = vld [vmem:[%s10969_s25 + $0x10c] sm:$0xf]  ;;  %v10871_v8 = vld [vmem:[%s10969_s25 + $0x118] sm:$0xff]  }
 0x192   : > { %v5730_v16 = vrot.slane %v5729_v44, 4  ;;  %v5739_v5 = vor.u32 %v5738_v29, %v5734_v39  ;;  %v5748_v6 = vrot.slane %v5746_v12, 4  ;;  %v5754_v1 = vrot.slane %v5752_v42, 5  ;;  %v12303_v34 = vpop.f32.mrf.mxu0  ;;  %v12305_v41 = vpop.f32.mrf.mxu1  ;;  %v10870_v44 = vld [vmem:[%s10969_s25 + $0x10c] sm:$0xff]  }
 0x193   : > { %14300 = vst [vmem:[#allocation63_spill] sm:$0xff] %v12296_v13  ;;  %14301 = vst [vmem:[#allocation64_spill] sm:$0xff] %v12300_v26  ;;  %v5725_v55 = vsel %vm10982_vm3, %v5720_v7, %v5724_v0  ;;  %v12311_v14 = vadd.f32 %v12166_v60, %v12216_v49  ;;  %v5757_v62 = vshrl.u32 %v9499_v10, 16  ;;  %v5760_v46 = vshll.u32 %v9499_v10, 16  ;;  %v9502_v7 = vld [vmem:[%s10969_s25 + $0x110] sm:$0xf] }
 0x194   : > { %v5735_v29 = vsel %vm10982_vm3, %v5730_v16, %v5734_v39  ;;  %v5740_v54 = vrot.slane %v5739_v5, 4  ;;  %v5749_v18 = vor.u32 %v5748_v6, %v5744_v25  ;;  %v5766_v48 = vshll.u32 %v9500_v30, 16  ;;  %v12318_v50 = vpop.f32.mrf.mxu0  ;;  %v12320_v12 = vpop.f32.mrf.mxu1 }
 0x195   : > { %14302 = vst [vmem:[#allocation65_spill] sm:$0xff] %v12311_v14  ;;  %v9621_v0 = vcombine.low %v5725_v55, %v5735_v29  ;;  %v5759_v60 = vrot.slane %v5757_v62, 4  ;;  %v5762_v49 = vrot.slane %v5760_v46, 5  ;;  %v5770_v42 = vshrl.u32 %v9500_v30, 16  ;;  %v9503_v62 = vld [vmem:[%s10969_s25 + $0x114] sm:$0x1] }
 0x196   : > { %v5745_v10 = vsel %vm10982_vm3, %v5740_v54, %v5744_v25  ;;  %v5750_v14 = vrot.slane %v5749_v18, 4  ;;  %v5768_v26 = vrot.slane %v5766_v48, 5  ;;  %v5776_v39 = vshll.u32 %v9501_v33, 16  ;;  %v12325_v16 = vpop.f32.mrf.mxu0  ;;  %v12327_v5 = vpop.f32.mrf.mxu1 }
 0x197   : > { %10684 = vmatprep.mubr.msk.bf16.mxu1 %vm1945_vm0, %v9621_v0  ;;  %v5763_v6 = vor.u32 %v5762_v49, %v5759_v60  ;;  %v5772_v13 = vrot.slane %v5770_v42, 4  ;;  %v5780_v55 = vshrl.u32 %v9501_v33, 16  ;;  %v12332_v30 = vadd.f32 %v12182_v9, %v12229_v37  ;;  %10559 = vmatmul.mubr.msk.bf16.gmra.mxu0 %vm1945_vm0, %v10870_v44  ;;  %v9504_v60 = vld [vmem:[%s10969_s25 + $0x118] sm:$0xf] }
 0x198   : > { %v5755_v25 = vsel %vm10982_vm3, %v5750_v14, %v5754_v1  ;;  %v5778_v46 = vrot.slane %v5776_v39, 5  ;;  %v5786_v29 = vshll.u32 %v9502_v7, 16  ;;  %v5790_v54 = vshrl.u32 %v9502_v7, 16  ;;  %10562 = vmatprep.mubr.msk.bf16.mxu0 %vm1945_vm0, %v10871_v8  ;;  %v12339_v18 = vpop.f32.mrf.mxu0  ;;  %v12341_v48 = vpop.f32.mrf.mxu1  ;;  %v9505_v8 = vld [vmem:[%s10969_s25 + $0x11c] sm:$0xf] }
 0x199   : > { %14303 = vst [vmem:[#allocation66_spill] sm:$0xff] %v12332_v30  ;;  %v9622_v33 = vcombine.low %v5745_v10, %v5755_v25  ;;  %v5764_v0 = vrot.slane %v5763_v6, 4  ;;  %v5773_v9 = vor.u32 %v5772_v13, %v5768_v26  ;;  %v5782_v37 = vrot.slane %v5780_v55, 4  ;;  %v10872_v55 = vld [vmem:[%s10969_s25 + $0x120] sm:$0xff]  }
 0x19a   : > { %v5788_v44 = vrot.slane %v5786_v29, 5  ;;  %v5792_v49 = vrot.slane %v5790_v54, 4  ;;  %v5796_v1 = vshll.u32 %v9503_v62, 16  ;;  %v12346_v14 = vadd.f32 %v12187_v43, %v12237_v45  ;;  %v12349_v42 = vpop.f32.mrf.mxu0  ;;  %v12351_v7 = vpop.f32.mrf.mxu1  ;;  %v9506_v25 = vld [vmem:[%s10969_s25 + $0x120] sm:$0xf]  ;;  %v10873_v54 = vld [vmem:[%s10969_s25 + $0x12c] sm:$0xff]  }
 0x19b   : > { %10685 = vmatmul.mubr.msk.bf16.gmra.mxu1 %vm1945_vm0, %v9622_v33  ;;  %v5769_v13 = vsel %vm10982_vm3, %v5764_v0, %v5768_v26  ;;  %v5774_v10 = vrot.slane %v5773_v9, 4  ;;  %v5783_v39 = vor.u32 %v5782_v37, %v5778_v46  ;;  %v12358_v6 = vadd.f32 %v12210_v24, %v12254_v47 }
 0x19c   : > { %14304 = vst [vmem:[#allocation67_spill] sm:$0xff] %v12346_v14  ;;  %v5793_v62 = vor.u32 %v5792_v49, %v5788_v44  ;;  %v5798_v43 = vrot.slane %v5796_v1, 5  ;;  %v12363_v45 = vadd.f32 %v12218_v40, %v12266_v53  ;;  %v5801_v29 = vshrl.u32 %v9504_v60, 16  ;;  %v12367_v33 = vpop.f32.mrf.mxu0  ;;  %v12369_v26 = vpop.f32.mrf.mxu1  ;;  %v9507_v40 = vld [vmem:[%s10969_s25 + $0x124] sm:$0xf] }
 0x19d   : > { %14305 = vst [vmem:[#allocation68_spill] sm:$0xff] %v12358_v6  ;;  %v5779_v24 = vsel %vm10982_vm3, %v5774_v10, %v5778_v46  ;;  %v5784_v47 = vrot.slane %v5783_v39, 4  ;;  %v5804_v0 = vshll.u32 %v9504_v60, 16  ;;  %v5810_v9 = vshll.u32 %v9505_v8, 16 }
 0x19e   : > { %14306 = vst [vmem:[#allocation69_spill] sm:$0xff] %v12363_v45  ;;  %v9623_v37 = vcombine.low %v5769_v13, %v5779_v24  ;;  %v5794_v49 = vrot.slane %v5793_v62, 4  ;;  %v5803_v1 = vrot.slane %v5801_v29, 4  ;;  %v5814_v6 = vshrl.u32 %v9505_v8, 16  ;;  %v12374_v53 = vpop.f32.mrf.mxu0  ;;  %v12376_v45 = vpop.f32.mrf.mxu1 }
 0x19f   : > { %v5789_v14 = vsel %vm10982_vm3, %v5784_v47, %v5788_v44  ;;  %v5806_v30 = vrot.slane %v5804_v0, 5  ;;  %v5812_v22 = vrot.slane %v5810_v9, 5  ;;  %v5820_v15 = vshll.u32 %v9506_v25, 16  ;;  %10563 = vmatmul.mubr.msk.bf16.gmra.mxu0 %vm1945_vm0, %v10872_v55  ;;  %v9509_v47 = vld [vmem:[%s10969_s25 + $0x12c] sm:$0xf] }
 0x1a0   : > { %10688 = vmatprep.mubr.msk.bf16.mxu1 %vm1945_vm0, %v9623_v37  ;;  %v5799_v46 = vsel %vm10982_vm3, %v5794_v49, %v5798_v43  ;;  %v5816_v60 = vrot.slane %v5814_v6, 4  ;;  %v5824_v8 = vshrl.u32 %v9506_v25, 16  ;;  %v12387_v13 = vadd.f32 %v12231_v38, %v12275_v57  ;;  %10566 = vmatprep.mubr.msk.bf16.mxu0 %vm1945_vm0, %v10873_v54  ;;  %v12390_v44 = vpop.f32.mrf.mxu0  ;;  %v12392_v10 = vpop.f32.mrf.mxu1 }
 0x1a1   : > { %v9624_v39 = vcombine.low %v5789_v14, %v5799_v46  ;;  %v5807_v55 = vor.u32 %v5806_v30, %v5803_v1  ;;  %v5822_v62 = vrot.slane %v5820_v15, 5  ;;  %v5830_v29 = vshll.u32 %v9507_v40, 16  ;;  %v9510_v15 = vld [vmem:[%s10969_s25 + $0x130] sm:$0xf]  ;;  %v10874_v14 = vld [vmem:[%s10969_s25 + $0x134] sm:$0xff]  }
 0x1a2   : > { %14307 = vst [vmem:[#allocation70_spill] sm:$0xff] %v12387_v13  ;;  %v5817_v24 = vor.u32 %v5816_v60, %v5812_v22  ;;  %v5826_v43 = vrot.slane %v5824_v8, 4  ;;  %v5834_v6 = vshrl.u32 %v9507_v40, 16  ;;  %v5840_v25 = vshll.u32 %v9508_v58, 16  ;;  %v10875_v40 = vld [vmem:[%s10969_s25 + $0x140] sm:$0xff]  }
 0x1a3   : > { %10689 = vmatmul.mubr.msk.bf16.gmra.mxu1 %vm1945_vm0, %v9624_v39  ;;  %v5808_v38 = vrot.slane %v5807_v55, 4  ;;  %v5832_v57 = vrot.slane %v5830_v29, 5  ;;  %v12398_v54 = vadd.f32 %v12239_v27, %v12287_v63  ;;  %v12402_v30 = vadd.f32 %v12256_v3, %v12303_v34  ;;  %v12406_v0 = vpop.f32.mrf.mxu0  ;;  %v12408_v9 = vpop.f32.mrf.mxu1  ;;  %v9511_v3 = vld [vmem:[%s10969_s25 + $0x134] sm:$0xf] }
 0x1a4   : > { %v5818_v58 = vrot.slane %v5817_v24, 4  ;;  %v5827_v37 = vor.u32 %v5826_v43, %v5822_v62  ;;  %v5836_v49 = vrot.slane %v5834_v6, 4  ;;  %v5842_v1 = vrot.slane %v5840_v25, 5  ;;  %v9519_v13 = vld [vmem:[%s10969_s25 + $0x154] sm:$0xf] }
 0x1a5   : > { %14308 = vst [vmem:[#allocation71_spill] sm:$0xff] %v12398_v54  ;;  %14309 = vst [vmem:[#allocation72_spill] sm:$0xff] %v12402_v30  ;;  %v5813_v27 = vsel %vm10982_vm3, %v5808_v38, %v5812_v22  ;;  %v12415_v63 = vadd.f32 %v12268_v59, %v12318_v50  ;;  %v5845_v34 = vshrl.u32 %v9509_v47, 16  ;;  %v5848_v46 = vshll.u32 %v9509_v47, 16  ;;  %v12418_v60 = vpop.f32.mrf.mxu0  ;;  %v12420_v8 = vpop.f32.mrf.mxu1  ;;  %v9512_v59 = vld [vmem:[%s10969_s25 + $0x138] sm:$0xf] }
 0x1a6   : > { %v5823_v39 = vsel %vm10982_vm3, %v5818_v58, %v5822_v62  ;;  %v5828_v55 = vrot.slane %v5827_v37, 4  ;;  %v5837_v29 = vor.u32 %v5836_v49, %v5832_v57  ;;  %v5854_v24 = vshll.u32 %v9510_v15, 16 }
 0x1a7   : > { %14310 = vst [vmem:[#allocation73_spill] sm:$0xff] %v12415_v63  ;;  %v9625_v43 = vcombine.low %v5813_v27, %v5823_v39  ;;  %v5847_v6 = vrot.slane %v5845_v34, 4  ;;  %v5850_v22 = vrot.slane %v5848_v46, 5  ;;  %v5858_v25 = vshrl.u32 %v9510_v15, 16  ;;  %10567 = vmatmul.mubr.msk.bf16.gmra.mxu0 %vm1945_vm0, %v10874_v14  ;;  %v12426_v50 = vpop.f32.mrf.mxu0  ;;  %v12428_v47 = vpop.f32.mrf.mxu1  ;;  %v9513_v27 = vld [vmem:[%s10969_s25 + $0x13c] sm:$0x1] }
 0x1a8   : > { %v5833_v38 = vsel %vm10982_vm3, %v5828_v55, %v5832_v57  ;;  %v5838_v63 = vrot.slane %v5837_v29, 4  ;;  %v5856_v62 = vrot.slane %v5854_v24, 5  ;;  %v5864_v58 = vshll.u32 %v9511_v3, 16  ;;  %10570 = vmatprep.mubr.msk.bf16.mxu0 %vm1945_vm0, %v10875_v40 }
 0x1a9   : > { %10692 = vmatprep.mubr.msk.bf16.mxu1 %vm1945_vm0, %v9625_v43  ;;  %v5851_v37 = vor.u32 %v5850_v22, %v5847_v6  ;;  %v5860_v15 = vrot.slane %v5858_v25, 4  ;;  %v5868_v49 = vshrl.u32 %v9511_v3, 16  ;;  %v12436_v14 = vadd.f32 %v12277_v11, %v12325_v16  ;;  %v12439_v34 = vpop.f32.mrf.mxu0  ;;  %v12441_v57 = vpop.f32.mrf.mxu1  ;;  %v9514_v6 = vld [vmem:[%s10969_s25 + $0x140] sm:$0xf]  ;;  %v10876_v11 = vld [vmem:[%s10969_s25 + $0x148] sm:$0xff]  }
 0x1aa   : > { %v5843_v40 = vsel %vm10982_vm3, %v5838_v63, %v5842_v1  ;;  %v5866_v46 = vrot.slane %v5864_v58, 5  ;;  %v5874_v39 = vshll.u32 %v9512_v59, 16  ;;  %v5878_v55 = vshrl.u32 %v9512_v59, 16  ;;  %v9515_v1 = vld [vmem:[%s10969_s25 + $0x144] sm:$0xf]  ;;  %v10877_v63 = vld [vmem:[%s10969_s25 + $0x154] sm:$0xff]  }
 0x1ab   : > { %14311 = vst [vmem:[#allocation74_spill] sm:$0xff] %v12436_v14  ;;  %v9626_v29 = vcombine.low %v5833_v38, %v5843_v40  ;;  %v5852_v24 = vrot.slane %v5851_v37, 4  ;;  %v5861_v3 = vor.u32 %v5860_v15, %v5856_v62  ;;  %v5870_v43 = vrot.slane %v5868_v49, 4  ;;  %v12447_v16 = vpop.f32.mrf.mxu0  ;;  %v9516_v40 = vld [vmem:[%s10969_s25 + $0x148] sm:$0xf] }
 0x1ac   : > { %v5876_v22 = vrot.slane %v5874_v39, 5  ;;  %v5880_v25 = vrot.slane %v5878_v55, 4  ;;  %v5884_v14 = vshll.u32 %v9513_v27, 16  ;;  %v12451_v30 = vadd.f32 %v12289_v4, %v12339_v18  ;;  %v12455_v58 = vpop.f32.mrf.mxu1 }
 0x1ad   : > { %10693 = vmatmul.mubr.msk.bf16.gmra.mxu1 %vm1945_vm0, %v9626_v29  ;;  %v5857_v59 = vsel %vm10982_vm3, %v5852_v24, %v5856_v62  ;;  %v5862_v38 = vrot.slane %v5861_v3, 4  ;;  %v5871_v37 = vor.u32 %v5870_v43, %v5866_v46  ;;  %v12462_v15 = vadd.f32 %v12305_v41, %v12349_v42  ;;  %v12464_v49 = vpop.f32.mrf.mxu0 }
 0x1ae   : > { %14312 = vst [vmem:[#allocation75_spill] sm:$0xff] %v12451_v30  ;;  %v5881_v27 = vor.u32 %v5880_v25, %v5876_v22  ;;  %v5886_v4 = vrot.slane %v5884_v14, 5  ;;  %v12468_v18 = vadd.f32 %v12320_v12, %v12367_v33  ;;  %v5889_v39 = vshrl.u32 %v9514_v6, 16  ;;  %v12471_v55 = vpop.f32.mrf.mxu1  ;;  %v9517_v33 = vld [vmem:[%s10969_s25 + $0x14c] sm:$0xf] }
 0x1af   : > { %14313 = vst [vmem:[#allocation76_spill] sm:$0xff] %v12462_v15  ;;  %v5867_v62 = vsel %vm10982_vm3, %v5862_v38, %v5866_v46  ;;  %v5872_v29 = vrot.slane %v5871_v37, 4  ;;  %v5892_v41 = vshll.u32 %v9514_v6, 16  ;;  %v5898_v42 = vshll.u32 %v9515_v1, 16  ;;  %10571 = vmatmul.mubr.msk.bf16.gmra.mxu0 %vm1945_vm0, %v10876_v11  ;;  %v12476_v24 = vpop.f32.mrf.mxu0 }
 0x1b0   : > { %14314 = vst [vmem:[#allocation77_spill] sm:$0xff] %v12468_v18  ;;  %v9627_v14 = vcombine.low %v5857_v59, %v5867_v62  ;;  %v5882_v3 = vrot.slane %v5881_v27, 4  ;;  %v5891_v43 = vrot.slane %v5889_v39, 4  ;;  %v5902_v12 = vshrl.u32 %v9515_v1, 16  ;;  %10574 = vmatprep.mubr.msk.bf16.mxu0 %vm1945_vm0, %v10877_v63  ;;  %v12480_v25 = vpop.f32.mrf.mxu1  ;;  %v9518_v18 = vld [vmem:[%s10969_s25 + $0x150] sm:$0x1] }
 0x1b1   : > { %v5877_v46 = vsel %vm10982_vm3, %v5872_v29, %v5876_v22  ;;  %v5894_v38 = vrot.slane %v5892_v41, 5  ;;  %v5900_v6 = vrot.slane %v5898_v42, 5  ;;  %v5908_v37 = vshll.u32 %v9516_v40, 16  ;;  %v12485_v11 = vpop.f32.mrf.mxu0  ;;  %v10878_v42 = vld [vmem:[%s10969_s25 + $0x15c] sm:$0xff]  }
 0x1b2   : > { %10696 = vmatprep.mubr.msk.bf16.mxu1 %vm1945_vm0, %v9627_v14  ;;  %v5887_v1 = vsel %vm10982_vm3, %v5882_v3, %v5886_v4  ;;  %v5904_v63 = vrot.slane %v5902_v12, 4  ;;  %v5912_v59 = vshrl.u32 %v9516_v40, 16  ;;  %v12492_v27 = vadd.f32 %v12327_v5, %v12374_v53  ;;  %v12494_v22 = vpop.f32.mrf.mxu1  ;;  %v10879_v4 = vld [vmem:[%s10969_s25 + $0x168] sm:$0xff]  }
 0x1b3   : > { %v9628_v39 = vcombine.low %v5877_v46, %v5887_v1  ;;  %v5895_v62 = vor.u32 %v5894_v38, %v5891_v43  ;;  %v5910_v29 = vrot.slane %v5908_v37, 5  ;;  %v5918_v41 = vshll.u32 %v9517_v33, 16  ;;  %v9520_v43 = vld [vmem:[%s10969_s25 + $0x158] sm:$0xf] }
 0x1b4   : > { %14315 = vst [vmem:[#allocation78_spill] sm:$0xff] %v12492_v27  ;;  %v5905_v15 = vor.u32 %v5904_v63, %v5900_v6  ;;  %v5914_v14 = vrot.slane %v5912_v59, 4  ;;  %v5922_v30 = vshrl.u32 %v9517_v33, 16  ;;  %v5928_v54 = vshll.u32 %v9518_v18, 16 }
 0x1b5   : > { %10697 = vmatmul.mubr.msk.bf16.gmra.mxu1 %vm1945_vm0, %v9628_v39  ;;  %v5896_v40 = vrot.slane %v5895_v62, 4  ;;  %v5920_v5 = vrot.slane %v5918_v41, 5  ;;  %v12502_v53 = vadd.f32 %v12341_v48, %v12390_v44  ;;  %v12506_v3 = vadd.f32 %v12351_v7, %v12406_v0  ;;  %v12509_v12 = vpop.f32.mrf.mxu0  ;;  %v9521_v44 = vld [vmem:[%s10969_s25 + $0x15c] sm:$0xf]  ;;  %v9522_v62 = vld [vmem:[%s10969_s25 + $0x160] sm:$0xf] }
 0x1b6   : > { %v5906_v33 = vrot.slane %v5905_v15, 4  ;;  %v5915_v18 = vor.u32 %v5914_v14, %v5910_v29  ;;  %v5924_v46 = vrot.slane %v5922_v30, 4  ;;  %v5930_v38 = vrot.slane %v5928_v54, 5  ;;  %v12511_v37 = vpop.f32.mrf.mxu1 }
 0x1b7   : > { %14316 = vst [vmem:[#allocation79_spill] sm:$0xff] %v12502_v53  ;;  %14317 = vst [vmem:[#allocation80_spill] sm:$0xff] %v12506_v3  ;;  %v5901_v1 = vsel %vm10982_vm3, %v5896_v40, %v5900_v6  ;;  %v12517_v48 = vadd.f32 %v12369_v26, %v12418_v60  ;;  %v5933_v7 = vshrl.u32 %v9519_v13, 16  ;;  %v5936_v0 = vshll.u32 %v9519_v13, 16  ;;  %10575 = vmatmul.mubr.msk.bf16.gmra.mxu0 %vm1945_vm0, %v10878_v42  ;;  %v12521_v63 = vpop.f32.mrf.mxu0 }
 0x1b8   : > { %v5911_v54 = vsel %vm10982_vm3, %v5906_v33, %v5910_v29  ;;  %v5916_v30 = vrot.slane %v5915_v18, 4  ;;  %v5925_v15 = vor.u32 %v5924_v46, %v5920_v5  ;;  %v5942_v59 = vshll.u32 %v9520_v43, 16  ;;  %10578 = vmatprep.mubr.msk.bf16.mxu0 %vm1945_vm0, %v10879_v4  ;;  %v12526_v6 = vpop.f32.mrf.mxu1 }
 0x1b9   : > { %14318 = vst [vmem:[#allocation81_spill] sm:$0xff] %v12517_v48  ;;  %v9629_v26 = vcombine.low %v5901_v1, %v5911_v54  ;;  %v5935_v60 = vrot.slane %v5933_v7, 4  ;;  %v5938_v39 = vrot.slane %v5936_v0, 5  ;;  %v5946_v13 = vshrl.u32 %v9520_v43, 16  ;;  %v12529_v41 = vpop.f32.mrf.mxu0  ;;  %v9523_v1 = vld [vmem:[%s10969_s25 + $0x164] sm:$0x1] }
 0x1ba   : > { %v5921_v42 = vsel %vm10982_vm3, %v5916_v30, %v5920_v5  ;;  %v5926_v29 = vrot.slane %v5925_v15, 4  ;;  %v5944_v14 = vrot.slane %v5942_v59, 5  ;;  %v5952_v40 = vshll.u32 %v9521_v44, 16  ;;  %v12533_v33 = vpop.f32.mrf.mxu1  ;;  %v10880_v7 = vld [vmem:[%s10969_s25 + $0x170] sm:$0xff]   ;;  %v10881_v59 = vld [vmem:[%s10969_s25 + $0x17c] sm:$0xff]  }
 0x1bb   : > { %10700 = vmatprep.mubr.msk.bf16.mxu1 %vm1945_vm0, %v9629_v26  ;;  %v5939_v4 = vor.u32 %v5938_v39, %v5935_v60  ;;  %v5948_v18 = vrot.slane %v5946_v13, 4  ;;  %v5956_v46 = vshrl.u32 %v9521_v44, 16  ;;  %v12538_v43 = vadd.f32 %v12376_v45, %v12426_v50  ;;  %v12542_v0 = vpop.f32.mrf.mxu0  ;;  %v9524_v45 = vld [vmem:[%s10969_s25 + $0x168] sm:$0xf] }
 0x1bc   : > { %v5931_v5 = vsel %vm10982_vm3, %v5926_v29, %v5930_v38  ;;  %v5954_v54 = vrot.slane %v5952_v40, 5  ;;  %v5962_v30 = vshll.u32 %v9522_v62, 16  ;;  %v5966_v15 = vshrl.u32 %v9522_v62, 16  ;;  %v12547_v26 = vpop.f32.mrf.mxu1  ;;  %v9525_v38 = vld [vmem:[%s10969_s25 + $0x16c] sm:$0xf] }
 0x1bd   : > { %14319 = vst [vmem:[#allocation82_spill] sm:$0xff] %v12538_v43  ;;  %v9630_v60 = vcombine.low %v5921_v42, %v5931_v5  ;;  %v5940_v44 = vrot.slane %v5939_v4, 4  ;;  %v5949_v39 = vor.u32 %v5948_v18, %v5944_v14  ;;  %v5958_v13 = vrot.slane %v5956_v46, 4 }
 0x1be   : > { %v5964_v50 = vrot.slane %v5962_v30, 5  ;;  %v5968_v43 = vrot.slane %v5966_v15, 4  ;;  %v5972_v48 = vshll.u32 %v9523_v1, 16  ;;  %v12552_v3 = vadd.f32 %v12392_v10, %v12439_v34  ;;  %v12555_v29 = vpop.f32.mrf.mxu0  ;;  %v9526_v1 = vld [vmem:[%s10969_s25 + $0x170] sm:$0xf] }
 0x1bf   : > { %10701 = vmatmul.mubr.msk.bf16.gmra.mxu1 %vm1945_vm0, %v9630_v60  ;;  %v5945_v62 = vsel %vm10982_vm3, %v5940_v44, %v5944_v14  ;;  %v5950_v42 = vrot.slane %v5949_v39, 4  ;;  %v5959_v40 = vor.u32 %v5958_v13, %v5954_v54  ;;  %v12562_v4 = vadd.f32 %v12408_v9, %v12447_v16  ;;  %10579 = vmatmul.mubr.msk.bf16.gmra.mxu0 %vm1945_vm0, %v10880_v7  ;;  %v12565_v18 = vpop.f32.mrf.mxu1  ;;  %v9527_v60 = vld [vmem:[%s10969_s25 + $0x174] sm:$0xf] }
 0x1c0   : > { %14320 = vst [vmem:[#allocation83_spill] sm:$0xff] %v12552_v3  ;;  %v5969_v10 = vor.u32 %v5968_v43, %v5964_v50  ;;  %v5974_v34 = vrot.slane %v5972_v48, 5  ;;  %v12569_v46 = vadd.f32 %v12420_v8, %v12464_v49  ;;  %v5977_v5 = vshrl.u32 %v9524_v45, 16  ;;  %10582 = vmatprep.mubr.msk.bf16.mxu0 %vm1945_vm0, %v10881_v59  ;;  %v12573_v14 = vpop.f32.mrf.mxu0 }
 0x1c1   : > { %14321 = vst [vmem:[#allocation84_spill] sm:$0xff] %v12562_v4  ;;  %v5955_v9 = vsel %vm10982_vm3, %v5950_v42, %v5954_v54  ;;  %v5960_v16 = vrot.slane %v5959_v40, 4  ;;  %v5980_v7 = vshll.u32 %v9524_v45, 16  ;;  %v5986_v43 = vshll.u32 %v9525_v38, 16  ;;  %v12577_v30 = vpop.f32.mrf.mxu1  ;;  %v9528_v42 = vld [vmem:[%s10969_s25 + $0x178] sm:$0x1] }
 0x1c2   : > { %14322 = vst [vmem:[#allocation85_spill] sm:$0xff] %v12569_v46  ;;  %v9631_v48 = vcombine.low %v5945_v62, %v5955_v9  ;;  %v5970_v15 = vrot.slane %v5969_v10, 4  ;;  %v5979_v8 = vrot.slane %v5977_v5, 4  ;;  %v5990_v49 = vshrl.u32 %v9525_v38, 16  ;;  %v12580_v44 = vpop.f32.mrf.mxu0  ;;  %v10882_v40 = vld [vmem:[%s10969_s25 + $0x184] sm:$0xff]   ;;  %v10883_v9 = vld [vmem:[%s10969_s25 + $0x190] sm:$0xff]  }
 0x1c3   : > { %v5965_v59 = vsel %vm10982_vm3, %v5960_v16, %v5964_v50  ;;  %v5982_v39 = vrot.slane %v5980_v7, 5  ;;  %v5988_v13 = vrot.slane %v5986_v43, 5  ;;  %v5996_v54 = vshll.u32 %v9526_v1, 16  ;;  %v12586_v45 = vpop.f32.mrf.mxu1 }
 0x1c4   : > { %10704 = vmatprep.mubr.msk.bf16.mxu1 %vm1945_vm0, %v9631_v48  ;;  %v5975_v38 = vsel %vm10982_vm3, %v5970_v15, %v5974_v34  ;;  %v5992_v62 = vrot.slane %v5990_v49, 4  ;;  %v6000_v10 = vshrl.u32 %v9526_v1, 16  ;;  %v12593_v5 = vadd.f32 %v12428_v47, %v12476_v24  ;;  %v12595_v50 = vpop.f32.mrf.mxu0  ;;  %v9529_v15 = vld [vmem:[%s10969_s25 + $0x17c] sm:$0xf]  ;;  %v9530_v49 = vld [vmem:[%s10969_s25 + $0x180] sm:$0xf] }
 0x1c5   : > { %v9632_v16 = vcombine.low %v5965_v59, %v5975_v38  ;;  %v5983_v7 = vor.u32 %v5982_v39, %v5979_v8  ;;  %v5998_v43 = vrot.slane %v5996_v54, 5  ;;  %v6006_v46 = vshll.u32 %v9527_v60, 16  ;;  %v12598_v4 = vpop.f32.mrf.mxu1 }
 0x1c6   : > { %14323 = vst [vmem:[#allocation86_spill] sm:$0xff] %v12593_v5  ;;  %v5993_v48 = vor.u32 %v5992_v62, %v5988_v13  ;;  %v6002_v3 = vrot.slane %v6000_v10, 4  ;;  %v6010_v53 = vshrl.u32 %v9527_v60, 16  ;;  %v6016_v34 = vshll.u32 %v9528_v42, 16  ;;  %v14356_v5 = vld [vmem:[#allocation2_spill] sm:$0xff] }
 0x1c7   : > { %10705 = vmatmul.mubr.msk.bf16.gmra.mxu1 %vm1945_vm0, %v9632_v16  ;;  %v5984_v47 = vrot.slane %v5983_v7, 4  ;;  %v6008_v24 = vrot.slane %v6006_v46, 5  ;;  %v12604_v1 = vadd.f32 %v12441_v57, %v12485_v11  ;;  %v12608_v8 = vadd.f32 %v12455_v58, %v12509_v12  ;;  %10583 = vmatmul.mubr.msk.bf16.gmra.mxu0 %vm1945_vm0, %v10882_v40  ;;  %v9531_v11 = vld [vmem:[%s10969_s25 + $0x184] sm:$0xf] }
 0x1c8   : > { %v5994_v59 = vrot.slane %v5993_v48, 4  ;;  %v6003_v60 = vor.u32 %v6002_v3, %v5998_v43  ;;  %v6012_v39 = vrot.slane %v6010_v53, 4  ;;  %v6018_v54 = vrot.slane %v6016_v34, 5  ;;  %10586 = vmatprep.mubr.msk.bf16.mxu0 %vm1945_vm0, %v10883_v9  ;;  %v12613_v42 = vpop.f32.mrf.mxu0  ;;  %v12615_v46 = vpop.f32.mrf.mxu1  ;;  %v10884_v48 = vld [vmem:[%s10969_s25 + $0x198] sm:$0xff]  }
 0x1c9   : > { %14324 = vst [vmem:[#allocation87_spill] sm:$0xff] %v12604_v1  ;;  %14325 = vst [vmem:[#allocation88_spill] sm:$0xff] %v12608_v8  ;;  %v5989_v57 = vsel %vm10982_vm3, %v5984_v47, %v5988_v13  ;;  %v12621_v58 = vadd.f32 %v12471_v55, %v12521_v63  ;;  %v6021_v12 = vshrl.u32 %v9529_v15, 16  ;;  %v6024_v3 = vshll.u32 %v9529_v15, 16  ;;  %v9532_v63 = vld [vmem:[%s10969_s25 + $0x188] sm:$0xf] }
 0x1ca   : > { %v5999_v53 = vsel %vm10982_vm3, %v5994_v59, %v5998_v43  ;;  %v6004_v40 = vrot.slane %v6003_v60, 4  ;;  %v6013_v38 = vor.u32 %v6012_v39, %v6008_v24  ;;  %v6030_v62 = vshll.u32 %v9530_v49, 16  ;;  %v12626_v10 = vpop.f32.mrf.mxu0  ;;  %v12628_v9 = vpop.f32.mrf.mxu1  ;;  %v10885_v60 = vld [vmem:[%s10969_s25 + $0x1a4] sm:$0xff]  }
 0x1cb   : > { %14326 = vst [vmem:[#allocation89_spill] sm:$0xff] %v12621_v58  ;;  %v9633_v13 = vcombine.low %v5989_v57, %v5999_v53  ;;  %v6023_v16 = vrot.slane %v6021_v12, 4  ;;  %v6026_v7 = vrot.slane %v6024_v3, 5  ;;  %v6034_v55 = vshrl.u32 %v9530_v49, 16  ;;  %v9533_v53 = vld [vmem:[%s10969_s25 + $0x18c] sm:$0x1] }
 0x1cc   : > { %v6009_v34 = vsel %vm10982_vm3, %v6004_v40, %v6008_v24  ;;  %v6014_v15 = vrot.slane %v6013_v38, 4  ;;  %v6032_v43 = vrot.slane %v6030_v62, 5  ;;  %v6040_v47 = vshll.u32 %v9531_v11, 16  ;;  %v12634_v59 = vpop.f32.mrf.mxu0  ;;  %v12637_v39 = vpop.f32.mrf.mxu1 }
 0x1cd   : > { %10708 = vmatprep.mubr.msk.bf16.mxu1 %vm1945_vm0, %v9633_v13  ;;  %v6027_v57 = vor.u32 %v6026_v7, %v6023_v16  ;;  %v6036_v12 = vrot.slane %v6034_v55, 4  ;;  %v6044_v3 = vshrl.u32 %v9531_v11, 16  ;;  %v12642_v49 = vadd.f32 %v12480_v25, %v12529_v41  ;;  %v9534_v55 = vld [vmem:[%s10969_s25 + $0x190] sm:$0xf] }
 0x1ce   : > { %v6019_v24 = vsel %vm10982_vm3, %v6014_v15, %v6018_v54  ;;  %v6042_v40 = vrot.slane %v6040_v47, 5  ;;  %v6050_v38 = vshll.u32 %v9532_v63, 16  ;;  %v6054_v62 = vshrl.u32 %v9532_v63, 16  ;;  %v12647_v58 = vpop.f32.mrf.mxu0  ;;  %v12649_v8 = vpop.f32.mrf.mxu1  ;;  %v9535_v63 = vld [vmem:[%s10969_s25 + $0x194] sm:$0xf] }
 0x1cf   : > { %14327 = vst [vmem:[#allocation90_spill] sm:$0xff] %v12642_v49  ;;  %v9634_v13 = vcombine.low %v6009_v34, %v6019_v24  ;;  %v6028_v16 = vrot.slane %v6027_v57, 4  ;;  %v6037_v7 = vor.u32 %v6036_v12, %v6032_v43  ;;  %v6046_v11 = vrot.slane %v6044_v3, 4  ;;  %10587 = vmatmul.mubr.msk.bf16.gmra.mxu0 %vm1945_vm0, %v10884_v48 }
 0x1d0   : > { %v6052_v25 = vrot.slane %v6050_v38, 5  ;;  %v6056_v41 = vrot.slane %v6054_v62, 4  ;;  %v6060_v49 = vshll.u32 %v9533_v53, 16  ;;  %v12655_v54 = vadd.f32 %v12494_v22, %v12542_v0  ;;  %10590 = vmatprep.mubr.msk.bf16.mxu0 %vm1945_vm0, %v10885_v60  ;;  %v9536_v0 = vld [vmem:[%s10969_s25 + $0x198] sm:$0xf]  ;;  %v10886_v38 = vld [vmem:[%s10969_s25 + $0x1ac] sm:$0xff]  }
 0x1d1   : > { %10709 = vmatmul.mubr.msk.bf16.gmra.mxu1 %vm1945_vm0, %v9634_v13  ;;  %v6033_v34 = vsel %vm10982_vm3, %v6028_v16, %v6032_v43  ;;  %v6038_v15 = vrot.slane %v6037_v7, 4  ;;  %v6047_v47 = vor.u32 %v6046_v11, %v6042_v40  ;;  %v12664_v48 = vadd.f32 %v12511_v37, %v12555_v29  ;;  %v10887_v11 = vld [vmem:[%s10969_s25 + $0x1b8] sm:$0xff]  }
 0x1d2   : > { %14328 = vst [vmem:[#allocation91_spill] sm:$0xff] %v12655_v54  ;;  %v6057_v57 = vor.u32 %v6056_v41, %v6052_v25  ;;  %v6062_v12 = vrot.slane %v6060_v49, 5  ;;  %v12668_v22 = vadd.f32 %v12526_v6, %v12573_v14  ;;  %v6065_v60 = vshrl.u32 %v9534_v55, 16  ;;  %v12671_v3 = vpop.f32.mrf.mxu0  ;;  %v12673_v53 = vpop.f32.mrf.mxu1  ;;  %v9537_v14 = vld [vmem:[%s10969_s25 + $0x19c] sm:$0xf] }
 0x1d3   : > { %14329 = vst [vmem:[#allocation92_spill] sm:$0xff] %v12664_v48  ;;  %v6043_v43 = vsel %vm10982_vm3, %v6038_v15, %v6042_v40  ;;  %v6048_v24 = vrot.slane %v6047_v47, 4  ;;  %v6068_v37 = vshll.u32 %v9534_v55, 16  ;;  %v6074_v29 = vshll.u32 %v9535_v63, 16  ;;  %v9538_v47 = vld [vmem:[%s10969_s25 + $0x1a0] sm:$0x1] }
 0x1d4   : > { %14330 = vst [vmem:[#allocation93_spill] sm:$0xff] %v12668_v22  ;;  %v9635_v49 = vcombine.low %v6033_v34, %v6043_v43  ;;  %v6058_v62 = vrot.slane %v6057_v57, 4  ;;  %v6067_v13 = vrot.slane %v6065_v60, 4  ;;  %v6078_v6 = vshrl.u32 %v9535_v63, 16  ;;  %v12679_v16 = vpop.f32.mrf.mxu0  ;;  %v12681_v7 = vpop.f32.mrf.mxu1 }
 0x1d5   : > { %v6053_v41 = vsel %vm10982_vm3, %v6048_v24, %v6052_v25  ;;  %v6070_v22 = vrot.slane %v6068_v37, 5  ;;  %v6076_v40 = vrot.slane %v6074_v29, 5  ;;  %v6084_v15 = vshll.u32 %v9536_v0, 16 }
 0x1d6   : > { %10712 = vmatprep.mubr.msk.bf16.mxu1 %vm1945_vm0, %v9635_v49  ;;  %v6063_v55 = vsel %vm10982_vm3, %v6058_v62, %v6062_v12  ;;  %v6080_v63 = vrot.slane %v6078_v6, 4  ;;  %v6088_v34 = vshrl.u32 %v9536_v0, 16  ;;  %v12692_v57 = vadd.f32 %v12533_v33, %v12580_v44  ;;  %v12694_v60 = vpop.f32.mrf.mxu0  ;;  %v12696_v43 = vpop.f32.mrf.mxu1  ;;  %v9539_v0 = vld [vmem:[%s10969_s25 + $0x1a4] sm:$0xf] }
 0x1d7   : > { %v9636_v25 = vcombine.low %v6053_v41, %v6063_v55  ;;  %v6071_v24 = vor.u32 %v6070_v22, %v6067_v13  ;;  %v6086_v37 = vrot.slane %v6084_v15, 5  ;;  %v6094_v29 = vshll.u32 %v9537_v14, 16  ;;  %10591 = vmatmul.mubr.msk.bf16.gmra.mxu0 %vm1945_vm0, %v10886_v38 }
 0x1d8   : > { %14331 = vst [vmem:[#allocation94_spill] sm:$0xff] %v12692_v57  ;;  %v6081_v49 = vor.u32 %v6080_v63, %v6076_v40  ;;  %v6090_v48 = vrot.slane %v6088_v34, 4  ;;  %v6098_v12 = vshrl.u32 %v9537_v14, 16  ;;  %v6104_v62 = vshll.u32 %v9538_v47, 16  ;;  %v12700_v6 = vpop.f32.mrf.mxu0  ;;  %10594 = vmatprep.mubr.msk.bf16.mxu0 %vm1945_vm0, %v10887_v11  ;;  %v12703_v33 = vpop.f32.mrf.mxu1  ;;  %v9540_v14 = vld [vmem:[%s10969_s25 + $0x1a8] sm:$0xf] }
 0x1d9   : > { %14332 = vst [vmem:[#allocation95_spill] sm:$0xff] %v12703_v33  ;;  %10713 = vmatmul.mubr.msk.bf16.gmra.mxu1 %vm1945_vm0, %v9636_v25  ;;  %v6072_v44 = vrot.slane %v6071_v24, 4  ;;  %v6096_v22 = vrot.slane %v6094_v29, 5  ;;  %v12708_v38 = vadd.f32 %v12547_v26, %v12595_v50  ;;  %v12712_v13 = vadd.f32 %v12565_v18, %v12613_v42  ;;  %v9541_v26 = vld [vmem:[%s10969_s25 + $0x1ac] sm:$0xf]  ;;  %v10888_v25 = vld [vmem:[%s10969_s25 + $0x1c0] sm:$0xff]  }
 0x1da   : > { %v6082_v41 = vrot.slane %v6081_v49, 4  ;;  %v6091_v15 = vor.u32 %v6090_v48, %v6086_v37  ;;  %v6100_v11 = vrot.slane %v6098_v12, 4  ;;  %v6106_v47 = vrot.slane %v6104_v62, 5 }
 0x1db   : > { %14333 = vst [vmem:[#allocation96_spill] sm:$0xff] %v12708_v38  ;;  %14334 = vst [vmem:[#allocation97_spill] sm:$0xff] %v12712_v13  ;;  %v6077_v55 = vsel %vm10982_vm3, %v6072_v44, %v6076_v40  ;;  %v12719_v63 = vadd.f32 %v12577_v30, %v12626_v10  ;;  %v6109_v50 = vshrl.u32 %v9539_v0, 16  ;;  %v6112_v34 = vshll.u32 %v9539_v0, 16  ;;  %v12723_v18 = vpop.f32.mrf.mxu1  ;;  %v10889_v40 = vld [vmem:[%s10969_s25 + $0x1cc] sm:$0xff]  }
 0x1dc   : > { %v6087_v42 = vsel %vm10982_vm3, %v6082_v41, %v6086_v37  ;;  %v6092_v48 = vrot.slane %v6091_v15, 4  ;;  %v6101_v24 = vor.u32 %v6100_v11, %v6096_v22  ;;  %v6118_v29 = vshll.u32 %v9540_v14, 16  ;;  %v12727_v49 = vpop.f32.mrf.mxu0  ;;  %v9542_v44 = vld [vmem:[%s10969_s25 + $0x1b0] sm:$0xf] }
 0x1dd   : > { %14335 = vst [vmem:[#allocation98_spill] sm:$0xff] %v12719_v63  ;;  %v9637_v12 = vcombine.low %v6077_v55, %v6087_v42  ;;  %v6111_v30 = vrot.slane %v6109_v50, 4  ;;  %v6114_v10 = vrot.slane %v6112_v34, 5  ;;  %v6122_v62 = vshrl.u32 %v9540_v14, 16  ;;  %v12731_v33 = vpop.f32.mrf.mxu1  ;;  %v9543_v50 = vld [vmem:[%s10969_s25 + $0x1b4] sm:$0x1] }
 0x1de   : > { %v6097_v0 = vsel %vm10982_vm3, %v6092_v48, %v6096_v22  ;;  %v6102_v63 = vrot.slane %v6101_v24, 4  ;;  %v6120_v13 = vrot.slane %v6118_v29, 5  ;;  %v6128_v37 = vshll.u32 %v9541_v26, 16  ;;  %v12735_v41 = vpop.f32.mrf.mxu0 }
 0x1df   : > { %10716 = vmatprep.mubr.msk.bf16.mxu1 %vm1945_vm0, %v9637_v12  ;;  %v6115_v15 = vor.u32 %v6114_v10, %v6111_v30  ;;  %v6124_v11 = vrot.slane %v6122_v62, 4  ;;  %v6132_v55 = vshrl.u32 %v9541_v26, 16  ;;  %v12740_v14 = vadd.f32 %v12586_v45, %v12634_v59  ;;  %10595 = vmatmul.mubr.msk.bf16.gmra.mxu0 %vm1945_vm0, %v10888_v25  ;;  %v12744_v34 = vpop.f32.mrf.mxu1  ;;  %v9544_v30 = vld [vmem:[%s10969_s25 + $0x1b8] sm:$0xf] }
 0x1e0   : > { %v6107_v22 = vsel %vm10982_vm3, %v6102_v63, %v6106_v47  ;;  %v6130_v42 = vrot.slane %v6128_v37, 5  ;;  %v6138_v48 = vshll.u32 %v9542_v44, 16  ;;  %v6142_v24 = vshrl.u32 %v9542_v44, 16  ;;  %v12748_v29 = vpop.f32.mrf.mxu0  ;;  %10598 = vmatprep.mubr.msk.bf16.mxu0 %vm1945_vm0, %v10889_v40  ;;  %v9545_v63 = vld [vmem:[%s10969_s25 + $0x1bc] sm:$0xf] }
 0x1e1   : > { %14336 = vst [vmem:[#allocation99_spill] sm:$0xff] %v12740_v14  ;;  %v9638_v26 = vcombine.low %v6097_v0, %v6107_v22  ;;  %v6116_v45 = vrot.slane %v6115_v15, 4  ;;  %v6125_v59 = vor.u32 %v6124_v11, %v6120_v13  ;;  %v6134_v12 = vrot.slane %v6132_v55, 4  ;;  %v10890_v11 = vld [vmem:[%s10969_s25 + $0x1d4] sm:$0xff]   ;;  %v12767_v55 = vpop.f32.mrf.mxu1  ;;  %v9546_v22 = vld [vmem:[%s10969_s25 + $0x1c0] sm:$0xf] }
 0x1e2   : > { %v6140_v25 = vrot.slane %v6138_v48, 5  ;;  %v6144_v10 = vrot.slane %v6142_v24, 4  ;;  %v6148_v62 = vshll.u32 %v9543_v50, 16  ;;  %v12754_v47 = vadd.f32 %v12598_v4, %v12647_v58  ;;  %v12757_v44 = vpop.f32.mrf.mxu0  ;;  %14340 = vst [vmem:[#allocation103_spill] sm:$0xff] %v12767_v55  ;;  %v9573_v14 = vld [vmem:[%s10969_s25 + $0x22c] sm:$0x1] }
 0x1e3   : > { %14338 = vst [vmem:[#allocation101_spill] sm:$0xff] %v12757_v44  ;;  %10717 = vmatmul.mubr.msk.bf16.gmra.mxu1 %vm1945_vm0, %v9638_v26  ;;  %v6121_v40 = vsel %vm10982_vm3, %v6116_v45, %v6120_v13  ;;  %v6126_v0 = vrot.slane %v6125_v59, 4  ;;  %v6135_v37 = vor.u32 %v6134_v12, %v6130_v42  ;;  %v12764_v15 = vadd.f32 %v12615_v46, %v12671_v3  ;;  %v10891_v13 = vld [vmem:[%s10969_s25 + $0x1e0] sm:$0xff]  }
 0x1e4   : > { %14337 = vst [vmem:[#allocation100_spill] sm:$0xff] %v12754_v47  ;;  %v6145_v4 = vor.u32 %v6144_v10, %v6140_v25  ;;  %v6150_v58 = vrot.slane %v6148_v62, 5  ;;  %v12771_v50 = vadd.f32 %v12628_v9, %v12679_v16  ;;  %v6153_v48 = vshrl.u32 %v9544_v30, 16  ;;  %v9547_v10 = vld [vmem:[%s10969_s25 + $0x1c4] sm:$0xf] }
 0x1e5   : > { %14339 = vst [vmem:[#allocation102_spill] sm:$0xff] %v12764_v15  ;;  %v6131_v24 = vsel %vm10982_vm3, %v6126_v0, %v6130_v42  ;;  %v6136_v26 = vrot.slane %v6135_v37, 4  ;;  %v6156_v46 = vshll.u32 %v9544_v30, 16  ;;  %v6162_v3 = vshll.u32 %v9545_v63, 16  ;;  %v9548_v15 = vld [vmem:[%s10969_s25 + $0x1c8] sm:$0x1]  ;;  %v12784_v42 = vpop.f32.mrf.mxu1 }
 0x1e6   : > { %14341 = vst [vmem:[#allocation104_spill] sm:$0xff] %v12771_v50  ;;  %v9639_v45 = vcombine.low %v6121_v40, %v6131_v24  ;;  %v6146_v59 = vrot.slane %v6145_v4, 4  ;;  %v6155_v12 = vrot.slane %v6153_v48, 4  ;;  %v6166_v55 = vshrl.u32 %v9545_v63, 16  ;;  %v12778_v62 = vpop.f32.mrf.mxu0 }
 0x1e7   : > { %v6141_v9 = vsel %vm10982_vm3, %v6136_v26, %v6140_v25  ;;  %v6158_v16 = vrot.slane %v6156_v46, 5  ;;  %v6164_v44 = vrot.slane %v6162_v3, 5  ;;  %v6172_v50 = vshll.u32 %v9546_v22, 16  ;;  %10599 = vmatmul.mubr.msk.bf16.gmra.mxu0 %vm1945_vm0, %v10890_v11  ;;  %v9550_v3 = vld [vmem:[%s10969_s25 + $0x1d0] sm:$0xf] }
 0x1e8   : > { %10720 = vmatprep.mubr.msk.bf16.mxu1 %vm1945_vm0, %v9639_v45  ;;  %v6151_v30 = vsel %vm10982_vm3, %v6146_v59, %v6150_v58  ;;  %v6168_v63 = vrot.slane %v6166_v55, 4  ;;  %v6176_v40 = vshrl.u32 %v9546_v22, 16  ;;  %v12791_v0 = vadd.f32 %v12637_v39, %v12694_v60  ;;  %v12793_v25 = vpop.f32.mrf.mxu0  ;;  %10602 = vmatprep.mubr.msk.bf16.mxu0 %vm1945_vm0, %v10891_v13  ;;  %v9549_v55 = vld [vmem:[%s10969_s25 + $0x1cc] sm:$0xf]  ;;  %v12809_v45 = vpop.f32.mrf.mxu1 }
 0x1e9   : > { %v9640_v37 = vcombine.low %v6141_v9, %v6151_v30  ;;  %v6159_v11 = vor.u32 %v6158_v16, %v6155_v12  ;;  %v6174_v4 = vrot.slane %v6172_v50, 5  ;;  %v6182_v48 = vshll.u32 %v9547_v10, 16  ;;  %v10893_v30 = vld [vmem:[%s10969_s25 + $0x1f4] sm:$0xff]  }
 0x1ea   : > { %14342 = vst [vmem:[#allocation105_spill] sm:$0xff] %v12791_v0  ;;  %v6169_v24 = vor.u32 %v6168_v63, %v6164_v44  ;;  %v6178_v26 = vrot.slane %v6176_v40, 4  ;;  %v6186_v46 = vshrl.u32 %v9547_v10, 16  ;;  %v6192_v58 = vshll.u32 %v9548_v15, 16  ;;  %v12797_v22 = vpop.f32.mrf.mxu0  ;;  %v10892_v15 = vld [vmem:[%s10969_s25 + $0x1e8] sm:$0xff]  }
 0x1eb   : > { %10721 = vmatmul.mubr.msk.bf16.gmra.mxu1 %vm1945_vm0, %v9640_v37  ;;  %v6160_v39 = vrot.slane %v6159_v11, 4  ;;  %v6184_v60 = vrot.slane %v6182_v48, 5  ;;  %v12802_v13 = vadd.f32 %v12649_v8, %v12700_v6  ;;  %v12806_v50 = vadd.f32 %v12673_v53, %v12727_v49  ;;  %v9551_v53 = vld [vmem:[%s10969_s25 + $0x1d4] sm:$0xf] }
 0x1ec   : > { %v6170_v59 = vrot.slane %v6169_v24, 4  ;;  %v6179_v12 = vor.u32 %v6178_v26, %v6174_v4  ;;  %v6188_v10 = vrot.slane %v6186_v46, 4  ;;  %v6194_v9 = vrot.slane %v6192_v58, 5  ;;  %v12812_v16 = vpop.f32.mrf.mxu0 }
 0x1ed   : > { %14343 = vst [vmem:[#allocation106_spill] sm:$0xff] %v12802_v13  ;;  %14344 = vst [vmem:[#allocation107_spill] sm:$0xff] %v12806_v50  ;;  %v6165_v8 = vsel %vm10982_vm3, %v6160_v39, %v6164_v44  ;;  %v12819_v6 = vadd.f32 %v12681_v7, %v12735_v41  ;;  %v6197_v49 = vshrl.u32 %v9549_v55, 16  ;;  %v6200_v63 = vshll.u32 %v9549_v55, 16  ;;  %v12827_v39 = vpop.f32.mrf.mxu1  ;;  %v9564_v50 = vld [vmem:[%s10969_s25 + $0x208] sm:$0xf] }
 0x1ee   : > { %14345 = vst [vmem:[#allocation108_spill] sm:$0xff] %v12812_v16  ;;  %v6175_v40 = vsel %vm10982_vm3, %v6170_v59, %v6174_v4  ;;  %v6180_v37 = vrot.slane %v6179_v12, 4  ;;  %v6189_v11 = vor.u32 %v6188_v10, %v6184_v60  ;;  %v6206_v48 = vshll.u32 %v9550_v3, 16  ;;  %v9552_v16 = vld [vmem:[%s10969_s25 + $0x1d8] sm:$0xf] }
 0x1ef   : > { %14346 = vst [vmem:[#allocation109_spill] sm:$0xff] %v12819_v6  ;;  %v9641_v24 = vcombine.low %v6165_v8, %v6175_v40  ;;  %v6199_v26 = vrot.slane %v6197_v49, 4  ;;  %v6202_v46 = vrot.slane %v6200_v63, 5  ;;  %v6210_v58 = vshrl.u32 %v9550_v3, 16  ;;  %v12825_v44 = vpop.f32.mrf.mxu0  ;;  %10603 = vmatmul.mubr.msk.bf16.gmra.mxu0 %vm1945_vm0, %v10892_v15  ;;  %v9553_v15 = vld [vmem:[%s10969_s25 + $0x1dc] sm:$0x1] }
 0x1f0   : > { %v6185_v7 = vsel %vm10982_vm3, %v6180_v37, %v6184_v60  ;;  %v6190_v41 = vrot.slane %v6189_v11, 4  ;;  %v6208_v4 = vrot.slane %v6206_v48, 5  ;;  %v6216_v55 = vshll.u32 %v9551_v53, 16  ;;  %10606 = vmatprep.mubr.msk.bf16.mxu0 %vm1945_vm0, %v10893_v30  ;;  %v9568_v13 = vld [vmem:[%s10969_s25 + $0x218] sm:$0x1] }
 0x1f1   : > { %10724 = vmatprep.mubr.msk.bf16.mxu1 %vm1945_vm0, %v9641_v24  ;;  %v6203_v59 = vor.u32 %v6202_v46, %v6199_v26  ;;  %v6212_v3 = vrot.slane %v6210_v58, 4  ;;  %v6220_v12 = vshrl.u32 %v9551_v53, 16  ;;  %v12836_v10 = vadd.f32 %v12696_v43, %v12748_v29  ;;  %v12839_v8 = vpop.f32.mrf.mxu0  ;;  %v9554_v53 = vld [vmem:[%s10969_s25 + $0x1e0] sm:$0xf]  ;;  %v12844_v24 = vpop.f32.mrf.mxu1 }
 0x1f2   : > { %v6195_v60 = vsel %vm10982_vm3, %v6190_v41, %v6194_v9  ;;  %v6218_v30 = vrot.slane %v6216_v55, 5  ;;  %v6226_v49 = vshll.u32 %v9552_v16, 16  ;;  %v6230_v63 = vshrl.u32 %v9552_v16, 16  ;;  %14348 = vst [vmem:[#allocation111_spill] sm:$0xff] %v12844_v24  ;;  %v10894_v29 = vld [vmem:[%s10969_s25 + $0x1fc] sm:$0xff]   ;;  %v10895_v9 = vld [vmem:[%s10969_s25 + $0x208] sm:$0xff]  }
 0x1f3   : > { %14347 = vst [vmem:[#allocation110_spill] sm:$0xff] %v12836_v10  ;;  %v9642_v40 = vcombine.low %v6185_v7, %v6195_v60  ;;  %v6204_v37 = vrot.slane %v6203_v59, 4  ;;  %v6213_v11 = vor.u32 %v6212_v3, %v6208_v4  ;;  %v6222_v48 = vrot.slane %v6220_v12, 4  ;;  %v12846_v43 = vpop.f32.mrf.mxu0  ;;  %v9555_v10 = vld [vmem:[%s10969_s25 + $0x1e4] sm:$0xf] }
 0x1f4   : > { %v6228_v26 = vrot.slane %v6226_v49, 5  ;;  %v6232_v46 = vrot.slane %v6230_v63, 4  ;;  %v6236_v58 = vshll.u32 %v9553_v15, 16  ;;  %v12856_v55 = vadd.f32 %v12723_v18, %v12778_v62  ;;  %v9556_v60 = vld [vmem:[%s10969_s25 + $0x1e8] sm:$0xf] }
 0x1f5   : > { %10725 = vmatmul.mubr.msk.bf16.gmra.mxu1 %vm1945_vm0, %v9642_v40  ;;  %v6209_v16 = vsel %vm10982_vm3, %v6204_v37, %v6208_v4  ;;  %v6214_v7 = vrot.slane %v6213_v11, 4  ;;  %v6223_v41 = vor.u32 %v6222_v48, %v6218_v30  ;;  %v12858_v59 = vpop.f32.mrf.mxu0  ;;  %v12862_v15 = vadd.f32 %v12731_v33, %v12793_v25  ;;  %v9557_v25 = vld [vmem:[%s10969_s25 + $0x1ec] sm:$0xf] }
 0x1f6   : > { %14349 = vst [vmem:[#allocation112_spill] sm:$0xff] %v12856_v55  ;;  %14350 = vst [vmem:[#allocation113_spill] sm:$0xff] %v12858_v59  ;;  %v6233_v3 = vor.u32 %v6232_v46, %v6228_v26  ;;  %v6238_v12 = vrot.slane %v6236_v58, 5  ;;  %v6241_v49 = vshrl.u32 %v9554_v53, 16  ;;  %v6244_v40 = vshll.u32 %v9554_v53, 16 }
 0x1f7   : > { %14351 = vst [vmem:[#allocation114_spill] sm:$0xff] %v12862_v15  ;;  %v6219_v4 = vsel %vm10982_vm3, %v6214_v7, %v6218_v30  ;;  %v6224_v63 = vrot.slane %v6223_v41, 4  ;;  %v6250_v37 = vshll.u32 %v9555_v10, 16  ;;  %v12867_v18 = vpop.f32.mrf.mxu1  ;;  %v12869_v62 = vpop.f32.mrf.mxu0  ;;  %10607 = vmatmul.mubr.msk.bf16.gmra.mxu0 %vm1945_vm0, %v10894_v29  ;;  %v6254_v33 = vshrl.u32 %v9555_v10, 16  ;;  %v9558_v41 = vld [vmem:[%s10969_s25 + $0x1f0] sm:$0x1] }
 0x1f8   : > { %v9643_v11 = vcombine.low %v6209_v16, %v6219_v4  ;;  %v6234_v48 = vrot.slane %v6233_v3, 4  ;;  %v6243_v46 = vrot.slane %v6241_v49, 4  ;;  %10610 = vmatprep.mubr.msk.bf16.mxu0 %vm1945_vm0, %v10895_v9  ;;  %v6246_v58 = vrot.slane %v6244_v40, 5 }
 0x1f9   : > { %v6229_v30 = vsel %vm10982_vm3, %v6224_v63, %v6228_v26  ;;  %v6252_v7 = vrot.slane %v6250_v37, 5  ;;  %v6260_v53 = vshll.u32 %v9556_v60, 16  ;;  %v12877_v24 = vpop.f32.mrf.mxu1  ;;  %v12879_v59 = vpop.f32.mrf.mxu0  ;;  %v6256_v29 = vrot.slane %v6254_v33, 4  ;;  %v10896_v37 = vld [vmem:[%s10969_s25 + $0x210] sm:$0xff]   ;;  %v10897_v33 = vld [vmem:[%s10969_s25 + $0x21c] sm:$0xff]  }
 0x1fa   : > { %10728 = vmatprep.mubr.msk.bf16.mxu1 %vm1945_vm0, %v9643_v11  ;;  %v6239_v10 = vsel %vm10982_vm3, %v6234_v48, %v6238_v12  ;;  %v6264_v9 = vshrl.u32 %v9556_v60, 16  ;;  %v12886_v26 = vadd.f32 %v12744_v34, %v12797_v22  ;;  %v6247_v3 = vor.u32 %v6246_v58, %v6243_v46  ;;  %v9559_v60 = vld [vmem:[%s10969_s25 + $0x1f4] sm:$0xf] }
 0x1fb   : > { %v9644_v16 = vcombine.low %v6229_v30, %v6239_v10  ;;  %v6262_v49 = vrot.slane %v6260_v53, 5  ;;  %v6270_v4 = vshll.u32 %v9557_v25, 16  ;;  %v12888_v63 = vpop.f32.mrf.mxu1  ;;  %v12890_v40 = vpop.f32.mrf.mxu0  ;;  %v6257_v11 = vor.u32 %v6256_v29, %v6252_v7  ;;  %v9560_v30 = vld [vmem:[%s10969_s25 + $0x1f8] sm:$0xf] }
 0x1fc   : > { %14352 = vst [vmem:[#allocation115_spill] sm:$0xff] %v12886_v26  ;;  %v6266_v15 = vrot.slane %v6264_v9, 4  ;;  %v6274_v12 = vshrl.u32 %v9557_v25, 16  ;;  %v6280_v48 = vshll.u32 %v9558_v41, 16  ;;  %v6248_v34 = vrot.slane %v6247_v3, 4 }
 0x1fd   : > { %10729 = vmatmul.mubr.msk.bf16.gmra.mxu1 %vm1945_vm0, %v9644_v16  ;;  %v6272_v22 = vrot.slane %v6270_v4, 5  ;;  %v12898_v46 = vadd.f32 %v12784_v42, %v12825_v44  ;;  %v12901_v58 = vpop.f32.mrf.mxu1  ;;  %v12903_v53 = vpop.f32.mrf.mxu0  ;;  %v6258_v10 = vrot.slane %v6257_v11, 4  ;;  %v12909_v16 = vadd.f32 %v12809_v45, %v12839_v8  ;;  %v9561_v3 = vld [vmem:[%s10969_s25 + $0x1fc] sm:$0xf] }
 0x1fe   : > { %v6267_v29 = vor.u32 %v6266_v15, %v6262_v49  ;;  %v6276_v25 = vrot.slane %v6274_v12, 4  ;;  %v6282_v41 = vrot.slane %v6280_v48, 5  ;;  %v6253_v9 = vsel %vm10982_vm3, %v6248_v34, %v6252_v7 }
 0x1ff   : > { %14353 = vst [vmem:[#allocation116_spill] sm:$0xff] %v12898_v46  ;;  %14354 = vst [vmem:[#allocation117_spill] sm:$0xff] %v12909_v16  ;;  %v6285_v42 = vshrl.u32 %v9559_v60, 16  ;;  %v6288_v44 = vshll.u32 %v9559_v60, 16  ;;  %v12912_v4 = vpop.f32.mrf.mxu0  ;;  %10611 = vmatmul.mubr.msk.bf16.gmra.mxu0 %vm1945_vm0, %v10896_v37  ;;  %v6263_v15 = vsel %vm10982_vm3, %v6258_v10, %v6262_v49  ;;  %v6294_v48 = vshll.u32 %v9560_v30, 16 }
 0x200   : > { %v6268_v11 = vrot.slane %v6267_v29, 4  ;;  %v6277_v12 = vor.u32 %v6276_v25, %v6272_v22  ;;  %10614 = vmatprep.mubr.msk.bf16.mxu0 %vm1945_vm0, %v10897_v33  ;;  %v9645_v7 = vcombine.low %v6253_v9, %v6263_v15  ;;  %v6298_v8 = vshrl.u32 %v9560_v30, 16  ;;  %v9562_v16 = vld [vmem:[%s10969_s25 + $0x200] sm:$0xf] }
 0x201   : > { %v6287_v34 = vrot.slane %v6285_v42, 4  ;;  %v6290_v45 = vrot.slane %v6288_v44, 5  ;;  %v12919_v60 = vpop.f32.mrf.mxu1  ;;  %v12921_v46 = vpop.f32.mrf.mxu0  ;;  %v6296_v10 = vrot.slane %v6294_v48, 5  ;;  %v6304_v29 = vshll.u32 %v9561_v3, 16  ;;  %v9563_v42 = vld [vmem:[%s10969_s25 + $0x204] sm:$0x1] }
 0x202   : > { %v6273_v37 = vsel %vm10982_vm3, %v6268_v11, %v6272_v22  ;;  %v6278_v49 = vrot.slane %v6277_v12, 4  ;;  %10732 = vmatprep.mubr.msk.bf16.mxu1 %vm1945_vm0, %v9645_v7  ;;  %v6300_v25 = vrot.slane %v6298_v8, 4  ;;  %v6308_v9 = vshrl.u32 %v9561_v3, 16  ;;  %v10898_v22 = vld [vmem:[%s10969_s25 + $0x224] sm:$0xff]  }
 0x203   : > { %v6291_v33 = vor.u32 %v6290_v45, %v6287_v34  ;;  %v12928_v30 = vadd.f32 %v12827_v39, %v12846_v43  ;;  %v12931_v44 = vpop.f32.mrf.mxu1  ;;  %v12933_v15 = vpop.f32.mrf.mxu0  ;;  %v6306_v12 = vrot.slane %v6304_v29, 5  ;;  %v6314_v48 = vshll.u32 %v9562_v16, 16  ;;  %v10899_v34 = vld [vmem:[%s10969_s25 + $0x230] sm:$0xff]  }
 0x204   : > { %v6283_v11 = vsel %vm10982_vm3, %v6278_v49, %v6282_v41  ;;  %v6318_v7 = vshrl.u32 %v9562_v16, 16  ;;  %v6301_v8 = vor.u32 %v6300_v25, %v6296_v10  ;;  %v6310_v26 = vrot.slane %v6308_v9, 4 }
 0x205   : > { %14355 = vst [vmem:[#allocation118_spill] sm:$0xff] %v12928_v30  ;;  %v9646_v45 = vcombine.low %v6273_v37, %v6283_v11  ;;  %v6292_v3 = vrot.slane %v6291_v33, 4  ;;  %v12939_v39 = vpop.f32.mrf.mxu1  ;;  %v12941_v43 = vpop.f32.mrf.mxu0  ;;  %v6316_v30 = vrot.slane %v6314_v48, 5  ;;  %v6324_v6 = vshll.u32 %v9563_v42, 16  ;;  %v12957_v42 = vld [vmem:[%s14235_s2] ss:$0 sm:$0xff] }
 0x206   : > { %v6320_v55 = vrot.slane %v6318_v7, 4  ;;  %v6302_v16 = vrot.slane %v6301_v8, 4  ;;  %v6311_v49 = vor.u32 %v6310_v26, %v6306_v12  ;;  %v4942_v37 = vadd.f32 %v12869_v62, %v11406_v32 }
 0x207   : > { %10733 = vmatmul.mubr.msk.bf16.gmra.mxu1 %vm1945_vm0, %v9646_v45  ;;  %v6297_v41 = vsel %vm10982_vm3, %v6292_v3, %v6296_v10  ;;  %v12949_v29 = vpop.f32.mrf.mxu1  ;;  %v12951_v33 = vpop.f32.mrf.mxu0  ;;  %10615 = vmatmul.mubr.msk.bf16.gmra.mxu0 %vm1945_vm0, %v10898_v22  ;;  %v6326_v9 = vrot.slane %v6324_v6, 5  ;;  %v4940_v26 = vadd.f32 %v12879_v59, %v11408_v35  ;;  %v9565_v10 = vld [vmem:[%s10969_s25 + $0x20c] sm:$0xf]  ;;  %v6329_v6 = vshrl.u32 %v9564_v50, 16 }
 0x208   : > { %v6321_v25 = vor.u32 %v6320_v55, %v6316_v30  ;;  %10618 = vmatprep.mubr.msk.bf16.mxu0 %vm1945_vm0, %v10899_v34  ;;  %v6307_v32 = vsel %vm10982_vm3, %v6302_v16, %v6306_v12  ;;  %v6312_v62 = vrot.slane %v6311_v49, 4  ;;  %v7575_v55 = vadd.f32 %v12867_v18, %v4942_v37  ;;  %v10900_v16 = vld [vmem:[%s10969_s25 + $0x238] sm:$0xff]   ;;  %v10901_v37 = vld [vmem:[%s10969_s25 + $0x244] sm:$0xff]  }
 0x209   : > { %v12966_v22 = vpop.f32.mrf.mxu1  ;;  %v12968_v11 = vpop.f32.mrf.mxu0  ;;  %v9647_v48 = vcombine.low %v6297_v41, %v6307_v32  ;;  %v7573_v35 = vadd.f32 %v12877_v24, %v4940_v26  ;;  %v6332_v59 = vshll.u32 %v9564_v50, 16  ;;  %v6331_v45 = vrot.slane %v6329_v6, 4  ;;  %v9566_v24 = vld [vmem:[%s10969_s25 + $0x210] sm:$0xf] }
 0x20a   : > { %v6322_v7 = vrot.slane %v6321_v25, 4  ;;  %v6317_v12 = vsel %vm10982_vm3, %v6312_v62, %v6316_v30  ;;  %v7710_v34 = vadd.f32 %v12957_v42, %v7575_v55  ;;  %v6338_v18 = vshll.u32 %v9565_v10, 16 }
 0x20b   : > { %v12974_v3 = vpop.f32.mrf.mxu1  ;;  %v12976_v8 = vpop.f32.mrf.mxu0  ;;  %10736 = vmatprep.mubr.msk.bf16.mxu1 %vm1945_vm0, %v9647_v48  ;;  %v7708_v50 = vadd.f32 %v12957_v42, %v7573_v35  ;;  %v6334_v49 = vrot.slane %v6332_v59, 5  ;;  %v6342_v30 = vshrl.u32 %v9565_v10, 16  ;;  %v6352_v35 = vshrl.u32 %v9566_v24, 16 }
 0x20c   : > { %v6327_v41 = vsel %vm10982_vm3, %v6322_v7, %v6326_v9  ;;  %vm7838_vm5 = vcmp.ge.f32.partialorder %v7710_v34, 0.0  ;;  %v7966_v26 = vmul.f32 0.2, %v7710_v34  ;;  %v6340_v32 = vrot.slane %v6338_v18, 5 }
 0x20d   : > { %v9648_v25 = vcombine.low %v6317_v12, %v6327_v41  ;;  %v12986_v62 = vpop.f32.mrf.mxu1  ;;  %v12988_v55 = vpop.f32.mrf.mxu0  ;;  %vm7836_vm6 = vcmp.ge.f32.partialorder %v7708_v50, 0.0  ;;  %v7964_v6 = vmul.f32 0.2, %v7708_v50  ;;  %v6335_v48 = vor.u32 %v6334_v49, %v6331_v45  ;;  %v9567_v12 = vld [vmem:[%s10969_s25 + $0x214] sm:$0xf] }
 0x20e   : > { %v6344_v9 = vrot.slane %v6342_v30, 4  ;;  %v8094_v10 = vsel %vm7838_vm5, %v7710_v34, %v7966_v26  ;;  %v6348_v7 = vshll.u32 %v9566_v24, 16  ;;  %v4943_v59 = vadd.f32 %v12890_v40, %v11425_v61 }
 0x20f   : > { %10737 = vmatmul.mubr.msk.bf16.gmra.mxu1 %vm1945_vm0, %v9648_v25  ;;  %v12999_v18 = vpop.f32.mrf.mxu1  ;;  %v13001_v45 = vpop.f32.mrf.mxu0  ;;  %10619 = vmatmul.mubr.msk.bf16.gmra.mxu0 %vm1945_vm0, %v10900_v16  ;;  %v9862_v41 = vpack.c.bf16 %v8094_v10, %v8094_v10  ;;  %v8092_v49 = vsel %vm7836_vm6, %v7708_v50, %v7964_v6  ;;  %v6336_v30 = vrot.slane %v6335_v48, 4  ;;  %v6354_v61 = vrot.slane %v6352_v35, 4 }
 0x210   : > { %v6345_v25 = vor.u32 %v6344_v9, %v6340_v32  ;;  %10622 = vmatprep.mubr.msk.bf16.mxu0 %vm1945_vm0, %v10901_v37  ;;  %v9860_v34 = vpack.c.bf16 %v8092_v49, %v8092_v49  ;;  %v6350_v24 = vrot.slane %v6348_v7, 5  ;;  %v7576_v40 = vadd.f32 %v12888_v63, %v4943_v59  ;;  %v10902_v59 = vld [vmem:[%s10969_s25 + $0x24c] sm:$0xff]  }
 0x211   : > { %v13007_v26 = vpop.f32.mrf.mxu0  ;;  %8735 = vst.msk [vmem:[%s12994_s4 + $0x8] sm:$0xf] %vm8732_vm4, %v9862_v41  ;;  %v6341_v16 = vsel %vm10982_vm3, %v6336_v30, %v6340_v32  ;;  %v6358_v6 = vshll.u32 %v9567_v12, 16  ;;  %v6362_v48 = vshrl.u32 %v9567_v12, 16  ;;  %v6368_v10 = vshll.u32 %v9568_v13, 16 }
 0x212   : > { %v6346_v50 = vrot.slane %v6345_v25, 4  ;;  %8733 = vst.msk [vmem:[%s12994_s4] sm:$0xf] %vm8732_vm4, %v9860_v34  ;;  %v6355_v37 = vor.u32 %v6354_v61, %v6350_v24  ;;  %v7711_v9 = vadd.f32 %v12957_v42, %v7576_v40  ;;  %v4941_v63 = vadd.f32 %v12903_v53, %v11434_v51  ;;  %v9569_v30 = vld [vmem:[%s10969_s25 + $0x21c] sm:$0xf] }
 0x213   : > { %v13018_v7 = vpop.f32.mrf.mxu1  ;;  %v13020_v35 = vpop.f32.mrf.mxu0  ;;  %v6360_v41 = vrot.slane %v6358_v6, 5  ;;  %v6364_v12 = vrot.slane %v6362_v48, 4  ;;  %v4946_v49 = vadd.f32 %v12912_v4, %v11442_v21  ;;  %v10903_v25 = vld [vmem:[%s10969_s25 + $0x258] sm:$0xff]   ;;  %v6370_v0 = vrot.slane %v6368_v10, 5  ;;  %v9570_v6 = vld [vmem:[%s10969_s25 + $0x220] sm:$0xf] }
 0x214   : > { %v6351_v32 = vsel %vm10982_vm3, %v6346_v50, %v6350_v24  ;;  %v6356_v13 = vrot.slane %v6355_v37, 4  ;;  %vm7839_vm7 = vcmp.ge.f32.partialorder %v7711_v9, 0.0  ;;  %v7967_v51 = vmul.f32 0.2, %v7711_v9 }
 0x215   : > { %v9649_v34 = vcombine.low %v6341_v16, %v6351_v32  ;;  %v13029_v53 = vpop.f32.mrf.mxu1  ;;  %v13031_v61 = vpop.f32.mrf.mxu0  ;;  %v6365_v40 = vor.u32 %v6364_v12, %v6360_v41  ;;  %v7574_v24 = vadd.f32 %v12901_v58, %v4941_v63  ;;  %v7579_v50 = vadd.f32 %v12919_v60, %v4946_v49 }
 0x216   : > { %v8095_v21 = vsel %vm7839_vm7, %v7711_v9, %v7967_v51  ;;  %v6361_v4 = vsel %vm10982_vm3, %v6356_v13, %v6360_v41  ;;  %v4944_v16 = vadd.f32 %v12921_v46, %v11447_v2  ;;  %v6373_v48 = vshrl.u32 %v9569_v30, 16  ;;  %v9571_v41 = vld [vmem:[%s10969_s25 + $0x224] sm:$0xf] }
 0x217   : > { %10740 = vmatprep.mubr.msk.bf16.mxu1 %vm1945_vm0, %v9649_v34  ;;  %v13041_v37 = vpop.f32.mrf.mxu1  ;;  %v13043_v10 = vpop.f32.mrf.mxu0  ;;  %10623 = vmatmul.mubr.msk.bf16.gmra.mxu0 %vm1945_vm0, %v10902_v59  ;;  %v9863_v58 = vpack.c.bf16 %v8095_v21, %v8095_v21  ;;  %v6366_v60 = vrot.slane %v6365_v40, 4  ;;  %v7709_v63 = vadd.f32 %v12957_v42, %v7574_v24  ;;  %v7714_v9 = vadd.f32 %v12957_v42, %v7579_v50  ;;  %v10904_v50 = vld [vmem:[%s10969_s25 + $0x260] sm:$0xff]  }
 0x218   : > { %10626 = vmatprep.mubr.msk.bf16.mxu0 %vm1945_vm0, %v10903_v25  ;;  %v7577_v32 = vadd.f32 %v12931_v44, %v4944_v16  ;;  %v6375_v2 = vrot.slane %v6373_v48, 4  ;;  %v6376_v46 = vshll.u32 %v9569_v30, 16  ;;  %v6382_v12 = vshll.u32 %v9570_v6, 16 }
 0x219   : > { %v13051_v49 = vpop.f32.mrf.mxu1  ;;  %v13053_v13 = vpop.f32.mrf.mxu0  ;;  %8736 = vst.msk [vmem:[%s12994_s4 + $0xc] sm:$0xf] %vm8732_vm4, %v9863_v58  ;;  %v6371_v59 = vsel %vm10982_vm3, %v6366_v60, %v6370_v0  ;;  %vm7837_vm8 = vcmp.ge.f32.partialorder %v7709_v63, 0.0  ;;  %v7965_v25 = vmul.f32 0.2, %v7709_v63  ;;  %vm7842_vm9 = vcmp.ge.f32.partialorder %v7714_v9, 0.0 }
 0x21a   : > { %v9650_v44 = vcombine.low %v6361_v4, %v6371_v59  ;;  %v7970_v34 = vmul.f32 0.2, %v7714_v9  ;;  %v7712_v51 = vadd.f32 %v12957_v42, %v7577_v32  ;;  %v6378_v30 = vrot.slane %v6376_v46, 5  ;;  %v9572_v58 = vld [vmem:[%s10969_s25 + $0x228] sm:$0xf]  ;;  %v10905_v60 = vld [vmem:[%s10969_s25 + $0x26c] sm:$0xff]  }
 0x21b   : > { %v13060_v40 = vpop.f32.mrf.mxu1  ;;  %v13062_v24 = vpop.f32.mrf.mxu0  ;;  %v8093_v21 = vsel %vm7837_vm8, %v7709_v63, %v7965_v25  ;;  %v6384_v16 = vrot.slane %v6382_v12, 5  ;;  %v6386_v48 = vshrl.u32 %v9570_v6, 16  ;;  %v6392_v0 = vshll.u32 %v9571_v41, 16 }
 0x21c   : > { %10741 = vmatmul.mubr.msk.bf16.gmra.mxu1 %vm1945_vm0, %v9650_v44  ;;  %v9861_v4 = vpack.c.bf16 %v8093_v21, %v8093_v21  ;;  %v8098_v59 = vsel %vm7842_vm9, %v7714_v9, %v7970_v34  ;;  %vm7840_vm10 = vcmp.ge.f32.partialorder %v7712_v51, 0.0  ;;  %v7968_v32 = vmul.f32 0.2, %v7712_v51 }
 0x21d   : > { %v13069_v46 = vpop.f32.mrf.mxu1  ;;  %v13071_v47 = vpop.f32.mrf.mxu0  ;;  %v9866_v63 = vpack.c.bf16 %v8098_v59, %v8098_v59  ;;  %v6379_v12 = vor.u32 %v6378_v30, %v6375_v2  ;;  %v6388_v25 = vrot.slane %v6386_v48, 4  ;;  %v6394_v6 = vrot.slane %v6392_v0, 5 }
 0x21e   : > { %8734 = vst.msk [vmem:[%s12994_s4 + $0x4] sm:$0xf] %vm8732_vm4, %v9861_v4  ;;  %v8096_v38 = vsel %vm7840_vm10, %v7712_v51, %v7968_v32  ;;  %v6396_v57 = vshrl.u32 %v9571_v41, 16  ;;  %v4947_v44 = vadd.f32 %v12933_v15, %v11464_v56  ;;  %v6402_v9 = vshll.u32 %v9572_v58, 16 }
 0x21f   : > { %v13078_v34 = vpop.f32.mrf.mxu1  ;;  %v13080_v21 = vpop.f32.mrf.mxu0  ;;  %10627 = vmatmul.mubr.msk.bf16.gmra.mxu0 %vm1945_vm0, %v10904_v50  ;;  %8739 = vst.msk [vmem:[%s12994_s4 + $0x18] sm:$0xf] %vm8732_vm4, %v9866_v63  ;;  %v9864_v2 = vpack.c.bf16 %v8096_v38, %v8096_v38  ;;  %v6380_v30 = vrot.slane %v6379_v12, 4  ;;  %v6389_v48 = vor.u32 %v6388_v25, %v6384_v16  ;;  %v6406_v0 = vshrl.u32 %v9572_v58, 16  ;;  %v10906_v12 = vld [vmem:[%s10969_s25 + $0x274] sm:$0xff]  }
 0x220   : > { %10630 = vmatprep.mubr.msk.bf16.mxu0 %vm1945_vm0, %v10905_v60  ;;  %v6398_v41 = vrot.slane %v6396_v57, 4  ;;  %v7580_v56 = vadd.f32 %v12939_v39, %v4947_v44  ;;  %v6404_v15 = vrot.slane %v6402_v9, 5  ;;  %v6412_v51 = vshll.u32 %v9573_v14, 16 }
 0x221   : > { %v13087_v4 = vpop.f32.mrf.mxu1  ;;  %v13089_v59 = vpop.f32.mrf.mxu0  ;;  %8737 = vst.msk [vmem:[%s12994_s4 + $0x10] sm:$0xf] %vm8732_vm4, %v9864_v2  ;;  %v6385_v38 = vsel %vm10982_vm3, %v6380_v30, %v6384_v16  ;;  %v6390_v50 = vrot.slane %v6389_v48, 4  ;;  %v6408_v58 = vrot.slane %v6406_v0, 4  ;;  %v4945_v57 = vadd.f32 %v12941_v43, %v11473_v36  ;;  %v9574_v36 = vld [vmem:[%s10969_s25 + $0x230] sm:$0xf] }
 0x222   : > { %v6399_v60 = vor.u32 %v6398_v41, %v6394_v6  ;;  %v7715_v39 = vadd.f32 %v12957_v42, %v7580_v56  ;;  %v6414_v14 = vrot.slane %v6412_v51, 5  ;;  %v4950_v32 = vadd.f32 %v12951_v33, %v11481_v19  ;;  %v10907_v43 = vld [vmem:[%s10969_s25 + $0x280] sm:$0xff]   ;;  %v9575_v56 = vld [vmem:[%s10969_s25 + $0x234] sm:$0xf] }
 0x223   : > { %v13100_v63 = vpop.f32.mrf.mxu0  ;;  %v6395_v25 = vsel %vm10982_vm3, %v6390_v50, %v6394_v6  ;;  %v6409_v44 = vor.u32 %v6408_v58, %v6404_v15  ;;  %v7578_v16 = vadd.f32 %v12949_v29, %v4945_v57  ;;  %v4948_v9 = vadd.f32 %v12968_v11, %v11484_v20 }
 0x224   : > { %v6400_v2 = vrot.slane %v6399_v60, 4  ;;  %v9651_v30 = vcombine.low %v6385_v38, %v6395_v25  ;;  %vm7843_vm11 = vcmp.ge.f32.partialorder %v7715_v39, 0.0  ;;  %v7971_v48 = vmul.f32 0.2, %v7715_v39 }
 0x225   : > { %v13110_v19 = vpop.f32.mrf.mxu1  ;;  %v13112_v33 = vpop.f32.mrf.mxu0  ;;  %v6410_v0 = vrot.slane %v6409_v44, 4  ;;  %v7713_v6 = vadd.f32 %v12957_v42, %v7578_v16  ;;  %v7583_v41 = vadd.f32 %v12966_v22, %v4950_v32  ;;  %v7581_v29 = vadd.f32 %v12974_v3, %v4948_v9  ;;  %v9576_v16 = vld [vmem:[%s10969_s25 + $0x238] sm:$0xf] }
 0x226   : > { %10744 = vmatprep.mubr.msk.bf16.mxu1 %vm1945_vm0, %v9651_v30  ;;  %v8099_v20 = vsel %vm7843_vm11, %v7715_v39, %v7971_v48  ;;  %v6405_v11 = vsel %vm10982_vm3, %v6400_v2, %v6404_v15  ;;  %v6417_v51 = vshrl.u32 %v9574_v36, 16  ;;  %v6420_v38 = vshll.u32 %v9574_v36, 16 }
 0x227   : > { %v13121_v50 = vpop.f32.mrf.mxu1  ;;  %v13123_v58 = vpop.f32.mrf.mxu0  ;;  %10631 = vmatmul.mubr.msk.bf16.gmra.mxu0 %vm1945_vm0, %v10906_v12  ;;  %v9867_v22 = vpack.c.bf16 %v8099_v20, %v8099_v20  ;;  %v6415_v3 = vsel %vm10982_vm3, %v6410_v0, %v6414_v14  ;;  %vm7841_vm12 = vcmp.ge.f32.partialorder %v7713_v6, 0.0  ;;  %v7969_v57 = vmul.f32 0.2, %v7713_v6  ;;  %v10908_v0 = vld [vmem:[%s10969_s25 + $0x288] sm:$0xff]  }
 0x228   : > { %10634 = vmatprep.mubr.msk.bf16.mxu0 %vm1945_vm0, %v10907_v43  ;;  %v9652_v15 = vcombine.low %v6405_v11, %v6415_v3  ;;  %v7718_v60 = vadd.f32 %v12957_v42, %v7583_v41  ;;  %v7716_v39 = vadd.f32 %v12957_v42, %v7581_v29  ;;  %v6419_v32 = vrot.slane %v6417_v51, 4 }
 0x229   : > { %v13131_v25 = vpop.f32.mrf.mxu1  ;;  %v13133_v44 = vpop.f32.mrf.mxu0  ;;  %8740 = vst.msk [vmem:[%s12994_s4 + $0x1c] sm:$0xf] %vm8732_vm4, %v9867_v22  ;;  %v8097_v12 = vsel %vm7841_vm12, %v7713_v6, %v7969_v57  ;;  %v6422_v14 = vrot.slane %v6420_v38, 5  ;;  %v6426_v9 = vshll.u32 %v9575_v56, 16  ;;  %v6430_v36 = vshrl.u32 %v9575_v56, 16 }
 0x22a   : > { %10745 = vmatmul.mubr.msk.bf16.gmra.mxu1 %vm1945_vm0, %v9652_v15  ;;  %v9865_v43 = vpack.c.bf16 %v8097_v12, %v8097_v12  ;;  %vm7846_vm13 = vcmp.ge.f32.partialorder %v7718_v60, 0.0  ;;  %v7974_v2 = vmul.f32 0.2, %v7718_v60  ;;  %vm7844_vm14 = vcmp.ge.f32.partialorder %v7716_v39, 0.0  ;;  %v9577_v22 = vld [vmem:[%s10969_s25 + $0x23c] sm:$0xf] }
 0x22b   : > { %v13139_v30 = vpop.f32.mrf.mxu1  ;;  %v13141_v48 = vpop.f32.mrf.mxu0  ;;  %v7972_v41 = vmul.f32 0.2, %v7716_v39  ;;  %v6423_v6 = vor.u32 %v6422_v14, %v6419_v32  ;;  %v6428_v29 = vrot.slane %v6426_v9, 5  ;;  %v6432_v20 = vrot.slane %v6430_v36, 4  ;;  %v9578_v9 = vld [vmem:[%s10969_s25 + $0x240] sm:$0x1] }
 0x22c   : > { %8738 = vst.msk [vmem:[%s12994_s4 + $0x14] sm:$0xf] %vm8732_vm4, %v9865_v43  ;;  %v8102_v11 = vsel %vm7846_vm13, %v7718_v60, %v7974_v2  ;;  %v6436_v56 = vshll.u32 %v9576_v16, 16  ;;  %v6440_v51 = vshrl.u32 %v9576_v16, 16  ;;  %v4951_v38 = vadd.f32 %v12976_v8, %v11501_v52 }
 0x22d   : > { %v13149_v3 = vpop.f32.mrf.mxu1  ;;  %v13151_v57 = vpop.f32.mrf.mxu0  ;;  %v9870_v15 = vpack.c.bf16 %v8102_v11, %v8102_v11  ;;  %v8100_v12 = vsel %vm7844_vm14, %v7716_v39, %v7972_v41  ;;  %v6424_v32 = vrot.slane %v6423_v6, 4  ;;  %v6433_v14 = vor.u32 %v6432_v20, %v6428_v29 }
 0x22e   : > { %v9868_v36 = vpack.c.bf16 %v8100_v12, %v8100_v12  ;;  %v6438_v60 = vrot.slane %v6436_v56, 5  ;;  %v6442_v43 = vrot.slane %v6440_v51, 4  ;;  %v7584_v16 = vadd.f32 %v12986_v62, %v4951_v38  ;;  %v9579_v12 = vld [vmem:[%s10969_s25 + $0x244] sm:$0xf] }
 0x22f   : > { %v13156_v2 = vpop.f32.mrf.mxu1  ;;  %v13158_v52 = vpop.f32.mrf.mxu0  ;;  %10635 = vmatmul.mubr.msk.bf16.gmra.mxu0 %vm1945_vm0, %v10908_v0  ;;  %8743 = vst.msk [vmem:[%s12994_s4 + $0x28] sm:$0xf] %vm8732_vm4, %v9870_v15  ;;  %v6429_v8 = vsel %vm10982_vm3, %v6424_v32, %v6428_v29  ;;  %v6434_v39 = vrot.slane %v6433_v14, 4  ;;  %v6446_v41 = vshll.u32 %v9577_v22, 16  ;;  %v6450_v6 = vshrl.u32 %v9577_v22, 16 }
 0x230   : > { %8741 = vst.msk [vmem:[%s12994_s4 + $0x20] sm:$0xf] %vm8732_vm4, %v9868_v36  ;;  %v6443_v20 = vor.u32 %v6442_v43, %v6438_v60  ;;  %v7719_v62 = vadd.f32 %v12957_v42, %v7584_v16  ;;  %v6456_v11 = vshll.u32 %v9578_v9, 16  ;;  %v4949_v56 = vadd.f32 %v12988_v55, %v11510_v23 }
 0x231   : > { %v13170_v51 = vpop.f32.mrf.mxu1  ;;  %v13172_v0 = vpop.f32.mrf.mxu0  ;;  %v6439_v29 = vsel %vm10982_vm3, %v6434_v39, %v6438_v60  ;;  %v6448_v38 = vrot.slane %v6446_v41, 5  ;;  %v6452_v15 = vrot.slane %v6450_v6, 4  ;;  %v4954_v22 = vadd.f32 %v13001_v45, %v11517_v17  ;;  %v9580_v39 = vld [vmem:[%s10969_s25 + $0x248] sm:$0xf] }
 0x232   : > { %v6444_v32 = vrot.slane %v6443_v20, 4  ;;  %v9653_v14 = vcombine.low %v6429_v8, %v6439_v29  ;;  %vm7847_vm15 = vcmp.ge.f32.partialorder %v7719_v62, 0.0  ;;  %v7975_v9 = vmul.f32 0.2, %v7719_v62  ;;  %v9581_v29 = vld [vmem:[%s10969_s25 + $0x24c] sm:$0xf] }
 0x233   : > { %v13179_v36 = vpop.f32.mrf.mxu1  ;;  %v13181_v23 = vpop.f32.mrf.mxu0  ;;  %v6453_v55 = vor.u32 %v6452_v15, %v6448_v38  ;;  %v6458_v43 = vrot.slane %v6456_v11, 5  ;;  %v7582_v16 = vadd.f32 %v12999_v18, %v4949_v56  ;;  %v7587_v60 = vadd.f32 %v13018_v7, %v4954_v22 }
 0x234   : > { %10748 = vmatprep.mubr.msk.bf16.mxu1 %vm1945_vm0, %v9653_v14  ;;  %v8103_v17 = vsel %vm7847_vm15, %v7719_v62, %v7975_v9  ;;  %v6449_v45 = vsel %vm10982_vm3, %v6444_v32, %v6448_v38  ;;  %v4952_v8 = vadd.f32 %v13007_v26, %v11523_v28  ;;  %v6461_v41 = vshrl.u32 %v9579_v12, 16 }
 0x235   : > { %v13191_v6 = vpop.f32.mrf.mxu0  ;;  %v9871_v20 = vpack.c.bf16 %v8103_v17, %v8103_v17  ;;  %v6454_v11 = vrot.slane %v6453_v55, 4  ;;  %v7717_v18 = vadd.f32 %v12957_v42, %v7582_v16  ;;  %v7722_v7 = vadd.f32 %v12957_v42, %v7587_v60 }
 0x236   : > { %v7585_v56 = vadd.f32 %v13029_v53, %v4952_v8  ;;  %v6463_v62 = vrot.slane %v6461_v41, 4  ;;  %v6464_v15 = vshll.u32 %v9579_v12, 16  ;;  %v6470_v22 = vshll.u32 %v9580_v39, 16 }
 0x237   : > { %v13197_v14 = vpop.f32.mrf.mxu1  ;;  %v13199_v38 = vpop.f32.mrf.mxu0  ;;  %8744 = vst.msk [vmem:[%s12994_s4 + $0x2c] sm:$0xf] %vm8732_vm4, %v9871_v20  ;;  %v6459_v28 = vsel %vm10982_vm3, %v6454_v11, %v6458_v43  ;;  %vm7845_vm1 = vcmp.ge.f32.partialorder %v7717_v18, 0.0  ;;  %v7973_v26 = vmul.f32 0.2, %v7717_v18  ;;  %vm7850_vm2 = vcmp.ge.f32.partialorder %v7722_v7, 0.0 }
 0x238   : > { %v9654_v32 = vcombine.low %v6449_v45, %v6459_v28  ;;  %v7978_v9 = vmul.f32 0.2, %v7722_v7  ;;  %v7720_v53 = vadd.f32 %v12957_v42, %v7585_v56  ;;  %v6466_v55 = vrot.slane %v6464_v15, 5  ;;  %v9582_v20 = vld [vmem:[%s10969_s25 + $0x250] sm:$0xf] }
 0x239   : > { %v13206_v12 = vpop.f32.mrf.mxu1  ;;  %v13208_v16 = vpop.f32.mrf.mxu0  ;;  %v8101_v60 = vsel %vm7845_vm1, %v7717_v18, %v7973_v26  ;;  %v6472_v17 = vrot.slane %v6470_v22, 5  ;;  %v6474_v8 = vshrl.u32 %v9580_v39, 16  ;;  %v6480_v41 = vshll.u32 %v9581_v29, 16  ;;  %v9583_v22 = vld [vmem:[%s10969_s25 + $0x254] sm:$0x1] }
 0x23a   : > { %10749 = vmatmul.mubr.msk.bf16.gmra.mxu1 %vm1945_vm0, %v9654_v32  ;;  %v9869_v43 = vpack.c.bf16 %v8101_v60, %v8101_v60  ;;  %v8106_v11 = vsel %vm7850_vm2, %v7722_v7, %v7978_v9  ;;  %vm7848_vm5 = vcmp.ge.f32.partialorder %v7720_v53, 0.0  ;;  %v7976_v45 = vmul.f32 0.2, %v7720_v53 }
 0x23b   : > { %v13212_v56 = vpop.f32.mrf.mxu1  ;;  %v13214_v15 = vpop.f32.mrf.mxu0  ;;  %v9874_v28 = vpack.c.bf16 %v8106_v11, %v8106_v11  ;;  %v6467_v54 = vor.u32 %v6466_v55, %v6463_v62  ;;  %v6476_v18 = vrot.slane %v6474_v8, 4  ;;  %v6482_v26 = vrot.slane %v6480_v41, 5 }
 0x23c   : > { %8742 = vst.msk [vmem:[%s12994_s4 + $0x24] sm:$0xf] %vm8732_vm4, %v9869_v43  ;;  %v8104_v39 = vsel %vm7848_vm5, %v7720_v53, %v7976_v45  ;;  %v6484_v1 = vshrl.u32 %v9581_v29, 16  ;;  %v4955_v7 = vadd.f32 %v13020_v35, %v14356_v5  ;;  %v6490_v32 = vshll.u32 %v9582_v20, 16 }
 0x23d   : > { %v13221_v9 = vpop.f32.mrf.mxu1  ;;  %v13223_v60 = vpop.f32.mrf.mxu0  ;;  %8747 = vst.msk [vmem:[%s12994_s4 + $0x38] sm:$0xf] %vm8732_vm4, %v9874_v28  ;;  %v9872_v11 = vpack.c.bf16 %v8104_v39, %v8104_v39  ;;  %v6468_v62 = vrot.slane %v6467_v54, 4  ;;  %v6477_v55 = vor.u32 %v6476_v18, %v6472_v17  ;;  %v6494_v8 = vshrl.u32 %v9582_v20, 16  ;;  %v14357_v54 = vld [vmem:[#allocation3_spill] sm:$0xff] }
 0x23e   : > { %v6486_v41 = vrot.slane %v6484_v1, 4  ;;  %v7588_v43 = vadd.f32 %v13041_v37, %v4955_v7  ;;  %v6492_v53 = vrot.slane %v6490_v32, 5  ;;  %v6500_v29 = vshll.u32 %v9583_v22, 16  ;;  %v14358_v22 = vld [vmem:[#allocation4_spill] sm:$0xff] }
 0x23f   : > { %v13228_v45 = vpop.f32.mrf.mxu1  ;;  %v13230_v27 = vpop.f32.mrf.mxu0  ;;  %8745 = vst.msk [vmem:[%s12994_s4 + $0x30] sm:$0xf] %vm8732_vm4, %v9872_v11  ;;  %v6473_v5 = vsel %vm10982_vm3, %v6468_v62, %v6472_v17  ;;  %v6478_v35 = vrot.slane %v6477_v55, 4  ;;  %v6496_v28 = vrot.slane %v6494_v8, 4  ;;  %v4953_v20 = vadd.f32 %v13031_v61, %v14357_v54  ;;  %v14360_v55 = vld [vmem:[#allocation5_spill] sm:$0xff] }
 0x240   : > { %v6487_v1 = vor.u32 %v6486_v41, %v6482_v26  ;;  %v7723_v37 = vadd.f32 %v12957_v42, %v7588_v43  ;;  %v6502_v18 = vrot.slane %v6500_v29, 5  ;;  %v4958_v39 = vadd.f32 %v13043_v10, %v14358_v22  ;;  %v9584_v8 = vld [vmem:[%s10969_s25 + $0x258] sm:$0xf] }
 0x241   : > { %v13241_v7 = vpop.f32.mrf.mxu1  ;;  %v13243_v32 = vpop.f32.mrf.mxu0  ;;  %v6483_v11 = vsel %vm10982_vm3, %v6478_v35, %v6482_v26  ;;  %v6497_v17 = vor.u32 %v6496_v28, %v6492_v53  ;;  %v7586_v62 = vadd.f32 %v13051_v49, %v4953_v20  ;;  %v4956_v61 = vadd.f32 %v13053_v13, %v14360_v55 }
 0x242   : > { %14359 = vst [vmem:[#allocation2_spill] sm:$0xff] %v13243_v32  ;;  %v6488_v41 = vrot.slane %v6487_v1, 4  ;;  %v9655_v43 = vcombine.low %v6473_v5, %v6483_v11  ;;  %vm7851_vm6 = vcmp.ge.f32.partialorder %v7723_v37, 0.0  ;;  %v7979_v29 = vmul.f32 0.2, %v7723_v37 }
 0x243   : > { %v13251_v10 = vpop.f32.mrf.mxu1  ;;  %v13253_v54 = vpop.f32.mrf.mxu0  ;;  %v6498_v22 = vrot.slane %v6497_v17, 4  ;;  %v7721_v32 = vadd.f32 %v12957_v42, %v7586_v62  ;;  %v7591_v26 = vadd.f32 %v13060_v40, %v4958_v39  ;;  %v7589_v49 = vadd.f32 %v13069_v46, %v4956_v61  ;;  %v9585_v5 = vld [vmem:[%s10969_s25 + $0x25c] sm:$0xf] }
 0x244   : > { %10752 = vmatprep.mubr.msk.bf16.mxu1 %vm1945_vm0, %v9655_v43  ;;  %v8107_v35 = vsel %vm7851_vm6, %v7723_v37, %v7979_v29  ;;  %v6493_v13 = vsel %vm10982_vm3, %v6488_v41, %v6492_v53  ;;  %v6505_v28 = vshrl.u32 %v9584_v8, 16  ;;  %v6508_v20 = vshll.u32 %v9584_v8, 16  ;;  %v9586_v8 = vld [vmem:[%s10969_s25 + $0x260] sm:$0xf] }
 0x245   : > { %v13262_v1 = vpop.f32.mrf.mxu1  ;;  %v13264_v11 = vpop.f32.mrf.mxu0  ;;  %v9875_v17 = vpack.c.bf16 %v8107_v35, %v8107_v35  ;;  %v6503_v40 = vsel %vm10982_vm3, %v6498_v22, %v6502_v18  ;;  %vm7849_vm7 = vcmp.ge.f32.partialorder %v7721_v32, 0.0  ;;  %v7977_v46 = vmul.f32 0.2, %v7721_v32 }
 0x246   : > { %14361 = vst [vmem:[#allocation3_spill] sm:$0xff] %v13264_v11  ;;  %v9656_v39 = vcombine.low %v6493_v13, %v6503_v40  ;;  %v7726_v37 = vadd.f32 %v12957_v42, %v7591_v26  ;;  %v7724_v62 = vadd.f32 %v12957_v42, %v7589_v49  ;;  %v6507_v53 = vrot.slane %v6505_v28, 4  ;;  %v14364_v40 = vld [vmem:[#allocation6_spill] sm:$0xff] }
 0x247   : > { %v13270_v55 = vpop.f32.mrf.mxu0  ;;  %8748 = vst.msk [vmem:[%s12994_s4 + $0x3c] sm:$0xf] %vm8732_vm4, %v9875_v17  ;;  %v8105_v61 = vsel %vm7849_vm7, %v7721_v32, %v7977_v46  ;;  %v6510_v41 = vrot.slane %v6508_v20, 5  ;;  %v6514_v43 = vshll.u32 %v9585_v5, 16  ;;  %v6518_v29 = vshrl.u32 %v9585_v5, 16 }
 0x248   : > { %14362 = vst [vmem:[#allocation4_spill] sm:$0xff] %v13270_v55  ;;  %10753 = vmatmul.mubr.msk.bf16.gmra.mxu1 %vm1945_vm0, %v9656_v39  ;;  %v9873_v18 = vpack.c.bf16 %v8105_v61, %v8105_v61  ;;  %vm7854_vm8 = vcmp.ge.f32.partialorder %v7726_v37, 0.0  ;;  %v7982_v22 = vmul.f32 0.2, %v7726_v37  ;;  %vm7852_vm9 = vcmp.ge.f32.partialorder %v7724_v62, 0.0 }
 0x249   : > { %v13276_v26 = vpop.f32.mrf.mxu1  ;;  %v13278_v49 = vpop.f32.mrf.mxu0  ;;  %v7980_v35 = vmul.f32 0.2, %v7724_v62  ;;  %v6511_v13 = vor.u32 %v6510_v41, %v6507_v53  ;;  %v6516_v32 = vrot.slane %v6514_v43, 5  ;;  %v6520_v28 = vrot.slane %v6518_v29, 4  ;;  %v9587_v39 = vld [vmem:[%s10969_s25 + $0x264] sm:$0xf] }
 0x24a   : > { %14363 = vst [vmem:[#allocation5_spill] sm:$0xff] %v13278_v49  ;;  %8746 = vst.msk [vmem:[%s12994_s4 + $0x34] sm:$0xf] %vm8732_vm4, %v9873_v18  ;;  %v8110_v20 = vsel %vm7854_vm8, %v7726_v37, %v7982_v22  ;;  %v6524_v5 = vshll.u32 %v9586_v8, 16  ;;  %v6528_v17 = vshrl.u32 %v9586_v8, 16  ;;  %v4959_v46 = vadd.f32 %v13062_v24, %v14364_v40 }
 0x24b   : > { %v13285_v61 = vpop.f32.mrf.mxu1  ;;  %v13287_v55 = vpop.f32.mrf.mxu0  ;;  %v9878_v49 = vpack.c.bf16 %v8110_v20, %v8110_v20  ;;  %v8108_v53 = vsel %vm7852_vm9, %v7724_v62, %v7980_v35  ;;  %v6512_v41 = vrot.slane %v6511_v13, 4  ;;  %v6521_v43 = vor.u32 %v6520_v28, %v6516_v32  ;;  %v9588_v29 = vld [vmem:[%s10969_s25 + $0x268] sm:$0x1] }
 0x24c   : > { %14365 = vst [vmem:[#allocation6_spill] sm:$0xff] %v13287_v55  ;;  %v9876_v18 = vpack.c.bf16 %v8108_v53, %v8108_v53  ;;  %v6526_v37 = vrot.slane %v6524_v5, 5  ;;  %v6530_v22 = vrot.slane %v6528_v17, 4  ;;  %v7592_v8 = vadd.f32 %v13078_v34, %v4959_v46  ;;  %v14367_v34 = vld [vmem:[#allocation7_spill] sm:$0xff] }
 0x24d   : > { %v13292_v11 = vpop.f32.mrf.mxu1  ;;  %v13294_v24 = vpop.f32.mrf.mxu0  ;;  %8751 = vst.msk [vmem:[%s12994_s4 + $0x48] sm:$0xf] %vm8732_vm4, %v9878_v49  ;;  %v6517_v20 = vsel %vm10982_vm3, %v6512_v41, %v6516_v32  ;;  %v6522_v40 = vrot.slane %v6521_v43, 4  ;;  %v6534_v62 = vshll.u32 %v9587_v39, 16  ;;  %v6538_v35 = vshrl.u32 %v9587_v39, 16  ;;  %v14369_v39 = vld [vmem:[#allocation8_spill] sm:$0xff] }
 0x24e   : > { %14366 = vst [vmem:[#allocation119_spill] sm:$0xff] %v13294_v24  ;;  %8749 = vst.msk [vmem:[%s12994_s4 + $0x40] sm:$0xf] %vm8732_vm4, %v9876_v18  ;;  %v6531_v13 = vor.u32 %v6530_v22, %v6526_v37  ;;  %v7727_v28 = vadd.f32 %v12957_v42, %v7592_v8  ;;  %v6544_v5 = vshll.u32 %v9588_v29, 16  ;;  %v4957_v17 = vadd.f32 %v13071_v47, %v14367_v34  ;;  %v9589_v18 = vld [vmem:[%s10969_s25 + $0x26c] sm:$0xf] }
 0x24f   : > { %v13305_v46 = vpop.f32.mrf.mxu1  ;;  %v13307_v53 = vpop.f32.mrf.mxu0  ;;  %v6527_v49 = vsel %vm10982_vm3, %v6522_v40, %v6526_v37  ;;  %v6536_v32 = vrot.slane %v6534_v62, 5  ;;  %v6540_v41 = vrot.slane %v6538_v35, 4  ;;  %v4962_v43 = vadd.f32 %v13080_v21, %v14369_v39  ;;  %v9590_v40 = vld [vmem:[%s10969_s25 + $0x270] sm:$0xf]  ;;  %v14371_v62 = vld [vmem:[#allocation9_spill] sm:$0xff] }
 0x250   : > { %14368 = vst [vmem:[#allocation7_spill] sm:$0xff] %v13307_v53  ;;  %v6532_v22 = vrot.slane %v6531_v13, 4  ;;  %v9657_v8 = vcombine.low %v6517_v20, %v6527_v49  ;;  %vm7855_vm10 = vcmp.ge.f32.partialorder %v7727_v28, 0.0  ;;  %v7983_v29 = vmul.f32 0.2, %v7727_v28 }
 0x251   : > { %v13314_v24 = vpop.f32.mrf.mxu1  ;;  %v13316_v47 = vpop.f32.mrf.mxu0  ;;  %v6541_v34 = vor.u32 %v6540_v41, %v6536_v32  ;;  %v6546_v53 = vrot.slane %v6544_v5, 5  ;;  %v7590_v55 = vadd.f32 %v13087_v4, %v4957_v17  ;;  %v7595_v37 = vadd.f32 %v13110_v19, %v4962_v43  ;;  %v9591_v39 = vld [vmem:[%s10969_s25 + $0x274] sm:$0xf] }
 0x252   : > { %14370 = vst [vmem:[#allocation8_spill] sm:$0xff] %v13316_v47  ;;  %10756 = vmatprep.mubr.msk.bf16.mxu1 %vm1945_vm0, %v9657_v8  ;;  %v8111_v21 = vsel %vm7855_vm10, %v7727_v28, %v7983_v29  ;;  %v6537_v20 = vsel %vm10982_vm3, %v6532_v22, %v6536_v32  ;;  %v4960_v35 = vadd.f32 %v13089_v59, %v14371_v62  ;;  %v6549_v13 = vshrl.u32 %v9589_v18, 16  ;;  %v9593_v47 = vld [vmem:[%s10969_s25 + $0x27c] sm:$0x1] }
 0x253   : > { %v13326_v49 = vpop.f32.mrf.mxu1  ;;  %v13328_v5 = vpop.f32.mrf.mxu0  ;;  %v9879_v41 = vpack.c.bf16 %v8111_v21, %v8111_v21  ;;  %v6542_v4 = vrot.slane %v6541_v34, 4  ;;  %v7725_v19 = vadd.f32 %v12957_v42, %v7590_v55  ;;  %v7730_v17 = vadd.f32 %v12957_v42, %v7595_v37 }
 0x254   : > { %14372 = vst [vmem:[#allocation9_spill] sm:$0xff] %v13328_v5  ;;  %v7593_v28 = vadd.f32 %v13121_v50, %v4960_v35  ;;  %v6551_v43 = vrot.slane %v6549_v13, 4  ;;  %v6552_v32 = vshll.u32 %v9589_v18, 16  ;;  %v6558_v22 = vshll.u32 %v9590_v40, 16  ;;  %v9592_v5 = vld [vmem:[%s10969_s25 + $0x278] sm:$0xf] }
 0x255   : > { %v13334_v8 = vpop.f32.mrf.mxu1  ;;  %v13336_v59 = vpop.f32.mrf.mxu0  ;;  %8752 = vst.msk [vmem:[%s12994_s4 + $0x4c] sm:$0xf] %vm8732_vm4, %v9879_v41  ;;  %v6547_v29 = vsel %vm10982_vm3, %v6542_v4, %v6546_v53  ;;  %vm7853_vm11 = vcmp.ge.f32.partialorder %v7725_v19, 0.0  ;;  %v7981_v55 = vmul.f32 0.2, %v7725_v19  ;;  %vm7858_vm12 = vcmp.ge.f32.partialorder %v7730_v17, 0.0 }
 0x256   : > { %14373 = vst [vmem:[#allocation120_spill] sm:$0xff] %v13336_v59  ;;  %v9658_v34 = vcombine.low %v6537_v20, %v6547_v29  ;;  %v7986_v37 = vmul.f32 0.2, %v7730_v17  ;;  %v7728_v50 = vadd.f32 %v12957_v42, %v7593_v28  ;;  %v6554_v21 = vrot.slane %v6552_v32, 5 }
 0x257   : > { %v13343_v18 = vpop.f32.mrf.mxu1  ;;  %v13345_v62 = vpop.f32.mrf.mxu0  ;;  %v8109_v35 = vsel %vm7853_vm11, %v7725_v19, %v7981_v55  ;;  %v6560_v13 = vrot.slane %v6558_v22, 5  ;;  %v6562_v41 = vshrl.u32 %v9590_v40, 16  ;;  %v6568_v59 = vshll.u32 %v9591_v39, 16  ;;  %v14375_v22 = vld [vmem:[#allocation10_spill] sm:$0xff] }
 0x258   : > { %14374 = vst [vmem:[#allocation121_spill] sm:$0xff] %v13345_v62  ;;  %10757 = vmatmul.mubr.msk.bf16.gmra.mxu1 %vm1945_vm0, %v9658_v34  ;;  %v9877_v53 = vpack.c.bf16 %v8109_v35, %v8109_v35  ;;  %v8114_v4 = vsel %vm7858_vm12, %v7730_v17, %v7986_v37  ;;  %vm7856_vm13 = vcmp.ge.f32.partialorder %v7728_v50, 0.0  ;;  %v7984_v20 = vmul.f32 0.2, %v7728_v50 }
 0x259   : > { %v13349_v42 = vpop.f32.mrf.mxu0  ;;  %v9882_v28 = vpack.c.bf16 %v8114_v4, %v8114_v4  ;;  %v6555_v32 = vor.u32 %v6554_v21, %v6551_v43  ;;  %v6564_v29 = vrot.slane %v6562_v41, 4  ;;  %v6570_v62 = vrot.slane %v6568_v59, 5 }
 0x25a   : > { %8750 = vst.msk [vmem:[%s12994_s4 + $0x44] sm:$0xf] %vm8732_vm4, %v9877_v53  ;;  %v8112_v19 = vsel %vm7856_vm13, %v7728_v50, %v7984_v20  ;;  %v6572_v40 = vshrl.u32 %v9591_v39, 16  ;;  %v4963_v55 = vadd.f32 %v13100_v63, %v14375_v22  ;;  %v6578_v34 = vshll.u32 %v9592_v5, 16  ;;  %v14378_v22 = vld [vmem:[#allocation12_spill] sm:$0xff] }
 0x25b   : > { %v13356_v17 = vpop.f32.mrf.mxu1  ;;  %v13358_v37 = vpop.f32.mrf.mxu0  ;;  %8755 = vst.msk [vmem:[%s12994_s4 + $0x58] sm:$0xf] %vm8732_vm4, %v9882_v28  ;;  %v9880_v35 = vpack.c.bf16 %v8112_v19, %v8112_v19  ;;  %v6556_v43 = vrot.slane %v6555_v32, 4  ;;  %v6565_v21 = vor.u32 %v6564_v29, %v6560_v13  ;;  %v6582_v59 = vshrl.u32 %v9592_v5, 16  ;;  %v14377_v32 = vld [vmem:[#allocation11_spill] sm:$0xff] }
 0x25c   : > { %v6574_v41 = vrot.slane %v6572_v40, 4  ;;  %v7596_v53 = vadd.f32 %v13131_v25, %v4963_v55  ;;  %v6580_v50 = vrot.slane %v6578_v34, 5  ;;  %v6588_v39 = vshll.u32 %v9593_v47, 16  ;;  %v13376_v25 = vld [vmem:[%s14235_s2] ss:$0 sm:$0xff] }
 0x25d   : > { %v13363_v4 = vpop.f32.mrf.mxu1  ;;  %v13365_v20 = vpop.f32.mrf.mxu0  ;;  %8753 = vst.msk [vmem:[%s12994_s4 + $0x50] sm:$0xf] %vm8732_vm4, %v9880_v35  ;;  %v6561_v63 = vsel %vm10982_vm3, %v6556_v43, %v6560_v13  ;;  %v6566_v28 = vrot.slane %v6565_v21, 4  ;;  %v6584_v19 = vrot.slane %v6582_v59, 4  ;;  %v4961_v5 = vadd.f32 %v13112_v33, %v14377_v32  ;;  %v14380_v21 = vld [vmem:[#allocation13_spill] sm:$0xff] }
 0x25e   : > { %14376 = vst [vmem:[#allocation10_spill] sm:$0xff] %v13365_v20  ;;  %v6575_v29 = vor.u32 %v6574_v41, %v6570_v62  ;;  %v7731_v47 = vadd.f32 %v13376_v25, %v7596_v53  ;;  %v6590_v40 = vrot.slane %v6588_v39, 5  ;;  %v4966_v55 = vadd.f32 %v13123_v58, %v14378_v22  ;;  %v9594_v41 = vld [vmem:[%s10969_s25 + $0x280] sm:$0xf] }
 0x25f   : > { %v13381_v34 = vpop.f32.mrf.mxu1  ;;  %v13383_v13 = vpop.f32.mrf.mxu0  ;;  %v6571_v35 = vsel %vm10982_vm3, %v6566_v28, %v6570_v62  ;;  %v6585_v33 = vor.u32 %v6584_v19, %v6580_v50  ;;  %v7594_v43 = vadd.f32 %v13139_v30, %v4961_v5  ;;  %v4964_v59 = vadd.f32 %v13133_v44, %v14380_v21 }
 0x260   : > { %14379 = vst [vmem:[#allocation11_spill] sm:$0xff] %v13383_v13  ;;  %v6576_v53 = vrot.slane %v6575_v29, 4  ;;  %v9659_v39 = vcombine.low %v6561_v63, %v6571_v35  ;;  %vm7859_vm14 = vcmp.ge.f32.partialorder %v7731_v47, 0.0  ;;  %v7987_v32 = vmul.f32 0.2, %v7731_v47 }
 0x261   : > { %v13391_v58 = vpop.f32.mrf.mxu1  ;;  %v13393_v22 = vpop.f32.mrf.mxu0  ;;  %v6586_v13 = vrot.slane %v6585_v33, 4  ;;  %v7729_v20 = vadd.f32 %v13376_v25, %v7594_v43  ;;  %v7599_v62 = vadd.f32 %v13149_v3, %v4966_v55  ;;  %v7597_v30 = vadd.f32 %v13156_v2, %v4964_v59  ;;  %v9595_v63 = vld [vmem:[%s10969_s25 + $0x284] sm:$0xf] }
 0x262   : > { %14381 = vst [vmem:[#allocation12_spill] sm:$0xff] %v13393_v22  ;;  %10760 = vmatprep.mubr.msk.bf16.mxu1 %vm1945_vm0, %v9659_v39  ;;  %v8115_v28 = vsel %vm7859_vm14, %v7731_v47, %v7987_v32  ;;  %v6581_v44 = vsel %vm10982_vm3, %v6576_v53, %v6580_v50  ;;  %v6593_v19 = vshrl.u32 %v9594_v41, 16  ;;  %v6596_v5 = vshll.u32 %v9594_v41, 16  ;;  %v9596_v53 = vld [vmem:[%s10969_s25 + $0x288] sm:$0xf] }
 0x263   : > { %v13402_v29 = vpop.f32.mrf.mxu1  ;;  %v13404_v35 = vpop.f32.mrf.mxu0  ;;  %v9883_v33 = vpack.c.bf16 %v8115_v28, %v8115_v28  ;;  %v6591_v3 = vsel %vm10982_vm3, %v6586_v13, %v6590_v40  ;;  %vm7857_vm15 = vcmp.ge.f32.partialorder %v7729_v20, 0.0  ;;  %v7985_v2 = vmul.f32 0.2, %v7729_v20 }
 0x264   : > { %14382 = vst [vmem:[#allocation13_spill] sm:$0xff] %v13404_v35  ;;  %v9660_v55 = vcombine.low %v6581_v44, %v6591_v3  ;;  %v7734_v47 = vadd.f32 %v13376_v25, %v7599_v62  ;;  %v7732_v50 = vadd.f32 %v13376_v25, %v7597_v30  ;;  %v6595_v43 = vrot.slane %v6593_v19, 4 }
 0x265   : > { %v13410_v21 = vpop.f32.mrf.mxu1  ;;  %v13412_v59 = vpop.f32.mrf.mxu0  ;;  %8756 = vst.msk [vmem:[%s12994_s4 + $0x5c] sm:$0xf] %vm8732_vm4, %v9883_v33  ;;  %v8113_v41 = vsel %vm7857_vm15, %v7729_v20, %v7985_v2  ;;  %v6598_v39 = vrot.slane %v6596_v5, 5  ;;  %v6602_v32 = vshll.u32 %v9595_v63, 16  ;;  %v6606_v40 = vshrl.u32 %v9595_v63, 16  ;;  %v14385_v2 = vld [vmem:[#allocation14_spill] sm:$0xff] }
 0x266   : > { %14383 = vst [vmem:[#allocation122_spill] sm:$0xff] %v13412_v59  ;;  %10761 = vmatmul.mubr.msk.bf16.gmra.mxu1 %vm1945_vm0, %v9660_v55  ;;  %v9881_v13 = vpack.c.bf16 %v8113_v41, %v8113_v41  ;;  %vm7862_vm1 = vcmp.ge.f32.partialorder %v7734_v47, 0.0  ;;  %v7990_v62 = vmul.f32 0.2, %v7734_v47  ;;  %vm7860_vm2 = vcmp.ge.f32.partialorder %v7732_v50, 0.0 }
 0x267   : > { %v13418_v30 = vpop.f32.mrf.mxu1  ;;  %v13420_v28 = vpop.f32.mrf.mxu0  ;;  %v7988_v44 = vmul.f32 0.2, %v7732_v50  ;;  %v6599_v19 = vor.u32 %v6598_v39, %v6595_v43  ;;  %v6604_v20 = vrot.slane %v6602_v32, 5  ;;  %v6608_v33 = vrot.slane %v6606_v40, 4  ;;  %v9597_v41 = vld [vmem:[%s10969_s25 + $0x28c] sm:$0xf] }
 0x268   : > { %14384 = vst [vmem:[#allocation123_spill] sm:$0xff] %v13420_v28  ;;  %8754 = vst.msk [vmem:[%s12994_s4 + $0x54] sm:$0xf] %vm8732_vm4, %v9881_v13  ;;  %v8118_v5 = vsel %vm7862_vm1, %v7734_v47, %v7990_v62  ;;  %v6612_v63 = vshll.u32 %v9596_v53, 16  ;;  %v6616_v3 = vshrl.u32 %v9596_v53, 16  ;;  %v4967_v55 = vadd.f32 %v13141_v48, %v14385_v2 }
 0x269   : > { %v13427_v59 = vpop.f32.mrf.mxu1  ;;  %v13429_v35 = vpop.f32.mrf.mxu0  ;;  %v9886_v28 = vpack.c.bf16 %v8118_v5, %v8118_v5  ;;  %v8116_v43 = vsel %vm7860_vm2, %v7732_v50, %v7988_v44  ;;  %v6600_v39 = vrot.slane %v6599_v19, 4  ;;  %v6609_v32 = vor.u32 %v6608_v33, %v6604_v20  ;;  %v9598_v40 = vld [vmem:[%s10969_s25 + $0x290] sm:$0x1]  ;;  %v14387_v33 = vld [vmem:[#allocation15_spill] sm:$0xff] }
 0x26a   : > { %14386 = vst [vmem:[#allocation14_spill] sm:$0xff] %v13429_v35  ;;  %v9884_v13 = vpack.c.bf16 %v8116_v43, %v8116_v43  ;;  %v6614_v47 = vrot.slane %v6612_v63, 5  ;;  %v6618_v62 = vrot.slane %v6616_v3, 4  ;;  %v7600_v53 = vadd.f32 %v13170_v51, %v4967_v55  ;;  %v14389_v43 = vld [vmem:[#allocation16_spill] sm:$0xff] }
 0x26b   : > { %v13434_v22 = vpop.f32.mrf.mxu0  ;;  %8759 = vst.msk [vmem:[%s12994_s4 + $0x68] sm:$0xf] %vm8732_vm4, %v9886_v28  ;;  %v6605_v48 = vsel %vm10982_vm3, %v6600_v39, %v6604_v20  ;;  %v6610_v2 = vrot.slane %v6609_v32, 4  ;;  %v6622_v35 = vshll.u32 %v9597_v41, 16  ;;  %v6626_v5 = vshrl.u32 %v9597_v41, 16 }
 0x26c   : > { %8757 = vst.msk [vmem:[%s12994_s4 + $0x60] sm:$0xf] %vm8732_vm4, %v9884_v13  ;;  %v6619_v50 = vor.u32 %v6618_v62, %v6614_v47  ;;  %v7735_v44 = vadd.f32 %v13376_v25, %v7600_v53  ;;  %v6632_v19 = vshll.u32 %v9598_v40, 16  ;;  %v4965_v63 = vadd.f32 %v13151_v57, %v14387_v33 }
 0x26d   : > { %v13445_v51 = vpop.f32.mrf.mxu1  ;;  %v13447_v3 = vpop.f32.mrf.mxu0  ;;  %v6615_v28 = vsel %vm10982_vm3, %v6610_v2, %v6614_v47  ;;  %v6624_v20 = vrot.slane %v6622_v35, 5  ;;  %v6628_v55 = vrot.slane %v6626_v5, 4  ;;  %v4970_v41 = vadd.f32 %v13158_v52, %v14389_v43  ;;  %v14390_v47 = vld [vmem:[#allocation17_spill] sm:$0xff]  ;;  %v14391_v2 = vld [vmem:[#allocation18_spill] sm:$0xff]  ;;  %v14393_v43 = vld [vmem:[#allocation20_spill] sm:$0xff] }
 0x26e   : > { %14388 = vst [vmem:[#allocation15_spill] sm:$0xff] %v13447_v3  ;;  %v6620_v39 = vrot.slane %v6619_v50, 4  ;;  %v9661_v32 = vcombine.low %v6605_v48, %v6615_v28  ;;  %vm7863_vm5 = vcmp.ge.f32.partialorder %v7735_v44, 0.0  ;;  %v7991_v13 = vmul.f32 0.2, %v7735_v44 }
 0x26f   : > { %v13453_v40 = vpop.f32.mrf.mxu1  ;;  %v13455_v62 = vpop.f32.mrf.mxu0  ;;  %v6629_v57 = vor.u32 %v6628_v55, %v6624_v20  ;;  %v6634_v53 = vrot.slane %v6632_v19, 5  ;;  %v7598_v33 = vadd.f32 %v13179_v36, %v4965_v63  ;;  %v7603_v3 = vadd.f32 %v13197_v14, %v4970_v41  ;;  %v14392_v55 = vld [vmem:[#allocation19_spill] sm:$0xff] }
 0x270   : > { %10764 = vmatprep.mubr.msk.bf16.mxu1 %vm1945_vm0, %v9661_v32  ;;  %v8119_v35 = vsel %vm7863_vm5, %v7735_v44, %v7991_v13  ;;  %v6625_v52 = vsel %vm10982_vm3, %v6620_v39, %v6624_v20  ;;  %v4968_v48 = vadd.f32 %v13172_v0, %v14390_v47  ;;  %v4971_v5 = vadd.f32 %v13181_v23, %v14391_v2 }
 0x271   : > { %v13466_v50 = vpop.f32.mrf.mxu1  ;;  %v13468_v19 = vpop.f32.mrf.mxu0  ;;  %v9887_v36 = vpack.c.bf16 %v8119_v35, %v8119_v35  ;;  %v6630_v63 = vrot.slane %v6629_v57, 4  ;;  %v7733_v14 = vadd.f32 %v13376_v25, %v7598_v33  ;;  %v7738_v44 = vadd.f32 %v13376_v25, %v7603_v3 }
 0x272   : > { %v7601_v28 = vadd.f32 %v13206_v12, %v4968_v48  ;;  %v7604_v20 = vadd.f32 %v13212_v56, %v4971_v5  ;;  %v4969_v0 = vadd.f32 %v13191_v6, %v14392_v55  ;;  %v4974_v23 = vadd.f32 %v13199_v38, %v14393_v43 }
 0x273   : > { %v13478_v41 = vpop.f32.mrf.mxu1  ;;  %v13480_v39 = vpop.f32.mrf.mxu0  ;;  %8760 = vst.msk [vmem:[%s12994_s4 + $0x6c] sm:$0xf] %vm8732_vm4, %v9887_v36  ;;  %v6635_v32 = vsel %vm10982_vm3, %v6630_v63, %v6634_v53  ;;  %vm7861_vm6 = vcmp.ge.f32.partialorder %v7733_v14, 0.0  ;;  %v7989_v3 = vmul.f32 0.2, %v7733_v14  ;;  %vm7866_vm7 = vcmp.ge.f32.partialorder %v7738_v44, 0.0 }
 0x274   : > { %v9662_v12 = vcombine.low %v6625_v52, %v6635_v32  ;;  %v7994_v56 = vmul.f32 0.2, %v7738_v44  ;;  %v7736_v13 = vadd.f32 %v13376_v25, %v7601_v28  ;;  %v7739_v6 = vadd.f32 %v13376_v25, %v7604_v20  ;;  %v14394_v53 = vld [vmem:[#allocation21_spill] sm:$0xff]  ;;  %v14395_v28 = vld [vmem:[#allocation22_spill] sm:$0xff] }
 0x275   : > { %v13488_v57 = vpop.f32.mrf.mxu1  ;;  %v13490_v38 = vpop.f32.mrf.mxu0  ;;  %v8117_v33 = vsel %vm7861_vm6, %v7733_v14, %v7989_v3  ;;  %v7602_v35 = vadd.f32 %v13221_v9, %v4969_v0  ;;  %v7607_v31 = vadd.f32 %v13228_v45, %v4974_v23  ;;  %v4972_v47 = vadd.f32 %v13208_v16, %v14394_v53 }
 0x276   : > { %10765 = vmatmul.mubr.msk.bf16.gmra.mxu1 %vm1945_vm0, %v9662_v12  ;;  %v9885_v52 = vpack.c.bf16 %v8117_v33, %v8117_v33  ;;  %v8122_v48 = vsel %vm7866_vm7, %v7738_v44, %v7994_v56  ;;  %vm7864_vm3 = vcmp.ge.f32.partialorder %v7736_v13, 0.0  ;;  %v7992_v2 = vmul.f32 0.2, %v7736_v13 }
 0x277   : > { %v13497_v5 = vpop.f32.mrf.mxu1  ;;  %v13499_v36 = vpop.f32.mrf.mxu0  ;;  %v9890_v63 = vpack.c.bf16 %v8122_v48, %v8122_v48  ;;  %vm7867_vm8 = vcmp.ge.f32.partialorder %v7739_v6, 0.0  ;;  %v7995_v14 = vmul.f32 0.2, %v7739_v6  ;;  %v7737_v9 = vadd.f32 %v13376_v25, %v7602_v35  ;;  %v14396_v35 = vld [vmem:[#allocation23_spill] sm:$0xff] }
 0x278   : > { %8758 = vst.msk [vmem:[%s12994_s4 + $0x64] sm:$0xf] %vm8732_vm4, %v9885_v52  ;;  %v8120_v45 = vsel %vm7864_vm3, %v7736_v13, %v7992_v2  ;;  %v7742_v16 = vadd.f32 %v13376_v25, %v7607_v31  ;;  %v7605_v44 = vadd.f32 %v13241_v7, %v4972_v47  ;;  %v4975_v20 = vadd.f32 %v13214_v15, %v14395_v28  ;;  %v14397_v31 = vld [vmem:[#allocation24_spill] sm:$0xff]  ;;  %v14400_v28 = vld [vmem:[#allocation26_spill] sm:$0xff] }
 0x279   : > { %v13508_v55 = vpop.f32.mrf.mxu1  ;;  %v13510_v0 = vpop.f32.mrf.mxu0  ;;  %8763 = vst.msk [vmem:[%s12994_s4 + $0x78] sm:$0xf] %vm8732_vm4, %v9890_v63  ;;  %v9888_v43 = vpack.c.bf16 %v8120_v45, %v8120_v45  ;;  %v8123_v23 = vsel %vm7867_vm8, %v7739_v6, %v7995_v14  ;;  %vm7865_vm0 = vcmp.ge.f32.partialorder %v7737_v9, 0.0  ;;  %v7993_v32 = vmul.f32 0.2, %v7737_v9  ;;  %v14399_v45 = vld [vmem:[#allocation2_spill] sm:$0xff] }
 0x27a   : > { %v9891_v3 = vpack.c.bf16 %v8123_v23, %v8123_v23  ;;  %vm7870_vm9 = vcmp.ge.f32.partialorder %v7742_v16, 0.0  ;;  %v7998_v12 = vmul.f32 0.2, %v7742_v16  ;;  %v7740_v56 = vadd.f32 %v13376_v25, %v7605_v44 }
 0x27b   : > { %v13515_v7 = vpop.f32.mrf.mxu1  ;;  %v13517_v13 = vpop.f32.mrf.mxu0  ;;  %8761 = vst.msk [vmem:[%s12994_s4 + $0x70] sm:$0xf] %vm8732_vm4, %v9888_v43  ;;  %v8121_v15 = vsel %vm7865_vm0, %v7737_v9, %v7993_v32  ;;  %v7608_v33 = vadd.f32 %v13251_v10, %v4975_v20  ;;  %v4973_v6 = vadd.f32 %v13223_v60, %v14396_v35  ;;  %v4978_v53 = vadd.f32 %v13230_v27, %v14397_v31  ;;  %v14398_v27 = vld [vmem:[#allocation25_spill] sm:$0xff]  ;;  %v14401_v20 = vld [vmem:[#allocation27_spill] sm:$0xff] }
 0x27c   : > { %8764 = vst.msk [vmem:[%s12994_s4 + $0x7c] sm:$0xf] %vm8732_vm4, %v9891_v3  ;;  %v9889_v47 = vpack.c.bf16 %v8121_v15, %v8121_v15  ;;  %v8126_v52 = vsel %vm7870_vm9, %v7742_v16, %v7998_v12  ;;  %vm7868_vm10 = vcmp.ge.f32.partialorder %v7740_v56, 0.0  ;;  %v7996_v48 = vmul.f32 0.2, %v7740_v56  ;;  %v14402_v43 = vld [vmem:[#allocation3_spill] sm:$0xff] }
 0x27d   : > { %v13528_v2 = vpop.f32.mrf.mxu0  ;;  %v9894_v63 = vpack.c.bf16 %v8126_v52, %v8126_v52  ;;  %v7743_v14 = vadd.f32 %v13376_v25, %v7608_v33  ;;  %v7606_v10 = vadd.f32 %v13262_v1, %v4973_v6  ;;  %v7611_v9 = vadd.f32 %v13276_v26, %v4978_v53  ;;  %v14404_v52 = vld [vmem:[#allocation4_spill] sm:$0xff] }
 0x27e   : > { %8762 = vst.msk [vmem:[%s12994_s4 + $0x74] sm:$0xf] %vm8732_vm4, %v9889_v47  ;;  %v8124_v60 = vsel %vm7868_vm10, %v7740_v56, %v7996_v48  ;;  %v4976_v44 = vadd.f32 %v14399_v45, %v14398_v27  ;;  %v4979_v16 = vadd.f32 %v13253_v54, %v14400_v28  ;;  %v4977_v23 = vadd.f32 %v14402_v43, %v14401_v20  ;;  %v14403_v47 = vld [vmem:[#allocation28_spill] sm:$0xff] }
 0x27f   : > { %v13541_v32 = vpop.f32.mrf.mxu1  ;;  %v13543_v3 = vpop.f32.mrf.mxu0  ;;  %8767 = vst.msk [vmem:[%s12994_s4 + $0x88] sm:$0xf] %vm8732_vm4, %v9894_v63  ;;  %v9892_v1 = vpack.c.bf16 %v8124_v60, %v8124_v60  ;;  %vm7871_vm11 = vcmp.ge.f32.partialorder %v7743_v14, 0.0  ;;  %v7999_v26 = vmul.f32 0.2, %v7743_v14  ;;  %v7741_v12 = vadd.f32 %v13376_v25, %v7606_v10 }
 0x280   : > { %v7746_v56 = vadd.f32 %v13376_v25, %v7611_v9  ;;  %v7609_v15 = vadd.f32 %v13285_v61, %v4976_v44  ;;  %v7612_v54 = vadd.f32 %v13292_v11, %v4979_v16  ;;  %v7610_v33 = vadd.f32 %v13305_v46, %v4977_v23 }
 0x281   : > { %v13552_v35 = vpop.f32.mrf.mxu1  ;;  %v13554_v6 = vpop.f32.mrf.mxu0  ;;  %8765 = vst.msk [vmem:[%s12994_s4 + $0x80] sm:$0xf] %vm8732_vm4, %v9892_v1  ;;  %v8127_v31 = vsel %vm7871_vm11, %v7743_v14, %v7999_v26  ;;  %vm7869_vm12 = vcmp.ge.f32.partialorder %v7741_v12, 0.0  ;;  %v7997_v53 = vmul.f32 0.2, %v7741_v12  ;;  %v4982_v48 = vadd.f32 %v14404_v52, %v14403_v47  ;;  %v14407_v47 = vld [vmem:[#allocation30_spill] sm:$0xff] }
 0x282   : > { %v9895_v63 = vpack.c.bf16 %v8127_v31, %v8127_v31  ;;  %vm7874_vm13 = vcmp.ge.f32.partialorder %v7746_v56, 0.0  ;;  %v8002_v61 = vmul.f32 0.2, %v7746_v56  ;;  %v7744_v11 = vadd.f32 %v13376_v25, %v7609_v15  ;;  %v14408_v52 = vld [vmem:[#allocation6_spill] sm:$0xff] }
 0x283   : > { %v13561_v10 = vpop.f32.mrf.mxu1  ;;  %v13563_v46 = vpop.f32.mrf.mxu0  ;;  %v8125_v9 = vsel %vm7869_vm12, %v7741_v12, %v7997_v53  ;;  %v7747_v60 = vadd.f32 %v13376_v25, %v7612_v54  ;;  %v7745_v14 = vadd.f32 %v13376_v25, %v7610_v33  ;;  %v7615_v27 = vadd.f32 %v13314_v24, %v4982_v48  ;;  %v14405_v12 = vld [vmem:[#allocation29_spill] sm:$0xff] }
 0x284   : > { %8768 = vst.msk [vmem:[%s12994_s4 + $0x8c] sm:$0xf] %vm8732_vm4, %v9895_v63  ;;  %v9893_v45 = vpack.c.bf16 %v8125_v9, %v8125_v9  ;;  %v8130_v44 = vsel %vm7874_vm13, %v7746_v56, %v8002_v61  ;;  %vm7872_vm14 = vcmp.ge.f32.partialorder %v7744_v11, 0.0  ;;  %v8000_v28 = vmul.f32 0.2, %v7744_v11  ;;  %v14406_v56 = vld [vmem:[#allocation5_spill] sm:$0xff] }
 0x285   : > { %v13570_v16 = vpop.f32.mrf.mxu1  ;;  %v13572_v20 = vpop.f32.mrf.mxu0  ;;  %v9898_v43 = vpack.c.bf16 %v8130_v44, %v8130_v44  ;;  %vm7875_vm15 = vcmp.ge.f32.partialorder %v7747_v60, 0.0  ;;  %v8003_v23 = vmul.f32 0.2, %v7747_v60  ;;  %vm7873_vm1 = vcmp.ge.f32.partialorder %v7745_v14, 0.0  ;;  %v14409_v63 = vld [vmem:[#allocation31_spill] sm:$0xff] }
 0x286   : > { %8766 = vst.msk [vmem:[%s12994_s4 + $0x84] sm:$0xf] %vm8732_vm4, %v9893_v45  ;;  %v8128_v1 = vsel %vm7872_vm14, %v7744_v11, %v8000_v28  ;;  %v8001_v26 = vmul.f32 0.2, %v7745_v14  ;;  %v7750_v24 = vadd.f32 %v13376_v25, %v7615_v27  ;;  %v4980_v15 = vadd.f32 %v14406_v56, %v14405_v12  ;;  %v14410_v61 = vld [vmem:[#allocation119_spill] sm:$0xff] }
 0x287   : > { %v13579_v54 = vpop.f32.mrf.mxu1  ;;  %v13581_v33 = vpop.f32.mrf.mxu0  ;;  %8771 = vst.msk [vmem:[%s12994_s4 + $0x98] sm:$0xf] %vm8732_vm4, %v9898_v43  ;;  %v9896_v31 = vpack.c.bf16 %v8128_v1, %v8128_v1  ;;  %v8131_v53 = vsel %vm7875_vm15, %v7747_v60, %v8003_v23  ;;  %v4983_v48 = vadd.f32 %v14408_v52, %v14407_v47  ;;  %v4981_v11 = vadd.f32 %v14410_v61, %v14409_v63  ;;  %v14414_v47 = vld [vmem:[#allocation8_spill] sm:$0xff]  ;;  %v14415_v63 = vld [vmem:[#allocation34_spill] sm:$0xff]  ;;  %v14416_v61 = vld [vmem:[#allocation9_spill] sm:$0xff] }
 0x288   : > { %v9899_v9 = vpack.c.bf16 %v8131_v53, %v8131_v53  ;;  %v8129_v27 = vsel %vm7873_vm1, %v7745_v14, %v8001_v26  ;;  %vm7878_vm2 = vcmp.ge.f32.partialorder %v7750_v24, 0.0  ;;  %v8006_v45 = vmul.f32 0.2, %v7750_v24  ;;  %v14411_v14 = vld [vmem:[#allocation32_spill] sm:$0xff]  ;;  %v14412_v26 = vld [vmem:[#allocation7_spill] sm:$0xff]  ;;  %v14413_v53 = vld [vmem:[#allocation33_spill] sm:$0xff] }
 0x289   : > { %v13589_v44 = vpop.f32.mrf.mxu1  ;;  %v13591_v28 = vpop.f32.mrf.mxu0  ;;  %8769 = vst.msk [vmem:[%s12994_s4 + $0x90] sm:$0xf] %vm8732_vm4, %v9896_v31  ;;  %v9897_v43 = vpack.c.bf16 %v8129_v27, %v8129_v27  ;;  %v7613_v60 = vadd.f32 %v13326_v49, %v4980_v15  ;;  %v7616_v23 = vadd.f32 %v13334_v8, %v4983_v48  ;;  %v7614_v1 = vadd.f32 %v13343_v18, %v4981_v11 }
 0x28a   : > { %8772 = vst.msk [vmem:[%s12994_s4 + $0x9c] sm:$0xf] %vm8732_vm4, %v9899_v9  ;;  %v8134_v12 = vsel %vm7878_vm2, %v7750_v24, %v8006_v45  ;;  %v4986_v56 = vadd.f32 %v14412_v26, %v14411_v14  ;;  %v4984_v52 = vadd.f32 %v14414_v47, %v14413_v53  ;;  %v4987_v31 = vadd.f32 %v14416_v61, %v14415_v63  ;;  %v14417_v45 = vld [vmem:[#allocation35_spill] sm:$0xff]  ;;  %v14418_v14 = vld [vmem:[#allocation120_spill] sm:$0xff] }
 0x28b   : > { %v13606_v27 = vpop.f32.mrf.mxu1  ;;  %v13608_v49 = vpop.f32.mrf.mxu0  ;;  %8770 = vst.msk [vmem:[%s12994_s4 + $0x94] sm:$0xf] %vm8732_vm4, %v9897_v43  ;;  %v9902_v8 = vpack.c.bf16 %v8134_v12, %v8134_v12  ;;  %v7748_v18 = vadd.f32 %v13376_v25, %v7613_v60  ;;  %v7751_v24 = vadd.f32 %v13376_v25, %v7616_v23  ;;  %v7749_v15 = vadd.f32 %v13376_v25, %v7614_v1 }
 0x28c   : > { %v7619_v48 = vadd.f32 %v13356_v17, %v4986_v56  ;;  %v7617_v11 = vadd.f32 %v13363_v4, %v4984_v52  ;;  %v7620_v9 = vadd.f32 %v13381_v34, %v4987_v31  ;;  %v4985_v26 = vadd.f32 %v14418_v14, %v14417_v45 }
 0x28d   : > { %v13620_v53 = vpop.f32.mrf.mxu1  ;;  %v13622_v47 = vpop.f32.mrf.mxu0  ;;  %8775 = vst.msk [vmem:[%s12994_s4 + $0xa8] sm:$0xf] %vm8732_vm4, %v9902_v8  ;;  %vm7876_vm5 = vcmp.ge.f32.partialorder %v7748_v18, 0.0  ;;  %v8004_v43 = vmul.f32 0.2, %v7748_v18  ;;  %vm7879_vm6 = vcmp.ge.f32.partialorder %v7751_v24, 0.0 }
 0x28e   : > { %v8007_v60 = vmul.f32 0.2, %v7751_v24  ;;  %vm7877_vm7 = vcmp.ge.f32.partialorder %v7749_v15, 0.0  ;;  %v8005_v23 = vmul.f32 0.2, %v7749_v15  ;;  %v7754_v17 = vadd.f32 %v13376_v25, %v7619_v48 }
 0x28f   : > { %v7752_v4 = vadd.f32 %v13376_v25, %v7617_v11  ;;  %v13628_v34 = vpop.f32.mrf.mxu0  ;;  %v8132_v1 = vsel %vm7876_vm5, %v7748_v18, %v8004_v43  ;;  %v7755_v56 = vadd.f32 %v13376_v25, %v7620_v9  ;;  %v7618_v52 = vadd.f32 %v13391_v58, %v4985_v26 }
 0x290   : > { %v8135_v12 = vsel %vm7879_vm6, %v7751_v24, %v8007_v60  ;;  %v9900_v63 = vpack.c.bf16 %v8132_v1, %v8132_v1  ;;  %v8133_v31 = vsel %vm7877_vm7, %v7749_v15, %v8005_v23  ;;  %vm7882_vm3 = vcmp.ge.f32.partialorder %v7754_v17, 0.0  ;;  %v14420_v24 = vld [vmem:[#allocation36_spill] sm:$0xff]  ;;  %v14421_v15 = vld [vmem:[#allocation121_spill] sm:$0xff] }
 0x291   : > { %v9903_v61 = vpack.c.bf16 %v8135_v12, %v8135_v12  ;;  %v13632_v8 = vpop.f32.mrf.mxu1  ;;  %v13634_v48 = vpop.f32.mrf.mxu0  ;;  %v9901_v11 = vpack.c.bf16 %v8133_v31, %v8133_v31  ;;  %v8010_v45 = vmul.f32 0.2, %v7754_v17  ;;  %vm7880_vm8 = vcmp.ge.f32.partialorder %v7752_v4, 0.0  ;;  %v14423_v1 = vld [vmem:[#allocation37_spill] sm:$0xff] }
 0x292   : > { %14419 = vst [vmem:[#allocation16_spill] sm:$0xff] %v13634_v48  ;;  %v8008_v14 = vmul.f32 0.2, %v7752_v4  ;;  %8773 = vst.msk [vmem:[%s12994_s4 + $0xa0] sm:$0xf] %vm8732_vm4, %v9900_v63  ;;  %vm7883_vm0 = vcmp.ge.f32.partialorder %v7755_v56, 0.0  ;;  %v7753_v58 = vadd.f32 %v13376_v25, %v7618_v52  ;;  %v4990_v9 = vadd.f32 %v14421_v15, %v14420_v24 }
 0x293   : > { %8776 = vst.msk [vmem:[%s12994_s4 + $0xac] sm:$0xf] %vm8732_vm4, %v9903_v61  ;;  %v8011_v18 = vmul.f32 0.2, %v7755_v56  ;;  %v13643_v26 = vpop.f32.mrf.mxu1  ;;  %v13645_v43 = vpop.f32.mrf.mxu0  ;;  %8774 = vst.msk [vmem:[%s12994_s4 + $0xa4] sm:$0xf] %vm8732_vm4, %v9901_v11  ;;  %v8138_v60 = vsel %vm7882_vm3, %v7754_v17, %v8010_v45  ;;  %v4988_v12 = vadd.f32 %v13349_v42, %v14423_v1 }
 0x294   : > { %14422 = vst [vmem:[#allocation17_spill] sm:$0xff] %v13645_v43  ;;  %v8136_v23 = vsel %vm7880_vm8, %v7752_v4, %v8008_v14  ;;  %v14424_v63 = vld [vmem:[#allocation38_spill] sm:$0xff]  ;;  %v9906_v61 = vpack.c.bf16 %v8138_v60, %v8138_v60  ;;  %vm7881_vm9 = vcmp.ge.f32.partialorder %v7753_v58, 0.0  ;;  %v8009_v48 = vmul.f32 0.2, %v7753_v58  ;;  %v14427_v14 = vld [vmem:[#allocation40_spill] sm:$0xff] }
 0x295   : > { %v4991_v52 = vadd.f32 %v13358_v37, %v14424_v63  ;;  %v9904_v31 = vpack.c.bf16 %v8136_v23, %v8136_v23  ;;  %v8139_v24 = vsel %vm7883_vm0, %v7755_v56, %v8011_v18  ;;  %v13654_v15 = vpop.f32.mrf.mxu1  ;;  %v13656_v43 = vpop.f32.mrf.mxu0  ;;  %v7623_v17 = vadd.f32 %v13402_v29, %v4990_v9  ;;  %v14425_v37 = vld [vmem:[#allocation39_spill] sm:$0xff]  ;;  %v14426_v56 = vld [vmem:[#allocation10_spill] sm:$0xff]  ;;  %v14429_v23 = vld [vmem:[#allocation41_spill] sm:$0xff] }
 0x296   : > { %v9907_v11 = vpack.c.bf16 %v8139_v24, %v8139_v24  ;;  %v7621_v4 = vadd.f32 %v13410_v21, %v4988_v12  ;;  %8779 = vst.msk [vmem:[%s12994_s4 + $0xb8] sm:$0xf] %vm8732_vm4, %v9906_v61  ;;  %v4989_v45 = vadd.f32 %v14426_v56, %v14425_v37  ;;  %v14428_v18 = vld [vmem:[#allocation11_spill] sm:$0xff]  ;;  %v14430_v1 = vld [vmem:[#allocation12_spill] sm:$0xff]  ;;  %v8137_v21 = vsel %vm7881_vm9, %v7753_v58, %v8009_v48  ;;  %v14431_v12 = vld [vmem:[#allocation42_spill] sm:$0xff] }
 0x297   : > { %8777 = vst.msk [vmem:[%s12994_s4 + $0xb0] sm:$0xf] %vm8732_vm4, %v9904_v31  ;;  %v7624_v42 = vadd.f32 %v13418_v30, %v4991_v52  ;;  %v4994_v60 = vadd.f32 %v14428_v18, %v14427_v14  ;;  %v4992_v63 = vadd.f32 %v14430_v1, %v14429_v23  ;;  %v13671_v24 = vpop.f32.mrf.mxu1  ;;  %v13673_v29 = vpop.f32.mrf.mxu0  ;;  %v7758_v30 = vadd.f32 %v13376_v25, %v7623_v17  ;;  %v14432_v52 = vld [vmem:[#allocation13_spill] sm:$0xff] }
 0x298   : > { %8780 = vst.msk [vmem:[%s12994_s4 + $0xbc] sm:$0xf] %vm8732_vm4, %v9907_v11  ;;  %v7756_v9 = vadd.f32 %v13376_v25, %v7621_v4  ;;  %v4995_v61 = vadd.f32 %v14432_v52, %v14431_v12  ;;  %v9905_v31 = vpack.c.bf16 %v8137_v21, %v8137_v21  ;;  %v7622_v56 = vadd.f32 %v13427_v59, %v4989_v45 }
 0x299   : > { %v7759_v37 = vadd.f32 %v13376_v25, %v7624_v42  ;;  %v7627_v14 = vadd.f32 %v13445_v51, %v4994_v60  ;;  %v13685_v18 = vpop.f32.mrf.mxu1  ;;  %v13687_v23 = vpop.f32.mrf.mxu0  ;;  %vm7886_vm10 = vcmp.ge.f32.partialorder %v7758_v30, 0.0  ;;  %v8014_v48 = vmul.f32 0.2, %v7758_v30 }
 0x29a   : > { %14433 = vst [vmem:[#allocation18_spill] sm:$0xff] %v13687_v23  ;;  %vm7884_vm11 = vcmp.ge.f32.partialorder %v7756_v9, 0.0  ;;  %v8012_v58 = vmul.f32 0.2, %v7756_v9  ;;  %8778 = vst.msk [vmem:[%s12994_s4 + $0xb4] sm:$0xf] %vm8732_vm4, %v9905_v31  ;;  %v7757_v17 = vadd.f32 %v13376_v25, %v7622_v56  ;;  %v7625_v60 = vadd.f32 %v13453_v40, %v4992_v63 }
 0x29b   : > { %vm7887_vm12 = vcmp.ge.f32.partialorder %v7759_v37, 0.0  ;;  %v8015_v11 = vmul.f32 0.2, %v7759_v37  ;;  %v7762_v4 = vadd.f32 %v13376_v25, %v7627_v14  ;;  %v13693_v42 = vpop.f32.mrf.mxu1  ;;  %v13695_v59 = vpop.f32.mrf.mxu0  ;;  %v8142_v51 = vsel %vm7886_vm10, %v7758_v30, %v8014_v48  ;;  %v14436_v63 = vld [vmem:[#allocation43_spill] sm:$0xff]  ;;  %v14437_v30 = vld [vmem:[#allocation122_spill] sm:$0xff] }
 0x29c   : > { %14434 = vst [vmem:[#allocation19_spill] sm:$0xff] %v13695_v59  ;;  %v8140_v45 = vsel %vm7884_vm11, %v7756_v9, %v8012_v58  ;;  %v7628_v1 = vadd.f32 %v13466_v50, %v4995_v61  ;;  %v9910_v21 = vpack.c.bf16 %v8142_v51, %v8142_v51  ;;  %vm7885_vm13 = vcmp.ge.f32.partialorder %v7757_v17, 0.0  ;;  %v14438_v61 = vld [vmem:[#allocation44_spill] sm:$0xff] }
 0x29d   : > { %v9908_v12 = vpack.c.bf16 %v8140_v45, %v8140_v45  ;;  %v8143_v52 = vsel %vm7887_vm12, %v7759_v37, %v8015_v11  ;;  %v13699_v31 = vpop.f32.mrf.mxu1  ;;  %v13701_v56 = vpop.f32.mrf.mxu0  ;;  %v8013_v23 = vmul.f32 0.2, %v7757_v17  ;;  %vm7890_vm14 = vcmp.ge.f32.partialorder %v7762_v4, 0.0  ;;  %v14439_v37 = vld [vmem:[#allocation123_spill] sm:$0xff] }
 0x29e   : > { %14435 = vst [vmem:[#allocation20_spill] sm:$0xff] %v13701_v56  ;;  %v9911_v14 = vpack.c.bf16 %v8143_v52, %v8143_v52  ;;  %v8018_v59 = vmul.f32 0.2, %v7762_v4  ;;  %8783 = vst.msk [vmem:[%s12994_s4 + $0xc8] sm:$0xf] %vm8732_vm4, %v9910_v21  ;;  %v7760_v40 = vadd.f32 %v13376_v25, %v7625_v60  ;;  %v7763_v50 = vadd.f32 %v13376_v25, %v7628_v1  ;;  %v14441_v60 = vld [vmem:[#allocation45_spill] sm:$0xff] }
 0x29f   : > { %8781 = vst.msk [vmem:[%s12994_s4 + $0xc0] sm:$0xf] %vm8732_vm4, %v9908_v12  ;;  %v4993_v9 = vadd.f32 %v14437_v30, %v14436_v63  ;;  %v4998_v48 = vadd.f32 %v14439_v37, %v14438_v61  ;;  %v13713_v58 = vpop.f32.mrf.mxu1  ;;  %v13715_v11 = vpop.f32.mrf.mxu0  ;;  %v8141_v51 = vsel %vm7885_vm13, %v7757_v17, %v8013_v23  ;;  %v14442_v21 = vld [vmem:[#allocation14_spill] sm:$0xff] }
 0x2a0   : > { %14440 = vst [vmem:[#allocation21_spill] sm:$0xff] %v13715_v11  ;;  %8784 = vst.msk [vmem:[%s12994_s4 + $0xcc] sm:$0xf] %vm8732_vm4, %v9911_v14  ;;  %v8146_v45 = vsel %vm7890_vm14, %v7762_v4, %v8018_v59  ;;  %v4996_v1 = vadd.f32 %v14442_v21, %v14441_v60  ;;  %v14443_v12 = vld [vmem:[#allocation46_spill] sm:$0xff]  ;;  %v9909_v63 = vpack.c.bf16 %v8141_v51, %v8141_v51  ;;  %vm7888_vm15 = vcmp.ge.f32.partialorder %v7760_v40, 0.0  ;;  %v14444_v4 = vld [vmem:[#allocation47_spill] sm:$0xff] }
 0x2a1   : > { %v4999_v52 = vadd.f32 %v13434_v22, %v14443_v12  ;;  %v9914_v30 = vpack.c.bf16 %v8146_v45, %v8146_v45  ;;  %v8016_v61 = vmul.f32 0.2, %v7760_v40  ;;  %v13724_v37 = vpop.f32.mrf.mxu0  ;;  %vm7891_vm1 = vcmp.ge.f32.partialorder %v7763_v50, 0.0  ;;  %v14445_v59 = vld [vmem:[#allocation15_spill] sm:$0xff] }
 0x2a2   : > { %v8019_v11 = vmul.f32 0.2, %v7763_v50  ;;  %v7626_v56 = vadd.f32 %v13478_v41, %v4993_v9  ;;  %v7631_v14 = vadd.f32 %v13488_v57, %v4998_v48  ;;  %8782 = vst.msk [vmem:[%s12994_s4 + $0xc4] sm:$0xf] %vm8732_vm4, %v9909_v63  ;;  %v7629_v22 = vadd.f32 %v13497_v5, %v4996_v1 }
 0x2a3   : > { %8787 = vst.msk [vmem:[%s12994_s4 + $0xd8] sm:$0xf] %vm8732_vm4, %v9914_v30  ;;  %v8144_v23 = vsel %vm7888_vm15, %v7760_v40, %v8016_v61  ;;  %v7632_v17 = vadd.f32 %v13508_v55, %v4999_v52  ;;  %v4997_v51 = vadd.f32 %v14445_v59, %v14444_v4  ;;  %v13736_v45 = vpop.f32.mrf.mxu1  ;;  %v13738_v60 = vpop.f32.mrf.mxu0 }
 0x2a4   : > { %v9912_v41 = vpack.c.bf16 %v8144_v23, %v8144_v23  ;;  %v8147_v57 = vsel %vm7891_vm1, %v7763_v50, %v8019_v11  ;;  %v7761_v9 = vadd.f32 %v13376_v25, %v7626_v56  ;;  %v7766_v48 = vadd.f32 %v13376_v25, %v7631_v14  ;;  %v14447_v23 = vld [vmem:[#allocation48_spill] sm:$0xff] }
 0x2a5   : > { %v9915_v40 = vpack.c.bf16 %v8147_v57, %v8147_v57  ;;  %v7764_v21 = vadd.f32 %v13376_v25, %v7629_v22  ;;  %v7767_v5 = vadd.f32 %v13376_v25, %v7632_v17  ;;  %v7630_v55 = vadd.f32 %v13515_v7, %v4997_v51  ;;  %v13745_v1 = vpop.f32.mrf.mxu1  ;;  %v13747_v12 = vpop.f32.mrf.mxu0 }
 0x2a6   : > { %8785 = vst.msk [vmem:[%s12994_s4 + $0xd0] sm:$0xf] %vm8732_vm4, %v9912_v41  ;;  %vm7889_vm2 = vcmp.ge.f32.partialorder %v7761_v9, 0.0  ;;  %v8017_v52 = vmul.f32 0.2, %v7761_v9  ;;  %vm7894_vm5 = vcmp.ge.f32.partialorder %v7766_v48, 0.0  ;;  %v5002_v22 = vadd.f32 %v13455_v62, %v14447_v23 }
 0x2a7   : > { %v8022_v50 = vmul.f32 0.2, %v7766_v48  ;;  %8788 = vst.msk [vmem:[%s12994_s4 + $0xdc] sm:$0xf] %vm8732_vm4, %v9915_v40  ;;  %vm7892_vm6 = vcmp.ge.f32.partialorder %v7764_v21, 0.0  ;;  %vm7895_vm7 = vcmp.ge.f32.partialorder %v7767_v5, 0.0  ;;  %v13753_v63 = vpop.f32.mrf.mxu1  ;;  %v13755_v7 = vpop.f32.mrf.mxu0  ;;  %v7765_v14 = vadd.f32 %v13376_v25, %v7630_v55 }
 0x2a8   : > { %v8020_v56 = vmul.f32 0.2, %v7764_v21  ;;  %v8023_v11 = vmul.f32 0.2, %v7767_v5  ;;  %14446 = vst [vmem:[#allocation22_spill] sm:$0xff] %v13755_v7  ;;  %v8145_v30 = vsel %vm7889_vm2, %v7761_v9, %v8017_v52  ;;  %v7635_v62 = vadd.f32 %v13541_v32, %v5002_v22  ;;  %v14449_v55 = vld [vmem:[#allocation50_spill] sm:$0xff] }
 0x2a9   : > { %v8150_v61 = vsel %vm7894_vm5, %v7766_v48, %v8022_v50  ;;  %v9913_v17 = vpack.c.bf16 %v8145_v30, %v8145_v30  ;;  %v13760_v41 = vpop.f32.mrf.mxu1  ;;  %v13762_v57 = vpop.f32.mrf.mxu0  ;;  %vm7893_vm3 = vcmp.ge.f32.partialorder %v7765_v14, 0.0  ;;  %v8021_v9 = vmul.f32 0.2, %v7765_v14  ;;  %v14448_v48 = vld [vmem:[#allocation49_spill] sm:$0xff]  ;;  %v14450_v52 = vld [vmem:[#allocation51_spill] sm:$0xff]  ;;  %v14451_v32 = vld [vmem:[#allocation52_spill] sm:$0xff] }
 0x2aa   : > { %v9918_v4 = vpack.c.bf16 %v8150_v61, %v8150_v61  ;;  %v8148_v59 = vsel %vm7892_vm6, %v7764_v21, %v8020_v56  ;;  %v8151_v51 = vsel %vm7895_vm7, %v7767_v5, %v8023_v11  ;;  %v5000_v21 = vadd.f32 %v13468_v19, %v14448_v48  ;;  %v14452_v19 = vld [vmem:[#allocation53_spill] sm:$0xff] }
 0x2ab   : > { %v9916_v40 = vpack.c.bf16 %v8148_v59, %v8148_v59  ;;  %v9919_v7 = vpack.c.bf16 %v8151_v51, %v8151_v51  ;;  %8786 = vst.msk [vmem:[%s12994_s4 + $0xd4] sm:$0xf] %vm8732_vm4, %v9913_v17  ;;  %v5003_v5 = vadd.f32 %v13480_v39, %v14449_v55  ;;  %v5001_v50 = vadd.f32 %v13490_v38, %v14450_v52  ;;  %v13775_v56 = vpop.f32.mrf.mxu1  ;;  %v13777_v11 = vpop.f32.mrf.mxu0  ;;  %v14453_v39 = vld [vmem:[#allocation54_spill] sm:$0xff] }
 0x2ac   : > { %8791 = vst.msk [vmem:[%s12994_s4 + $0xe8] sm:$0xf] %vm8732_vm4, %v9918_v4  ;;  %v8149_v30 = vsel %vm7893_vm3, %v7765_v14, %v8021_v9  ;;  %v5006_v61 = vadd.f32 %v13499_v36, %v14451_v32  ;;  %v5004_v23 = vadd.f32 %v13510_v0, %v14452_v19  ;;  %v5007_v22 = vadd.f32 %v13517_v13, %v14453_v39 }
 0x2ad   : > { %8789 = vst.msk [vmem:[%s12994_s4 + $0xe0] sm:$0xf] %vm8732_vm4, %v9916_v40  ;;  %8792 = vst.msk [vmem:[%s12994_s4 + $0xec] sm:$0xf] %vm8732_vm4, %v9919_v7  ;;  %v9917_v38 = vpack.c.bf16 %v8149_v30, %v8149_v30  ;;  %v7770_v17 = vadd.f32 %v13376_v25, %v7635_v62  ;;  %v7633_v4 = vadd.f32 %v13552_v35, %v5000_v21  ;;  %v13792_v51 = vpop.f32.mrf.mxu1  ;;  %v13794_v7 = vpop.f32.mrf.mxu0 }
 0x2ae   : > { %v7636_v59 = vadd.f32 %v13561_v10, %v5003_v5  ;;  %v7634_v14 = vadd.f32 %v13570_v16, %v5001_v50  ;;  %v7639_v36 = vadd.f32 %v13579_v54, %v5006_v61  ;;  %v7637_v0 = vadd.f32 %v13589_v44, %v5004_v23 }
 0x2af   : > { %v7640_v40 = vadd.f32 %v13606_v27, %v5007_v22  ;;  %8790 = vst.msk [vmem:[%s12994_s4 + $0xe4] sm:$0xf] %vm8732_vm4, %v9917_v38  ;;  %vm7898_vm8 = vcmp.ge.f32.partialorder %v7770_v17, 0.0  ;;  %v8026_v13 = vmul.f32 0.2, %v7770_v17  ;;  %v7768_v35 = vadd.f32 %v13376_v25, %v7633_v4  ;;  %v13804_v9 = vpop.f32.mrf.mxu1  ;;  %v13806_v62 = vpop.f32.mrf.mxu0 }
 0x2b0   : > { %v7771_v10 = vadd.f32 %v13376_v25, %v7636_v59  ;;  %v7769_v16 = vadd.f32 %v13376_v25, %v7634_v14  ;;  %v7774_v54 = vadd.f32 %v13376_v25, %v7639_v36  ;;  %v7772_v44 = vadd.f32 %v13376_v25, %v7637_v0 }
 0x2b1   : > { %v7775_v27 = vadd.f32 %v13376_v25, %v7640_v40  ;;  %v8154_v48 = vsel %vm7898_vm8, %v7770_v17, %v8026_v13  ;;  %vm7896_vm0 = vcmp.ge.f32.partialorder %v7768_v35, 0.0  ;;  %v8024_v21 = vmul.f32 0.2, %v7768_v35  ;;  %v13812_v55 = vpop.f32.mrf.mxu1  ;;  %v13814_v5 = vpop.f32.mrf.mxu0  ;;  %v14454_v13 = vld [vmem:[#allocation55_spill] sm:$0xff] }
 0x2b2   : > { %vm7899_vm9 = vcmp.ge.f32.partialorder %v7771_v10, 0.0  ;;  %v9922_v52 = vpack.c.bf16 %v8154_v48, %v8154_v48  ;;  %v8027_v50 = vmul.f32 0.2, %v7771_v10  ;;  %vm7897_vm10 = vcmp.ge.f32.partialorder %v7769_v16, 0.0  ;;  %v14456_v48 = vld [vmem:[#allocation57_spill] sm:$0xff] }
 0x2b3   : > { %v8025_v30 = vmul.f32 0.2, %v7769_v16  ;;  %v8152_v32 = vsel %vm7896_vm0, %v7768_v35, %v8024_v21  ;;  %vm7902_vm11 = vcmp.ge.f32.partialorder %v7774_v54, 0.0  ;;  %v8030_v61 = vmul.f32 0.2, %v7774_v54  ;;  %v13818_v38 = vpop.f32.mrf.mxu0 }
 0x2b4   : > { %vm7900_vm12 = vcmp.ge.f32.partialorder %v7772_v44, 0.0  ;;  %8795 = vst.msk [vmem:[%s12994_s4 + $0xf8] sm:$0xf] %vm8732_vm4, %v9922_v52  ;;  %v9920_v19 = vpack.c.bf16 %v8152_v32, %v8152_v32  ;;  %v8155_v23 = vsel %vm7899_vm9, %v7771_v10, %v8027_v50  ;;  %v8028_v22 = vmul.f32 0.2, %v7772_v44  ;;  %v14457_v52 = vld [vmem:[#allocation58_spill] sm:$0xff] }
 0x2b5   : > { %v8153_v39 = vsel %vm7897_vm10, %v7769_v16, %v8025_v30  ;;  %v9923_v17 = vpack.c.bf16 %v8155_v23, %v8155_v23  ;;  %v8158_v59 = vsel %vm7902_vm11, %v7774_v54, %v8030_v61  ;;  %vm7903_vm13 = vcmp.ge.f32.partialorder %v7775_v27, 0.0  ;;  %v13820_v14 = vpop.f32.mrf.mxu1  ;;  %v14455_v16 = vld [vmem:[#allocation56_spill] sm:$0xff]  ;;  %v14458_v32 = vld [vmem:[#allocation59_spill] sm:$0xff]  ;;  %v13845_v23 = vpop.f32.mrf.mxu0 }
 0x2b6   : > { %v9921_v4 = vpack.c.bf16 %v8153_v39, %v8153_v39  ;;  %8793 = vst.msk [vmem:[%s12994_s4 + $0xf0] sm:$0xf] %vm8732_vm4, %v9920_v19  ;;  %v9926_v36 = vpack.c.bf16 %v8158_v59, %v8158_v59  ;;  %v8156_v0 = vsel %vm7900_vm12, %v7772_v44, %v8028_v22  ;;  %v8031_v40 = vmul.f32 0.2, %v7775_v27  ;;  %v14459_v19 = vld [vmem:[#allocation60_spill] sm:$0xff] }
 0x2b7   : > { %v5005_v35 = vadd.f32 %v13528_v2, %v14454_v13  ;;  %8796 = vst.msk [vmem:[%s12994_s4 + $0xfc] sm:$0xf] %vm8732_vm4, %v9923_v17  ;;  %v9924_v10 = vpack.c.bf16 %v8156_v0, %v8156_v0  ;;  %v5010_v54 = vadd.f32 %v13543_v3, %v14455_v16  ;;  %v5008_v21 = vadd.f32 %v13554_v6, %v14456_v48  ;;  %v13836_v44 = vpop.f32.mrf.mxu1  ;;  %v13875_v13 = vpop.f32.mrf.mxu0 }
 0x2b8   : > { %8794 = vst.msk [vmem:[%s12994_s4 + $0xf4] sm:$0xf] %vm8732_vm4, %v9921_v4  ;;  %v5011_v50 = vadd.f32 %v13563_v46, %v14457_v52  ;;  %8799 = vst.msk [vmem:[%s12994_s4 + $0x108] sm:$0xf] %vm8732_vm4, %v9926_v36  ;;  %v8159_v2 = vsel %vm7903_vm13, %v7775_v27, %v8031_v40  ;;  %v5009_v61 = vadd.f32 %v13572_v20, %v14458_v32 }
 0x2b9   : > { %v7638_v30 = vadd.f32 %v13620_v53, %v5005_v35  ;;  %v5014_v3 = vadd.f32 %v13581_v33, %v14459_v19  ;;  %8797 = vst.msk [vmem:[%s12994_s4 + $0x100] sm:$0xf] %vm8732_vm4, %v9924_v10  ;;  %v9927_v6 = vpack.c.bf16 %v8159_v2, %v8159_v2  ;;  %v7643_v46 = vadd.f32 %v13632_v8, %v5010_v54  ;;  %v13852_v27 = vpop.f32.mrf.mxu1  ;;  %v14460_v33 = vld [vmem:[#allocation61_spill] sm:$0xff] }
 0x2ba   : > { %v7641_v39 = vadd.f32 %v13643_v26, %v5008_v21  ;;  %v7644_v22 = vadd.f32 %v13654_v15, %v5011_v50  ;;  %v7642_v20 = vadd.f32 %v13671_v24, %v5009_v61  ;;  %v5012_v4 = vadd.f32 %v13591_v28, %v14460_v33  ;;  %v14461_v15 = vld [vmem:[#allocation62_spill] sm:$0xff]  ;;  %v13881_v61 = vpop.f32.mrf.mxu0  ;;  %v14463_v33 = vld [vmem:[#allocation64_spill] sm:$0xff] }
 0x2bb   : > { %v7773_v53 = vadd.f32 %v13376_v25, %v7638_v30  ;;  %v7647_v17 = vadd.f32 %v13685_v18, %v5014_v3  ;;  %8800 = vst.msk [vmem:[%s12994_s4 + $0x10c] sm:$0xf] %vm8732_vm4, %v9927_v6  ;;  %v7778_v59 = vadd.f32 %v13376_v25, %v7643_v46  ;;  %v5015_v36 = vadd.f32 %v13608_v49, %v14461_v15  ;;  %v13866_v0 = vpop.f32.mrf.mxu1  ;;  %v13871_v18 = vld [vmem:[%s14235_s2] ss:$0 sm:$0xff] }
 0x2bc   : > { %v7776_v8 = vadd.f32 %v13376_v25, %v7641_v39  ;;  %v7779_v26 = vadd.f32 %v13376_v25, %v7644_v22  ;;  %v7777_v28 = vadd.f32 %v13871_v18, %v7642_v20  ;;  %v7645_v46 = vadd.f32 %v13693_v42, %v5012_v4  ;;  %v14462_v20 = vld [vmem:[#allocation63_spill] sm:$0xff]  ;;  %v14464_v4 = vld [vmem:[#allocation65_spill] sm:$0xff] }
 0x2bd   : > { %vm7901_vm14 = vcmp.ge.f32.partialorder %v7773_v53, 0.0  ;;  %v8029_v24 = vmul.f32 0.2, %v7773_v53  ;;  %v7782_v40 = vadd.f32 %v13871_v18, %v7647_v17  ;;  %vm7906_vm15 = vcmp.ge.f32.partialorder %v7778_v59, 0.0  ;;  %v13877_v49 = vpop.f32.mrf.mxu1 }
 0x2be   : > { %v8034_v25 = vmul.f32 0.2, %v7778_v59  ;;  %vm7904_vm1 = vcmp.ge.f32.partialorder %v7776_v8, 0.0  ;;  %v8032_v35 = vmul.f32 0.2, %v7776_v8  ;;  %vm7907_vm2 = vcmp.ge.f32.partialorder %v7779_v26, 0.0 }
 0x2bf   : > { %v8157_v10 = vsel %vm7901_vm14, %v7773_v53, %v8029_v24  ;;  %v8035_v16 = vmul.f32 0.2, %v7779_v26  ;;  %vm7905_vm5 = vcmp.ge.f32.partialorder %v7777_v28, 0.0  ;;  %v8033_v52 = vmul.f32 0.2, %v7777_v28  ;;  %v13879_v50 = vpop.f32.mrf.mxu1  ;;  %v14466_v24 = vld [vmem:[#allocation66_spill] sm:$0xff] }
 0x2c0   : > { %v9925_v54 = vpack.c.bf16 %v8157_v10, %v8157_v10  ;;  %v8162_v48 = vsel %vm7906_vm15, %v7778_v59, %v8034_v25  ;;  %v8160_v21 = vsel %vm7904_vm1, %v7776_v8, %v8032_v35  ;;  %vm7910_vm6 = vcmp.ge.f32.partialorder %v7782_v40, 0.0 }
 0x2c1   : > { %v9930_v2 = vpack.c.bf16 %v8162_v48, %v8162_v48  ;;  %v9928_v30 = vpack.c.bf16 %v8160_v21, %v8160_v21  ;;  %v8163_v32 = vsel %vm7907_vm2, %v7779_v26, %v8035_v16  ;;  %v8161_v3 = vsel %vm7905_vm5, %v7777_v28, %v8033_v52  ;;  %v13886_v39 = vpop.f32.mrf.mxu1  ;;  %v14465_v26 = vld [vmem:[#allocation16_spill] sm:$0xff]  ;;  %v14467_v28 = vld [vmem:[#allocation17_spill] sm:$0xff] }
 0x2c2   : > { %8798 = vst.msk [vmem:[%s12994_s4 + $0x104] sm:$0xf] %vm8732_vm4, %v9925_v54  ;;  %v9931_v19 = vpack.c.bf16 %v8163_v32, %v8163_v32  ;;  %v8038_v6 = vmul.f32 0.2, %v7782_v40  ;;  %v9929_v22 = vpack.c.bf16 %v8161_v3, %v8161_v3  ;;  %v7648_v53 = vadd.f32 %v13699_v31, %v5015_v36 }
 0x2c3   : > { %8803 = vst.msk [vmem:[%s12994_s4 + $0x118] sm:$0xf] %vm8732_vm4, %v9930_v2  ;;  %8801 = vst.msk [vmem:[%s12994_s4 + $0x110] sm:$0xf] %vm8732_vm4, %v9928_v30  ;;  %v5013_v17 = vadd.f32 %v13622_v47, %v14462_v20  ;;  %v5018_v59 = vadd.f32 %v13628_v34, %v14463_v33  ;;  %v7780_v42 = vadd.f32 %v13871_v18, %v7645_v46  ;;  %v13904_v35 = vpop.f32.mrf.mxu1  ;;  %v14468_v30 = vld [vmem:[#allocation67_spill] sm:$0xff] }
 0x2c4   : > { %8804 = vst.msk [vmem:[%s12994_s4 + $0x11c] sm:$0xf] %vm8732_vm4, %v9931_v19  ;;  %v8166_v8 = vsel %vm7910_vm6, %v7782_v40, %v8038_v6  ;;  %v5016_v15 = vadd.f32 %v14465_v26, %v14464_v4  ;;  %v5019_v25 = vadd.f32 %v14467_v28, %v14466_v24  ;;  %8802 = vst.msk [vmem:[%s12994_s4 + $0x114] sm:$0xf] %vm8732_vm4, %v9929_v22  ;;  %v13911_v40 = vpop.f32.mrf.mxu0 }
 0x2c5   : > { %v9934_v47 = vpack.c.bf16 %v8166_v8, %v8166_v8  ;;  %v7783_v31 = vadd.f32 %v13871_v18, %v7648_v53  ;;  %v7646_v34 = vadd.f32 %v13713_v58, %v5013_v17  ;;  %v7651_v36 = vadd.f32 %v13736_v45, %v5018_v59 }
 0x2c6   : > { %vm7908_vm7 = vcmp.ge.f32.partialorder %v7780_v42, 0.0  ;;  %v8036_v10 = vmul.f32 0.2, %v7780_v42  ;;  %v7649_v16 = vadd.f32 %v13745_v1, %v5016_v15  ;;  %v7652_v54 = vadd.f32 %v13753_v63, %v5019_v25  ;;  %v13925_v6 = vpop.f32.mrf.mxu0  ;;  %v14470_v25 = vld [vmem:[#allocation69_spill] sm:$0xff] }
 0x2c7   : > { %8807 = vst.msk [vmem:[%s12994_s4 + $0x128] sm:$0xf] %vm8732_vm4, %v9934_v47  ;;  %vm7911_vm3 = vcmp.ge.f32.partialorder %v7783_v31, 0.0  ;;  %v8039_v48 = vmul.f32 0.2, %v7783_v31  ;;  %v7781_v21 = vadd.f32 %v13871_v18, %v7646_v34  ;;  %v7786_v52 = vadd.f32 %v13871_v18, %v7651_v36  ;;  %v13923_v1 = vpop.f32.mrf.mxu1  ;;  %v14471_v47 = vld [vmem:[#allocation18_spill] sm:$0xff] }
 0x2c8   : > { %v8164_v58 = vsel %vm7908_vm7, %v7780_v42, %v8036_v10  ;;  %v7784_v45 = vadd.f32 %v13871_v18, %v7649_v16  ;;  %v7787_v2 = vadd.f32 %v13871_v18, %v7652_v54  ;;  %v5017_v32 = vadd.f32 %v13656_v43, %v14468_v30  ;;  %v14469_v42 = vld [vmem:[#allocation68_spill] sm:$0xff]  ;;  %v13940_v34 = vpop.f32.mrf.mxu0 }
 0x2c9   : > { %v9932_v63 = vpack.c.bf16 %v8164_v58, %v8164_v58  ;;  %v8167_v19 = vsel %vm7911_vm3, %v7783_v31, %v8039_v48  ;;  %vm7909_vm8 = vcmp.ge.f32.partialorder %v7781_v21, 0.0  ;;  %v8037_v3 = vmul.f32 0.2, %v7781_v21  ;;  %v13927_v53 = vpop.f32.mrf.mxu1  ;;  %v14472_v48 = vld [vmem:[#allocation70_spill] sm:$0xff]  ;;  %v14474_v58 = vld [vmem:[#allocation71_spill] sm:$0xff]  ;;  %v14476_v30 = vld [vmem:[#allocation72_spill] sm:$0xff] }
 0x2ca   : > { %v9935_v46 = vpack.c.bf16 %v8167_v19, %v8167_v19  ;;  %vm7914_vm0 = vcmp.ge.f32.partialorder %v7786_v52, 0.0  ;;  %v8042_v22 = vmul.f32 0.2, %v7786_v52  ;;  %vm7912_vm9 = vcmp.ge.f32.partialorder %v7784_v45, 0.0 }
 0x2cb   : > { %8805 = vst.msk [vmem:[%s12994_s4 + $0x120] sm:$0xf] %vm8732_vm4, %v9932_v63  ;;  %v8165_v20 = vsel %vm7909_vm8, %v7781_v21, %v8037_v3  ;;  %v8040_v43 = vmul.f32 0.2, %v7784_v45  ;;  %vm7915_vm10 = vcmp.ge.f32.partialorder %v7787_v2, 0.0  ;;  %v7650_v8 = vadd.f32 %v13760_v41, %v5017_v32  ;;  %v13936_v26 = vpop.f32.mrf.mxu1  ;;  %v14473_v21 = vld [vmem:[#allocation19_spill] sm:$0xff] }
 0x2cc   : > { %v8043_v17 = vmul.f32 0.2, %v7787_v2  ;;  %8808 = vst.msk [vmem:[%s12994_s4 + $0x12c] sm:$0xf] %vm8732_vm4, %v9935_v46  ;;  %v9933_v33 = vpack.c.bf16 %v8165_v20, %v8165_v20  ;;  %v8170_v59 = vsel %vm7914_vm0, %v7786_v52, %v8042_v22  ;;  %v5022_v4 = vadd.f32 %v13673_v29, %v14469_v42  ;;  %v14477_v32 = vld [vmem:[#allocation21_spill] sm:$0xff] }
 0x2cd   : > { %v9938_v15 = vpack.c.bf16 %v8170_v59, %v8170_v59  ;;  %v8168_v24 = vsel %vm7912_vm9, %v7784_v45, %v8040_v43  ;;  %v5020_v31 = vadd.f32 %v14471_v47, %v14470_v25  ;;  %v7785_v41 = vadd.f32 %v13871_v18, %v7650_v8  ;;  %v13946_v16 = vpop.f32.mrf.mxu1  ;;  %v14475_v45 = vld [vmem:[#allocation20_spill] sm:$0xff]  ;;  %v14478_v3 = vld [vmem:[#allocation73_spill] sm:$0xff] }
 0x2ce   : > { %v8171_v28 = vsel %vm7915_vm10, %v7787_v2, %v8043_v17  ;;  %8806 = vst.msk [vmem:[%s12994_s4 + $0x124] sm:$0xf] %vm8732_vm4, %v9933_v33  ;;  %v9936_v36 = vpack.c.bf16 %v8168_v24, %v8168_v24  ;;  %v7655_v29 = vadd.f32 %v13775_v56, %v5022_v4  ;;  %v5023_v52 = vadd.f32 %v14473_v21, %v14472_v48  ;;  %v13970_v33 = vpop.f32.mrf.mxu0 }
 0x2cf   : > { %v9939_v10 = vpack.c.bf16 %v8171_v28, %v8171_v28  ;;  %8811 = vst.msk [vmem:[%s12994_s4 + $0x138] sm:$0xf] %vm8732_vm4, %v9938_v15  ;;  %v7653_v54 = vadd.f32 %v13792_v51, %v5020_v31  ;;  %v5021_v2 = vadd.f32 %v14475_v45, %v14474_v58  ;;  %v5026_v63 = vadd.f32 %v14477_v32, %v14476_v30  ;;  %v13964_v46 = vpop.f32.mrf.mxu1  ;;  %v14479_v58 = vld [vmem:[#allocation74_spill] sm:$0xff] }
 0x2d0   : > { %8809 = vst.msk [vmem:[%s12994_s4 + $0x130] sm:$0xf] %vm8732_vm4, %v9936_v36  ;;  %vm7913_vm11 = vcmp.ge.f32.partialorder %v7785_v41, 0.0  ;;  %v8041_v56 = vmul.f32 0.2, %v7785_v41  ;;  %v7790_v19 = vadd.f32 %v13871_v18, %v7655_v29  ;;  %v5024_v51 = vadd.f32 %v13724_v37, %v14478_v3  ;;  %v13981_v31 = vpop.f32.mrf.mxu0  ;;  %v14482_v3 = vld [vmem:[#allocation22_spill] sm:$0xff] }
 0x2d1   : > { %8812 = vst.msk [vmem:[%s12994_s4 + $0x13c] sm:$0xf] %vm8732_vm4, %v9939_v10  ;;  %v7788_v22 = vadd.f32 %v13871_v18, %v7653_v54  ;;  %v7656_v20 = vadd.f32 %v13804_v9, %v5023_v52  ;;  %v7654_v43 = vadd.f32 %v13812_v55, %v5021_v2  ;;  %v7659_v17 = vadd.f32 %v13820_v14, %v5026_v63  ;;  %v13973_v4 = vpop.f32.mrf.mxu1  ;;  %v14480_v2 = vld [vmem:[#allocation75_spill] sm:$0xff] }
 0x2d2   : > { %v8169_v59 = vsel %vm7913_vm11, %v7785_v41, %v8041_v56  ;;  %vm7918_vm12 = vcmp.ge.f32.partialorder %v7790_v19, 0.0  ;;  %v8046_v8 = vmul.f32 0.2, %v7790_v19  ;;  %v7657_v42 = vadd.f32 %v13836_v44, %v5024_v51 }
 0x2d3   : > { %v9937_v37 = vpack.c.bf16 %v8169_v59, %v8169_v59  ;;  %vm7916_vm13 = vcmp.ge.f32.partialorder %v7788_v22, 0.0  ;;  %v8044_v15 = vmul.f32 0.2, %v7788_v22  ;;  %v7791_v24 = vadd.f32 %v13871_v18, %v7656_v20  ;;  %v13983_v41 = vpop.f32.mrf.mxu1 }
 0x2d4   : > { %v8174_v9 = vsel %vm7918_vm12, %v7790_v19, %v8046_v8  ;;  %v7789_v55 = vadd.f32 %v13871_v18, %v7654_v43  ;;  %v7794_v14 = vadd.f32 %v13871_v18, %v7659_v17  ;;  %v7792_v28 = vadd.f32 %v13871_v18, %v7657_v42  ;;  %v14481_v19 = vld [vmem:[#allocation76_spill] sm:$0xff]  ;;  %v14483_v8 = vld [vmem:[#allocation77_spill] sm:$0xff] }
 0x2d5   : > { %8810 = vst.msk [vmem:[%s12994_s4 + $0x134] sm:$0xf] %vm8732_vm4, %v9937_v37  ;;  %v9942_v25 = vpack.c.bf16 %v8174_v9, %v8174_v9  ;;  %v8172_v44 = vsel %vm7916_vm13, %v7788_v22, %v8044_v15  ;;  %vm7919_vm14 = vcmp.ge.f32.partialorder %v7791_v24, 0.0  ;;  %v8047_v47 = vmul.f32 0.2, %v7791_v24  ;;  %v13995_v22 = vpop.f32.mrf.mxu0  ;;  %v14001_v59 = vpop.f32.mrf.mxu1  ;;  %v14484_v37 = vld [vmem:[#allocation78_spill] sm:$0xff] }
 0x2d6   : > { %v9940_v36 = vpack.c.bf16 %v8172_v44, %v8172_v44  ;;  %vm7917_vm15 = vcmp.ge.f32.partialorder %v7789_v55, 0.0  ;;  %v8045_v10 = vmul.f32 0.2, %v7789_v55  ;;  %vm7922_vm1 = vcmp.ge.f32.partialorder %v7794_v14, 0.0 }
 0x2d7   : > { %8815 = vst.msk [vmem:[%s12994_s4 + $0x148] sm:$0xf] %vm8732_vm4, %v9942_v25  ;;  %v8175_v29 = vsel %vm7919_vm14, %v7791_v24, %v8047_v47  ;;  %v8050_v54 = vmul.f32 0.2, %v7794_v14  ;;  %vm7920_vm2 = vcmp.ge.f32.partialorder %v7792_v28, 0.0  ;;  %v5027_v45 = vadd.f32 %v13738_v60, %v14479_v58  ;;  %v14485_v24 = vld [vmem:[#allocation79_spill] sm:$0xff]  ;;  %v14026_v44 = vpop.f32.mrf.mxu0 }
 0x2d8   : > { %v8048_v48 = vmul.f32 0.2, %v7792_v28  ;;  %8813 = vst.msk [vmem:[%s12994_s4 + $0x140] sm:$0xf] %vm8732_vm4, %v9940_v36  ;;  %v9943_v21 = vpack.c.bf16 %v8175_v29, %v8175_v29  ;;  %v8173_v52 = vsel %vm7917_vm15, %v7789_v55, %v8045_v10  ;;  %v5025_v30 = vadd.f32 %v13747_v12, %v14480_v2  ;;  %v14486_v55 = vld [vmem:[#allocation80_spill] sm:$0xff] }
 0x2d9   : > { %v9941_v32 = vpack.c.bf16 %v8173_v52, %v8173_v52  ;;  %v8178_v63 = vsel %vm7922_vm1, %v7794_v14, %v8050_v54  ;;  %v5030_v51 = vadd.f32 %v14482_v3, %v14481_v19  ;;  %v7660_v17 = vadd.f32 %v13852_v27, %v5027_v45  ;;  %v14487_v14 = vld [vmem:[#allocation81_spill] sm:$0xff]  ;;  %v14036_v45 = vpop.f32.mrf.mxu0 }
 0x2da   : > { %v8176_v56 = vsel %vm7920_vm2, %v7792_v28, %v8048_v48  ;;  %8816 = vst.msk [vmem:[%s12994_s4 + $0x14c] sm:$0xf] %vm8732_vm4, %v9943_v21  ;;  %v9946_v20 = vpack.c.bf16 %v8178_v63, %v8178_v63  ;;  %v7658_v60 = vadd.f32 %v13866_v0, %v5025_v30  ;;  %v5028_v42 = vadd.f32 %v13762_v57, %v14483_v8 }
 0x2db   : > { %v9944_v43 = vpack.c.bf16 %v8176_v56, %v8176_v56  ;;  %8814 = vst.msk [vmem:[%s12994_s4 + $0x144] sm:$0xf] %vm8732_vm4, %v9941_v32  ;;  %v7663_v12 = vadd.f32 %v13877_v49, %v5030_v51  ;;  %v5031_v15 = vadd.f32 %v13777_v11, %v14484_v37  ;;  %v5029_v9 = vadd.f32 %v13794_v7, %v14485_v24  ;;  %v14488_v51 = vld [vmem:[#allocation82_spill] sm:$0xff] }
 0x2dc   : > { %8819 = vst.msk [vmem:[%s12994_s4 + $0x158] sm:$0xf] %vm8732_vm4, %v9946_v20  ;;  %v7795_v27 = vadd.f32 %v13871_v18, %v7660_v17  ;;  %v7793_v0 = vadd.f32 %v13871_v18, %v7658_v60  ;;  %v5034_v49 = vadd.f32 %v13806_v62, %v14486_v55  ;;  %v5032_v57 = vadd.f32 %v13814_v5, %v14487_v14  ;;  %v14028_v10 = vpop.f32.mrf.mxu1 }
 0x2dd   : > { %8817 = vst.msk [vmem:[%s12994_s4 + $0x150] sm:$0xf] %vm8732_vm4, %v9944_v43  ;;  %v7798_v28 = vadd.f32 %v13871_v18, %v7663_v12  ;;  %v7661_v11 = vadd.f32 %v13879_v50, %v5028_v42  ;;  %v7664_v7 = vadd.f32 %v13886_v39, %v5031_v15  ;;  %v7662_v25 = vadd.f32 %v13904_v35, %v5029_v9  ;;  %v14489_v43 = vld [vmem:[#allocation83_spill] sm:$0xff] }
 0x2de   : > { %vm7923_vm5 = vcmp.ge.f32.partialorder %v7795_v27, 0.0  ;;  %v8051_v47 = vmul.f32 0.2, %v7795_v27  ;;  %vm7921_vm6 = vcmp.ge.f32.partialorder %v7793_v0, 0.0  ;;  %v8049_v36 = vmul.f32 0.2, %v7793_v0  ;;  %v14034_v48 = vpop.f32.mrf.mxu1 }
 0x2df   : > { %vm7926_vm7 = vcmp.ge.f32.partialorder %v7798_v28, 0.0  ;;  %v8054_v62 = vmul.f32 0.2, %v7798_v28  ;;  %v7796_v5 = vadd.f32 %v13871_v18, %v7661_v11  ;;  %v7799_v29 = vadd.f32 %v13871_v18, %v7664_v7 }
 0x2e0   : > { %v8179_v50 = vsel %vm7923_vm5, %v7795_v27, %v8051_v47  ;;  %v8177_v39 = vsel %vm7921_vm6, %v7793_v0, %v8049_v36  ;;  %v7797_v35 = vadd.f32 %v13871_v18, %v7662_v25  ;;  %v7667_v54 = vadd.f32 %v13923_v1, %v5034_v49  ;;  %v14050_v60 = vpop.f32.mrf.mxu1  ;;  %v14491_v0 = vld [vmem:[#allocation85_spill] sm:$0xff]  ;;  %v14492_v49 = vld [vmem:[#allocation86_spill] sm:$0xff] }
 0x2e1   : > { %v9947_v21 = vpack.c.bf16 %v8179_v50, %v8179_v50  ;;  %v9945_v52 = vpack.c.bf16 %v8177_v39, %v8177_v39  ;;  %v8182_v58 = vsel %vm7926_vm7, %v7798_v28, %v8054_v62  ;;  %vm7924_vm3 = vcmp.ge.f32.partialorder %v7796_v5, 0.0  ;;  %v14493_v39 = vld [vmem:[#allocation87_spill] sm:$0xff] }
 0x2e2   : > { %v9950_v2 = vpack.c.bf16 %v8182_v58, %v8182_v58  ;;  %v8052_v30 = vmul.f32 0.2, %v7796_v5  ;;  %vm7927_vm8 = vcmp.ge.f32.partialorder %v7799_v29, 0.0  ;;  %v8055_v32 = vmul.f32 0.2, %v7799_v29  ;;  %v7465_v11 = vpop.f32.mrf.mxu1 }
 0x2e3   : > { %8820 = vst.msk [vmem:[%s12994_s4 + $0x15c] sm:$0xf] %vm8732_vm4, %v9947_v21  ;;  %8818 = vst.msk [vmem:[%s12994_s4 + $0x154] sm:$0xf] %vm8732_vm4, %v9945_v52  ;;  %vm7925_vm0 = vcmp.ge.f32.partialorder %v7797_v35, 0.0  ;;  %v7802_v1 = vadd.f32 %v13871_v18, %v7667_v54  ;;  %v7665_v56 = vadd.f32 %v13927_v53, %v5032_v57  ;;  %v5035_v20 = vadd.f32 %v13818_v38, %v14488_v51  ;;  %v14052_v53 = vpop.f32.mrf.mxu0  ;;  %v14495_v51 = vld [vmem:[#allocation89_spill] sm:$0xff] }
 0x2e4   : > { %v8053_v63 = vmul.f32 0.2, %v7797_v35  ;;  %8823 = vst.msk [vmem:[%s12994_s4 + $0x168] sm:$0xf] %vm8732_vm4, %v9950_v2  ;;  %v8180_v19 = vsel %vm7924_vm3, %v7796_v5, %v8052_v30  ;;  %v8183_v3 = vsel %vm7927_vm8, %v7799_v29, %v8055_v32  ;;  %v5033_v17 = vadd.f32 %v13845_v23, %v14489_v43  ;;  %v14490_v23 = vld [vmem:[#allocation84_spill] sm:$0xff]  ;;  %v14496_v43 = vld [vmem:[#allocation90_spill] sm:$0xff] }
 0x2e5   : > { %v9948_v12 = vpack.c.bf16 %v8180_v19, %v8180_v19  ;;  %v9951_v8 = vpack.c.bf16 %v8183_v3, %v8183_v3  ;;  %vm7930_vm9 = vcmp.ge.f32.partialorder %v7802_v1, 0.0  ;;  %v8058_v15 = vmul.f32 0.2, %v7802_v1 }
 0x2e6   : > { %v8181_v42 = vsel %vm7925_vm0, %v7797_v35, %v8053_v63  ;;  %v7800_v24 = vadd.f32 %v13871_v18, %v7665_v56  ;;  %v7668_v9 = vadd.f32 %v13936_v26, %v5035_v20  ;;  %v7666_v38 = vadd.f32 %v13946_v16, %v5033_v17 }
 0x2e7   : > { %v9949_v37 = vpack.c.bf16 %v8181_v42, %v8181_v42  ;;  %8821 = vst.msk [vmem:[%s12994_s4 + $0x160] sm:$0xf] %vm8732_vm4, %v9948_v12  ;;  %8824 = vst.msk [vmem:[%s12994_s4 + $0x16c] sm:$0xf] %vm8732_vm4, %v9951_v8  ;;  %v5038_v27 = vadd.f32 %v13875_v13, %v14490_v23  ;;  %v5036_v55 = vadd.f32 %v13881_v61, %v14491_v0  ;;  %v14073_v61 = vpop.f32.mrf.mxu0 }
 0x2e8   : > { %v5039_v14 = vadd.f32 %v13911_v40, %v14492_v49  ;;  %v8186_v57 = vsel %vm7930_vm9, %v7802_v1, %v8058_v15  ;;  %vm7928_vm10 = vcmp.ge.f32.partialorder %v7800_v24, 0.0  ;;  %v8056_v26 = vmul.f32 0.2, %v7800_v24  ;;  %v14494_v1 = vld [vmem:[#allocation88_spill] sm:$0xff]  ;;  %v14499_v49 = vld [vmem:[#allocation93_spill] sm:$0xff] }
 0x2e9   : > { %8822 = vst.msk [vmem:[%s12994_s4 + $0x164] sm:$0xf] %vm8732_vm4, %v9949_v37  ;;  %v7803_v28 = vadd.f32 %v13871_v18, %v7668_v9  ;;  %v9954_v7 = vpack.c.bf16 %v8186_v57, %v8186_v57  ;;  %v7801_v16 = vadd.f32 %v13871_v18, %v7666_v38  ;;  %v7671_v13 = vadd.f32 %v13964_v46, %v5038_v27  ;;  %v14085_v58 = vpop.f32.mrf.mxu0  ;;  %v14497_v9 = vld [vmem:[#allocation91_spill] sm:$0xff]  ;;  %v14498_v27 = vld [vmem:[#allocation92_spill] sm:$0xff] }
 0x2ea   : > { %v7669_v25 = vadd.f32 %v13973_v4, %v5036_v55  ;;  %v8184_v40 = vsel %vm7928_vm10, %v7800_v24, %v8056_v26  ;;  %v7672_v36 = vadd.f32 %v13983_v41, %v5039_v14  ;;  %v5037_v35 = vadd.f32 %v13925_v6, %v14493_v39  ;;  %v10746_v54 = vpop.f32.mrf.mxu1 }
 0x2eb   : > { %vm7931_vm11 = vcmp.ge.f32.partialorder %v7803_v28, 0.0  ;;  %v8059_v47 = vmul.f32 0.2, %v7803_v28  ;;  %8827 = vst.msk [vmem:[%s12994_s4 + $0x178] sm:$0xf] %vm8732_vm4, %v9954_v7  ;;  %v9952_v62 = vpack.c.bf16 %v8184_v40, %v8184_v40  ;;  %vm7929_vm12 = vcmp.ge.f32.partialorder %v7801_v16, 0.0 }
 0x2ec   : > { %v8057_v5 = vmul.f32 0.2, %v7801_v16  ;;  %v7806_v29 = vadd.f32 %v13871_v18, %v7671_v13  ;;  %v7804_v46 = vadd.f32 %v13871_v18, %v7669_v25  ;;  %v7807_v4 = vadd.f32 %v13871_v18, %v7672_v36  ;;  %v7478_v12 = vpop.f32.mrf.mxu1 }
 0x2ed   : > { %v8187_v50 = vsel %vm7931_vm11, %v7803_v28, %v8059_v47  ;;  %8825 = vst.msk [vmem:[%s12994_s4 + $0x170] sm:$0xf] %vm8732_vm4, %v9952_v62  ;;  %v7670_v6 = vadd.f32 %v14001_v59, %v5037_v35  ;;  %v5042_v56 = vadd.f32 %v13940_v34, %v14494_v1  ;;  %v5040_v20 = vadd.f32 %v13970_v33, %v14495_v51  ;;  %v14100_v34 = vpop.f32.mrf.mxu0  ;;  %v14500_v62 = vld [vmem:[#allocation94_spill] sm:$0xff] }
 0x2ee   : > { %v9955_v41 = vpack.c.bf16 %v8187_v50, %v8187_v50  ;;  %v8185_v21 = vsel %vm7929_vm12, %v7801_v16, %v8057_v5  ;;  %vm7934_vm13 = vcmp.ge.f32.partialorder %v7806_v29, 0.0  ;;  %v8062_v52 = vmul.f32 0.2, %v7806_v29 }
 0x2ef   : > { %v9953_v2 = vpack.c.bf16 %v8185_v21, %v8185_v21  ;;  %vm7932_vm14 = vcmp.ge.f32.partialorder %v7804_v46, 0.0  ;;  %v8060_v30 = vmul.f32 0.2, %v7804_v46  ;;  %vm7935_vm15 = vcmp.ge.f32.partialorder %v7807_v4, 0.0  ;;  %v10621_v28 = vpop.f32.mrf.mxu0 }
 0x2f0   : > { %8828 = vst.msk [vmem:[%s12994_s4 + $0x17c] sm:$0xf] %vm8732_vm4, %v9955_v41  ;;  %v8190_v32 = vsel %vm7934_vm13, %v7806_v29, %v8062_v52  ;;  %v8063_v63 = vmul.f32 0.2, %v7807_v4  ;;  %v5043_v17 = vadd.f32 %v13981_v31, %v14496_v43  ;;  %v7805_v59 = vadd.f32 %v13871_v18, %v7670_v6  ;;  %v14501_v52 = vld [vmem:[#allocation96_spill] sm:$0xff] }
 0x2f1   : > { %8826 = vst.msk [vmem:[%s12994_s4 + $0x174] sm:$0xf] %vm8732_vm4, %v9953_v2  ;;  %v9958_v19 = vpack.c.bf16 %v8190_v32, %v8190_v32  ;;  %v8188_v3 = vsel %vm7932_vm14, %v7804_v46, %v8060_v30  ;;  %v7675_v37 = vadd.f32 %v14028_v10, %v5042_v56  ;;  %v7673_v24 = vadd.f32 %v14034_v48, %v5040_v20  ;;  %v14502_v2 = vld [vmem:[#allocation97_spill] sm:$0xff] }
 0x2f2   : > { %v9956_v8 = vpack.c.bf16 %v8188_v3, %v8188_v3  ;;  %v8191_v42 = vsel %vm7935_vm15, %v7807_v4, %v8063_v63  ;;  %v7676_v33 = vadd.f32 %v14050_v60, %v5043_v17  ;;  %v5041_v31 = vadd.f32 %v13995_v22, %v14497_v9  ;;  %v10747_v60 = vpop.f32.mrf.mxu1  ;;  %v4864_v4 = vpop.f32.mrf.mxu0 }
 0x2f3   : > { %8831 = vst.msk [vmem:[%s12994_s4 + $0x188] sm:$0xf] %vm8732_vm4, %v9958_v19  ;;  %v9959_v15 = vpack.c.bf16 %v8191_v42, %v8191_v42  ;;  %vm7933_vm1 = vcmp.ge.f32.partialorder %v7805_v59, 0.0  ;;  %v8061_v38 = vmul.f32 0.2, %v7805_v59  ;;  %v7810_v23 = vadd.f32 %v13871_v18, %v7675_v37  ;;  %v14505_v42 = vld [vmem:[#allocation100_spill] sm:$0xff] }
 0x2f4   : > { %8829 = vst.msk [vmem:[%s12994_s4 + $0x180] sm:$0xf] %vm8732_vm4, %v9956_v8  ;;  %v5046_v10 = vadd.f32 %v14026_v44, %v14498_v27  ;;  %v7808_v0 = vadd.f32 %v13871_v18, %v7673_v24  ;;  %v7811_v48 = vadd.f32 %v13871_v18, %v7676_v33  ;;  %v7674_v55 = vadd.f32 %v7465_v11, %v5041_v31  ;;  %v7481_v36 = vpop.f32.mrf.mxu1  ;;  %v10624_v20 = vpop.f32.mrf.mxu0 }
 0x2f5   : > { %8832 = vst.msk [vmem:[%s12994_s4 + $0x18c] sm:$0xf] %vm8732_vm4, %v9959_v15  ;;  %v5044_v22 = vadd.f32 %v14036_v45, %v14499_v49  ;;  %v8189_v14 = vsel %vm7933_vm1, %v7805_v59, %v8061_v38  ;;  %vm7938_vm2 = vcmp.ge.f32.partialorder %v7810_v23, 0.0  ;;  %v8066_v57 = vmul.f32 0.2, %v7810_v23 }
 0x2f6   : > { %v7679_v26 = vadd.f32 %v10746_v54, %v5046_v10  ;;  %v9957_v7 = vpack.c.bf16 %v8189_v14, %v8189_v14  ;;  %vm7936_vm5 = vcmp.ge.f32.partialorder %v7808_v0, 0.0  ;;  %v8064_v44 = vmul.f32 0.2, %v7808_v0  ;;  %v4877_v27 = vpop.f32.mrf.mxu0 }
 0x2f7   : > { %vm7939_vm6 = vcmp.ge.f32.partialorder %v7811_v48, 0.0  ;;  %v8194_v16 = vsel %vm7938_vm2, %v7810_v23, %v8066_v57  ;;  %v8067_v13 = vmul.f32 0.2, %v7811_v48  ;;  %v7809_v25 = vadd.f32 %v13871_v18, %v7674_v55 }
 0x2f8   : > { %v7814_v11 = vadd.f32 %v13871_v18, %v7679_v26  ;;  %8830 = vst.msk [vmem:[%s12994_s4 + $0x184] sm:$0xf] %vm8732_vm4, %v9957_v7  ;;  %v9962_v45 = vpack.c.bf16 %v8194_v16, %v8194_v16  ;;  %v8192_v40 = vsel %vm7936_vm5, %v7808_v0, %v8064_v44  ;;  %v7677_v47 = vadd.f32 %v7478_v12, %v5044_v22  ;;  %v14504_v12 = vld [vmem:[#allocation99_spill] sm:$0xff]  ;;  %v10625_v16 = vpop.f32.mrf.mxu0 }
 0x2f9   : > { %v5047_v5 = vadd.f32 %v14052_v53, %v14500_v62  ;;  %v9960_v29 = vpack.c.bf16 %v8192_v40, %v8192_v40  ;;  %v8195_v50 = vsel %vm7939_vm6, %v7811_v48, %v8067_v13  ;;  %vm7937_vm7 = vcmp.ge.f32.partialorder %v7809_v25, 0.0 }
 0x2fa   : > { %v8065_v46 = vmul.f32 0.2, %v7809_v25  ;;  %8835 = vst.msk [vmem:[%s12994_s4 + $0x198] sm:$0xf] %vm8732_vm4, %v9962_v45  ;;  %v9963_v39 = vpack.c.bf16 %v8195_v50, %v8195_v50  ;;  %vm7942_vm3 = vcmp.ge.f32.partialorder %v7814_v11, 0.0  ;;  %v7812_v54 = vadd.f32 %v13871_v18, %v7677_v47  ;;  %v10750_v1 = vpop.f32.mrf.mxu1  ;;  %v4880_v50 = vpop.f32.mrf.mxu0 }
 0x2fb   : > { %v8070_v35 = vmul.f32 0.2, %v7814_v11  ;;  %8833 = vst.msk [vmem:[%s12994_s4 + $0x190] sm:$0xf] %vm8732_vm4, %v9960_v29  ;;  %v7680_v21 = vadd.f32 %v10747_v60, %v5047_v5  ;;  %v5045_v53 = vadd.f32 %v14073_v61, %v14501_v52  ;;  %v5050_v30 = vadd.f32 %v14085_v58, %v14502_v2  ;;  %v14503_v58 = vld [vmem:[#allocation98_spill] sm:$0xff]  ;;  %v14507_v5 = vld [vmem:[#allocation104_spill] sm:$0xff] }
 0x2fc   : > { %v8193_v41 = vsel %vm7937_vm7, %v7809_v25, %v8065_v46  ;;  %8836 = vst.msk [vmem:[%s12994_s4 + $0x19c] sm:$0xf] %vm8732_vm4, %v9963_v39  ;;  %vm7940_vm8 = vcmp.ge.f32.partialorder %v7812_v54, 0.0  ;;  %v8068_v6 = vmul.f32 0.2, %v7812_v54  ;;  %v7494_v43 = vpop.f32.mrf.mxu1  ;;  %v5048_v17 = vadd.f32 %v14100_v34, %v14503_v58  ;;  %v14506_v25 = vld [vmem:[#allocation102_spill] sm:$0xff] }
 0x2fd   : > { %v9961_v32 = vpack.c.bf16 %v8193_v41, %v8193_v41  ;;  %v8198_v63 = vsel %vm7942_vm3, %v7814_v11, %v8070_v35  ;;  %v7815_v19 = vadd.f32 %v13871_v18, %v7680_v21  ;;  %v7678_v3 = vadd.f32 %v7481_v36, %v5045_v53  ;;  %v14508_v35 = vld [vmem:[#allocation105_spill] sm:$0xff]  ;;  %v10628_v53 = vpop.f32.mrf.mxu0 }
 0x2fe   : > { %v9966_v56 = vpack.c.bf16 %v8198_v63, %v8198_v63  ;;  %v7683_v51 = vadd.f32 %v10750_v1, %v5050_v30  ;;  %v8196_v61 = vsel %vm7940_vm8, %v7812_v54, %v8068_v6  ;;  %v5051_v8 = vadd.f32 %v10621_v28, %v14504_v12  ;;  %v10751_v9 = vpop.f32.mrf.mxu1  ;;  %v14509_v30 = vld [vmem:[#allocation106_spill] sm:$0xff] }
 0x2ff   : > { %8834 = vst.msk [vmem:[%s12994_s4 + $0x194] sm:$0xf] %vm8732_vm4, %v9961_v32  ;;  %v5049_v59 = vadd.f32 %v4864_v4, %v14505_v42  ;;  %v9964_v37 = vpack.c.bf16 %v8196_v61, %v8196_v61  ;;  %vm7943_vm0 = vcmp.ge.f32.partialorder %v7815_v19, 0.0  ;;  %v8071_v15 = vmul.f32 0.2, %v7815_v19 }
 0x300   : > { %8839 = vst.msk [vmem:[%s12994_s4 + $0x1a8] sm:$0xf] %vm8732_vm4, %v9966_v56  ;;  %v7813_v24 = vadd.f32 %v13871_v18, %v7678_v3  ;;  %v7818_v33 = vadd.f32 %v13871_v18, %v7683_v51  ;;  %v7681_v31 = vadd.f32 %v7494_v43, %v5048_v17  ;;  %v7684_v23 = vadd.f32 %v10751_v9, %v5051_v8  ;;  %v7497_v55 = vpop.f32.mrf.mxu1 }
 0x301   : > { %8837 = vst.msk [vmem:[%s12994_s4 + $0x1a0] sm:$0xf] %vm8732_vm4, %v9964_v37  ;;  %v8199_v38 = vsel %vm7943_vm0, %v7815_v19, %v8071_v15  ;;  %v7682_v22 = vadd.f32 %v7497_v55, %v5049_v59  ;;  %v5054_v11 = vadd.f32 %v10624_v20, %v14506_v25  ;;  %v5052_v29 = vadd.f32 %v4877_v27, %v14507_v5  ;;  %v4893_v20 = vpop.f32.mrf.mxu0  ;;  %v14513_v55 = vld [vmem:[#allocation101_spill] sm:$0xff] }
 0x302   : > { %vm7941_vm9 = vcmp.ge.f32.partialorder %v7813_v24, 0.0  ;;  %v8069_v34 = vmul.f32 0.2, %v7813_v24  ;;  %v9967_v10 = vpack.c.bf16 %v8199_v38, %v8199_v38  ;;  %vm7946_vm10 = vcmp.ge.f32.partialorder %v7818_v33, 0.0  ;;  %v14511_v38 = vld [vmem:[#allocation109_spill] sm:$0xff] }
 0x303   : > { %v8074_v0 = vmul.f32 0.2, %v7818_v33  ;;  %v7816_v48 = vadd.f32 %v13871_v18, %v7681_v31  ;;  %v7819_v49 = vadd.f32 %v13871_v18, %v7684_v23  ;;  %v7817_v44 = vadd.f32 %v13871_v18, %v7682_v22  ;;  %v10629_v59 = vpop.f32.mrf.mxu0 }
 0x304   : > { %v8197_v60 = vsel %vm7941_vm9, %v7813_v24, %v8069_v34  ;;  %8840 = vst.msk [vmem:[%s12994_s4 + $0x1ac] sm:$0xf] %vm8732_vm4, %v9967_v10  ;;  %v5055_v54 = vadd.f32 %v10625_v16, %v14508_v35  ;;  %v5053_v32 = vadd.f32 %v4880_v50, %v14509_v30  ;;  %v14510_v24 = vld [vmem:[#allocation107_spill] sm:$0xff]  ;;  %v5056_v34 = vadd.f32 %v4893_v20, %v14511_v38 }
 0x305   : > { %v9965_v14 = vpack.c.bf16 %v8197_v60, %v8197_v60  ;;  %v8202_v57 = vsel %vm7946_vm10, %v7818_v33, %v8074_v0  ;;  %vm7944_vm11 = vcmp.ge.f32.partialorder %v7816_v48, 0.0  ;;  %v8072_v26 = vmul.f32 0.2, %v7816_v48  ;;  %v4896_v23 = vpop.f32.mrf.mxu0  ;;  %v14512_v0 = vld [vmem:[#allocation110_spill] sm:$0xff]  ;;  %v14514_v60 = vld [vmem:[#allocation95_spill] sm:$0xff] }
 0x306   : > { %v9970_v28 = vpack.c.bf16 %v8202_v57, %v8202_v57  ;;  %vm7947_vm12 = vcmp.ge.f32.partialorder %v7819_v49, 0.0  ;;  %v8075_v7 = vmul.f32 0.2, %v7819_v49  ;;  %vm7945_vm13 = vcmp.ge.f32.partialorder %v7817_v44, 0.0 }
 0x307   : > { %8838 = vst.msk [vmem:[%s12994_s4 + $0x1a4] sm:$0xf] %vm8732_vm4, %v9965_v14  ;;  %v8200_v13 = vsel %vm7944_vm11, %v7816_v48, %v8072_v26  ;;  %v8073_v47 = vmul.f32 0.2, %v7817_v44  ;;  %v5058_v33 = vadd.f32 %v10628_v53, %v14510_v24  ;;  %v5059_v48 = vadd.f32 %v10629_v59, %v14512_v0  ;;  %v10632_v26 = vpop.f32.mrf.mxu0 }
 0x308   : > { %8843 = vst.msk [vmem:[%s12994_s4 + $0x1b8] sm:$0xf] %vm8732_vm4, %v9970_v28  ;;  %v9968_v45 = vpack.c.bf16 %v8200_v13, %v8200_v13  ;;  %v8203_v40 = vsel %vm7947_vm12, %v7819_v49, %v8075_v7  ;;  %v10754_v46 = vpop.f32.mrf.mxu1  ;;  %v3703_v49 = vadd.f32 %v14514_v60, %v14513_v55  ;;  %v14520_v60 = vld [vmem:[#allocation116_spill] sm:$0xff] }
 0x309   : > { %v9971_v36 = vpack.c.bf16 %v8203_v40, %v8203_v40  ;;  %v8201_v62 = vsel %vm7945_vm13, %v7817_v44, %v8073_v47  ;;  %v7687_v39 = vadd.f32 %v10754_v46, %v5054_v11  ;;  %v4909_v47 = vpop.f32.mrf.mxu0 }
 0x30a   : > { %8841 = vst.msk [vmem:[%s12994_s4 + $0x1b0] sm:$0xf] %vm8732_vm4, %v9968_v45  ;;  %v9969_v4 = vpack.c.bf16 %v8201_v62, %v8201_v62  ;;  %v7510_v41 = vpop.f32.mrf.mxu1  ;;  %v5057_v7 = vadd.f32 %v4896_v23, %v3703_v49 }
 0x30b   : > { %8844 = vst.msk [vmem:[%s12994_s4 + $0x1bc] sm:$0xf] %vm8732_vm4, %v9971_v36  ;;  %v7822_v21 = vadd.f32 %v13871_v18, %v7687_v39  ;;  %v7685_v52 = vadd.f32 %v7510_v41, %v5052_v29  ;;  %v14515_v39 = vld [vmem:[#allocation112_spill] sm:$0xff] }
 0x30c   : > { %8842 = vst.msk [vmem:[%s12994_s4 + $0x1b4] sm:$0xf] %vm8732_vm4, %v9969_v4  ;;  %v10755_v2 = vpop.f32.mrf.mxu1  ;;  %v5062_v35 = vadd.f32 %v10632_v26, %v14515_v39  ;;  %v14521_v26 = vld [vmem:[#allocation117_spill] sm:$0xff] }
 0x30d   : > { %vm7950_vm14 = vcmp.ge.f32.partialorder %v7822_v21, 0.0  ;;  %v8078_v63 = vmul.f32 0.2, %v7822_v21  ;;  %v7820_v6 = vadd.f32 %v13871_v18, %v7685_v52  ;;  %v7688_v1 = vadd.f32 %v10755_v2, %v5055_v54  ;;  %v10633_v54 = vpop.f32.mrf.mxu0  ;;  %v14516_v52 = vld [vmem:[#allocation114_spill] sm:$0xff] }
 0x30e   : > { %v7513_v3 = vpop.f32.mrf.mxu1  ;;  %v5060_v53 = vadd.f32 %v4909_v47, %v14516_v52  ;;  %v10911_v47 = vld [vmem:[%s14235_s2] ss:$0 sm:$0xff] }
 0x30f   : > { %v8206_v56 = vsel %vm7950_vm14, %v7822_v21, %v8078_v63  ;;  %vm7948_vm15 = vcmp.ge.f32.partialorder %v7820_v6, 0.0  ;;  %v8076_v19 = vmul.f32 0.2, %v7820_v6  ;;  %v7823_v51 = vadd.f32 %v13871_v18, %v7688_v1 }
 0x310   : > { %v9974_v61 = vpack.c.bf16 %v8206_v56, %v8206_v56  ;;  %v7686_v43 = vadd.f32 %v7513_v3, %v5053_v32  ;;  %v4912_v56 = vpop.f32.mrf.mxu0  ;;  %v14519_v3 = vld [vmem:[#allocation103_spill] sm:$0xff] }
 0x311   : > { %v8204_v58 = vsel %vm7948_vm15, %v7820_v6, %v8076_v19  ;;  %vm7951_vm1 = vcmp.ge.f32.partialorder %v7823_v51, 0.0  ;;  %v8079_v17 = vmul.f32 0.2, %v7823_v51  ;;  %v14517_v6 = vld [vmem:[#allocation115_spill] sm:$0xff]  ;;  %v14518_v19 = vld [vmem:[#allocation108_spill] sm:$0xff] }
 0x312   : > { %8847 = vst.msk [vmem:[%s12994_s4 + $0x1c8] sm:$0xf] %vm8732_vm4, %v9974_v61  ;;  %v9972_v12 = vpack.c.bf16 %v8204_v58, %v8204_v58  ;;  %v7821_v8 = vadd.f32 %v13871_v18, %v7686_v43  ;;  %v5063_v1 = vadd.f32 %v10633_v54, %v14517_v6  ;;  %v10636_v59 = vpop.f32.mrf.mxu0 }
 0x313   : > { %v8207_v42 = vsel %vm7951_vm1, %v7823_v51, %v8079_v17  ;;  %v3719_v51 = vadd.f32 %v14519_v3, %v14518_v19  ;;  %v5066_v49 = vadd.f32 %v10636_v59, %v14520_v60 }
 0x314   : > { %8845 = vst.msk [vmem:[%s12994_s4 + $0x1c0] sm:$0xf] %vm8732_vm4, %v9972_v12  ;;  %v9975_v37 = vpack.c.bf16 %v8207_v42, %v8207_v42  ;;  %vm7949_vm2 = vcmp.ge.f32.partialorder %v7821_v8, 0.0  ;;  %v8077_v15 = vmul.f32 0.2, %v7821_v8  ;;  %v4925_v23 = vpop.f32.mrf.mxu0 }
 0x315   : > { %v5061_v17 = vadd.f32 %v4912_v56, %v3719_v51 }
 0x316   : > { %8848 = vst.msk [vmem:[%s12994_s4 + $0x1cc] sm:$0xf] %vm8732_vm4, %v9975_v37  ;;  %v8205_v9 = vsel %vm7949_vm2, %v7821_v8, %v8077_v15 }
 0x317   : > { %v9973_v31 = vpack.c.bf16 %v8205_v9, %v8205_v9 }
 0x318   : > { %v10758_v27 = vpop.f32.mrf.mxu1 }
 0x319   : > { %8846 = vst.msk [vmem:[%s12994_s4 + $0x1c4] sm:$0xf] %vm8732_vm4, %v9973_v31  ;;  %v7691_v10 = vadd.f32 %v10758_v27, %v5058_v33 }
 0x31a   : > { %v7526_v22 = vpop.f32.mrf.mxu1 }
 0x31b   : > { %v7826_v14 = vadd.f32 %v13871_v18, %v7691_v10  ;;  %v7689_v57 = vadd.f32 %v7526_v22, %v5056_v34  ;;  %v10637_v22 = vpop.f32.mrf.mxu0 }
 0x31c   : > { %v10759_v28 = vpop.f32.mrf.mxu1 }
 0x31d   : > { %vm7954_vm5 = vcmp.ge.f32.partialorder %v7826_v14, 0.0  ;;  %v8082_v44 = vmul.f32 0.2, %v7826_v14  ;;  %v7824_v16 = vadd.f32 %v13871_v18, %v7689_v57  ;;  %v7692_v13 = vadd.f32 %v10759_v28, %v5059_v48 }
 0x31e   : > { %v7529_v45 = vpop.f32.mrf.mxu1  ;;  %v5064_v28 = vadd.f32 %v4925_v23, %v14521_v26 }
 0x31f   : > { %v8210_v25 = vsel %vm7954_vm5, %v7826_v14, %v8082_v44  ;;  %vm7952_vm6 = vcmp.ge.f32.partialorder %v7824_v16, 0.0  ;;  %v8080_v11 = vmul.f32 0.2, %v7824_v16  ;;  %v7827_v40 = vadd.f32 %v13871_v18, %v7692_v13  ;;  %v4928_v13 = vpop.f32.mrf.mxu0 }
 0x320   : > { %v9978_v36 = vpack.c.bf16 %v8210_v25, %v8210_v25  ;;  %v7690_v62 = vadd.f32 %v7529_v45, %v5057_v7  ;;  %v14523_v25 = vld [vmem:[#allocation113_spill] sm:$0xff] }
 0x321   : > { %v8208_v5 = vsel %vm7952_vm6, %v7824_v16, %v8080_v11  ;;  %vm7955_vm7 = vcmp.ge.f32.partialorder %v7827_v40, 0.0  ;;  %v8083_v29 = vmul.f32 0.2, %v7827_v40  ;;  %v14524_v11 = vld [vmem:[#allocation111_spill] sm:$0xff] }
 0x322   : > { %8851 = vst.msk [vmem:[%s12994_s4 + $0x1d8] sm:$0xf] %vm8732_vm4, %v9978_v36  ;;  %v9976_v50 = vpack.c.bf16 %v8208_v5, %v8208_v5  ;;  %v7825_v46 = vadd.f32 %v13871_v18, %v7690_v62  ;;  %v3735_v45 = vadd.f32 %v14524_v11, %v14523_v25 }
 0x323   : > { %v8211_v4 = vsel %vm7955_vm7, %v7827_v40, %v8083_v29 }
 0x324   : > { %8849 = vst.msk [vmem:[%s12994_s4 + $0x1d0] sm:$0xf] %vm8732_vm4, %v9976_v50  ;;  %v9979_v41 = vpack.c.bf16 %v8211_v4, %v8211_v4  ;;  %vm7953_vm3 = vcmp.ge.f32.partialorder %v7825_v46, 0.0  ;;  %v8081_v21 = vmul.f32 0.2, %v7825_v46  ;;  %v5065_v29 = vadd.f32 %v4928_v13, %v3735_v45 }
 0x326   : > { %8852 = vst.msk [vmem:[%s12994_s4 + $0x1dc] sm:$0xf] %vm8732_vm4, %v9979_v41  ;;  %v10762_v2 = vpop.f32.mrf.mxu1  ;;  %v8209_v30 = vsel %vm7953_vm3, %v7825_v46, %v8081_v21 }
 0x327   : > { %v9977_v32 = vpack.c.bf16 %v8209_v30, %v8209_v30  ;;  %v7695_v63 = vadd.f32 %v10762_v2, %v5062_v35 }
 0x328   : > { %v7542_v20 = vpop.f32.mrf.mxu1 }
 0x329   : > { %8850 = vst.msk [vmem:[%s12994_s4 + $0x1d4] sm:$0xf] %vm8732_vm4, %v9977_v32  ;;  %v7830_v61 = vadd.f32 %v13871_v18, %v7695_v63  ;;  %v7693_v43 = vadd.f32 %v7542_v20, %v5060_v53 }
 0x32a   : > { %v10763_v58 = vpop.f32.mrf.mxu1 }
 0x32b   : > { %vm7958_vm8 = vcmp.ge.f32.partialorder %v7830_v61, 0.0  ;;  %v8086_v12 = vmul.f32 0.2, %v7830_v61  ;;  %v7828_v8 = vadd.f32 %v13871_v18, %v7693_v43  ;;  %v7696_v42 = vadd.f32 %v10763_v58, %v5063_v1 }
 0x32c   : > { %v7545_v24 = vpop.f32.mrf.mxu1 }
 0x32d   : > { %v8214_v37 = vsel %vm7958_vm8, %v7830_v61, %v8086_v12  ;;  %vm7956_vm0 = vcmp.ge.f32.partialorder %v7828_v8, 0.0  ;;  %v8084_v15 = vmul.f32 0.2, %v7828_v8  ;;  %v7831_v33 = vadd.f32 %v13871_v18, %v7696_v42 }
 0x32e   : > { %v9982_v9 = vpack.c.bf16 %v8214_v37, %v8214_v37  ;;  %v7694_v31 = vadd.f32 %v7545_v24, %v5061_v17 }
 0x32f   : > { %v8212_v38 = vsel %vm7956_vm0, %v7828_v8, %v8084_v15  ;;  %vm7959_vm9 = vcmp.ge.f32.partialorder %v7831_v33, 0.0  ;;  %v8087_v34 = vmul.f32 0.2, %v7831_v33 }
 0x330   : > { %8855 = vst.msk [vmem:[%s12994_s4 + $0x1e8] sm:$0xf] %vm8732_vm4, %v9982_v9  ;;  %v9980_v27 = vpack.c.bf16 %v8212_v38, %v8212_v38  ;;  %v7829_v10 = vadd.f32 %v13871_v18, %v7694_v31  ;;  %v14522_v18 = vld [vmem:[#allocation118_spill] sm:$0xff] }
 0x331   : > { %v8215_v0 = vsel %vm7959_vm9, %v7831_v33, %v8087_v34  ;;  %v5067_v16 = vadd.f32 %v10637_v22, %v14522_v18 }
 0x332   : > { %8853 = vst.msk [vmem:[%s12994_s4 + $0x1e0] sm:$0xf] %vm8732_vm4, %v9980_v27  ;;  %v9983_v48 = vpack.c.bf16 %v8215_v0, %v8215_v0  ;;  %vm7957_vm10 = vcmp.ge.f32.partialorder %v7829_v10, 0.0  ;;  %v8085_v55 = vmul.f32 0.2, %v7829_v10 }
 0x334   : > { %8856 = vst.msk [vmem:[%s12994_s4 + $0x1ec] sm:$0xf] %vm8732_vm4, %v9983_v48  ;;  %v8213_v14 = vsel %vm7957_vm10, %v7829_v10, %v8085_v55 }
 0x335   : > { %v9981_v57 = vpack.c.bf16 %v8213_v14, %v8213_v14 }
 0x336   : > { %v10766_v7 = vpop.f32.mrf.mxu1 }
 0x337   : > { %8854 = vst.msk [vmem:[%s12994_s4 + $0x1e4] sm:$0xf] %vm8732_vm4, %v9981_v57  ;;  %v7699_v44 = vadd.f32 %v10766_v7, %v5066_v49 }
 0x338   : > { %v7558_v40 = vpop.f32.mrf.mxu1 }
 0x339   : > { %v7834_v36 = vadd.f32 %v10911_v47, %v7699_v44  ;;  %v7697_v62 = vadd.f32 %v7558_v40, %v5064_v28 }
 0x33a   : > { %v10767_v5 = vpop.f32.mrf.mxu1 }
 0x33b   : > { %vm7962_vm11 = vcmp.ge.f32.partialorder %v7834_v36, 0.0  ;;  %v8090_v50 = vmul.f32 0.2, %v7834_v36  ;;  %v7832_v46 = vadd.f32 %v10911_v47, %v7697_v62  ;;  %v7700_v4 = vadd.f32 %v10767_v5, %v5067_v16 }
 0x33c   : > { %v7561_v54 = vpop.f32.mrf.mxu1 }
 0x33d   : > { %v8218_v39 = vsel %vm7962_vm11, %v7834_v36, %v8090_v50  ;;  %vm7960_vm12 = vcmp.ge.f32.partialorder %v7832_v46, 0.0  ;;  %v8088_v35 = vmul.f32 0.2, %v7832_v46  ;;  %v7835_v41 = vadd.f32 %v10911_v47, %v7700_v4 }
 0x33e   : > { %v9986_v21 = vpack.c.bf16 %v8218_v39, %v8218_v39  ;;  %v7698_v52 = vadd.f32 %v7561_v54, %v5065_v29 }
 0x33f   : > { %v8216_v53 = vsel %vm7960_vm12, %v7832_v46, %v8088_v35  ;;  %vm7963_vm13 = vcmp.ge.f32.partialorder %v7835_v41, 0.0  ;;  %v8091_v2 = vmul.f32 0.2, %v7835_v41 }
 0x340   : > { %8859 = vst.msk [vmem:[%s12994_s4 + $0x1f8] sm:$0xf] %vm8732_vm4, %v9986_v21  ;;  %v9984_v30 = vpack.c.bf16 %v8216_v53, %v8216_v53  ;;  %v7833_v32 = vadd.f32 %v10911_v47, %v7698_v52 }
 0x341   : > { %v8219_v63 = vsel %vm7963_vm13, %v7835_v41, %v8091_v2 }
 0x342   : > { %8857 = vst.msk [vmem:[%s12994_s4 + $0x1f0] sm:$0xf] %vm8732_vm4, %v9984_v30  ;;  %v9987_v6 = vpack.c.bf16 %v8219_v63, %v8219_v63  ;;  %vm7961_vm14 = vcmp.ge.f32.partialorder %v7833_v32, 0.0  ;;  %v8089_v1 = vmul.f32 0.2, %v7833_v32 }
 0x344   : > { %8860 = vst.msk [vmem:[%s12994_s4 + $0x1fc] sm:$0xf] %vm8732_vm4, %v9987_v6  ;;  %v8217_v56 = vsel %vm7961_vm14, %v7833_v32, %v8089_v1 }
 0x345   : > { %v9985_v19 = vpack.c.bf16 %v8217_v56, %v8217_v56 }
 0x347   : > { %8858 = vst.msk [vmem:[%s12994_s4 + $0x1f4] sm:$0xf] %vm8732_vm4, %v9985_v19 }
 0x348 PF: > { %s13_s12 = sadd.s32 1, %s10918_s12  }
 0x349   : > { %p10_p4 = scmp.ge.s32.totalorder %s13_s12, 4  }
 0x34b   :  { %12 = sbr.rel (!%p10_p4) target bundleno = 1 (0x1), region = 63 }

// kernel: critic_forward.5
= control target key start
LH: loop header
LB: loop body
LE: loop exit
PB: predicated region body
PF: predicated region fallthrough
CT: control target
= control target key end

     0   :  { %s3545_s15 = smov 0   ;;  %s4707_s0 = inlined_call_operand.vmem [shape: bf16[2,17,17,32], index: 0, kind: input, shape index: {}]   ;;  %s4708_s1 = inlined_call_operand.vmem [shape: bf16[128,16], index: 1, kind: input, shape index: {}]   ;;  %s4709_s2 = inlined_call_operand.vmem [shape: f32[1,16], index: 2, kind: input, shape index: {}]   ;;  %s4710_s3 = inlined_call_operand.vmem [shape: f32[1,16], index: 3, kind: input, shape index: {}]   ;;  %s4711_s4 = inlined_call_operand.vmem [shape: bf16[2,256,16], index: 4, kind: output, shape index: {}]  }
   0x1 LB: > { %s2952_s16 = sadd.s32 4294967295, %s3518_s15   ;;  %p2956_p0 = scmp.ge.s32.totalorder %s3518_s15, 1  ;;  %s3518_s15 = sphi %s3545_s15, %s14_s15  }
   0x2   : > { %p162_p1 = scmp.lt.s32.totalorder %s3518_s15, 3 }
   0x4   : > { %p163_p2 = pnand %p2956_p0, %p162_p1 }
   0x6   : > { %166 = sbr.rel (%p163_p2) target bundleno = 473 (0x1d9), region = 36 }
   0xb   : > { %v3470_v0 = vld [vmem:[%s4708_s1 + $0x8] sm:$0xff]   ;;  %p188_p3 = scmp.lt.s32.totalorder %s2952_s16, 1  ;;  %v3471_v1 = vld [vmem:[%s4708_s1 + $0x18] sm:$0xff]   ;;  %v3472_v2 = vld [vmem:[%s4708_s1] sm:$0xff]   ;;  %vm251_vm0 = vsmask.f32 3328 }
   0xc   : > { %3353 = vmatprep.subr.bf16.mxu1 %v3470_v0  ;;  %3317 = vmatprep.subr.bf16.mxu0 %v3471_v1  ;;  %v3473_v3 = vld [vmem:[%s4708_s1 + $0x10] sm:$0xff]   ;;  %vm252_vm1 = vsmask.f32 7440  ;;  %v3571_v4 = vld [vmem:[%s4708_s1 + $0x28] sm:$0xff]   ;;  %vm702_vm2 = vcmask 261120   ;;  %v3477_v5 = vld [vmem:[%s4708_s1 + $0x38] sm:$0xff]  }
   0xd   : > { %s4732_s16 = smov (!%p188_p3, %s2952_s16), 1  ;;  %3354 = vmatpush3.bf16.msra.mxu1 %v3470_v0  ;;  %3318 = vmatpush3.bf16.msra.mxu0 %v3471_v1  ;;  %v3487_v33 = vld [vmem:[%s4708_s1 + $0x30] sm:$0xff]   ;;  %vm3595_vm3 = vmor %vm251_vm0, %vm252_vm1  ;;  %vm2320_vm4 = vcmask 130048  }
   0xe   : > { %3355 = vmatprep.subr.bf16.mxu1 %v3472_v2  ;;  %s3461_s25 = smul.u32 204, %s4732_s16  ;;  %3319 = vmatprep.subr.bf16.mxu0 %v3473_v3  ;;  %s3212_s17 = sshll.u32 %s4732_s16, 7 }
   0xf   : > { %s4572_s19 = scalar_lea.vmem %s4711_s4, %s3212_s17 }
  0x10   : > { %s3576_s30 = scalar_lea.vmem %s4707_s0, %s3461_s25 }
  0x11   : > { %3356 = vmatpush3.bf16.msra.mxu1 %v3472_v2  ;;  %v199_v6 = vld [vmem:[%s3576_s30] sm:$0xf]  ;;  %v200_v7 = vld [vmem:[%s3576_s30 + $0x4] sm:$0xf]  ;;  %v201_v8 = vld [vmem:[%s3576_s30 + $0xc] sm:$0xf]  ;;  %3320 = vmatpush3.bf16.msra.mxu0 %v3473_v3 }
  0x12   : > { %v255_v9 = vshrl.u32 %v199_v6, 16  ;;  %v258_v10 = vshll.u32 %v199_v6, 16  ;;  %v264_v11 = vshll.u32 %v200_v7, 16  ;;  %v268_v12 = vshrl.u32 %v200_v7, 16  ;;  %v202_v13 = vld [vmem:[%s3576_s30 + $0x10] sm:$0xf]  ;;  %3425 = vmatprep.subr.bf16.mxu1 %v3477_v5  ;;  %3389 = vmatprep.subr.bf16.mxu0 %v3571_v4 }
  0x13   : > { %v2994_v14 = vcombine.low %v199_v6, %v200_v7  ;;  %v279_v15 = vshrl.u32 %v201_v8, 16  ;;  %v282_v16 = vshll.u32 %v201_v8, 16  ;;  %v288_v17 = vshll.u32 %v202_v13, 16  ;;  %v235_v18 = vld [vmem:[%s3576_s30 + $0x8] sm:$0x1] }
  0x14   : > { %v257_v19 = vrot.slane %v255_v9, 4  ;;  %v260_v20 = vrot.slane %v258_v10, 5  ;;  %v266_v21 = vrot.slane %v264_v11, 5  ;;  %v270_v22 = vrot.slane %v268_v12, 4  ;;  %v236_v23 = vld [vmem:[%s3576_s30 + $0x14] sm:$0x1] }
  0x15   : > { %3357 = vmatprep.mubr.msk.bf16.mxu1 %vm702_vm2, %v2994_v14  ;;  %v281_v24 = vrot.slane %v279_v15, 4  ;;  %v284_v25 = vrot.slane %v282_v16, 5  ;;  %v290_v26 = vrot.slane %v288_v17, 5  ;;  %v292_v27 = vshrl.u32 %v202_v13, 16  ;;  %v203_v28 = vld [vmem:[%s3576_s30 + $0x18] sm:$0xf] }
  0x16   : > { %v2995_v29 = vcombine.low %v201_v8, %v202_v13  ;;  %v261_v30 = vor.u32 %v260_v20, %v257_v19  ;;  %v271_v31 = vor.u32 %v270_v22, %v266_v21  ;;  %v274_v32 = vshll.u32 %v235_v18, 16  ;;  %v204_v38 = vld [vmem:[%s3576_s30 + $0x1c] sm:$0xf]  ;;  %v205_v48 = vld [vmem:[%s3576_s30 + $0x24] sm:$0xf] }
  0x17   : > { %v294_v34 = vrot.slane %v292_v27, 4  ;;  %v285_v36 = vor.u32 %v284_v25, %v281_v24  ;;  %v298_v37 = vshll.u32 %v236_v23, 16  ;;  %v303_v39 = vshrl.u32 %v203_v28, 16  ;;  %v206_v53 = vld [vmem:[%s3576_s30 + $0x28] sm:$0xf]  ;;  %v3486_v10 = vld [vmem:[%s4708_s1 + $0x20] sm:$0xff]  }
  0x18   : > { %3358 = vmatmul.mubr.msk.bf16.vlgmr.msra.gmra.mxu1 %vm702_vm2, %v2995_v29  ;;  %v262_v40 = vrot.slane %v261_v30, 4  ;;  %v272_v41 = vrot.slane %v271_v31, 4  ;;  %v276_v42 = vrot.slane %v274_v32, 5  ;;  %v306_v43 = vshll.u32 %v203_v28, 16  ;;  %v237_v58 = vld [vmem:[%s3576_s30 + $0x20] sm:$0x1] }
  0x19   : > { %v286_v44 = vrot.slane %v285_v36, 4  ;;  %v295_v45 = vor.u32 %v294_v34, %v290_v26  ;;  %v300_v46 = vrot.slane %v298_v37, 5  ;;  %3426 = vmatpush3.bf16.msra.mxu1 %v3477_v5  ;;  %v305_v47 = vrot.slane %v303_v39, 4  ;;  %v238_v63 = vld [vmem:[%s3576_s30 + $0x2c] sm:$0x1] }
  0x1a   : > { %v267_v49 = vsel %vm3595_vm3, %v262_v40, %v266_v21  ;;  %v277_v50 = vsel %vm3595_vm3, %v272_v41, %v276_v42  ;;  %v308_v51 = vrot.slane %v306_v43, 5  ;;  %v312_v52 = vshll.u32 %v204_v38, 16  ;;  %3427 = vmatprep.subr.bf16.mxu1 %v3487_v33  ;;  %v207_v5 = vld [vmem:[%s3576_s30 + $0x30] sm:$0xf]  ;;  %v208_v18 = vld [vmem:[%s3576_s30 + $0x34] sm:$0xf] }
  0x1b   : > { %v2960_v54 = vcombine.low %v267_v49, %v277_v50  ;;  %v291_v55 = vsel %vm3595_vm3, %v286_v44, %v290_v26  ;;  %v296_v56 = vrot.slane %v295_v45, 4  ;;  %v316_v57 = vshrl.u32 %v204_v38, 16  ;;  %v240_v39 = vld [vmem:[%s3576_s30 + $0x44] sm:$0x1]  ;;  %v211_v44 = vld [vmem:[%s3576_s30 + $0x48] sm:$0xf] }
  0x1c   : > { %v314_v59 = vrot.slane %v312_v52, 5  ;;  %v2996_v60 = vcombine.low %v203_v28, %v204_v38  ;;  %v327_v61 = vshrl.u32 %v205_v48, 16  ;;  %v330_v62 = vshll.u32 %v205_v48, 16  ;;  %v209_v28 = vld [vmem:[%s3576_s30 + $0x3c] sm:$0xf] }
  0x1d   : > { %3321 = vmatprep.mubr.msk.bf16.mxu0 %vm702_vm2, %v2960_v54  ;;  %v301_v0 = vsel %vm3595_vm3, %v296_v56, %v300_v46  ;;  %v318_v1 = vrot.slane %v316_v57, 4  ;;  %v336_v2 = vshll.u32 %v206_v53, 16  ;;  %v340_v3 = vshrl.u32 %v206_v53, 16  ;;  %3428 = vmatpush3.bf16.msra.mxu1 %v3487_v33  ;;  %v239_v38 = vld [vmem:[%s3576_s30 + $0x38] sm:$0x1] }
  0x1e   : > { %v2961_v6 = vcombine.low %v291_v55, %v301_v0  ;;  %3361 = vmatprep.mubr.msk.bf16.mxu1 %vm702_vm2, %v2996_v60  ;;  %v329_v7 = vrot.slane %v327_v61, 4  ;;  %v332_v8 = vrot.slane %v330_v62, 5  ;;  %v2997_v9 = vcombine.low %v205_v48, %v206_v53  ;;  %v212_v60 = vld [vmem:[%s3576_s30 + $0x4c] sm:$0xf] }
  0x1f   : > { %v338_v11 = vrot.slane %v336_v2, 5  ;;  %v342_v12 = vrot.slane %v340_v3, 4  ;;  %v309_v13 = vor.u32 %v308_v51, %v305_v47  ;;  %v319_v14 = vor.u32 %v318_v1, %v314_v59 }
  0x20   : > { %3322 = vmatmul.mubr.msk.bf16.vlgmr.msra.gmra.mxu0 %vm702_vm2, %v2961_v6  ;;  %3362 = vmatmul.mubr.msk.bf16.gmra.mxu1 %vm702_vm2, %v2997_v9  ;;  %v322_v15 = vshll.u32 %v237_v58, 16  ;;  %v333_v16 = vor.u32 %v332_v8, %v329_v7  ;;  %v346_v17 = vshll.u32 %v238_v63, 16  ;;  %v351_v19 = vshrl.u32 %v207_v5, 16  ;;  %v213_v7 = vld [vmem:[%s3576_s30 + $0x54] sm:$0xf] }
  0x21   : > { %3390 = vmatpush3.bf16.msra.mxu0 %v3571_v4  ;;  %v310_v20 = vrot.slane %v309_v13, 4  ;;  %v320_v21 = vrot.slane %v319_v14, 4  ;;  %v343_v22 = vor.u32 %v342_v12, %v338_v11  ;;  %v354_v23 = vshll.u32 %v207_v5, 16  ;;  %v210_v4 = vld [vmem:[%s3576_s30 + $0x40] sm:$0xf] }
  0x22   : > { %v324_v24 = vrot.slane %v322_v15, 5  ;;  %v334_v25 = vrot.slane %v333_v16, 4  ;;  %v348_v26 = vrot.slane %v346_v17, 5  ;;  %v353_v27 = vrot.slane %v351_v19, 4  ;;  %3391 = vmatprep.subr.bf16.mxu0 %v3486_v10  ;;  %v214_v12 = vld [vmem:[%s3576_s30 + $0x58] sm:$0xf] }
  0x23   : > { %v315_v29 = vsel %vm3595_vm3, %v310_v20, %v314_v59  ;;  %v344_v30 = vrot.slane %v343_v22, 4  ;;  %v356_v31 = vrot.slane %v354_v23, 5  ;;  %v360_v32 = vshll.u32 %v208_v18, 16  ;;  %v241_v17 = vld [vmem:[%s3576_s30 + $0x50] sm:$0x1] }
  0x24   : > { %v325_v33 = vsel %vm3595_vm3, %v320_v21, %v324_v24  ;;  %v339_v34 = vsel %vm3595_vm3, %v334_v25, %v338_v11  ;;  %v364_v36 = vshrl.u32 %v208_v18, 16  ;;  %v2998_v37 = vcombine.low %v207_v5, %v208_v18  ;;  %v242_v22 = vld [vmem:[%s3576_s30 + $0x5c] sm:$0x1] }
  0x25   : > { %v2962_v40 = vcombine.low %v315_v29, %v325_v33  ;;  %v349_v41 = vsel %vm3595_vm3, %v344_v30, %v348_v26  ;;  %v362_v42 = vrot.slane %v360_v32, 5  ;;  %v375_v43 = vshrl.u32 %v209_v28, 16  ;;  %3392 = vmatpush3.bf16.msra.mxu0 %v3486_v10 }
  0x26   : > { %v2963_v45 = vcombine.low %v339_v34, %v349_v41  ;;  %v366_v46 = vrot.slane %v364_v36, 4  ;;  %3365 = vmatprep.mubr.msk.bf16.mxu1 %vm702_vm2, %v2998_v37  ;;  %v378_v47 = vshll.u32 %v209_v28, 16  ;;  %v384_v48 = vshll.u32 %v210_v4, 16 }
  0x27   : > { %3325 = vmatprep.mubr.msk.bf16.mxu0 %vm702_vm2, %v2962_v40  ;;  %v377_v49 = vrot.slane %v375_v43, 4  ;;  %v388_v50 = vshrl.u32 %v210_v4, 16  ;;  %v2999_v51 = vcombine.low %v209_v28, %v210_v4  ;;  %v357_v52 = vor.u32 %v356_v31, %v353_v27  ;;  %v215_v27 = vld [vmem:[%s3576_s30 + $0x60] sm:$0xf] }
  0x28   : > { %3326 = vmatmul.mubr.msk.bf16.gmra.mxu0 %vm702_vm2, %v2963_v45  ;;  %v380_v53 = vrot.slane %v378_v47, 5  ;;  %v386_v54 = vrot.slane %v384_v48, 5  ;;  %v367_v55 = vor.u32 %v366_v46, %v362_v42  ;;  %v370_v56 = vshll.u32 %v239_v38, 16 }
  0x29   : > { %v390_v57 = vrot.slane %v388_v50, 4  ;;  %3366 = vmatmul.mubr.msk.bf16.gmra.mxu1 %vm702_vm2, %v2999_v51  ;;  %v358_v58 = vrot.slane %v357_v52, 4  ;;  %v394_v59 = vshll.u32 %v240_v39, 16  ;;  %v399_v61 = vshrl.u32 %v211_v44, 16  ;;  %v216_v39 = vld [vmem:[%s3576_s30 + $0x64] sm:$0xf] }
  0x2a   : > { %v368_v62 = vrot.slane %v367_v55, 4  ;;  %v372_v63 = vrot.slane %v370_v56, 5  ;;  %v381_v0 = vor.u32 %v380_v53, %v377_v49  ;;  %v402_v1 = vshll.u32 %v211_v44, 16  ;;  %v217_v49 = vld [vmem:[%s3576_s30 + $0x6c] sm:$0xf] }
  0x2b   : > { %v363_v2 = vsel %vm3595_vm3, %v358_v58, %v362_v42  ;;  %v391_v3 = vor.u32 %v390_v57, %v386_v54  ;;  %v396_v5 = vrot.slane %v394_v59, 5  ;;  %v401_v6 = vrot.slane %v399_v61, 4 }
  0x2c   : > { %v373_v8 = vsel %vm3595_vm3, %v368_v62, %v372_v63  ;;  %v382_v9 = vrot.slane %v381_v0, 4  ;;  %v404_v10 = vrot.slane %v402_v1, 5  ;;  %v408_v11 = vshll.u32 %v212_v60, 16  ;;  %v243_v63 = vld [vmem:[%s3576_s30 + $0x68] sm:$0x1] }
  0x2d   : > { %v2964_v13 = vcombine.low %v363_v2, %v373_v8  ;;  %v392_v14 = vrot.slane %v391_v3, 4  ;;  %v412_v15 = vshrl.u32 %v212_v60, 16  ;;  %v3000_v16 = vcombine.low %v211_v44, %v212_v60  ;;  %v244_v0 = vld [vmem:[%s3576_s30 + $0x74] sm:$0x1] }
  0x2e   : > { %v387_v18 = vsel %vm3595_vm3, %v382_v9, %v386_v54  ;;  %v410_v19 = vrot.slane %v408_v11, 5  ;;  %v423_v20 = vshrl.u32 %v213_v7, 16  ;;  %v426_v21 = vshll.u32 %v213_v7, 16  ;;  %v218_v54 = vld [vmem:[%s3576_s30 + $0x70] sm:$0xf] }
  0x2f   : > { %3329 = vmatprep.mubr.msk.bf16.mxu0 %vm702_vm2, %v2964_v13  ;;  %v397_v23 = vsel %vm3595_vm3, %v392_v14, %v396_v5  ;;  %v414_v24 = vrot.slane %v412_v15, 4  ;;  %3369 = vmatprep.mubr.msk.bf16.mxu1 %vm702_vm2, %v3000_v16  ;;  %v432_v25 = vshll.u32 %v214_v12, 16  ;;  %v436_v26 = vshrl.u32 %v214_v12, 16  ;;  %v220_v11 = vld [vmem:[%s3576_s30 + $0x7c] sm:$0xf] }
  0x30   : > { %v2965_v28 = vcombine.low %v387_v18, %v397_v23  ;;  %v425_v29 = vrot.slane %v423_v20, 4  ;;  %v428_v30 = vrot.slane %v426_v21, 5  ;;  %v3001_v31 = vcombine.low %v213_v7, %v214_v12 }
  0x31   : > { %v434_v32 = vrot.slane %v432_v25, 5  ;;  %v438_v4 = vrot.slane %v436_v26, 4  ;;  %v405_v33 = vor.u32 %v404_v10, %v401_v6  ;;  %v415_v34 = vor.u32 %v414_v24, %v410_v19  ;;  %v219_v6 = vld [vmem:[%s3576_s30 + $0x78] sm:$0xf] }
  0x32   : > { %3330 = vmatmul.mubr.msk.bf16.gmra.mxu0 %vm702_vm2, %v2965_v28  ;;  %3370 = vmatmul.mubr.msk.bf16.gmra.mxu1 %vm702_vm2, %v3001_v31  ;;  %v418_v36 = vshll.u32 %v241_v17, 16  ;;  %v429_v37 = vor.u32 %v428_v30, %v425_v29  ;;  %v442_v38 = vshll.u32 %v242_v22, 16  ;;  %v447_v40 = vshrl.u32 %v215_v27, 16  ;;  %v221_v28 = vld [vmem:[%s3576_s30 + $0x84] sm:$0xf] }
  0x33   : > { %v406_v41 = vrot.slane %v405_v33, 4  ;;  %v416_v42 = vrot.slane %v415_v34, 4  ;;  %v439_v43 = vor.u32 %v438_v4, %v434_v32  ;;  %v450_v44 = vshll.u32 %v215_v27, 16  ;;  %v222_v4 = vld [vmem:[%s3576_s30 + $0x88] sm:$0xf] }
  0x34   : > { %v420_v45 = vrot.slane %v418_v36, 5  ;;  %v430_v46 = vrot.slane %v429_v37, 4  ;;  %v444_v47 = vrot.slane %v442_v38, 5  ;;  %v449_v48 = vrot.slane %v447_v40, 4  ;;  %v245_v38 = vld [vmem:[%s3576_s30 + $0x80] sm:$0x1] }
  0x35   : > { %v411_v50 = vsel %vm3595_vm3, %v406_v41, %v410_v19  ;;  %v440_v51 = vrot.slane %v439_v43, 4  ;;  %v452_v52 = vrot.slane %v450_v44, 5  ;;  %v456_v53 = vshll.u32 %v216_v39, 16  ;;  %v246_v43 = vld [vmem:[%s3576_s30 + $0x8c] sm:$0x1] }
  0x36   : > { %v421_v55 = vsel %vm3595_vm3, %v416_v42, %v420_v45  ;;  %v435_v56 = vsel %vm3595_vm3, %v430_v46, %v434_v32  ;;  %v460_v57 = vshrl.u32 %v216_v39, 16  ;;  %v3002_v58 = vcombine.low %v215_v27, %v216_v39 }
  0x37   : > { %v2966_v59 = vcombine.low %v411_v50, %v421_v55  ;;  %v445_v60 = vsel %vm3595_vm3, %v440_v51, %v444_v47  ;;  %v458_v61 = vrot.slane %v456_v53, 5  ;;  %v471_v62 = vshrl.u32 %v217_v49, 16 }
  0x38   : > { %v2967_v1 = vcombine.low %v435_v56, %v445_v60  ;;  %v462_v2 = vrot.slane %v460_v57, 4  ;;  %3373 = vmatprep.mubr.msk.bf16.mxu1 %vm702_vm2, %v3002_v58  ;;  %v474_v3 = vshll.u32 %v217_v49, 16  ;;  %v480_v5 = vshll.u32 %v218_v54, 16  ;;  %v224_v60 = vld [vmem:[%s3576_s30 + $0x94] sm:$0xf] }
  0x39   : > { %3333 = vmatprep.mubr.msk.bf16.mxu0 %vm702_vm2, %v2966_v59  ;;  %v473_v7 = vrot.slane %v471_v62, 4  ;;  %v484_v8 = vshrl.u32 %v218_v54, 16  ;;  %v3003_v9 = vcombine.low %v217_v49, %v218_v54  ;;  %v453_v10 = vor.u32 %v452_v52, %v449_v48  ;;  %v223_v48 = vld [vmem:[%s3576_s30 + $0x90] sm:$0xf] }
  0x3a   : > { %3334 = vmatmul.mubr.msk.bf16.gmra.mxu0 %vm702_vm2, %v2967_v1  ;;  %v476_v12 = vrot.slane %v474_v3, 5  ;;  %v482_v13 = vrot.slane %v480_v5, 5  ;;  %v463_v14 = vor.u32 %v462_v2, %v458_v61  ;;  %v466_v15 = vshll.u32 %v243_v63, 16  ;;  %v225_v2 = vld [vmem:[%s3576_s30 + $0x9c] sm:$0xf] }
  0x3b   : > { %v486_v16 = vrot.slane %v484_v8, 4  ;;  %3374 = vmatmul.mubr.msk.bf16.gmra.mxu1 %vm702_vm2, %v3003_v9  ;;  %v454_v17 = vrot.slane %v453_v10, 4  ;;  %v490_v18 = vshll.u32 %v244_v0, 16  ;;  %v495_v19 = vshrl.u32 %v219_v6, 16  ;;  %v226_v8 = vld [vmem:[%s3576_s30 + $0xa0] sm:$0xf] }
  0x3c   : > { %v464_v20 = vrot.slane %v463_v14, 4  ;;  %v468_v21 = vrot.slane %v466_v15, 5  ;;  %v477_v22 = vor.u32 %v476_v12, %v473_v7  ;;  %v498_v23 = vshll.u32 %v219_v6, 16 }
  0x3d   : > { %v459_v24 = vsel %vm3595_vm3, %v454_v17, %v458_v61  ;;  %v487_v25 = vor.u32 %v486_v16, %v482_v13  ;;  %v492_v26 = vrot.slane %v490_v18, 5  ;;  %v497_v27 = vrot.slane %v495_v19, 4  ;;  %v248_v18 = vld [vmem:[%s3576_s30 + $0xa4] sm:$0x1]  ;;  %v227_v19 = vld [vmem:[%s3576_s30 + $0xa8] sm:$0xf] }
  0x3e   : > { %v469_v29 = vsel %vm3595_vm3, %v464_v20, %v468_v21  ;;  %v478_v30 = vrot.slane %v477_v22, 4  ;;  %v500_v31 = vrot.slane %v498_v23, 5  ;;  %v504_v32 = vshll.u32 %v220_v11, 16 }
  0x3f   : > { %v2968_v33 = vcombine.low %v459_v24, %v469_v29  ;;  %v488_v34 = vrot.slane %v487_v25, 4  ;;  %v508_v36 = vshrl.u32 %v220_v11, 16  ;;  %v3004_v37 = vcombine.low %v219_v6, %v220_v11 }
  0x40   : > { %v483_v39 = vsel %vm3595_vm3, %v478_v30, %v482_v13  ;;  %v506_v40 = vrot.slane %v504_v32, 5  ;;  %v519_v41 = vshrl.u32 %v221_v28, 16  ;;  %v522_v42 = vshll.u32 %v221_v28, 16  ;;  %v247_v13 = vld [vmem:[%s3576_s30 + $0x98] sm:$0x1] }
  0x41   : > { %3337 = vmatprep.mubr.msk.bf16.mxu0 %vm702_vm2, %v2968_v33  ;;  %v493_v44 = vsel %vm3595_vm3, %v488_v34, %v492_v26  ;;  %v510_v45 = vrot.slane %v508_v36, 4  ;;  %3377 = vmatprep.mubr.msk.bf16.mxu1 %vm702_vm2, %v3004_v37  ;;  %v528_v46 = vshll.u32 %v222_v4, 16  ;;  %v532_v47 = vshrl.u32 %v222_v4, 16 }
  0x42   : > { %v2969_v49 = vcombine.low %v483_v39, %v493_v44  ;;  %v521_v50 = vrot.slane %v519_v41, 4  ;;  %v524_v51 = vrot.slane %v522_v42, 5  ;;  %v3005_v52 = vcombine.low %v221_v28, %v222_v4  ;;  %v228_v39 = vld [vmem:[%s3576_s30 + $0xac] sm:$0xf] }
  0x43   : > { %v530_v53 = vrot.slane %v528_v46, 5  ;;  %v534_v54 = vrot.slane %v532_v47, 4  ;;  %v501_v55 = vor.u32 %v500_v31, %v497_v27  ;;  %v511_v56 = vor.u32 %v510_v45, %v506_v40 }
  0x44   : > { %3338 = vmatmul.mubr.msk.bf16.gmra.mxu0 %vm702_vm2, %v2969_v49  ;;  %3378 = vmatmul.mubr.msk.bf16.gmra.mxu1 %vm702_vm2, %v3005_v52  ;;  %v514_v57 = vshll.u32 %v245_v38, 16  ;;  %v525_v58 = vor.u32 %v524_v51, %v521_v50  ;;  %v538_v59 = vshll.u32 %v246_v43, 16  ;;  %v543_v61 = vshrl.u32 %v223_v48, 16  ;;  %v229_v49 = vld [vmem:[%s3576_s30 + $0xb4] sm:$0xf] }
  0x45   : > { %v502_v62 = vrot.slane %v501_v55, 4  ;;  %v512_v63 = vrot.slane %v511_v56, 4  ;;  %v535_v0 = vor.u32 %v534_v54, %v530_v53  ;;  %v546_v1 = vshll.u32 %v223_v48, 16  ;;  %v230_v50 = vld [vmem:[%s3576_s30 + $0xb8] sm:$0xf] }
  0x46   : > { %v516_v3 = vrot.slane %v514_v57, 5  ;;  %v526_v5 = vrot.slane %v525_v58, 4  ;;  %v540_v6 = vrot.slane %v538_v59, 5  ;;  %v545_v7 = vrot.slane %v543_v61, 4  ;;  %v249_v59 = vld [vmem:[%s3576_s30 + $0xb0] sm:$0x1] }
  0x47   : > { %v507_v9 = vsel %vm3595_vm3, %v502_v62, %v506_v40  ;;  %v536_v10 = vrot.slane %v535_v0, 4  ;;  %v548_v11 = vrot.slane %v546_v1, 5  ;;  %v552_v12 = vshll.u32 %v224_v60, 16 }
  0x48   : > { %v517_v14 = vsel %vm3595_vm3, %v512_v63, %v516_v3  ;;  %v531_v15 = vsel %vm3595_vm3, %v526_v5, %v530_v53  ;;  %v556_v16 = vshrl.u32 %v224_v60, 16  ;;  %v3006_v17 = vcombine.low %v223_v48, %v224_v60  ;;  %v250_v60 = vld [vmem:[%s3576_s30 + $0xbc] sm:$0x1] }
  0x49   : > { %v2970_v20 = vcombine.low %v507_v9, %v517_v14  ;;  %v541_v21 = vsel %vm3595_vm3, %v536_v10, %v540_v6  ;;  %v554_v22 = vrot.slane %v552_v12, 5  ;;  %v567_v23 = vshrl.u32 %v225_v2, 16  ;;  %v3094_v6 = vld [vmem:[%s3576_s30 + $0xc] sm:$0xf] }
  0x4a   : > { %v2971_v24 = vcombine.low %v531_v15, %v541_v21  ;;  %v558_v25 = vrot.slane %v556_v16, 4  ;;  %3381 = vmatprep.mubr.msk.bf16.mxu1 %vm702_vm2, %v3006_v17  ;;  %v570_v26 = vshll.u32 %v225_v2, 16  ;;  %v576_v27 = vshll.u32 %v226_v8, 16  ;;  %v3095_v15 = vld [vmem:[%s3576_s30 + $0x10] sm:$0xf] }
  0x4b   : > { %3341 = vmatprep.mubr.msk.bf16.mxu0 %vm702_vm2, %v2970_v20  ;;  %v569_v28 = vrot.slane %v567_v23, 4  ;;  %v580_v29 = vshrl.u32 %v226_v8, 16  ;;  %v3007_v30 = vcombine.low %v225_v2, %v226_v8  ;;  %v549_v31 = vor.u32 %v548_v11, %v545_v7 }
  0x4c   : > { %3342 = vmatmul.mubr.msk.bf16.gmra.mxu0 %vm702_vm2, %v2971_v24  ;;  %v572_v32 = vrot.slane %v570_v26, 5  ;;  %v578_v4 = vrot.slane %v576_v27, 5  ;;  %v559_v33 = vor.u32 %v558_v25, %v554_v22  ;;  %v562_v34 = vshll.u32 %v247_v13, 16  ;;  %v3097_v25 = vld [vmem:[%s3576_s30 + $0x18] sm:$0xf] }
  0x4d   : > { %v582_v36 = vrot.slane %v580_v29, 4  ;;  %3382 = vmatmul.mubr.msk.bf16.gmra.mxu1 %vm702_vm2, %v3007_v30  ;;  %v550_v37 = vrot.slane %v549_v31, 4  ;;  %v586_v38 = vshll.u32 %v248_v18, 16  ;;  %v591_v40 = vshrl.u32 %v227_v19, 16 }
  0x4e   : > { %v560_v41 = vrot.slane %v559_v33, 4  ;;  %v564_v42 = vrot.slane %v562_v34, 5  ;;  %v573_v43 = vor.u32 %v572_v32, %v569_v28  ;;  %v594_v44 = vshll.u32 %v227_v19, 16 }
  0x4f   : > { %v555_v45 = vsel %vm3595_vm3, %v550_v37, %v554_v22  ;;  %v583_v46 = vor.u32 %v582_v36, %v578_v4  ;;  %v588_v47 = vrot.slane %v586_v38, 5  ;;  %v593_v48 = vrot.slane %v591_v40, 4  ;;  %v3098_v38 = vld [vmem:[%s3576_s30 + $0x1c] sm:$0xf] }
  0x50   : > { %v565_v51 = vsel %vm3595_vm3, %v560_v41, %v564_v42  ;;  %v574_v52 = vrot.slane %v573_v43, 4  ;;  %v596_v53 = vrot.slane %v594_v44, 5  ;;  %v600_v54 = vshll.u32 %v228_v39, 16  ;;  %v3099_v43 = vld [vmem:[%s3576_s30 + $0x20] sm:$0x1]  ;;  %v3494_v44 = vld [vmem:[%s3576_s30 + $0xc] sm:$0xff]  }
  0x51   : > { %v2972_v55 = vcombine.low %v555_v45, %v565_v51  ;;  %v584_v56 = vrot.slane %v583_v46, 4  ;;  %v604_v57 = vshrl.u32 %v228_v39, 16  ;;  %v3008_v58 = vcombine.low %v227_v19, %v228_v39  ;;  %v3096_v19 = vld [vmem:[%s3576_s30 + $0x14] sm:$0x1]  ;;  %v3100_v45 = vld [vmem:[%s3576_s30 + $0x24] sm:$0xf] }
  0x52   : > { %v579_v61 = vsel %vm3595_vm3, %v574_v52, %v578_v4  ;;  %v602_v62 = vrot.slane %v600_v54, 5  ;;  %v615_v63 = vshrl.u32 %v229_v49, 16  ;;  %v618_v0 = vshll.u32 %v229_v49, 16 }
  0x53   : > { %3345 = vmatprep.mubr.msk.bf16.mxu0 %vm702_vm2, %v2972_v55  ;;  %v589_v1 = vsel %vm3595_vm3, %v584_v56, %v588_v47  ;;  %v606_v2 = vrot.slane %v604_v57, 4  ;;  %3385 = vmatprep.mubr.msk.bf16.mxu1 %vm702_vm2, %v3008_v58  ;;  %v624_v3 = vshll.u32 %v230_v50, 16  ;;  %v628_v5 = vshrl.u32 %v230_v50, 16  ;;  %v3102_v55 = vld [vmem:[%s3576_s30 + $0x2c] sm:$0x1] }
  0x54   : > { %v2973_v7 = vcombine.low %v579_v61, %v589_v1  ;;  %v617_v8 = vrot.slane %v615_v63, 4  ;;  %v620_v9 = vrot.slane %v618_v0, 5  ;;  %v3009_v10 = vcombine.low %v229_v49, %v230_v50  ;;  %v3101_v50 = vld [vmem:[%s3576_s30 + $0x28] sm:$0xf] }
  0x55   : > { %v626_v11 = vrot.slane %v624_v3, 5  ;;  %v630_v12 = vrot.slane %v628_v5, 4  ;;  %v597_v13 = vor.u32 %v596_v53, %v593_v48  ;;  %v607_v14 = vor.u32 %v606_v2, %v602_v62 }
  0x56   : > { %3346 = vmatmul.mubr.msk.bf16.gmra.mxu0 %vm702_vm2, %v2973_v7  ;;  %3386 = vmatmul.mubr.msk.bf16.gmra.mxu1 %vm702_vm2, %v3009_v10  ;;  %v610_v16 = vshll.u32 %v249_v59, 16  ;;  %v621_v17 = vor.u32 %v620_v9, %v617_v8  ;;  %v634_v18 = vshll.u32 %v250_v60, 16  ;;  %v1632_v20 = vshrl.u32 %v3094_v6, 16  ;;  %v3103_v60 = vld [vmem:[%s3576_s30 + $0x30] sm:$0xf] }
  0x57   : > { %v598_v21 = vrot.slane %v597_v13, 4  ;;  %v608_v22 = vrot.slane %v607_v14, 4  ;;  %v631_v23 = vor.u32 %v630_v12, %v626_v11  ;;  %v1635_v24 = vshll.u32 %v3094_v6, 16  ;;  %v3104_v14 = vld [vmem:[%s3576_s30 + $0x34] sm:$0xf] }
  0x58   : > { %v612_v26 = vrot.slane %v610_v16, 5  ;;  %v622_v27 = vrot.slane %v621_v17, 4  ;;  %v636_v28 = vrot.slane %v634_v18, 5  ;;  %v1634_v29 = vrot.slane %v1632_v20, 4  ;;  %v3105_v20 = vld [vmem:[%s3576_s30 + $0x38] sm:$0x1] }
  0x59   : > { %v603_v30 = vsel %vm3595_vm3, %v598_v21, %v602_v62  ;;  %v632_v31 = vrot.slane %v631_v23, 4  ;;  %v1637_v32 = vrot.slane %v1635_v24, 5  ;;  %v1641_v4 = vshll.u32 %v3095_v15, 16  ;;  %v3496_v21 = vld [vmem:[%s3576_s30 + $0x24] sm:$0xff]  }
  0x5a   : > { %v613_v33 = vsel %vm3595_vm3, %v608_v22, %v612_v26  ;;  %v627_v34 = vsel %vm3595_vm3, %v622_v27, %v626_v11  ;;  %v1645_v36 = vshrl.u32 %v3095_v15, 16  ;;  %v1651_v37 = vshll.u32 %v3096_v19, 16  ;;  %v3495_v11 = vld [vmem:[%s3576_s30 + $0x18] sm:$0xff]  }
  0x5b   : > { %v2974_v39 = vcombine.low %v603_v30, %v613_v33  ;;  %v637_v40 = vsel %vm3595_vm3, %v632_v31, %v636_v28  ;;  %v1638_v41 = vor.u32 %v1637_v32, %v1634_v29  ;;  %v1643_v42 = vrot.slane %v1641_v4, 5  ;;  %v3106_v26 = vld [vmem:[%s3576_s30 + $0x3c] sm:$0xf]  ;;  %v3107_v31 = vld [vmem:[%s3576_s30 + $0x40] sm:$0xf] }
  0x5c   : > { %v2975_v46 = vcombine.low %v627_v34, %v637_v40  ;;  %v1647_v47 = vrot.slane %v1645_v36, 4  ;;  %v1653_v48 = vrot.slane %v1651_v37, 5  ;;  %v1656_v49 = vshrl.u32 %v3097_v25, 16  ;;  %v3108_v36 = vld [vmem:[%s3576_s30 + $0x44] sm:$0x1] }
  0x5d   : > { %3349 = vmatprep.mubr.msk.bf16.mxu0 %vm702_vm2, %v2974_v39  ;;  %v1639_v51 = vrot.slane %v1638_v41, 4  ;;  %v1659_v52 = vshll.u32 %v3097_v25, 16  ;;  %v1665_v53 = vshll.u32 %v3098_v38, 16  ;;  %v1669_v54 = vshrl.u32 %v3098_v38, 16  ;;  %v3109_v41 = vld [vmem:[%s3576_s30 + $0x48] sm:$0xf] }
  0x5e   : > { %3350 = vmatmul.mubr.msk.bf16.gmra.mxu0 %vm702_vm2, %v2975_v46  ;;  %v1648_v56 = vor.u32 %v1647_v47, %v1643_v42  ;;  %v1658_v57 = vrot.slane %v1656_v49, 4  ;;  %v1675_v58 = vshll.u32 %v3099_v43, 16  ;;  %v1680_v59 = vshrl.u32 %v3100_v45, 16 }
  0x5f   : > { %v1644_v61 = vsel %vm3595_vm3, %v1639_v51, %v1643_v42  ;;  %v1661_v62 = vrot.slane %v1659_v52, 5  ;;  %v1667_v63 = vrot.slane %v1665_v53, 5  ;;  %v1671_v0 = vrot.slane %v1669_v54, 4  ;;  %3393 = vmatprep.mubr.msk.bf16.mxu0 %vm702_vm2, %v3494_v44  ;;  %v3497_v52 = vld [vmem:[%s3576_s30 + $0x30] sm:$0xff]  }
  0x60   : > { %v1649_v1 = vrot.slane %v1648_v56, 4  ;;  %v1677_v2 = vrot.slane %v1675_v58, 5  ;;  %v1682_v3 = vrot.slane %v1680_v59, 4  ;;  %v1683_v5 = vshll.u32 %v3100_v45, 16 }
  0x61   : > { %v1662_v6 = vor.u32 %v1661_v62, %v1658_v57  ;;  %v1672_v7 = vor.u32 %v1671_v0, %v1667_v63  ;;  %v1689_v8 = vshll.u32 %v3101_v50, 16  ;;  %v1693_v9 = vshrl.u32 %v3101_v50, 16  ;;  %v3111_v0 = vld [vmem:[%s3576_s30 + $0x50] sm:$0x1] }
  0x62   : > { %v1654_v10 = vsel %vm3595_vm3, %v1649_v1, %v1653_v48  ;;  %v1685_v12 = vrot.slane %v1683_v5, 5  ;;  %v1699_v13 = vshll.u32 %v3102_v55, 16  ;;  %v1704_v15 = vshrl.u32 %v3103_v60, 16  ;;  %v3110_v55 = vld [vmem:[%s3576_s30 + $0x4c] sm:$0xf] }
  0x63   : > { %v3142_v16 = vcombine.low %v1644_v61, %v1654_v10  ;;  %v1663_v17 = vrot.slane %v1662_v6, 4  ;;  %v1673_v18 = vrot.slane %v1672_v7, 4  ;;  %v1691_v19 = vrot.slane %v1689_v8, 5  ;;  %v3112_v7 = vld [vmem:[%s3576_s30 + $0x54] sm:$0xf] }
  0x64   : > { %v1686_v22 = vor.u32 %v1685_v12, %v1682_v3  ;;  %v1695_v23 = vrot.slane %v1693_v9, 4  ;;  %v1701_v24 = vrot.slane %v1699_v13, 5  ;;  %v1706_v25 = vrot.slane %v1704_v15, 4  ;;  %v3113_v12 = vld [vmem:[%s3576_s30 + $0x58] sm:$0xf] }
  0x65   : > { %3429 = vmatprep.mubr.msk.bf16.mxu1 %vm702_vm2, %v3142_v16  ;;  %v1668_v27 = vsel %vm3595_vm3, %v1663_v17, %v1667_v63  ;;  %v1678_v28 = vsel %vm3595_vm3, %v1673_v18, %v1677_v2  ;;  %v1707_v29 = vshll.u32 %v3103_v60, 16  ;;  %v1713_v30 = vshll.u32 %v3104_v14, 16  ;;  %v3498_v60 = vld [vmem:[%s3576_s30 + $0x3c] sm:$0xff]  }
  0x66   : > { %v3143_v32 = vcombine.low %v1668_v27, %v1678_v28  ;;  %3394 = vmatmul.mubr.msk.bf16.vlgmr.msra.gmra.mxu0 %vm702_vm2, %v3495_v11  ;;  %v1687_v4 = vrot.slane %v1686_v22, 4  ;;  %v1696_v33 = vor.u32 %v1695_v23, %v1691_v19  ;;  %v1717_v34 = vshrl.u32 %v3104_v14, 16  ;;  %v3114_v17 = vld [vmem:[%s3576_s30 + $0x5c] sm:$0x1]  ;;  %v3115_v18 = vld [vmem:[%s3576_s30 + $0x60] sm:$0xf] }
  0x67   : > { %v1709_v37 = vrot.slane %v1707_v29, 5  ;;  %v1715_v38 = vrot.slane %v1713_v30, 5  ;;  %v1723_v39 = vshll.u32 %v3105_v20, 16  ;;  %3397 = vmatprep.mubr.msk.bf16.mxu0 %vm702_vm2, %v3496_v21  ;;  %v1728_v40 = vshrl.u32 %v3106_v26, 16  ;;  %v3499_v29 = vld [vmem:[%s3576_s30 + $0x48] sm:$0xff]  }
  0x68   : > { %3430 = vmatmul.mubr.msk.bf16.vlgmr.msra.gmra.mxu1 %vm702_vm2, %v3143_v32  ;;  %v1692_v42 = vsel %vm3595_vm3, %v1687_v4, %v1691_v19  ;;  %v1697_v43 = vrot.slane %v1696_v33, 4  ;;  %v1719_v44 = vrot.slane %v1717_v34, 4  ;;  %v1731_v45 = vshll.u32 %v3106_v26, 16 }
  0x69   : > { %v1710_v46 = vor.u32 %v1709_v37, %v1706_v25  ;;  %v1725_v47 = vrot.slane %v1723_v39, 5  ;;  %v1730_v48 = vrot.slane %v1728_v40, 4  ;;  %v1737_v49 = vshll.u32 %v3107_v31, 16  ;;  %v3500_v37 = vld [vmem:[%s3576_s30 + $0x54] sm:$0xff]  }
  0x6a   : > { %v1702_v50 = vsel %vm3595_vm3, %v1697_v43, %v1701_v24  ;;  %v1720_v51 = vor.u32 %v1719_v44, %v1715_v38  ;;  %v1733_v53 = vrot.slane %v1731_v45, 5  ;;  %v1741_v54 = vshrl.u32 %v3107_v31, 16  ;;  %v3117_v45 = vld [vmem:[%s3576_s30 + $0x68] sm:$0x1] }
  0x6b   : > { %v3144_v56 = vcombine.low %v1692_v42, %v1702_v50  ;;  %v1711_v57 = vrot.slane %v1710_v46, 4  ;;  %v1739_v58 = vrot.slane %v1737_v49, 5  ;;  %v1747_v59 = vshll.u32 %v3108_v36, 16  ;;  %v3116_v36 = vld [vmem:[%s3576_s30 + $0x64] sm:$0xf] }
  0x6c   : > { %v1721_v61 = vrot.slane %v1720_v51, 4  ;;  %v1734_v62 = vor.u32 %v1733_v53, %v1730_v48  ;;  %v1743_v63 = vrot.slane %v1741_v54, 4  ;;  %v1752_v1 = vshrl.u32 %v3109_v41, 16  ;;  %v3118_v51 = vld [vmem:[%s3576_s30 + $0x6c] sm:$0xf] }
  0x6d   : > { %3433 = vmatprep.mubr.msk.bf16.mxu1 %vm702_vm2, %v3144_v56  ;;  %v1716_v2 = vsel %vm3595_vm3, %v1711_v57, %v1715_v38  ;;  %v1749_v3 = vrot.slane %v1747_v59, 5  ;;  %v1755_v5 = vshll.u32 %v3109_v41, 16  ;;  %v1761_v6 = vshll.u32 %v3110_v55, 16  ;;  %v3119_v56 = vld [vmem:[%s3576_s30 + $0x70] sm:$0xf] }
  0x6e   : > { %v1726_v8 = vsel %vm3595_vm3, %v1721_v61, %v1725_v47  ;;  %3398 = vmatmul.mubr.msk.bf16.gmra.mxu0 %vm702_vm2, %v3497_v52  ;;  %v1735_v9 = vrot.slane %v1734_v62, 4  ;;  %v1744_v10 = vor.u32 %v1743_v63, %v1739_v58  ;;  %v1754_v11 = vrot.slane %v1752_v1, 4 }
  0x6f   : > { %v3145_v13 = vcombine.low %v1716_v2, %v1726_v8  ;;  %v1757_v14 = vrot.slane %v1755_v5, 5  ;;  %v1763_v15 = vrot.slane %v1761_v6, 5  ;;  %v1765_v16 = vshrl.u32 %v3110_v55, 16  ;;  %3401 = vmatprep.mubr.msk.bf16.mxu0 %vm702_vm2, %v3498_v60  ;;  %v3501_v5 = vld [vmem:[%s3576_s30 + $0x60] sm:$0xff]   ;;  %v3121_v8 = vld [vmem:[%s3576_s30 + $0x78] sm:$0xf] }
  0x70   : > { %v1740_v19 = vsel %vm3595_vm3, %v1735_v9, %v1739_v58  ;;  %v1745_v20 = vrot.slane %v1744_v10, 4  ;;  %v1771_v21 = vshll.u32 %v3111_v0, 16  ;;  %v1776_v22 = vshrl.u32 %v3112_v7, 16  ;;  %v3120_v0 = vld [vmem:[%s3576_s30 + $0x74] sm:$0x1] }
  0x71   : > { %3434 = vmatmul.mubr.msk.bf16.gmra.mxu1 %vm702_vm2, %v3145_v13  ;;  %v1758_v23 = vor.u32 %v1757_v14, %v1754_v11  ;;  %v1767_v24 = vrot.slane %v1765_v16, 4  ;;  %v1779_v25 = vshll.u32 %v3112_v7, 16  ;;  %v1785_v26 = vshll.u32 %v3113_v12, 16  ;;  %v3122_v13 = vld [vmem:[%s3576_s30 + $0x7c] sm:$0xf]  ;;  %v3502_v14 = vld [vmem:[%s3576_s30 + $0x6c] sm:$0xff]  }
  0x72   : > { %v1750_v27 = vsel %vm3595_vm3, %v1745_v20, %v1749_v3  ;;  %v1773_v28 = vrot.slane %v1771_v21, 5  ;;  %v1778_v30 = vrot.slane %v1776_v22, 4  ;;  %v1789_v31 = vshrl.u32 %v3113_v12, 16  ;;  %v3123_v21 = vld [vmem:[%s3576_s30 + $0x80] sm:$0x1] }
  0x73   : > { %v3146_v32 = vcombine.low %v1740_v19, %v1750_v27  ;;  %v1759_v4 = vrot.slane %v1758_v23, 4  ;;  %v1768_v33 = vor.u32 %v1767_v24, %v1763_v15  ;;  %v1781_v34 = vrot.slane %v1779_v25, 5 }
  0x74   : > { %v1787_v38 = vrot.slane %v1785_v26, 5  ;;  %v1791_v39 = vrot.slane %v1789_v31, 4  ;;  %v1795_v40 = vshll.u32 %v3114_v17, 16  ;;  %v1800_v41 = vshrl.u32 %v3115_v18, 16 }
  0x75   : > { %3437 = vmatprep.mubr.msk.bf16.mxu1 %vm702_vm2, %v3146_v32  ;;  %v1764_v42 = vsel %vm3595_vm3, %v1759_v4, %v1763_v15  ;;  %v1769_v43 = vrot.slane %v1768_v33, 4  ;;  %v1782_v44 = vor.u32 %v1781_v34, %v1778_v30  ;;  %v1803_v46 = vshll.u32 %v3115_v18, 16  ;;  %v3125_v4 = vld [vmem:[%s3576_s30 + $0x88] sm:$0xf] }
  0x76   : > { %3402 = vmatmul.mubr.msk.bf16.gmra.mxu0 %vm702_vm2, %v3499_v29  ;;  %v1792_v47 = vor.u32 %v1791_v39, %v1787_v38  ;;  %v1797_v48 = vrot.slane %v1795_v40, 5  ;;  %v1802_v49 = vrot.slane %v1800_v41, 4  ;;  %v1809_v50 = vshll.u32 %v3116_v36, 16 }
  0x77   : > { %v1774_v52 = vsel %vm3595_vm3, %v1769_v43, %v1773_v28  ;;  %v1783_v53 = vrot.slane %v1782_v44, 4  ;;  %v1805_v54 = vrot.slane %v1803_v46, 5  ;;  %v1813_v55 = vshrl.u32 %v3116_v36, 16  ;;  %3405 = vmatprep.mubr.msk.bf16.mxu0 %vm702_vm2, %v3500_v37  ;;  %v3124_v28 = vld [vmem:[%s3576_s30 + $0x84] sm:$0xf]  ;;  %v3503_v44 = vld [vmem:[%s3576_s30 + $0x78] sm:$0xff]  }
  0x78   : > { %v3147_v57 = vcombine.low %v1764_v42, %v1774_v52  ;;  %v1793_v58 = vrot.slane %v1792_v47, 4  ;;  %v1811_v59 = vrot.slane %v1809_v50, 5  ;;  %v1819_v60 = vshll.u32 %v3117_v45, 16  ;;  %v3126_v45 = vld [vmem:[%s3576_s30 + $0x8c] sm:$0x1] }
  0x79   : > { %v1788_v61 = vsel %vm3595_vm3, %v1783_v53, %v1787_v38  ;;  %v1806_v62 = vor.u32 %v1805_v54, %v1802_v49  ;;  %v1815_v63 = vrot.slane %v1813_v55, 4  ;;  %v1824_v1 = vshrl.u32 %v3118_v51, 16  ;;  %v3127_v52 = vld [vmem:[%s3576_s30 + $0x90] sm:$0xf]  ;;  %v3504_v53 = vld [vmem:[%s3576_s30 + $0x84] sm:$0xff]  }
  0x7a   : > { %3438 = vmatmul.mubr.msk.bf16.gmra.mxu1 %vm702_vm2, %v3147_v57  ;;  %v1798_v2 = vsel %vm3595_vm3, %v1793_v58, %v1797_v48  ;;  %v1821_v3 = vrot.slane %v1819_v60, 5  ;;  %v1827_v6 = vshll.u32 %v3118_v51, 16  ;;  %v1833_v7 = vshll.u32 %v3119_v56, 16  ;;  %v3128_v58 = vld [vmem:[%s3576_s30 + $0x94] sm:$0xf] }
  0x7b   : > { %v3148_v9 = vcombine.low %v1788_v61, %v1798_v2  ;;  %v1807_v10 = vrot.slane %v1806_v62, 4  ;;  %v1816_v11 = vor.u32 %v1815_v63, %v1811_v59  ;;  %v1826_v12 = vrot.slane %v1824_v1, 4  ;;  %v3129_v1 = vld [vmem:[%s3576_s30 + $0x98] sm:$0x1] }
  0x7c   : > { %v1829_v15 = vrot.slane %v1827_v6, 5  ;;  %v1835_v16 = vrot.slane %v1833_v7, 5  ;;  %v1837_v17 = vshrl.u32 %v3119_v56, 16  ;;  %v1843_v18 = vshll.u32 %v3120_v0, 16 }
  0x7d   : > { %3441 = vmatprep.mubr.msk.bf16.mxu1 %vm702_vm2, %v3148_v9  ;;  %v1812_v19 = vsel %vm3595_vm3, %v1807_v10, %v1811_v59  ;;  %v1817_v20 = vrot.slane %v1816_v11, 4  ;;  %v1848_v22 = vshrl.u32 %v3121_v8, 16  ;;  %v1851_v23 = vshll.u32 %v3121_v8, 16  ;;  %v3130_v9 = vld [vmem:[%s3576_s30 + $0x9c] sm:$0xf] }
  0x7e   : > { %3406 = vmatmul.mubr.msk.bf16.gmra.mxu0 %vm702_vm2, %v3501_v5  ;;  %v1830_v24 = vor.u32 %v1829_v15, %v1826_v12  ;;  %v1839_v25 = vrot.slane %v1837_v17, 4  ;;  %v1845_v26 = vrot.slane %v1843_v18, 5  ;;  %v1857_v27 = vshll.u32 %v3122_v13, 16 }
  0x7f   : > { %v1822_v29 = vsel %vm3595_vm3, %v1817_v20, %v1821_v3  ;;  %v1850_v30 = vrot.slane %v1848_v22, 4  ;;  %v1853_v31 = vrot.slane %v1851_v23, 5  ;;  %v1861_v32 = vshrl.u32 %v3122_v13, 16  ;;  %3409 = vmatprep.mubr.msk.bf16.mxu0 %vm702_vm2, %v3502_v14  ;;  %v3131_v14 = vld [vmem:[%s3576_s30 + $0xa0] sm:$0xf] }
  0x80   : > { %v3149_v33 = vcombine.low %v1812_v19, %v1822_v29  ;;  %v1831_v34 = vrot.slane %v1830_v24, 4  ;;  %v1840_v36 = vor.u32 %v1839_v25, %v1835_v16  ;;  %v1859_v37 = vrot.slane %v1857_v27, 5  ;;  %v3506_v24 = vld [vmem:[%s3576_s30 + $0x9c] sm:$0xff]  }
  0x81   : > { %v1854_v38 = vor.u32 %v1853_v31, %v1850_v30  ;;  %v1863_v39 = vrot.slane %v1861_v32, 4  ;;  %v1867_v40 = vshll.u32 %v3123_v21, 16  ;;  %v1872_v41 = vshrl.u32 %v3124_v28, 16  ;;  %v3505_v21 = vld [vmem:[%s3576_s30 + $0x90] sm:$0xff]   ;;  %v3133_v30 = vld [vmem:[%s3576_s30 + $0xa8] sm:$0xf] }
  0x82   : > { %3442 = vmatmul.mubr.msk.bf16.gmra.mxu1 %vm702_vm2, %v3149_v33  ;;  %v1836_v42 = vsel %vm3595_vm3, %v1831_v34, %v1835_v16  ;;  %v1841_v43 = vrot.slane %v1840_v36, 4  ;;  %v1875_v46 = vshll.u32 %v3124_v28, 16  ;;  %v1881_v47 = vshll.u32 %v3125_v4, 16  ;;  %v3132_v28 = vld [vmem:[%s3576_s30 + $0xa4] sm:$0x1] }
  0x83   : > { %v1855_v48 = vrot.slane %v1854_v38, 4  ;;  %v1864_v49 = vor.u32 %v1863_v39, %v1859_v37  ;;  %v1869_v50 = vrot.slane %v1867_v40, 5  ;;  %v1874_v51 = vrot.slane %v1872_v41, 4  ;;  %v3134_v34 = vld [vmem:[%s3576_s30 + $0xac] sm:$0xf] }
  0x84   : > { %v1846_v54 = vsel %vm3595_vm3, %v1841_v43, %v1845_v26  ;;  %v1877_v55 = vrot.slane %v1875_v46, 5  ;;  %v1883_v56 = vrot.slane %v1881_v47, 5  ;;  %v1885_v57 = vshrl.u32 %v3125_v4, 16  ;;  %v3135_v46 = vld [vmem:[%s3576_s30 + $0xb0] sm:$0x1] }
  0x85   : > { %v3150_v59 = vcombine.low %v1836_v42, %v1846_v54  ;;  %v1860_v60 = vsel %vm3595_vm3, %v1855_v48, %v1859_v37  ;;  %v1865_v61 = vrot.slane %v1864_v49, 4  ;;  %v1891_v62 = vshll.u32 %v3126_v45, 16  ;;  %v3136_v49 = vld [vmem:[%s3576_s30 + $0xb4] sm:$0xf]  ;;  %v3137_v54 = vld [vmem:[%s3576_s30 + $0xb8] sm:$0xf] }
  0x86   : > { %3410 = vmatmul.mubr.msk.bf16.gmra.mxu0 %vm702_vm2, %v3503_v44  ;;  %v1878_v63 = vor.u32 %v1877_v55, %v1874_v51  ;;  %v1887_v0 = vrot.slane %v1885_v57, 4  ;;  %v1896_v2 = vshrl.u32 %v3127_v52, 16  ;;  %v1899_v3 = vshll.u32 %v3127_v52, 16 }
  0x87   : > { %3445 = vmatprep.mubr.msk.bf16.mxu1 %vm702_vm2, %v3150_v59  ;;  %v1870_v5 = vsel %vm3595_vm3, %v1865_v61, %v1869_v50  ;;  %v1893_v6 = vrot.slane %v1891_v62, 5  ;;  %v1905_v7 = vshll.u32 %v3128_v58, 16  ;;  %v1909_v8 = vshrl.u32 %v3128_v58, 16  ;;  %3413 = vmatprep.mubr.msk.bf16.mxu0 %vm702_vm2, %v3504_v53  ;;  %v3507_v62 = vld [vmem:[%s3576_s30 + $0xa8] sm:$0xff]  }
  0x88   : > { %v3151_v10 = vcombine.low %v1860_v60, %v1870_v5  ;;  %v1879_v11 = vrot.slane %v1878_v63, 4  ;;  %v1888_v12 = vor.u32 %v1887_v0, %v1883_v56  ;;  %v1898_v13 = vrot.slane %v1896_v2, 4  ;;  %v3138_v63 = vld [vmem:[%s3576_s30 + $0xbc] sm:$0x1] }
  0x89   : > { %v1901_v15 = vrot.slane %v1899_v3, 5  ;;  %v1907_v16 = vrot.slane %v1905_v7, 5  ;;  %v1911_v17 = vrot.slane %v1909_v8, 4  ;;  %v1915_v18 = vshll.u32 %v3129_v1, 16  ;;  %v3508_v7 = vld [vmem:[%s3576_s30 + $0xb4] sm:$0xff]  }
  0x8a   : > { %3446 = vmatmul.mubr.msk.bf16.gmra.mxu1 %vm702_vm2, %v3151_v10  ;;  %v1884_v19 = vsel %vm3595_vm3, %v1879_v11, %v1883_v56  ;;  %v1889_v20 = vrot.slane %v1888_v12, 4  ;;  %v1920_v22 = vshrl.u32 %v3130_v9, 16  ;;  %v1923_v23 = vshll.u32 %v3130_v9, 16 }
  0x8b   : > { %v1902_v25 = vor.u32 %v1901_v15, %v1898_v13  ;;  %v1912_v26 = vor.u32 %v1911_v17, %v1907_v16  ;;  %v1917_v27 = vrot.slane %v1915_v18, 5  ;;  %v1929_v29 = vshll.u32 %v3131_v14, 16 }
  0x8c   : > { %v1894_v31 = vsel %vm3595_vm3, %v1889_v20, %v1893_v6  ;;  %v1922_v32 = vrot.slane %v1920_v22, 4  ;;  %v1925_v4 = vrot.slane %v1923_v23, 5  ;;  %v1933_v33 = vshrl.u32 %v3131_v14, 16  ;;  %v3139_v6 = vld [vmem:[%s3576_s30 + $0xc0] sm:$0xf] }
  0x8d   : > { %v3152_v36 = vcombine.low %v1884_v19, %v1894_v31  ;;  %v1903_v37 = vrot.slane %v1902_v25, 4  ;;  %v1913_v38 = vrot.slane %v1912_v26, 4  ;;  %v1931_v39 = vrot.slane %v1929_v29, 5 }
  0x8e   : > { %3414 = vmatmul.mubr.msk.bf16.gmra.mxu0 %vm702_vm2, %v3505_v21  ;;  %v1926_v40 = vor.u32 %v1925_v4, %v1922_v32  ;;  %v1935_v41 = vrot.slane %v1933_v33, 4  ;;  %v1939_v42 = vshll.u32 %v3132_v28, 16  ;;  %v1944_v43 = vshrl.u32 %v3133_v30, 16 }
  0x8f   : > { %3449 = vmatprep.mubr.msk.bf16.mxu1 %vm702_vm2, %v3152_v36  ;;  %v1908_v44 = vsel %vm3595_vm3, %v1903_v37, %v1907_v16  ;;  %v1918_v45 = vsel %vm3595_vm3, %v1913_v38, %v1917_v27  ;;  %v1947_v47 = vshll.u32 %v3133_v30, 16  ;;  %v1953_v48 = vshll.u32 %v3134_v34, 16  ;;  %3417 = vmatprep.mubr.msk.bf16.mxu0 %vm702_vm2, %v3506_v24  ;;  %v3140_v16 = vld [vmem:[%s3576_s30 + $0xc4] sm:$0xf]  ;;  %v3141_v24 = vld [vmem:[%s3576_s30 + $0xc8] sm:$0x1] }
  0x90   : > { %v3153_v50 = vcombine.low %v1908_v44, %v1918_v45  ;;  %v1927_v51 = vrot.slane %v1926_v40, 4  ;;  %v1936_v52 = vor.u32 %v1935_v41, %v1931_v39  ;;  %v1941_v53 = vrot.slane %v1939_v42, 5  ;;  %v3509_v38 = vld [vmem:[%s3576_s30 + $0xc0] sm:$0xff]  }
  0x91   : > { %v1946_v55 = vrot.slane %v1944_v43, 4  ;;  %v1949_v56 = vrot.slane %v1947_v47, 5  ;;  %v1955_v57 = vrot.slane %v1953_v48, 5  ;;  %v1957_v58 = vshrl.u32 %v3134_v34, 16 }
  0x92   : > { %3450 = vmatmul.mubr.msk.bf16.gmra.mxu1 %vm702_vm2, %v3153_v50  ;;  %v1932_v59 = vsel %vm3595_vm3, %v1927_v51, %v1931_v39  ;;  %v1937_v60 = vrot.slane %v1936_v52, 4  ;;  %v1963_v61 = vshll.u32 %v3135_v46, 16  ;;  %v1968_v0 = vshrl.u32 %v3136_v49, 16 }
  0x93   : > { %v1950_v1 = vor.u32 %v1949_v56, %v1946_v55  ;;  %v1959_v2 = vrot.slane %v1957_v58, 4  ;;  %v1971_v3 = vshll.u32 %v3136_v49, 16  ;;  %v1977_v5 = vshll.u32 %v3137_v54, 16 }
  0x94   : > { %v1942_v8 = vsel %vm3595_vm3, %v1937_v60, %v1941_v53  ;;  %v1965_v9 = vrot.slane %v1963_v61, 5  ;;  %v1970_v10 = vrot.slane %v1968_v0, 4  ;;  %v1981_v11 = vshrl.u32 %v3137_v54, 16 }
  0x95   : > { %v3154_v12 = vcombine.low %v1932_v59, %v1942_v8  ;;  %v1951_v13 = vrot.slane %v1950_v1, 4  ;;  %v1960_v14 = vor.u32 %v1959_v2, %v1955_v57  ;;  %v1973_v15 = vrot.slane %v1971_v3, 5 }
  0x96   : > { %3418 = vmatmul.mubr.msk.bf16.gmra.mxu0 %vm702_vm2, %v3507_v62  ;;  %v1979_v17 = vrot.slane %v1977_v5, 5  ;;  %v1983_v18 = vrot.slane %v1981_v11, 4  ;;  %v1987_v19 = vshll.u32 %v3138_v63, 16  ;;  %v1992_v20 = vshrl.u32 %v3139_v6, 16 }
  0x97   : > { %3453 = vmatprep.mubr.msk.bf16.mxu1 %vm702_vm2, %v3154_v12  ;;  %v1956_v21 = vsel %vm3595_vm3, %v1951_v13, %v1955_v57  ;;  %v1961_v22 = vrot.slane %v1960_v14, 4  ;;  %v1974_v23 = vor.u32 %v1973_v15, %v1970_v10  ;;  %v1995_v25 = vshll.u32 %v3139_v6, 16  ;;  %3421 = vmatprep.mubr.msk.bf16.mxu0 %vm702_vm2, %v3508_v7 }
  0x98   : > { %v1984_v26 = vor.u32 %v1983_v18, %v1979_v17  ;;  %v1989_v27 = vrot.slane %v1987_v19, 5  ;;  %v1994_v28 = vrot.slane %v1992_v20, 4  ;;  %v2001_v29 = vshll.u32 %v3140_v16, 16 }
  0x99   : > { %v1966_v30 = vsel %vm3595_vm3, %v1961_v22, %v1965_v9  ;;  %v1975_v31 = vrot.slane %v1974_v23, 4  ;;  %v1997_v32 = vrot.slane %v1995_v25, 5  ;;  %v2005_v4 = vshrl.u32 %v3140_v16, 16 }
  0x9a   : > { %v3155_v33 = vcombine.low %v1956_v21, %v1966_v30  ;;  %v1985_v34 = vrot.slane %v1984_v26, 4  ;;  %v2003_v36 = vrot.slane %v2001_v29, 5  ;;  %v2011_v37 = vshll.u32 %v3141_v24, 16 }
  0x9b   : > { %v1980_v39 = vsel %vm3595_vm3, %v1975_v31, %v1979_v17  ;;  %v1998_v40 = vor.u32 %v1997_v32, %v1994_v28  ;;  %v2007_v41 = vrot.slane %v2005_v4, 4 }
  0x9c   : > { %3454 = vmatmul.mubr.msk.bf16.gmra.mxu1 %vm702_vm2, %v3155_v33  ;;  %v1990_v42 = vsel %vm3595_vm3, %v1985_v34, %v1989_v27  ;;  %v2013_v46 = vrot.slane %v2011_v37, 5 }
  0x9d   : > { %v3156_v43 = vcombine.low %v1980_v39, %v1990_v42  ;;  %v1999_v44 = vrot.slane %v1998_v40, 4  ;;  %v2008_v45 = vor.u32 %v2007_v41, %v2003_v36 }
  0x9e   : > { %3422 = vmatmul.mubr.msk.bf16.gmra.mxu0 %vm702_vm2, %v3509_v38 }
  0x9f   : > { %3457 = vmatprep.mubr.msk.bf16.mxu1 %vm702_vm2, %v3156_v43  ;;  %v2004_v47 = vsel %vm3595_vm3, %v1999_v44, %v2003_v36  ;;  %v2009_v48 = vrot.slane %v2008_v45, 4 }
  0xa1   : > { %v2014_v49 = vsel %vm3595_vm3, %v2009_v48, %v2013_v46 }
  0xa2   : > { %v3157_v50 = vcombine.low %v2004_v47, %v2014_v49 }
  0xa4   : > { %3458 = vmatmul.mubr.msk.bf16.gmra.mxu1 %vm702_vm2, %v3157_v50 }
  0xd8   : > { %v3359_v51 = vpop.f32.mrf.mxu1 }
  0xda   : > { %v1086_v52 = vpop.f32.mrf.mxu1 }
  0xdc   : > { %v3360_v53 = vpop.f32.mrf.mxu1 }
  0xde   : > { %v3899_v54 = vpop.f32.mrf.mxu1 }
  0xe0   : > { %v3323_v55 = vpop.f32.mrf.mxu0  ;;  %v3363_v56 = vpop.f32.mrf.mxu1 }
  0xe1   : > { %v3901_v57 = vadd.f32 %v3359_v51, %v3323_v55 }
  0xe2   : > { %v785_v58 = vpop.f32.mrf.mxu0  ;;  %v3903_v59 = vpop.f32.mrf.mxu1 }
  0xe3   : > { %v3905_v60 = vadd.f32 %v1086_v52, %v785_v58 }
  0xe4   : > { %v3324_v61 = vpop.f32.mrf.mxu0  ;;  %v3364_v35 = vpop.f32.mrf.mxu1 }
  0xe5   : > { %v3907_v62 = vadd.f32 %v3360_v53, %v3324_v61 }
  0xe6   : > { %v3909_v63 = vpop.f32.mrf.mxu0  ;;  %v3911_v0 = vpop.f32.mrf.mxu1 }
  0xe8   : > { %v3327_v1 = vpop.f32.mrf.mxu0 }
  0xe9   : > { %v3913_v2 = vadd.f32 %v3363_v56, %v3327_v1  ;;  %v3367_v3 = vpop.f32.mrf.mxu1 }
  0xea   : > { %v3915_v5 = vpop.f32.mrf.mxu0 }
  0xeb   : > { %v3917_v6 = vpop.f32.mrf.mxu1 }
  0xec   : > { %v3328_v7 = vpop.f32.mrf.mxu0 }
  0xed   : > { %v3919_v8 = vadd.f32 %v3364_v35, %v3328_v7  ;;  %v3368_v9 = vpop.f32.mrf.mxu1 }
  0xee   : > { %v3921_v10 = vpop.f32.mrf.mxu0 }
  0xef   : > { %v3923_v11 = vpop.f32.mrf.mxu1 }
  0xf2   : > { %v3331_v12 = vpop.f32.mrf.mxu0  ;;  %v3371_v13 = vpop.f32.mrf.mxu1 }
  0xf3   : > { %v3925_v14 = vadd.f32 %v3367_v3, %v3331_v12 }
  0xf4   : > { %v3927_v15 = vpop.f32.mrf.mxu0  ;;  %v3929_v16 = vpop.f32.mrf.mxu1 }
  0xf6   : > { %v3332_v17 = vpop.f32.mrf.mxu0  ;;  %v3372_v18 = vpop.f32.mrf.mxu1 }
  0xf7   : > { %v3931_v19 = vadd.f32 %v3368_v9, %v3332_v17 }
  0xf8   : > { %v3933_v20 = vpop.f32.mrf.mxu0  ;;  %v3935_v21 = vpop.f32.mrf.mxu1 }
  0xfa   : > { %v3335_v22 = vpop.f32.mrf.mxu0 }
  0xfb   : > { %v3937_v23 = vadd.f32 %v3371_v13, %v3335_v22  ;;  %v3375_v24 = vpop.f32.mrf.mxu1 }
  0xfc   : > { %v3939_v25 = vpop.f32.mrf.mxu0 }
  0xfd   : > { %v3941_v26 = vpop.f32.mrf.mxu1 }
  0xfe   : > { %v3336_v27 = vpop.f32.mrf.mxu0 }
  0xff   : > { %v3943_v28 = vadd.f32 %v3372_v18, %v3336_v27  ;;  %v3376_v29 = vpop.f32.mrf.mxu1 }
 0x100   : > { %v3945_v30 = vpop.f32.mrf.mxu0 }
 0x101   : > { %v3947_v31 = vpop.f32.mrf.mxu1 }
 0x104   : > { %v3339_v32 = vpop.f32.mrf.mxu0  ;;  %v3379_v4 = vpop.f32.mrf.mxu1 }
 0x105   : > { %v3949_v33 = vadd.f32 %v3375_v24, %v3339_v32 }
 0x106   : > { %v3951_v34 = vpop.f32.mrf.mxu0  ;;  %v3953_v36 = vpop.f32.mrf.mxu1 }
 0x108   : > { %v3340_v37 = vpop.f32.mrf.mxu0  ;;  %v3380_v38 = vpop.f32.mrf.mxu1 }
 0x109   : > { %v3955_v39 = vadd.f32 %v3376_v29, %v3340_v37 }
 0x10a   : > { %v3957_v40 = vpop.f32.mrf.mxu0  ;;  %v3959_v41 = vpop.f32.mrf.mxu1 }
 0x10c   : > { %v3343_v42 = vpop.f32.mrf.mxu0 }
 0x10d   : > { %v3961_v43 = vadd.f32 %v3379_v4, %v3343_v42  ;;  %v3383_v44 = vpop.f32.mrf.mxu1 }
 0x10e   : > { %v3963_v45 = vpop.f32.mrf.mxu0 }
 0x10f   : > { %v3965_v46 = vpop.f32.mrf.mxu1 }
 0x110   : > { %v3344_v47 = vpop.f32.mrf.mxu0 }
 0x111   : > { %v3967_v48 = vadd.f32 %v3380_v38, %v3344_v47  ;;  %v3384_v49 = vpop.f32.mrf.mxu1 }
 0x112   : > { %v3969_v50 = vpop.f32.mrf.mxu0 }
 0x113   : > { %v3971_v51 = vpop.f32.mrf.mxu1 }
 0x116   : > { %v3347_v52 = vpop.f32.mrf.mxu0  ;;  %v3387_v56 = vpop.f32.mrf.mxu1 }
 0x117   : > { %v3973_v53 = vadd.f32 %v3383_v44, %v3347_v52  ;;  %v1090_v44 = vadd.f32 %v3899_v54, %v3909_v63 }
 0x118   : > { %v3975_v55 = vpop.f32.mrf.mxu0  ;;  %v3981_v1 = vpop.f32.mrf.mxu1 }
 0x11a   : > { %v3348_v58 = vpop.f32.mrf.mxu0  ;;  %v3388_v9 = vpop.f32.mrf.mxu1 }
 0x11b   : > { %v3977_v61 = vadd.f32 %v3384_v49, %v3348_v58 }
 0x11c   : > { %v3979_v35 = vpop.f32.mrf.mxu0  ;;  %v3989_v18 = vpop.f32.mrf.mxu1 }
 0x11e   : > { %v3351_v3 = vpop.f32.mrf.mxu0 }
 0x11f   : > { %v3983_v7 = vadd.f32 %v3387_v56, %v3351_v3 }
 0x120   : > { %v3985_v12 = vpop.f32.mrf.mxu0 }
 0x122   : > { %v3352_v13 = vpop.f32.mrf.mxu0 }
 0x123   : > { %v3987_v17 = vadd.f32 %v3388_v9, %v3352_v13 }
 0x124   : > { %v3991_v22 = vpop.f32.mrf.mxu0 }
 0x126   : > { %v3395_v24 = vpop.f32.mrf.mxu0 }
 0x127   : > { %v1553_v37 = vadd.f32 %v3395_v24, %v3901_v57 }
 0x128   : > { %v3431_v27 = vpop.f32.mrf.mxu1  ;;  %v1424_v29 = vpop.f32.mrf.mxu0 }
 0x129   : > { %v1551_v32 = vadd.f32 %v1424_v29, %v3905_v60  ;;  %v4000_v56 = vadd.f32 %v3431_v27, %v1553_v37  ;;  %v1103_v60 = vadd.f32 %v3903_v59, %v3915_v5  ;;  %v1106_v37 = vadd.f32 %v3911_v0, %v3921_v10 }
 0x12a   : > { %v2161_v4 = vpop.f32.mrf.mxu1  ;;  %v3396_v38 = vpop.f32.mrf.mxu0 }
 0x12b   : > { %v3995_v42 = vadd.f32 %v2161_v4, %v1551_v32  ;;  %v1554_v49 = vadd.f32 %v3396_v38, %v3907_v62  ;;  %4715 = vst [vmem:[#allocation2_spill] sm:$0xff] %v4000_v56  ;;  %v2394_v29 = vmul.f32 %v4000_v56, %v4000_v56 }
 0x12c   : > { %v3432_v47 = vpop.f32.mrf.mxu1  ;;  %v1427_v52 = vpop.f32.mrf.mxu0 }
 0x12d   : > { %v1552_v3 = vadd.f32 %v1427_v52, %v1090_v44  ;;  %v2392_v57 = vmul.f32 %v3995_v42, %v3995_v42  ;;  %v4006_v13 = vadd.f32 %v3432_v47, %v1554_v49  ;;  %v2321_v32 = vsel %vm2320_vm4, %v3995_v42, 0.0 }
 0x12e   : > { %v2164_v58 = vpop.f32.mrf.mxu1  ;;  %v3399_v9 = vpop.f32.mrf.mxu0 }
 0x12f   : > { %v4008_v24 = vadd.f32 %v2164_v58, %v1552_v3  ;;  %v1557_v62 = vadd.f32 %v3399_v9, %v3913_v2  ;;  %v2324_v2 = vsel %vm2320_vm4, %v4000_v56, 0.0  ;;  %v2424_v38 = vsel %vm2320_vm4, %v2392_v57, 0.0 }
 0x130   : > { %v1440_v54 = vpop.f32.mrf.mxu0  ;;  %v2395_v49 = vmul.f32 %v4006_v13, %v4006_v13  ;;  %v2427_v57 = vsel %vm2320_vm4, %v2394_v29, 0.0 }
 0x131   : > { %v3435_v63 = vpop.f32.mrf.mxu1  ;;  %v1555_v27 = vadd.f32 %v1440_v54, %v1103_v60  ;;  %v2322_v59 = vsel %vm2320_vm4, %v4008_v24, 0.0  ;;  %v2393_v5 = vmul.f32 %v4008_v24, %v4008_v24 }
 0x132   : > { %v3400_v4 = vpop.f32.mrf.mxu0  ;;  %v2323_v44 = vadd.f32 %v2322_v59, %v2321_v32  ;;  %v4030_v0 = vadd.f32 %v3435_v63, %v1557_v62  ;;  %v2326_v32 = vsel %vm2320_vm4, %v4006_v13, 0.0  ;;  %v2429_v63 = vsel %vm2320_vm4, %v2395_v49, 0.0 }
 0x133   : > { %v2177_v47 = vpop.f32.mrf.mxu1  ;;  %v2425_v52 = vsel %vm2320_vm4, %v2393_v5, 0.0  ;;  %v1558_v3 = vadd.f32 %v3400_v4, %v3919_v8 }
 0x134   : > { %v4027_v58 = vadd.f32 %v2177_v47, %v1555_v27  ;;  %v1443_v9 = vpop.f32.mrf.mxu0  ;;  %v2325_v60 = vadd.f32 %v2324_v2, %v2323_v44  ;;  %v2426_v54 = vadd.f32 %v2425_v52, %v2424_v38  ;;  %v1119_v27 = vadd.f32 %v3917_v6, %v3927_v15 }
 0x135   : > { %v3436_v10 = vpop.f32.mrf.mxu1  ;;  %v1556_v56 = vadd.f32 %v1443_v9, %v1106_v37  ;;  %v2398_v44 = vmul.f32 %v4030_v0, %v4030_v0 }
 0x136   : > { %v2396_v59 = vmul.f32 %v4027_v58, %v4027_v58  ;;  %v3403_v5 = vpop.f32.mrf.mxu0  ;;  %v2428_v8 = vadd.f32 %v2427_v57, %v2426_v54  ;;  %v2327_v4 = vadd.f32 %v2326_v32, %v2325_v60  ;;  %v2328_v62 = vsel %vm2320_vm4, %v4027_v58, 0.0 }
 0x137   : > { %v2180_v2 = vpop.f32.mrf.mxu1  ;;  %v4042_v37 = vadd.f32 %v3436_v10, %v1558_v3  ;;  %v1561_v10 = vadd.f32 %v3403_v5, %v3925_v14  ;;  %v1122_v57 = vadd.f32 %v3923_v11, %v3933_v20  ;;  %v2332_v32 = vsel %vm2320_vm4, %v4030_v0, 0.0 }
 0x138   : > { %v4044_v29 = vadd.f32 %v2180_v2, %v1556_v56  ;;  %v1456_v38 = vpop.f32.mrf.mxu0  ;;  %v2329_v47 = vadd.f32 %v2328_v62, %v2327_v4  ;;  %v2430_v52 = vadd.f32 %v2429_v63, %v2428_v8  ;;  %v2431_v6 = vsel %vm2320_vm4, %v2396_v59, 0.0 }
 0x139   : > { %v1559_v60 = vadd.f32 %v1456_v38, %v1119_v27  ;;  %v2399_v59 = vmul.f32 %v4042_v37, %v4042_v37  ;;  %v2435_v27 = vsel %vm2320_vm4, %v2398_v44, 0.0  ;;  %v2334_v14 = vsel %vm2320_vm4, %v4042_v37, 0.0 }
 0x13a   : > { %v3439_v15 = vpop.f32.mrf.mxu1  ;;  %v2330_v9 = vsel %vm2320_vm4, %v4044_v29, 0.0  ;;  %v2397_v49 = vmul.f32 %v4044_v29, %v4044_v29  ;;  %v3404_v3 = vpop.f32.mrf.mxu0  ;;  %v2432_v54 = vadd.f32 %v2431_v6, %v2430_v52 }
 0x13b   : > { %v2331_v56 = vadd.f32 %v2330_v9, %v2329_v47  ;;  %v1562_v11 = vadd.f32 %v3404_v3, %v3931_v19  ;;  %v4067_v6 = vadd.f32 %v3439_v15, %v1561_v10  ;;  %v2437_v44 = vsel %vm2320_vm4, %v2399_v59, 0.0 }
 0x13c   : > { %v2433_v8 = vsel %vm2320_vm4, %v2397_v49, 0.0  ;;  %v2193_v4 = vpop.f32.mrf.mxu1  ;;  %v1459_v2 = vpop.f32.mrf.mxu0  ;;  %v1135_v49 = vadd.f32 %v3929_v16, %v3939_v25  ;;  %v1138_v59 = vadd.f32 %v3935_v21, %v3945_v30 }
 0x13d   : > { %v2333_v63 = vadd.f32 %v2332_v32, %v2331_v56  ;;  %v2434_v62 = vadd.f32 %v2433_v8, %v2432_v54  ;;  %v4064_v38 = vadd.f32 %v2193_v4, %v1559_v60  ;;  %v1560_v20 = vadd.f32 %v1459_v2, %v1122_v57 }
 0x13e   : > { %v3440_v5 = vpop.f32.mrf.mxu1  ;;  %v3407_v47 = vpop.f32.mrf.mxu0  ;;  %v2402_v4 = vmul.f32 %v4067_v6, %v4067_v6  ;;  %v2340_v21 = vsel %vm2320_vm4, %v4067_v6, 0.0 }
 0x13f   : > { %v2436_v52 = vadd.f32 %v2435_v27, %v2434_v62  ;;  %v2335_v9 = vadd.f32 %v2334_v14, %v2333_v63  ;;  %v2336_v54 = vsel %vm2320_vm4, %v4064_v38, 0.0  ;;  %v2400_v60 = vmul.f32 %v4064_v38, %v4064_v38 }
 0x140   : > { %v2196_v56 = vpop.f32.mrf.mxu1  ;;  %v1472_v32 = vpop.f32.mrf.mxu0  ;;  %v4077_v15 = vadd.f32 %v3440_v5, %v1562_v11  ;;  %v1565_v14 = vadd.f32 %v3407_v47, %v3937_v23  ;;  %v1151_v23 = vadd.f32 %v3941_v26, %v3951_v34  ;;  %v1154_v34 = vadd.f32 %v3947_v31, %v3957_v40 }
 0x141   : > { %v2337_v19 = vadd.f32 %v2336_v54, %v2335_v9  ;;  %v2438_v3 = vadd.f32 %v2437_v44, %v2436_v52  ;;  %v2439_v57 = vsel %vm2320_vm4, %v2400_v60, 0.0  ;;  %v4079_v8 = vadd.f32 %v2196_v56, %v1560_v20 }
 0x142   : > { %v3443_v10 = vpop.f32.mrf.mxu1  ;;  %v1563_v16 = vadd.f32 %v1472_v32, %v1135_v49  ;;  %v3408_v25 = vpop.f32.mrf.mxu0  ;;  %v2403_v30 = vmul.f32 %v4077_v15, %v4077_v15  ;;  %v2342_v56 = vsel %vm2320_vm4, %v4077_v15, 0.0 }
 0x143   : > { %v2440_v2 = vadd.f32 %v2439_v57, %v2438_v3  ;;  %v2338_v27 = vsel %vm2320_vm4, %v4079_v8, 0.0  ;;  %v2401_v63 = vmul.f32 %v4079_v8, %v4079_v8  ;;  %v1566_v5 = vadd.f32 %v3408_v25, %v3943_v28 }
 0x144   : > { %v2209_v62 = vpop.f32.mrf.mxu1  ;;  %v1475_v11 = vpop.f32.mrf.mxu0  ;;  %v2339_v20 = vadd.f32 %v2338_v27, %v2337_v19  ;;  %v2443_v28 = vsel %vm2320_vm4, %v2402_v4, 0.0  ;;  %v4103_v32 = vadd.f32 %v3443_v10, %v1565_v14  ;;  %v2445_v4 = vsel %vm2320_vm4, %v2403_v30, 0.0 }
 0x145   : > { %v4091_v52 = vadd.f32 %v2209_v62, %v1563_v16  ;;  %v2441_v9 = vsel %vm2320_vm4, %v2401_v63, 0.0  ;;  %v1564_v44 = vadd.f32 %v1475_v11, %v1138_v59 }
 0x146   : > { %v3444_v49 = vpop.f32.mrf.mxu1  ;;  %v3411_v54 = vpop.f32.mrf.mxu0  ;;  %v2341_v47 = vadd.f32 %v2340_v21, %v2339_v20  ;;  %v2442_v60 = vadd.f32 %v2441_v9, %v2440_v2  ;;  %v2406_v20 = vmul.f32 %v4103_v32, %v4103_v32 }
 0x147   : > { %v2404_v19 = vmul.f32 %v4091_v52, %v4091_v52  ;;  %v4107_v57 = vadd.f32 %v3444_v49, %v1566_v5  ;;  %v2344_v10 = vsel %vm2320_vm4, %v4091_v52, 0.0  ;;  %v1569_v30 = vadd.f32 %v3411_v54, %v3949_v33 }
 0x148   : > { %v2212_v3 = vpop.f32.mrf.mxu1  ;;  %v1488_v16 = vpop.f32.mrf.mxu0  ;;  %v2444_v25 = vadd.f32 %v2443_v28, %v2442_v60  ;;  %v2343_v59 = vadd.f32 %v2342_v56, %v2341_v47  ;;  %v2348_v47 = vsel %vm2320_vm4, %v4103_v32, 0.0  ;;  %v2451_v54 = vsel %vm2320_vm4, %v2406_v20, 0.0 }
 0x149   : > { %v4109_v27 = vadd.f32 %v2212_v3, %v1564_v44  ;;  %v1567_v26 = vadd.f32 %v1488_v16, %v1151_v23  ;;  %v2447_v31 = vsel %vm2320_vm4, %v2404_v19, 0.0  ;;  %v2407_v40 = vmul.f32 %v4107_v57, %v4107_v57 }
 0x14a   : > { %v3447_v2 = vpop.f32.mrf.mxu1  ;;  %v3412_v63 = vpop.f32.mrf.mxu0  ;;  %v2345_v62 = vadd.f32 %v2344_v10, %v2343_v59  ;;  %v2446_v14 = vadd.f32 %v2445_v4, %v2444_v25  ;;  %v1167_v16 = vadd.f32 %v3953_v36, %v3963_v45  ;;  %v2350_v59 = vsel %vm2320_vm4, %v4107_v57, 0.0 }
 0x14b   : > { %v2346_v5 = vsel %vm2320_vm4, %v4109_v27, 0.0  ;;  %v2405_v11 = vmul.f32 %v4109_v27, %v4109_v27  ;;  %v1570_v56 = vadd.f32 %v3412_v63, %v3955_v39  ;;  %v2453_v39 = vsel %vm2320_vm4, %v2407_v40, 0.0 }
 0x14c   : > { %v2225_v21 = vpop.f32.mrf.mxu1  ;;  %v1491_v9 = vpop.f32.mrf.mxu0  ;;  %v2448_v49 = vadd.f32 %v2447_v31, %v2446_v14  ;;  %v2347_v44 = vadd.f32 %v2346_v5, %v2345_v62 }
 0x14d   : > { %v2449_v23 = vsel %vm2320_vm4, %v2405_v11, 0.0  ;;  %v4127_v28 = vadd.f32 %v2225_v21, %v1567_v26  ;;  %v1568_v19 = vadd.f32 %v1491_v9, %v1154_v34  ;;  %v4137_v26 = vadd.f32 %v3447_v2, %v1569_v30 }
 0x14e   : > { %v3448_v60 = vpop.f32.mrf.mxu1  ;;  %v3415_v3 = vpop.f32.mrf.mxu0  ;;  %v2349_v25 = vadd.f32 %v2348_v47, %v2347_v44  ;;  %v2450_v33 = vadd.f32 %v2449_v23, %v2448_v49  ;;  %v1170_v9 = vadd.f32 %v3959_v41, %v3969_v50 }
 0x14f   : > { %v2408_v4 = vmul.f32 %v4127_v28, %v4127_v28  ;;  %v2352_v36 = vsel %vm2320_vm4, %v4127_v28, 0.0  ;;  %v4146_v45 = vadd.f32 %v3448_v60, %v1570_v56  ;;  %v1573_v2 = vadd.f32 %v3415_v3, %v3961_v43 }
 0x150   : > { %v2228_v10 = vpop.f32.mrf.mxu1  ;;  %v1504_v62 = vpop.f32.mrf.mxu0  ;;  %v2452_v34 = vadd.f32 %v2451_v54, %v2450_v33  ;;  %v2351_v63 = vadd.f32 %v2350_v59, %v2349_v25  ;;  %v2356_v49 = vsel %vm2320_vm4, %v4137_v26, 0.0  ;;  %v2410_v44 = vmul.f32 %v4137_v26, %v4137_v26 }
 0x151   : > { %v4142_v14 = vadd.f32 %v2228_v10, %v1568_v19  ;;  %v1571_v11 = vadd.f32 %v1504_v62, %v1167_v16  ;;  %v2455_v43 = vsel %vm2320_vm4, %v2408_v4, 0.0  ;;  %v2411_v16 = vmul.f32 %v4146_v45, %v4146_v45 }
 0x152   : > { %v3451_v5 = vpop.f32.mrf.mxu1  ;;  %v3416_v20 = vpop.f32.mrf.mxu0  ;;  %v2353_v31 = vadd.f32 %v2352_v36, %v2351_v63  ;;  %v2454_v21 = vadd.f32 %v2453_v39, %v2452_v34  ;;  %v2459_v10 = vsel %vm2320_vm4, %v2410_v44, 0.0  ;;  %v2358_v62 = vsel %vm2320_vm4, %v4146_v45, 0.0 }
 0x153   : > { %v2354_v30 = vsel %vm2320_vm4, %v4142_v14, 0.0  ;;  %v2409_v40 = vmul.f32 %v4142_v14, %v4142_v14  ;;  %v4165_v41 = vadd.f32 %v3451_v5, %v1573_v2  ;;  %v1574_v25 = vadd.f32 %v3416_v20, %v3967_v48 }
 0x154   : > { %v2241_v23 = vpop.f32.mrf.mxu1  ;;  %v1507_v47 = vpop.f32.mrf.mxu0  ;;  %v2456_v60 = vadd.f32 %v2455_v43, %v2454_v21  ;;  %v2355_v56 = vadd.f32 %v2354_v30, %v2353_v31  ;;  %v1183_v36 = vadd.f32 %v3965_v46, %v3975_v55 }
 0x155   : > { %v2457_v19 = vsel %vm2320_vm4, %v2409_v40, 0.0  ;;  %v4161_v3 = vadd.f32 %v2241_v23, %v1571_v11  ;;  %v1572_v33 = vadd.f32 %v1507_v47, %v1170_v9  ;;  %v2461_v11 = vsel %vm2320_vm4, %v2411_v16, 0.0 }
 0x156   : > { %v3452_v50 = vpop.f32.mrf.mxu1  ;;  %v3419_v54 = vpop.f32.mrf.mxu0  ;;  %v2357_v59 = vadd.f32 %v2356_v49, %v2355_v56  ;;  %v2458_v4 = vadd.f32 %v2457_v19, %v2456_v60  ;;  %v2414_v20 = vmul.f32 %v4165_v41, %v4165_v41  ;;  %v1186_v19 = vadd.f32 %v3971_v51, %v3979_v35 }
 0x157   : > { %v2412_v39 = vmul.f32 %v4161_v3, %v4161_v3  ;;  %v2360_v31 = vsel %vm2320_vm4, %v4161_v3, 0.0  ;;  %v4182_v21 = vadd.f32 %v3452_v50, %v1574_v25  ;;  %v2364_v16 = vsel %vm2320_vm4, %v4165_v41, 0.0 }
 0x158   : > { %v2244_v34 = vpop.f32.mrf.mxu1  ;;  %v1520_v63 = vpop.f32.mrf.mxu0  ;;  %v2460_v5 = vadd.f32 %v2459_v10, %v2458_v4  ;;  %v2359_v2 = vadd.f32 %v2358_v62, %v2357_v59  ;;  %v2467_v4 = vsel %vm2320_vm4, %v2414_v20, 0.0 }
 0x159   : > { %v4175_v48 = vadd.f32 %v2244_v34, %v1572_v33  ;;  %v2463_v49 = vsel %vm2320_vm4, %v2412_v39, 0.0  ;;  %v1575_v43 = vadd.f32 %v1520_v63, %v1183_v36  ;;  %v2415_v50 = vmul.f32 %v4182_v21, %v4182_v21 }
 0x15a   : > { %v3420_v30 = vpop.f32.mrf.mxu0  ;;  %v2361_v40 = vadd.f32 %v2360_v31, %v2359_v2  ;;  %v2462_v9 = vadd.f32 %v2461_v11, %v2460_v5  ;;  %v1577_v33 = vadd.f32 %v3419_v54, %v3973_v53  ;;  %v2366_v39 = vsel %vm2320_vm4, %v4182_v21, 0.0 }
 0x15b   : > { %v2362_v46 = vsel %vm2320_vm4, %v4175_v48, 0.0  ;;  %v2413_v55 = vmul.f32 %v4175_v48, %v4175_v48  ;;  %v1578_v51 = vadd.f32 %v3420_v30, %v3977_v61  ;;  %v1199_v5 = vadd.f32 %v3981_v1, %v3985_v12 }
 0x15c   : > { %v3455_v44 = vpop.f32.mrf.mxu1  ;;  %v1523_v23 = vpop.f32.mrf.mxu0  ;;  %v2464_v47 = vadd.f32 %v2463_v49, %v2462_v9  ;;  %v2363_v60 = vadd.f32 %v2362_v46, %v2361_v40  ;;  %v2469_v54 = vsel %vm2320_vm4, %v2415_v50, 0.0 }
 0x15d   : > { %v2465_v56 = vsel %vm2320_vm4, %v2413_v55, 0.0  ;;  %v1576_v35 = vadd.f32 %v1523_v23, %v1186_v19  ;;  %v4206_v11 = vadd.f32 %v3455_v44, %v1577_v33 }
 0x15e   : > { %v2257_v25 = vpop.f32.mrf.mxu1  ;;  %v3423_v59 = vpop.f32.mrf.mxu0  ;;  %v2365_v10 = vadd.f32 %v2364_v16, %v2363_v60  ;;  %v2466_v62 = vadd.f32 %v2465_v56, %v2464_v47 }
 0x15f   : > { %v4200_v63 = vadd.f32 %v2257_v25, %v1575_v43  ;;  %v1202_v43 = vadd.f32 %v3989_v18, %v3991_v22  ;;  %v2418_v47 = vmul.f32 %v4206_v11, %v4206_v11  ;;  %v1581_v16 = vadd.f32 %v3423_v59, %v3983_v7 }
 0x160   : > { %v3456_v34 = vpop.f32.mrf.mxu1  ;;  %v1536_v36 = vpop.f32.mrf.mxu0  ;;  %v2468_v2 = vadd.f32 %v2467_v4, %v2466_v62  ;;  %v2367_v53 = vadd.f32 %v2366_v39, %v2365_v10  ;;  %v2372_v18 = vsel %vm2320_vm4, %v4206_v11, 0.0 }
 0x161   : > { %v2368_v20 = vsel %vm2320_vm4, %v4200_v63, 0.0  ;;  %v2416_v31 = vmul.f32 %v4200_v63, %v4200_v63  ;;  %v1579_v46 = vadd.f32 %v1536_v36, %v1199_v5  ;;  %v4213_v1 = vadd.f32 %v3456_v34, %v1578_v51 }
 0x162   : > { %v2260_v40 = vpop.f32.mrf.mxu1  ;;  %v3424_v9 = vpop.f32.mrf.mxu0  ;;  %v2369_v61 = vadd.f32 %v2368_v20, %v2367_v53  ;;  %v2470_v30 = vadd.f32 %v2469_v54, %v2468_v2  ;;  %v2475_v51 = vsel %vm2320_vm4, %v2418_v47, 0.0 }
 0x163   : > { %v2471_v55 = vsel %vm2320_vm4, %v2416_v31, 0.0  ;;  %v4215_v49 = vadd.f32 %v2260_v40, %v1576_v35  ;;  %v2419_v22 = vmul.f32 %v4213_v1, %v4213_v1  ;;  %v1582_v62 = vadd.f32 %v3424_v9, %v3987_v17 }
 0x164   : > { %v3459_v12 = vpop.f32.mrf.mxu1  ;;  %v1539_v44 = vpop.f32.mrf.mxu0  ;;  %v2472_v23 = vadd.f32 %v2471_v55, %v2470_v30  ;;  %v2374_v7 = vsel %vm2320_vm4, %v4213_v1, 0.0 }
 0x165   : > { %v2370_v60 = vsel %vm2320_vm4, %v4215_v49, 0.0  ;;  %v2417_v56 = vmul.f32 %v4215_v49, %v4215_v49  ;;  %v1580_v33 = vadd.f32 %v1539_v44, %v1202_v43  ;;  %v4237_v59 = vadd.f32 %v3459_v12, %v1581_v16 }
 0x166   : > { %v2273_v19 = vpop.f32.mrf.mxu1  ;;  %v2371_v50 = vadd.f32 %v2370_v60, %v2369_v61  ;;  %v2477_v54 = vsel %vm2320_vm4, %v2419_v22, 0.0 }
 0x167   : > { %v4226_v25 = vadd.f32 %v2273_v19, %v1579_v46  ;;  %v2473_v4 = vsel %vm2320_vm4, %v2417_v56, 0.0  ;;  %v2422_v30 = vmul.f32 %v4237_v59, %v4237_v59  ;;  %v2380_v43 = vsel %vm2320_vm4, %v4237_v59, 0.0 }
 0x168   : > { %v3460_v10 = vpop.f32.mrf.mxu1  ;;  %v2373_v39 = vadd.f32 %v2372_v18, %v2371_v50  ;;  %v2474_v34 = vadd.f32 %v2473_v4, %v2472_v23 }
 0x169   : > { %v2420_v35 = vmul.f32 %v4226_v25, %v4226_v25  ;;  %v2376_v17 = vsel %vm2320_vm4, %v4226_v25, 0.0  ;;  %v4246_v20 = vadd.f32 %v3460_v10, %v1582_v62  ;;  %v2483_v56 = vsel %vm2320_vm4, %v2422_v30, 0.0 }
 0x16a   : > { %v2276_v36 = vpop.f32.mrf.mxu1  ;;  %v2476_v5 = vadd.f32 %v2475_v51, %v2474_v34  ;;  %v2375_v2 = vadd.f32 %v2374_v7, %v2373_v39 }
 0x16b   : > { %v4241_v53 = vadd.f32 %v2276_v36, %v1580_v33  ;;  %v2479_v46 = vsel %vm2320_vm4, %v2420_v35, 0.0  ;;  %v2423_v23 = vmul.f32 %v4246_v20, %v4246_v20  ;;  %v2382_v19 = vsel %vm2320_vm4, %v4246_v20, 0.0 }
 0x16c   : > { %v2377_v31 = vadd.f32 %v2376_v17, %v2375_v2  ;;  %v2478_v40 = vadd.f32 %v2477_v54, %v2476_v5 }
 0x16d   : > { %v2378_v9 = vsel %vm2320_vm4, %v4241_v53, 0.0  ;;  %v2421_v61 = vmul.f32 %v4241_v53, %v4241_v53  ;;  %v2485_v33 = vsel %vm2320_vm4, %v2423_v23, 0.0 }
 0x16e   : > { %v2480_v55 = vadd.f32 %v2479_v46, %v2478_v40  ;;  %v2379_v12 = vadd.f32 %v2378_v9, %v2377_v31 }
 0x16f   : > { %v2481_v44 = vsel %vm2320_vm4, %v2421_v61, 0.0 }
 0x170   : > { %v2381_v47 = vadd.f32 %v2380_v43, %v2379_v12  ;;  %v2482_v60 = vadd.f32 %v2481_v44, %v2480_v55 }
 0x172   : > { %v2383_v16 = vadd.f32 %v2382_v19, %v2381_v47  ;;  %v2484_v50 = vadd.f32 %v2483_v56, %v2482_v60 }
 0x174   : > { %v2384_v18 = vrot.slane %v2383_v16, 4  ;;  %v2486_v22 = vadd.f32 %v2485_v33, %v2484_v50 }
 0x176   : > { %v2385_v4 = vadd.f32 %v2384_v18, %v2383_v16  ;;  %v2487_v10 = vrot.slane %v2486_v22, 4 }
 0x178   : > { %v2386_v62 = vrot.slane %v2385_v4, 2  ;;  %v2488_v39 = vadd.f32 %v2487_v10, %v2486_v22 }
 0x17a   : > { %v2387_v34 = vadd.f32 %v2386_v62, %v2385_v4  ;;  %v2489_v51 = vrot.slane %v2488_v39, 2 }
 0x17c   : > { %v2388_v7 = vrot.slane %v2387_v34, 1  ;;  %v2490_v35 = vadd.f32 %v2489_v51, %v2488_v39 }
 0x17e   : > { %v2389_v36 = vadd.f32 %v2388_v7, %v2387_v34  ;;  %v2491_v5 = vrot.slane %v2490_v35, 1 }
 0x180   : > { %v4264_v2 = vmul.f32 0.00390625, %v2389_v36  ;;  %v2492_v54 = vadd.f32 %v2491_v5, %v2490_v35 }
 0x182   : > { %v2493_v17 = vmul.f32 0.00390625, %v2492_v54  ;;  %v2494_v31 = vmul.f32 %v4264_v2, %v4264_v2  ;;  %v2508_v9 = vsub.f32 %v4091_v52, %v4264_v2  ;;  %v2509_v61 = vsub.f32 %v4109_v27, %v4264_v2 }
 0x183   : > { %v2511_v30 = vsub.f32 %v4107_v57, %v4264_v2  ;;  %v2512_v46 = vsub.f32 %v4127_v28, %v4264_v2  ;;  %v2513_v55 = vsub.f32 %v4142_v14, %v4264_v2  ;;  %v2514_v12 = vsub.f32 %v4137_v26, %v4264_v2 }
 0x184   : > { %v2495_v40 = vsub.f32 %v2493_v17, %v2494_v31  ;;  %v2515_v44 = vsub.f32 %v4146_v45, %v4264_v2  ;;  %v2516_v52 = vsub.f32 %v4161_v3, %v4264_v2  ;;  %v2518_v27 = vsub.f32 %v4165_v41, %v4264_v2 }
 0x185   : > { %v2519_v57 = vsub.f32 %v4182_v21, %v4264_v2  ;;  %v2520_v28 = vsub.f32 %v4200_v63, %v4264_v2  ;;  %v2522_v14 = vsub.f32 %v4206_v11, %v4264_v2  ;;  %v2523_v26 = vsub.f32 %v4213_v1, %v4264_v2  ;;  %v4716_v11 = vld [vmem:[#allocation2_spill] sm:$0xff] }
 0x186   : > { %v2524_v45 = vsub.f32 %v4226_v25, %v4264_v2  ;;  %v2526_v3 = vsub.f32 %v4237_v59, %v4264_v2  ;;  %v2527_v41 = vsub.f32 %v4246_v20, %v4264_v2  ;;  %v2528_v43 = vadd.f32 1e-05, %v2495_v40 }
 0x187   : > { %v2496_v21 = vsub.f32 %v3995_v42, %v4264_v2  ;;  %v2497_v63 = vsub.f32 %v4008_v24, %v4264_v2  ;;  %v2498_v1 = vsub.f32 %v4716_v11, %v4264_v2  ;;  %v2499_v25 = vsub.f32 %v4006_v13, %v4264_v2 }
 0x188   : > { %3510 = vrsqrt.f32 %v2528_v43  ;;  %v2500_v59 = vsub.f32 %v4027_v58, %v4264_v2  ;;  %v2501_v20 = vsub.f32 %v4044_v29, %v4264_v2  ;;  %v2502_v23 = vsub.f32 %v4030_v0, %v4264_v2 }
 0x189   : > { %v2503_v42 = vsub.f32 %v4042_v37, %v4264_v2  ;;  %v2504_v24 = vsub.f32 %v4064_v38, %v4264_v2  ;;  %v2505_v47 = vsub.f32 %v4079_v8, %v4264_v2  ;;  %v2506_v13 = vsub.f32 %v4067_v6, %v4264_v2 }
 0x18a   : > { %v2507_v58 = vsub.f32 %v4077_v15, %v4264_v2  ;;  %v2510_v29 = vsub.f32 %v4103_v32, %v4264_v2  ;;  %v2517_v0 = vsub.f32 %v4175_v48, %v4264_v2  ;;  %v2521_v37 = vsub.f32 %v4215_v49, %v4264_v2 }
 0x18b   : > { %v2525_v38 = vsub.f32 %v4241_v53, %v4264_v2 }
 0x195   : > { %v3511_v60 = vpop.eup %3510 }
 0x196   : > { %v2530_v8 = vmul.f32 %v3511_v60, %v2496_v21  ;;  %v2531_v56 = vmul.f32 %v3511_v60, %v2497_v63  ;;  %v2532_v19 = vmul.f32 %v3511_v60, %v2498_v1  ;;  %v2533_v6 = vmul.f32 %v3511_v60, %v2499_v25 }
 0x197   : > { %v2534_v16 = vmul.f32 %v3511_v60, %v2500_v59  ;;  %v2535_v50 = vmul.f32 %v3511_v60, %v2501_v20  ;;  %v2536_v15 = vmul.f32 %v3511_v60, %v2502_v23  ;;  %v2537_v33 = vmul.f32 %v3511_v60, %v2503_v42 }
 0x198   : > { %v2538_v18 = vmul.f32 %v3511_v60, %v2504_v24  ;;  %v2539_v22 = vmul.f32 %v3511_v60, %v2505_v47  ;;  %v2540_v32 = vmul.f32 %v3511_v60, %v2506_v13  ;;  %v2541_v4 = vmul.f32 %v3511_v60, %v2507_v58  ;;  %v3177_v13 = vld [vmem:[%s4710_s3] ss:$0 sm:$0xff] }
 0x199   : > { %v2542_v10 = vmul.f32 %v3511_v60, %v2508_v9  ;;  %v2543_v48 = vmul.f32 %v3511_v60, %v2509_v61  ;;  %v2544_v62 = vmul.f32 %v3511_v60, %v2510_v29  ;;  %v2545_v39 = vmul.f32 %v3511_v60, %v2511_v30  ;;  %v3176_v9 = vld [vmem:[%s4709_s2] ss:$0 sm:$0xff] }
 0x19a   : > { %v2546_v49 = vmul.f32 %v3511_v60, %v2512_v46  ;;  %v2547_v34 = vmul.f32 %v3511_v60, %v2513_v55  ;;  %v2548_v51 = vmul.f32 %v3511_v60, %v2514_v12  ;;  %v2549_v53 = vmul.f32 %v3511_v60, %v2515_v44 }
 0x19b   : > { %v2550_v7 = vmul.f32 %v3511_v60, %v2516_v52  ;;  %v2551_v35 = vmul.f32 %v3511_v60, %v2517_v0  ;;  %v2552_v36 = vmul.f32 %v3511_v60, %v2518_v27  ;;  %v2553_v5 = vmul.f32 %v3511_v60, %v2519_v57 }
 0x19c   : > { %v2554_v2 = vmul.f32 %v3511_v60, %v2520_v28  ;;  %v2555_v54 = vmul.f32 %v3511_v60, %v2521_v37  ;;  %v2556_v17 = vmul.f32 %v3511_v60, %v2522_v14  ;;  %v2557_v31 = vmul.f32 %v3511_v60, %v2523_v26 }
 0x19d   : > { %v2558_v40 = vmul.f32 %v3511_v60, %v2524_v45  ;;  %v2559_v43 = vmul.f32 %v3511_v60, %v2525_v38  ;;  %v2560_v21 = vmul.f32 %v3511_v60, %v2526_v3  ;;  %v2561_v63 = vmul.f32 %v3511_v60, %v2527_v41 }
 0x19e   : > { %v2569_v61 = vmul.f32 %v3176_v9, %v2530_v8  ;;  %v2570_v30 = vmul.f32 %v3176_v9, %v2531_v56  ;;  %v2571_v46 = vmul.f32 %v3176_v9, %v2532_v19  ;;  %v2572_v55 = vmul.f32 %v3176_v9, %v2533_v6 }
 0x19f   : > { %v2573_v12 = vmul.f32 %v3176_v9, %v2534_v16  ;;  %v2574_v44 = vmul.f32 %v3176_v9, %v2535_v50  ;;  %v2575_v52 = vmul.f32 %v3176_v9, %v2536_v15  ;;  %v2576_v27 = vmul.f32 %v3176_v9, %v2537_v33 }
 0x1a0   : > { %v2577_v57 = vmul.f32 %v3176_v9, %v2538_v18  ;;  %v2578_v28 = vmul.f32 %v3176_v9, %v2539_v22  ;;  %v2579_v14 = vmul.f32 %v3176_v9, %v2540_v32  ;;  %v2580_v26 = vmul.f32 %v3176_v9, %v2541_v4 }
 0x1a1   : > { %v2581_v45 = vmul.f32 %v3176_v9, %v2542_v10  ;;  %v2582_v11 = vmul.f32 %v3176_v9, %v2543_v48  ;;  %v2583_v3 = vmul.f32 %v3176_v9, %v2544_v62  ;;  %v2584_v41 = vmul.f32 %v3176_v9, %v2545_v39 }
 0x1a2   : > { %v2585_v1 = vmul.f32 %v3176_v9, %v2546_v49  ;;  %v2586_v25 = vmul.f32 %v3176_v9, %v2547_v34  ;;  %v2587_v59 = vmul.f32 %v3176_v9, %v2548_v51  ;;  %v2588_v20 = vmul.f32 %v3176_v9, %v2549_v53 }
 0x1a3   : > { %v2589_v23 = vmul.f32 %v3176_v9, %v2550_v7  ;;  %v2590_v42 = vmul.f32 %v3176_v9, %v2551_v35  ;;  %v2591_v24 = vmul.f32 %v3176_v9, %v2552_v36  ;;  %v2592_v47 = vmul.f32 %v3176_v9, %v2553_v5 }
 0x1a4   : > { %v2593_v58 = vmul.f32 %v3176_v9, %v2554_v2  ;;  %v2594_v60 = vmul.f32 %v3176_v9, %v2555_v54  ;;  %v2595_v29 = vmul.f32 %v3176_v9, %v2556_v17  ;;  %v2596_v0 = vmul.f32 %v3176_v9, %v2557_v31 }
 0x1a5   : > { %v2597_v37 = vmul.f32 %v3176_v9, %v2558_v40  ;;  %v2598_v38 = vmul.f32 %v3176_v9, %v2559_v43  ;;  %v2599_v8 = vmul.f32 %v3176_v9, %v2560_v21  ;;  %v2600_v56 = vmul.f32 %v3176_v9, %v2561_v63 }
 0x1a6   : > { %v4338_v19 = vadd.f32 %v3177_v13, %v2569_v61  ;;  %v4340_v6 = vadd.f32 %v3177_v13, %v2570_v30  ;;  %v4342_v16 = vadd.f32 %v3177_v13, %v2571_v46  ;;  %v4344_v50 = vadd.f32 %v3177_v13, %v2572_v55 }
 0x1a7   : > { %v4346_v15 = vadd.f32 %v3177_v13, %v2573_v12  ;;  %v4348_v33 = vadd.f32 %v3177_v13, %v2574_v44  ;;  %v4350_v18 = vadd.f32 %v3177_v13, %v2575_v52  ;;  %v4352_v22 = vadd.f32 %v3177_v13, %v2576_v27 }
 0x1a8   : > { %v4354_v32 = vadd.f32 %v3177_v13, %v2577_v57  ;;  %v4356_v4 = vadd.f32 %v3177_v13, %v2578_v28  ;;  %v4358_v10 = vadd.f32 %v3177_v13, %v2579_v14  ;;  %v4360_v48 = vadd.f32 %v3177_v13, %v2580_v26 }
 0x1a9   : > { %v4362_v62 = vadd.f32 %v3177_v13, %v2581_v45  ;;  %v4364_v39 = vadd.f32 %v3177_v13, %v2582_v11  ;;  %v4366_v49 = vadd.f32 %v3177_v13, %v2583_v3  ;;  %v4368_v34 = vadd.f32 %v3177_v13, %v2584_v41 }
 0x1aa   : > { %v4370_v51 = vadd.f32 %v3177_v13, %v2585_v1  ;;  %v4372_v53 = vadd.f32 %v3177_v13, %v2586_v25  ;;  %v4374_v7 = vadd.f32 %v3177_v13, %v2587_v59  ;;  %v4376_v35 = vadd.f32 %v3177_v13, %v2588_v20 }
 0x1ab   : > { %v4378_v36 = vadd.f32 %v3177_v13, %v2589_v23  ;;  %v4380_v5 = vadd.f32 %v3177_v13, %v2590_v42  ;;  %v4382_v2 = vadd.f32 %v3177_v13, %v2591_v24  ;;  %v4384_v54 = vadd.f32 %v3177_v13, %v2592_v47 }
 0x1ac   : > { %v4386_v17 = vadd.f32 %v3177_v13, %v2593_v58  ;;  %v4388_v31 = vadd.f32 %v3177_v13, %v2594_v60  ;;  %v4390_v40 = vadd.f32 %v3177_v13, %v2595_v29  ;;  %v4392_v43 = vadd.f32 %v3177_v13, %v2596_v0 }
 0x1ad   : > { %v4394_v21 = vadd.f32 %v3177_v13, %v2597_v37  ;;  %v4396_v63 = vadd.f32 %v3177_v13, %v2598_v38  ;;  %vm2640_vm5 = vcmp.ge.f32.partialorder %v4338_v19, 0.0  ;;  %vm2641_vm6 = vcmp.ge.f32.partialorder %v4340_v6, 0.0 }
 0x1ae   : > { %vm2642_vm7 = vcmp.ge.f32.partialorder %v4342_v16, 0.0  ;;  %vm2643_vm8 = vcmp.ge.f32.partialorder %v4344_v50, 0.0  ;;  %vm2644_vm9 = vcmp.ge.f32.partialorder %v4346_v15, 0.0  ;;  %vm2645_vm10 = vcmp.ge.f32.partialorder %v4348_v33, 0.0 }
 0x1af   : > { %vm2646_vm11 = vcmp.ge.f32.partialorder %v4350_v18, 0.0  ;;  %vm2647_vm12 = vcmp.ge.f32.partialorder %v4352_v22, 0.0  ;;  %vm2648_vm13 = vcmp.ge.f32.partialorder %v4354_v32, 0.0  ;;  %v4408_v9 = vadd.f32 %v3177_v13, %v2599_v8 }
 0x1b0   : > { %v2672_v61 = vmul.f32 0.2, %v4338_v19  ;;  %v2673_v30 = vmul.f32 0.2, %v4340_v6  ;;  %v2674_v46 = vmul.f32 0.2, %v4342_v16  ;;  %v4417_v55 = vadd.f32 %v3177_v13, %v2600_v56 }
 0x1b1   : > { %vm2655_vm4 = vcmp.ge.f32.partialorder %v4368_v34, 0.0  ;;  %vm2656_vm15 = vcmp.ge.f32.partialorder %v4370_v51, 0.0  ;;  %v2675_v12 = vmul.f32 0.2, %v4344_v50  ;;  %v2676_v44 = vmul.f32 0.2, %v4346_v15 }
 0x1b2   : > { %v2677_v52 = vmul.f32 0.2, %v4348_v33  ;;  %vm2661_vm3 = vcmp.ge.f32.partialorder %v4380_v5, 0.0  ;;  %v2678_v27 = vmul.f32 0.2, %v4350_v18  ;;  %v4436_v14 = vsel %vm2640_vm5, %v4338_v19, %v2672_v61 }
 0x1b3   : > { %v2679_v57 = vmul.f32 0.2, %v4352_v22  ;;  %v2680_v28 = vmul.f32 0.2, %v4354_v32  ;;  %vm2665_vm14 = vcmp.ge.f32.partialorder %v4388_v31, 0.0  ;;  %v4448_v3 = vsel %vm2641_vm6, %v4340_v6, %v2673_v30 }
 0x1b4   : > { %v2681_v26 = vmul.f32 0.2, %v4356_v4  ;;  %v2682_v45 = vmul.f32 0.2, %v4358_v10  ;;  %v2683_v11 = vmul.f32 0.2, %v4360_v48  ;;  %v4460_v59 = vsel %vm2642_vm7, %v4342_v16, %v2674_v46 }
 0x1b5   : > { %vm2667_vm0 = vcmp.ge.f32.partialorder %v4392_v43, 0.0  ;;  %vm2668_vm2 = vcmp.ge.f32.partialorder %v4394_v21, 0.0  ;;  %vm2669_vm1 = vcmp.ge.f32.partialorder %v4396_v63, 0.0  ;;  %v2684_v41 = vmul.f32 0.2, %v4362_v62 }
 0x1b6   : > { %v2685_v1 = vmul.f32 0.2, %v4364_v39  ;;  %v2686_v25 = vmul.f32 0.2, %v4366_v49  ;;  %vm2670_vm6 = vcmp.ge.f32.partialorder %v4408_v9, 0.0  ;;  %vm2671_vm5 = vcmp.ge.f32.partialorder %v4417_v55, 0.0 }
 0x1b7   : > { %v2687_v20 = vmul.f32 0.2, %v4368_v34  ;;  %v2688_v23 = vmul.f32 0.2, %v4370_v51  ;;  %v2689_v42 = vmul.f32 0.2, %v4372_v53  ;;  %v4470_v24 = vsel %vm2643_vm8, %v4344_v50, %v2675_v12 }
 0x1b8   : > { %v2690_v47 = vmul.f32 0.2, %v4374_v7  ;;  %v2691_v13 = vmul.f32 0.2, %v4376_v35  ;;  %v2692_v58 = vmul.f32 0.2, %v4378_v36  ;;  %v2708_v60 = vsel %vm2644_vm9, %v4346_v15, %v2676_v44 }
 0x1b9   : > { %v2693_v29 = vmul.f32 0.2, %v4380_v5  ;;  %v2694_v0 = vmul.f32 0.2, %v4382_v2  ;;  %v2695_v37 = vmul.f32 0.2, %v4384_v54  ;;  %v2709_v38 = vsel %vm2645_vm10, %v4348_v33, %v2677_v52 }
 0x1ba   : > { %vm2864_vm7 = vcmask 125952   ;;  %v2696_v8 = vmul.f32 0.2, %v4386_v17  ;;  %v2697_v56 = vmul.f32 0.2, %v4388_v31  ;;  %v2710_v6 = vsel %vm2646_vm11, %v4350_v18, %v2678_v27 }
 0x1bb   : > { %v2698_v19 = vmul.f32 0.2, %v4390_v40  ;;  %v2699_v16 = vmul.f32 0.2, %v4392_v43  ;;  %v2700_v50 = vmul.f32 0.2, %v4394_v21  ;;  %v2711_v33 = vsel %vm2647_vm12, %v4352_v22, %v2679_v57 }
 0x1bc   : > { %v2701_v15 = vmul.f32 0.2, %v4396_v63  ;;  %v2702_v61 = vmul.f32 0.2, %v4408_v9  ;;  %v2703_v30 = vmul.f32 0.2, %v4417_v55  ;;  %v2712_v46 = vsel %vm2648_vm13, %v4354_v32, %v2680_v28 }
 0x1bd   : > { %vm4717_vm8 = vcmp.ge.f32.partialorder %v4356_v4, 0.0  ;;  %vm4718_vm9 = vcmp.ge.f32.partialorder %v4358_v10, 0.0  ;;  %vm4719_vm10 = vcmp.ge.f32.partialorder %v4360_v48, 0.0  ;;  %vm4720_vm11 = vcmp.ge.f32.partialorder %v4362_v62, 0.0 }
 0x1be   : > { %v2713_v18 = vsel %vm4717_vm8, %v4356_v4, %v2681_v26  ;;  %v2714_v12 = vsel %vm4718_vm9, %v4358_v10, %v2682_v45  ;;  %v2715_v22 = vsel %vm4719_vm10, %v4360_v48, %v2683_v11  ;;  %v2716_v44 = vsel %vm4720_vm11, %v4362_v62, %v2684_v41 }
 0x1bf   : > { %vm4721_vm12 = vcmp.ge.f32.partialorder %v4364_v39, 0.0  ;;  %vm4722_vm13 = vcmp.ge.f32.partialorder %v4366_v49, 0.0  ;;  %v2719_v10 = vsel %vm2655_vm4, %v4368_v34, %v2687_v20  ;;  %v2720_v48 = vsel %vm2656_vm15, %v4370_v51, %v2688_v23 }
 0x1c0   : > { %v2717_v32 = vsel %vm4721_vm12, %v4364_v39, %v2685_v1  ;;  %v2718_v4 = vsel %vm4722_vm13, %v4366_v49, %v2686_v25  ;;  %vm4723_vm8 = vcmp.ge.f32.partialorder %v4372_v53, 0.0  ;;  %vm4724_vm9 = vcmp.ge.f32.partialorder %v4374_v7, 0.0 }
 0x1c1   : > { %v2721_v62 = vsel %vm4723_vm8, %v4372_v53, %v2689_v42  ;;  %v4532_v39 = vsel %vm4724_vm9, %v4374_v7, %v2690_v47  ;;  %vm4725_vm10 = vcmp.ge.f32.partialorder %v4376_v35, 0.0  ;;  %vm4726_vm4 = vcmp.ge.f32.partialorder %v4378_v36, 0.0 }
 0x1c2   : > { %v4537_v49 = vsel %vm4725_vm10, %v4376_v35, %v2691_v13  ;;  %v4542_v34 = vsel %vm4726_vm4, %v4378_v36, %v2692_v58  ;;  %v4547_v51 = vsel %vm2661_vm3, %v4380_v5, %v2693_v29  ;;  %vm4727_vm15 = vcmp.ge.f32.partialorder %v4382_v2, 0.0 }
 0x1c3   : > { %v4552_v53 = vsel %vm4727_vm15, %v4382_v2, %v2694_v0  ;;  %vm4728_vm11 = vcmp.ge.f32.partialorder %v4384_v54, 0.0  ;;  %vm4729_vm12 = vcmp.ge.f32.partialorder %v4386_v17, 0.0  ;;  %v4567_v36 = vsel %vm2665_vm14, %v4388_v31, %v2697_v56 }
 0x1c4   : > { %v4557_v7 = vsel %vm4728_vm11, %v4384_v54, %v2695_v37  ;;  %v4562_v35 = vsel %vm4729_vm12, %v4386_v17, %v2696_v8  ;;  %vm4730_vm3 = vcmp.ge.f32.partialorder %v4390_v40, 0.0  ;;  %v4582_v2 = vsel %vm2667_vm0, %v4392_v43, %v2699_v16 }
 0x1c5   : > { %v4577_v5 = vsel %vm4730_vm3, %v4390_v40, %v2698_v19  ;;  %v4587_v54 = vsel %vm2668_vm2, %v4394_v21, %v2700_v50  ;;  %v4592_v17 = vsel %vm2669_vm1, %v4396_v63, %v2701_v15  ;;  %v4597_v31 = vsel %vm2670_vm6, %v4408_v9, %v2702_v61 }
 0x1c6   : > { %v4602_v40 = vsel %vm2671_vm5, %v4417_v55, %v2703_v30  ;;  %v3213_v43 = vpack.c.bf16 %v4436_v14, %v4436_v14  ;;  %v3214_v21 = vpack.c.bf16 %v4448_v3, %v4448_v3  ;;  %v3215_v63 = vpack.c.bf16 %v4460_v59, %v4460_v59 }
 0x1c7   : > { %v3216_v9 = vpack.c.bf16 %v4470_v24, %v4470_v24  ;;  %v3217_v52 = vpack.c.bf16 %v2708_v60, %v2708_v60  ;;  %v3218_v27 = vpack.c.bf16 %v2709_v38, %v2709_v38  ;;  %v3219_v55 = vpack.c.bf16 %v2710_v6, %v2710_v6 }
 0x1c8   : > { %v3220_v57 = vpack.c.bf16 %v2711_v33, %v2711_v33  ;;  %v3221_v28 = vpack.c.bf16 %v2712_v46, %v2712_v46  ;;  %v3222_v14 = vpack.c.bf16 %v2713_v18, %v2713_v18  ;;  %2865 = vst.msk [vmem:[%s4572_s19] sm:$0xf] %vm2864_vm7, %v3213_v43  ;;  %2866 = vst.msk [vmem:[%s4572_s19 + $0x4] sm:$0xf] %vm2864_vm7, %v3214_v21 }
 0x1c9   : > { %v3223_v26 = vpack.c.bf16 %v2714_v12, %v2714_v12  ;;  %v3224_v45 = vpack.c.bf16 %v2715_v22, %v2715_v22  ;;  %v3225_v11 = vpack.c.bf16 %v2716_v44, %v2716_v44  ;;  %v3226_v3 = vpack.c.bf16 %v2717_v32, %v2717_v32  ;;  %2867 = vst.msk [vmem:[%s4572_s19 + $0x8] sm:$0xf] %vm2864_vm7, %v3215_v63 }
 0x1ca   : > { %2868 = vst.msk [vmem:[%s4572_s19 + $0xc] sm:$0xf] %vm2864_vm7, %v3216_v9  ;;  %2869 = vst.msk [vmem:[%s4572_s19 + $0x10] sm:$0xf] %vm2864_vm7, %v3217_v52  ;;  %v3227_v41 = vpack.c.bf16 %v2718_v4, %v2718_v4  ;;  %v3228_v1 = vpack.c.bf16 %v2719_v10, %v2719_v10  ;;  %v3229_v25 = vpack.c.bf16 %v2720_v48, %v2720_v48 }
 0x1cb   : > { %2870 = vst.msk [vmem:[%s4572_s19 + $0x14] sm:$0xf] %vm2864_vm7, %v3218_v27  ;;  %v3230_v59 = vpack.c.bf16 %v2721_v62, %v2721_v62  ;;  %2871 = vst.msk [vmem:[%s4572_s19 + $0x18] sm:$0xf] %vm2864_vm7, %v3219_v55  ;;  %v3231_v20 = vpack.c.bf16 %v4532_v39, %v4532_v39  ;;  %v3232_v23 = vpack.c.bf16 %v4537_v49, %v4537_v49 }
 0x1cc   : > { %2872 = vst.msk [vmem:[%s4572_s19 + $0x1c] sm:$0xf] %vm2864_vm7, %v3220_v57  ;;  %2873 = vst.msk [vmem:[%s4572_s19 + $0x20] sm:$0xf] %vm2864_vm7, %v3221_v28  ;;  %v3233_v42 = vpack.c.bf16 %v4542_v34, %v4542_v34  ;;  %v3234_v24 = vpack.c.bf16 %v4547_v51, %v4547_v51  ;;  %v3235_v47 = vpack.c.bf16 %v4552_v53, %v4552_v53 }
 0x1cd   : > { %2874 = vst.msk [vmem:[%s4572_s19 + $0x24] sm:$0xf] %vm2864_vm7, %v3222_v14  ;;  %2875 = vst.msk [vmem:[%s4572_s19 + $0x28] sm:$0xf] %vm2864_vm7, %v3223_v26  ;;  %v3236_v13 = vpack.c.bf16 %v4557_v7, %v4557_v7  ;;  %v3237_v58 = vpack.c.bf16 %v4562_v35, %v4562_v35  ;;  %v3238_v60 = vpack.c.bf16 %v4567_v36, %v4567_v36 }
 0x1ce   : > { %2876 = vst.msk [vmem:[%s4572_s19 + $0x2c] sm:$0xf] %vm2864_vm7, %v3224_v45  ;;  %2877 = vst.msk [vmem:[%s4572_s19 + $0x30] sm:$0xf] %vm2864_vm7, %v3225_v11  ;;  %v3239_v29 = vpack.c.bf16 %v4577_v5, %v4577_v5  ;;  %v3240_v0 = vpack.c.bf16 %v4582_v2, %v4582_v2  ;;  %v3241_v37 = vpack.c.bf16 %v4587_v54, %v4587_v54 }
 0x1cf   : > { %2878 = vst.msk [vmem:[%s4572_s19 + $0x34] sm:$0xf] %vm2864_vm7, %v3226_v3  ;;  %2879 = vst.msk [vmem:[%s4572_s19 + $0x38] sm:$0xf] %vm2864_vm7, %v3227_v41  ;;  %v3242_v38 = vpack.c.bf16 %v4592_v17, %v4592_v17  ;;  %v3243_v8 = vpack.c.bf16 %v4597_v31, %v4597_v31  ;;  %v3244_v56 = vpack.c.bf16 %v4602_v40, %v4602_v40 }
 0x1d0   : > { %2880 = vst.msk [vmem:[%s4572_s19 + $0x3c] sm:$0xf] %vm2864_vm7, %v3228_v1  ;;  %2881 = vst.msk [vmem:[%s4572_s19 + $0x40] sm:$0xf] %vm2864_vm7, %v3229_v25 }
 0x1d1   : > { %2882 = vst.msk [vmem:[%s4572_s19 + $0x44] sm:$0xf] %vm2864_vm7, %v3230_v59  ;;  %2883 = vst.msk [vmem:[%s4572_s19 + $0x48] sm:$0xf] %vm2864_vm7, %v3231_v20 }
 0x1d2   : > { %2884 = vst.msk [vmem:[%s4572_s19 + $0x4c] sm:$0xf] %vm2864_vm7, %v3232_v23  ;;  %2885 = vst.msk [vmem:[%s4572_s19 + $0x50] sm:$0xf] %vm2864_vm7, %v3233_v42 }
 0x1d3   : > { %2886 = vst.msk [vmem:[%s4572_s19 + $0x54] sm:$0xf] %vm2864_vm7, %v3234_v24  ;;  %2887 = vst.msk [vmem:[%s4572_s19 + $0x58] sm:$0xf] %vm2864_vm7, %v3235_v47 }
 0x1d4   : > { %2888 = vst.msk [vmem:[%s4572_s19 + $0x5c] sm:$0xf] %vm2864_vm7, %v3236_v13  ;;  %2889 = vst.msk [vmem:[%s4572_s19 + $0x60] sm:$0xf] %vm2864_vm7, %v3237_v58 }
 0x1d5   : > { %2890 = vst.msk [vmem:[%s4572_s19 + $0x64] sm:$0xf] %vm2864_vm7, %v3238_v60  ;;  %2891 = vst.msk [vmem:[%s4572_s19 + $0x68] sm:$0xf] %vm2864_vm7, %v3239_v29 }
 0x1d6   : > { %2892 = vst.msk [vmem:[%s4572_s19 + $0x6c] sm:$0xf] %vm2864_vm7, %v3240_v0  ;;  %2893 = vst.msk [vmem:[%s4572_s19 + $0x70] sm:$0xf] %vm2864_vm7, %v3241_v37 }
 0x1d7   : > { %2894 = vst.msk [vmem:[%s4572_s19 + $0x74] sm:$0xf] %vm2864_vm7, %v3242_v38  ;;  %2895 = vst.msk [vmem:[%s4572_s19 + $0x78] sm:$0xf] %vm2864_vm7, %v3243_v8 }
 0x1d8   : > { %2896 = vst.msk [vmem:[%s4572_s19 + $0x7c] sm:$0xf] %vm2864_vm7, %v3244_v56 }
 0x1d9 PF: > { %s14_s15 = sadd.s32 1, %s3518_s15  }
 0x1da   : > { %p11_p4 = scmp.ge.s32.totalorder %s14_s15, 4  }
 0x1dc   :  { %13 = sbr.rel (!%p11_p4) target bundleno = 1 (0x1), region = 67 }

// kernel: critic_forward.6
= control target key start
LH: loop header
LB: loop body
LE: loop exit
PB: predicated region body
PF: predicated region fallthrough
CT: control target
= control target key end

     0   :  { %s1473_s15 = smov 0   ;;  %s1706_s0 = inlined_call_operand.vmem [shape: bf16[2,9,9,64], index: 0, kind: input, shape index: {}]   ;;  %s1707_s1 = inlined_call_operand.vmem [shape: bf16[256,32], index: 1, kind: input, shape index: {}]   ;;  %s1708_s2 = inlined_call_operand.vmem [shape: f32[1,32], index: 2, kind: input, shape index: {}]   ;;  %s1709_s3 = inlined_call_operand.vmem [shape: f32[1,32], index: 3, kind: input, shape index: {}]   ;;  %s1710_s4 = inlined_call_operand.vmem [shape: bf16[2,64,32], index: 4, kind: output, shape index: {}]  }
   0x1 LB: > { %s1208_s16 = sadd.s32 4294967295, %s1446_s15   ;;  %p1212_p0 = scmp.ge.s32.totalorder %s1446_s15, 1  ;;  %s1446_s15 = sphi %s1473_s15, %s14_s15  }
   0x2   : > { %p162_p1 = scmp.lt.s32.totalorder %s1446_s15, 3 }
   0x4   : > { %p163_p2 = pnand %p1212_p0, %p162_p1 }
   0x5   : > { %p188_p3 = scmp.lt.s32.totalorder (!%p163_p2), %s1208_s16, 1 }
   0x6   : > { %166 = sbr.rel (%p163_p2) target bundleno = 321 (0x141), region = 36 }
   0xb   : > { %v1414_v0 = vld [vmem:[%s1707_s1 + $0x38] sm:$0xff]   ;;  %v1416_v2 = vld [vmem:[%s1707_s1 + $0x30] sm:$0xff]   ;;  %s1714_s16 = smov (!%p188_p3, %s1208_s16), 1  ;;  %v1418_v4 = vld [vmem:[%s1707_s1 + $0x28] sm:$0xff]   ;;  %vm382_vm0 = vcmask 523264   ;;  %vm984_vm4 = vcmask 261120  }
   0xc   : > { %v1415_v1 = vld [vmem:[%s1707_s1 + $0x18] sm:$0xff]   ;;  %1341 = vmatprep.subr.bf16.mxu0 %v1414_v0  ;;  %v1417_v3 = vld [vmem:[%s1707_s1 + $0x10] sm:$0xff]   ;;  %s1405_s27 = smul.u32 72, %s1714_s16  ;;  %v1419_v5 = vld [vmem:[%s1707_s1 + $0x8] sm:$0xff]   ;;  %vm223_vm1 = vsmask.f32 3328 }
   0xd   : > { %1357 = vmatprep.subr.bf16.mxu1 %v1415_v1  ;;  %1342 = vmatpush3.bf16.msra.mxu0 %v1414_v0  ;;  %v1420_v6 = vld [vmem:[%s1707_s1 + $0x20] sm:$0xff]   ;;  %vm224_vm2 = vsmask.f32 7440  ;;  %v1520_v18 = vld [vmem:[%s1707_s1 + $0x58] sm:$0xff]   ;;  %v1427_v53 = vld [vmem:[%s1707_s1 + $0x70] sm:$0xff]   ;;  %vm1144_vm5 = vcmask 257024  }
   0xe   : > { %1358 = vmatpush3.bf16.msra.mxu1 %v1415_v1  ;;  %1343 = vmatprep.subr.bf16.mxu0 %v1416_v2  ;;  %s1508_s8 = scalar_lea.vmem %s1706_s0, %s1405_s27  ;;  %v1421_v7 = vld [vmem:[%s1707_s1] sm:$0xff]   ;;  %vm1527_vm3 = vmor %vm223_vm1, %vm224_vm2  ;;  %v1425_v38 = vld [vmem:[%s1707_s1 + $0x78] sm:$0xff]   ;;  %s1300_s7 = sshll.u32 %s1714_s16, 5 }
   0xf   : > { %1359 = vmatprep.subr.bf16.mxu1 %v1417_v3  ;;  %v199_v8 = vld [vmem:[%s1508_s8] sm:$0xf]  ;;  %v200_v9 = vld [vmem:[%s1508_s8 + $0x8] sm:$0xf]  ;;  %v215_v10 = vld [vmem:[%s1508_s8 + $0x4] sm:$0x1]  ;;  %s197_s16 = scalar_lea.vmem %s1710_s4, %s1300_s7 }
  0x10   : > { %v227_v11 = vshrl.u32 %v199_v8, 16  ;;  %v230_v12 = vshll.u32 %v199_v8, 16  ;;  %v241_v13 = vshrl.u32 %v200_v9, 16  ;;  %v244_v14 = vshll.u32 %v200_v9, 16  ;;  %v216_v15 = vld [vmem:[%s1508_s8 + $0xc] sm:$0x1] }
  0x11   : > { %1344 = vmatpush3.bf16.msra.mxu0 %v1416_v2  ;;  %v1228_v16 = vcombine.low %v199_v8, %v200_v9  ;;  %v236_v17 = vshll.u32 %v215_v10, 16  ;;  %v201_v23 = vld [vmem:[%s1508_s8 + $0x10] sm:$0xf]  ;;  %v250_v25 = vshll.u32 %v216_v15, 16  ;;  %v202_v26 = vld [vmem:[%s1508_s8 + $0x18] sm:$0xf] }
  0x12   : > { %1360 = vmatpush3.bf16.msra.mxu1 %v1417_v3  ;;  %1345 = vmatprep.subr.bf16.mxu0 %v1418_v4  ;;  %v229_v19 = vrot.slane %v227_v11, 4  ;;  %v232_v20 = vrot.slane %v230_v12, 5  ;;  %v243_v21 = vrot.slane %v241_v13, 4  ;;  %v246_v22 = vrot.slane %v244_v14, 5  ;;  %v217_v43 = vld [vmem:[%s1508_s8 + $0x14] sm:$0x1] }
  0x13   : > { %1361 = vmatprep.subr.bf16.mxu1 %v1419_v5  ;;  %v238_v24 = vrot.slane %v236_v17, 5  ;;  %v255_v27 = vshrl.u32 %v201_v23, 16  ;;  %v258_v28 = vshll.u32 %v201_v23, 16  ;;  %1365 = vmatprep.mubr.msk.bf16.mxu1 %vm382_vm0, %v1228_v16  ;;  %v269_v31 = vshrl.u32 %v202_v26, 16  ;;  %v218_v44 = vld [vmem:[%s1508_s8 + $0x1c] sm:$0x1] }
  0x14   : > { %v233_v29 = vor.u32 %v232_v20, %v229_v19  ;;  %v247_v30 = vor.u32 %v246_v22, %v243_v21  ;;  %v272_v32 = vshll.u32 %v202_v26, 16  ;;  %v252_v34 = vrot.slane %v250_v25, 5  ;;  %v203_v56 = vld [vmem:[%s1508_s8 + $0x20] sm:$0xf]  ;;  %v204_v57 = vld [vmem:[%s1508_s8 + $0x28] sm:$0xf] }
  0x15   : > { %1346 = vmatpush3.bf16.msra.mxu0 %v1418_v4  ;;  %v257_v35 = vrot.slane %v255_v27, 4  ;;  %v260_v36 = vrot.slane %v258_v28, 5  ;;  %v1229_v37 = vcombine.low %v201_v23, %v202_v26  ;;  %v271_v41 = vrot.slane %v269_v31, 4  ;;  %v219_v62 = vld [vmem:[%s1508_s8 + $0x24] sm:$0x1]  ;;  %v1431_v10 = vld [vmem:[%s1707_s1 + $0x68] sm:$0xff]  }
  0x16   : > { %1362 = vmatpush3.bf16.msra.mxu1 %v1419_v5  ;;  %1347 = vmatprep.subr.bf16.mxu0 %v1420_v6  ;;  %v234_v39 = vrot.slane %v233_v29, 4  ;;  %v248_v40 = vrot.slane %v247_v30, 4  ;;  %v274_v42 = vrot.slane %v272_v32, 5  ;;  %v264_v48 = vshll.u32 %v217_v43, 16  ;;  %v220_v2 = vld [vmem:[%s1508_s8 + $0x2c] sm:$0x1] }
  0x17   : > { %1363 = vmatprep.subr.bf16.mxu1 %v1421_v7  ;;  %v261_v45 = vor.u32 %v260_v36, %v257_v35  ;;  %v278_v52 = vshll.u32 %v218_v44, 16  ;;  %v283_v59 = vshrl.u32 %v203_v56, 16  ;;  %v286_v60 = vshll.u32 %v203_v56, 16  ;;  %v205_v4 = vld [vmem:[%s1508_s8 + $0x30] sm:$0xf]  ;;  %v1433_v21 = vld [vmem:[%s1707_s1 + $0x60] sm:$0xff]  }
  0x18   : > { %v239_v46 = vsel %vm1527_vm3, %v234_v39, %v238_v24  ;;  %v253_v47 = vsel %vm1527_vm3, %v248_v40, %v252_v34  ;;  %v275_v49 = vor.u32 %v274_v42, %v271_v41  ;;  %v266_v54 = vrot.slane %v264_v48, 5  ;;  %v206_v9 = vld [vmem:[%s1508_s8 + $0x38] sm:$0xf]  ;;  %v1426_v12 = vld [vmem:[%s1707_s1 + $0x50] sm:$0xff]   ;;  %v1430_v34 = vld [vmem:[%s1707_s1 + $0x48] sm:$0xff]  }
  0x19   : > { %1348 = vmatpush3.bf16.msra.mxu0 %v1420_v6  ;;  %v1216_v50 = vcombine.low %v239_v46, %v253_v47  ;;  %v262_v51 = vrot.slane %v261_v45, 4  ;;  %v280_v58 = vrot.slane %v278_v52, 5  ;;  %v297_v61 = vshrl.u32 %v204_v57, 16  ;;  %v221_v30 = vld [vmem:[%s1508_s8 + $0x34] sm:$0x1]  ;;  %v1432_v42 = vld [vmem:[%s1707_s1 + $0x40] sm:$0xff]  }
  0x1a   : > { %1364 = vmatpush3.bf16.msra.mxu1 %v1421_v7  ;;  %1373 = vmatprep.subr.bf16.mxu0 %v1520_v18  ;;  %v276_v55 = vrot.slane %v275_v49, 4  ;;  %v300_v0 = vshll.u32 %v204_v57, 16  ;;  %v1230_v1 = vcombine.low %v203_v56, %v204_v57  ;;  %v292_v3 = vshll.u32 %v219_v62, 16  ;;  %v222_v35 = vld [vmem:[%s1508_s8 + $0x3c] sm:$0x1] }
  0x1b   : > { %1389 = vmatprep.subr.bf16.mxu1 %v1425_v38  ;;  %1349 = vmatprep.mubr.msk.bf16.mxu0 %vm382_vm0, %v1216_v50  ;;  %v267_v63 = vsel %vm1527_vm3, %v262_v51, %v266_v54  ;;  %v285_v6 = vrot.slane %v283_v59, 4  ;;  %v288_v7 = vrot.slane %v286_v60, 5  ;;  %v299_v8 = vrot.slane %v297_v61, 4  ;;  %v1260_v46 = vld [vmem:[%s1508_s8 + $0x8] sm:$0xf] }
  0x1c   : > { %v281_v5 = vsel %vm1527_vm3, %v276_v55, %v280_v58  ;;  %v302_v13 = vrot.slane %v300_v0, 5  ;;  %v294_v14 = vrot.slane %v292_v3, 5  ;;  %v306_v15 = vshll.u32 %v220_v2, 16  ;;  %v1261_v47 = vld [vmem:[%s1508_s8 + $0xc] sm:$0x1] }
  0x1d   : > { %1366 = vmatmul.mubr.msk.bf16.vlgmr.msra.gmra.mxu1 %vm382_vm0, %v1229_v37  ;;  %v1217_v11 = vcombine.low %v267_v63, %v281_v5  ;;  %v289_v16 = vor.u32 %v288_v7, %v285_v6  ;;  %v311_v17 = vshrl.u32 %v205_v4, 16  ;;  %v314_v19 = vshll.u32 %v205_v4, 16  ;;  %v1262_v49 = vld [vmem:[%s1508_s8 + $0x10] sm:$0xf]  ;;  %v1263_v50 = vld [vmem:[%s1508_s8 + $0x14] sm:$0x1] }
  0x1e   : > { %1390 = vmatpush3.bf16.msra.mxu1 %v1425_v38  ;;  %1369 = vmatprep.mubr.msk.bf16.mxu1 %vm382_vm0, %v1230_v1  ;;  %v325_v20 = vshrl.u32 %v206_v9, 16  ;;  %v303_v22 = vor.u32 %v302_v13, %v299_v8  ;;  %v308_v23 = vrot.slane %v306_v15, 5  ;;  %v328_v24 = vshll.u32 %v206_v9, 16  ;;  %v1434_v0 = vld [vmem:[%s1508_s8 + $0x8] ss:$8 sps:$4 sm:$0xff]  }
  0x1f   : > { %1391 = vmatprep.subr.bf16.mxu1 %v1427_v53  ;;  %1350 = vmatmul.mubr.msk.bf16.vlgmr.msra.gmra.mxu0 %vm382_vm0, %v1217_v11  ;;  %v1231_v25 = vcombine.low %v205_v4, %v206_v9  ;;  %v290_v26 = vrot.slane %v289_v16, 4  ;;  %v313_v27 = vrot.slane %v311_v17, 4  ;;  %v316_v28 = vrot.slane %v314_v19, 5  ;;  %v1264_v3 = vld [vmem:[%s1508_s8 + $0x18] sm:$0xf] }
  0x20   : > { %1374 = vmatpush3.bf16.msra.mxu0 %v1520_v18  ;;  %v327_v29 = vrot.slane %v325_v20, 4  ;;  %v304_v31 = vrot.slane %v303_v22, 4  ;;  %v330_v32 = vrot.slane %v328_v24, 5  ;;  %v320_v36 = vshll.u32 %v221_v30, 16  ;;  %v1265_v4 = vld [vmem:[%s1508_s8 + $0x1c] sm:$0x1] }
  0x21   : > { %1375 = vmatprep.subr.bf16.mxu0 %v1426_v12  ;;  %v295_v18 = vsel %vm1527_vm3, %v290_v26, %v294_v14  ;;  %v317_v37 = vor.u32 %v316_v28, %v313_v27  ;;  %v334_v38 = vshll.u32 %v222_v35, 16  ;;  %v744_v51 = vshrl.u32 %v1260_v46, 16  ;;  %v1266_v6 = vld [vmem:[%s1508_s8 + $0x20] sm:$0xf]  ;;  %v1267_v7 = vld [vmem:[%s1508_s8 + $0x24] sm:$0x1] }
  0x22   : > { %1392 = vmatpush3.bf16.msra.mxu1 %v1427_v53  ;;  %v309_v39 = vsel %vm1527_vm3, %v304_v31, %v308_v23  ;;  %v322_v40 = vrot.slane %v320_v36, 5  ;;  %v331_v41 = vor.u32 %v330_v32, %v327_v29  ;;  %v747_v53 = vshll.u32 %v1260_v46, 16  ;;  %v1435_v22 = vld [vmem:[%s1508_s8 + $0x18] ss:$8 sps:$4 sm:$0xff]   ;;  %v1268_v27 = vld [vmem:[%s1508_s8 + $0x28] sm:$0xf] }
  0x23   : > { %1393 = vmatprep.subr.bf16.mxu1 %v1431_v10  ;;  %v1218_v43 = vcombine.low %v295_v18, %v309_v39  ;;  %v318_v44 = vrot.slane %v317_v37, 4  ;;  %v336_v45 = vrot.slane %v334_v38, 5  ;;  %v753_v54 = vshll.u32 %v1261_v47, 16  ;;  %v1269_v28 = vld [vmem:[%s1508_s8 + $0x2c] sm:$0x1] }
  0x24   : > { %1376 = vmatpush3.bf16.msra.mxu0 %v1426_v12  ;;  %v332_v48 = vrot.slane %v331_v41, 4  ;;  %v758_v55 = vshrl.u32 %v1262_v49, 16  ;;  %v746_v57 = vrot.slane %v744_v51, 4  ;;  %v761_v58 = vshll.u32 %v1262_v49, 16  ;;  %v1270_v31 = vld [vmem:[%s1508_s8 + $0x30] sm:$0xf] }
  0x25   : > { %1370 = vmatmul.mubr.msk.bf16.gmra.mxu1 %vm382_vm0, %v1231_v25  ;;  %1377 = vmatprep.subr.bf16.mxu0 %v1430_v34  ;;  %v323_v52 = vsel %vm1527_vm3, %v318_v44, %v322_v40  ;;  %v767_v59 = vshll.u32 %v1263_v50, 16  ;;  %v749_v61 = vrot.slane %v747_v53, 5  ;;  %v755_v62 = vrot.slane %v753_v54, 5  ;;  %v1271_v32 = vld [vmem:[%s1508_s8 + $0x34] sm:$0x1] }
  0x26   : > { %1394 = vmatpush3.bf16.msra.mxu1 %v1431_v10  ;;  %1353 = vmatprep.mubr.msk.bf16.mxu0 %vm382_vm0, %v1218_v43  ;;  %v337_v56 = vsel %vm1527_vm3, %v332_v48, %v336_v45  ;;  %v760_v63 = vrot.slane %v758_v55, 4  ;;  %v763_v1 = vrot.slane %v761_v58, 5  ;;  %v772_v8 = vshrl.u32 %v1264_v3, 16  ;;  %v1436_v46 = vld [vmem:[%s1508_s8 + $0x28] ss:$8 sps:$4 sm:$0xff]  }
  0x27   : > { %1395 = vmatprep.subr.bf16.mxu1 %v1433_v21  ;;  %v1219_v60 = vcombine.low %v323_v52, %v337_v56  ;;  %v769_v2 = vrot.slane %v767_v59, 5  ;;  %v750_v5 = vor.u32 %v749_v61, %v746_v57  ;;  %v775_v9 = vshll.u32 %v1264_v3, 16  ;;  %v1272_v51 = vld [vmem:[%s1508_s8 + $0x38] sm:$0xf]  ;;  %v1273_v52 = vld [vmem:[%s1508_s8 + $0x3c] sm:$0x1] }
  0x28   : > { %1378 = vmatpush3.bf16.msra.mxu0 %v1430_v34  ;;  %v764_v10 = vor.u32 %v763_v1, %v760_v63  ;;  %v781_v11 = vshll.u32 %v1265_v4, 16  ;;  %v786_v12 = vshrl.u32 %v1266_v6, 16  ;;  %v789_v13 = vshll.u32 %v1266_v6, 16  ;;  %v1274_v55 = vld [vmem:[%s1508_s8 + $0x40] sm:$0xf] }
  0x29   : > { %1379 = vmatprep.subr.bf16.mxu0 %v1432_v42  ;;  %1354 = vmatmul.mubr.msk.bf16.gmra.mxu0 %vm382_vm0, %v1219_v60  ;;  %v751_v14 = vrot.slane %v750_v5, 4  ;;  %v774_v15 = vrot.slane %v772_v8, 4  ;;  %v777_v16 = vrot.slane %v775_v9, 5  ;;  %v795_v17 = vshll.u32 %v1267_v7, 16  ;;  %v1275_v56 = vld [vmem:[%s1508_s8 + $0x44] sm:$0x1] }
  0x2a   : > { %1396 = vmatpush3.bf16.msra.mxu1 %v1433_v21  ;;  %1381 = vmatprep.mubr.msk.bf16.mxu0 %vm382_vm0, %v1434_v0  ;;  %v765_v19 = vrot.slane %v764_v10, 4  ;;  %v788_v20 = vrot.slane %v786_v12, 4  ;;  %v791_v21 = vrot.slane %v789_v13, 5  ;;  %v783_v25 = vrot.slane %v781_v11, 5  ;;  %v1437_v5 = vld [vmem:[%s1508_s8 + $0x38] ss:$8 sps:$4 sm:$0xff]  }
  0x2b   : > { %v756_v23 = vsel %vm1527_vm3, %v751_v14, %v755_v62  ;;  %v778_v24 = vor.u32 %v777_v16, %v774_v15  ;;  %v797_v26 = vrot.slane %v795_v17, 5  ;;  %v800_v34 = vshrl.u32 %v1268_v27, 16 }
  0x2c   : > { %1380 = vmatpush3.bf16.msra.mxu0 %v1432_v42  ;;  %v770_v29 = vsel %vm1527_vm3, %v765_v19, %v769_v2  ;;  %v792_v30 = vor.u32 %v791_v21, %v788_v20  ;;  %v803_v35 = vshll.u32 %v1268_v27, 16  ;;  %v809_v37 = vshll.u32 %v1269_v28, 16 }
  0x2d   : > { %v1276_v36 = vcombine.low %v756_v23, %v770_v29  ;;  %v779_v18 = vrot.slane %v778_v24, 4  ;;  %v814_v38 = vshrl.u32 %v1270_v31, 16  ;;  %v802_v40 = vrot.slane %v800_v34, 4 }
  0x2e   : > { %v793_v39 = vrot.slane %v792_v30, 4  ;;  %v805_v41 = vrot.slane %v803_v35, 5  ;;  %v817_v42 = vshll.u32 %v1270_v31, 16  ;;  %v823_v45 = vshll.u32 %v1271_v32, 16 }
  0x2f   : > { %1397 = vmatprep.mubr.msk.bf16.mxu1 %vm382_vm0, %v1276_v36  ;;  %v784_v43 = vsel %vm1527_vm3, %v779_v18, %v783_v25  ;;  %v816_v44 = vrot.slane %v814_v38, 4  ;;  %v811_v49 = vrot.slane %v809_v37, 5  ;;  %v828_v57 = vshrl.u32 %v1272_v51, 16 }
  0x30   : > { %v798_v47 = vsel %vm1527_vm3, %v793_v39, %v797_v26  ;;  %v806_v48 = vor.u32 %v805_v41, %v802_v40  ;;  %v819_v50 = vrot.slane %v817_v42, 5  ;;  %v825_v54 = vrot.slane %v823_v45, 5 }
  0x31   : > { %1382 = vmatmul.mubr.msk.bf16.vlgmr.msra.gmra.mxu0 %vm382_vm0, %v1435_v22  ;;  %v1277_v53 = vcombine.low %v784_v43, %v798_v47  ;;  %v831_v60 = vshll.u32 %v1272_v51, 16  ;;  %v837_v61 = vshll.u32 %v1273_v52, 16  ;;  %v830_v62 = vrot.slane %v828_v57, 4 }
  0x32   : > { %1385 = vmatprep.mubr.msk.bf16.mxu0 %vm382_vm0, %v1436_v46  ;;  %v807_v58 = vrot.slane %v806_v48, 4  ;;  %v820_v59 = vor.u32 %v819_v50, %v816_v44  ;;  %v842_v63 = vshrl.u32 %v1274_v55, 16  ;;  %v845_v0 = vshll.u32 %v1274_v55, 16 }
  0x33   : > { %1398 = vmatmul.mubr.msk.bf16.vlgmr.msra.gmra.mxu1 %vm382_vm0, %v1277_v53  ;;  %v851_v1 = vshll.u32 %v1275_v56, 16  ;;  %v833_v4 = vrot.slane %v831_v60, 5  ;;  %v839_v10 = vrot.slane %v837_v61, 5 }
  0x34   : > { %v812_v2 = vsel %vm1527_vm3, %v807_v58, %v811_v49  ;;  %v821_v3 = vrot.slane %v820_v59, 4  ;;  %v844_v6 = vrot.slane %v842_v63, 4  ;;  %v847_v7 = vrot.slane %v845_v0, 5 }
  0x35   : > { %v834_v9 = vor.u32 %v833_v4, %v830_v62  ;;  %v853_v13 = vrot.slane %v851_v1, 5 }
  0x36   : > { %v826_v8 = vsel %vm1527_vm3, %v821_v3, %v825_v54  ;;  %v848_v12 = vor.u32 %v847_v7, %v844_v6 }
  0x37   : > { %v1278_v11 = vcombine.low %v812_v2, %v826_v8  ;;  %v835_v14 = vrot.slane %v834_v9, 4 }
  0x38   : > { %v849_v15 = vrot.slane %v848_v12, 4 }
  0x39   : > { %1386 = vmatmul.mubr.msk.bf16.gmra.mxu0 %vm382_vm0, %v1437_v5  ;;  %1401 = vmatprep.mubr.msk.bf16.mxu1 %vm382_vm0, %v1278_v11  ;;  %v840_v16 = vsel %vm1527_vm3, %v835_v14, %v839_v10 }
  0x3a   : > { %v854_v17 = vsel %vm1527_vm3, %v849_v15, %v853_v13 }
  0x3b   : > { %v1279_v19 = vcombine.low %v840_v16, %v854_v17 }
  0x3d   : > { %1402 = vmatmul.mubr.msk.bf16.gmra.mxu1 %vm382_vm0, %v1279_v19 }
  0xdd   : > { %v1367_v20 = vpop.f32.mrf.mxu1 }
  0xdf   : > { %v550_v21 = vpop.f32.mrf.mxu1  ;;  %v1351_v23 = vpop.f32.mrf.mxu0 }
  0xe0   : > { %v559_v38 = vadd.f32 %v1367_v20, %v1351_v23 }
  0xe1   : > { %v1368_v22 = vpop.f32.mrf.mxu1  ;;  %v429_v24 = vpop.f32.mrf.mxu0 }
  0xe2   : > { %v551_v18 = vadd.f32 %v550_v21, %v429_v24 }
  0xe3   : > { %v553_v25 = vpop.f32.mrf.mxu1  ;;  %v1352_v26 = vpop.f32.mrf.mxu0 }
  0xe4   : > { %v562_v42 = vadd.f32 %v1368_v22, %v1352_v26 }
  0xe5   : > { %v432_v27 = vpop.f32.mrf.mxu0  ;;  %v1371_v28 = vpop.f32.mrf.mxu1 }
  0xe6   : > { %v554_v43 = vadd.f32 %v553_v25, %v432_v27 }
  0xe7   : > { %v566_v30 = vpop.f32.mrf.mxu1 }
  0xe9   : > { %v1355_v29 = vpop.f32.mrf.mxu0  ;;  %v1372_v32 = vpop.f32.mrf.mxu1 }
  0xea   : > { %v575_v0 = vadd.f32 %v1371_v28, %v1355_v29 }
  0xeb   : > { %v445_v31 = vpop.f32.mrf.mxu0  ;;  %v569_v33 = vpop.f32.mrf.mxu1 }
  0xec   : > { %v567_v58 = vadd.f32 %v566_v30, %v445_v31 }
  0xed   : > { %v1356_v34 = vpop.f32.mrf.mxu0 }
  0xee   : > { %v578_v1 = vadd.f32 %v1372_v32, %v1356_v34 }
  0xef   : > { %v448_v35 = vpop.f32.mrf.mxu0 }
  0xf0   : > { %v570_v10 = vadd.f32 %v569_v33, %v448_v35 }
  0xf1   : > { %v1383_v36 = vpop.f32.mrf.mxu0 }
  0xf2   : > { %v721_v44 = vadd.f32 %v1383_v36, %v559_v38 }
  0xf3   : > { %v688_v37 = vpop.f32.mrf.mxu0  ;;  %v1399_v40 = vpop.f32.mrf.mxu1 }
  0xf4   : > { %v719_v39 = vadd.f32 %v688_v37, %v551_v18  ;;  %v1633_v52 = vadd.f32 %v1399_v40, %v721_v44 }
  0xf5   : > { %v1384_v41 = vpop.f32.mrf.mxu0  ;;  %v945_v45 = vpop.f32.mrf.mxu1 }
  0xf6   : > { %v1631_v47 = vadd.f32 %v945_v45, %v719_v39  ;;  %v722_v48 = vadd.f32 %v1384_v41, %v562_v42  ;;  %v1010_v60 = vmul.f32 %v1633_v52, %v1633_v52  ;;  %v988_v4 = vsel %vm984_vm4, %v1633_v52, 0.0 }
  0xf7   : > { %v691_v46 = vpop.f32.mrf.mxu0  ;;  %v1400_v50 = vpop.f32.mrf.mxu1 }
  0xf8   : > { %v720_v49 = vadd.f32 %v691_v46, %v554_v43  ;;  %v1008_v55 = vmul.f32 %v1631_v47, %v1631_v47  ;;  %v1637_v56 = vadd.f32 %v1400_v50, %v722_v48  ;;  %v985_v61 = vsel %vm984_vm4, %v1631_v47, 0.0 }
  0xf9   : > { %v1387_v51 = vpop.f32.mrf.mxu0  ;;  %v948_v53 = vpop.f32.mrf.mxu1  ;;  %v1019_v14 = vsel %vm984_vm4, %v1010_v60, 0.0 }
  0xfa   : > { %v1639_v57 = vadd.f32 %v948_v53, %v720_v49  ;;  %v1016_v5 = vsel %vm984_vm4, %v1008_v55, 0.0  ;;  %v1011_v6 = vmul.f32 %v1637_v56, %v1637_v56  ;;  %v725_v13 = vadd.f32 %v1387_v51, %v575_v0 }
  0xfb   : > { %v704_v54 = vpop.f32.mrf.mxu0  ;;  %v990_v15 = vsel %vm984_vm4, %v1637_v56, 0.0 }
  0xfc   : > { %v986_v62 = vsel %vm984_vm4, %v1639_v57, 0.0  ;;  %v1009_v63 = vmul.f32 %v1639_v57, %v1639_v57  ;;  %v723_v3 = vadd.f32 %v704_v54, %v567_v58  ;;  %v1021_v22 = vsel %vm984_vm4, %v1011_v6, 0.0 }
  0xfd   : > { %v1388_v59 = vpop.f32.mrf.mxu0  ;;  %v987_v2 = vadd.f32 %v986_v62, %v985_v61  ;;  %v1403_v8 = vpop.f32.mrf.mxu1 }
  0xfe   : > { %v1017_v7 = vsel %vm984_vm4, %v1009_v63, 0.0  ;;  %v726_v20 = vadd.f32 %v1388_v59, %v578_v1  ;;  %v982_v25 = vadd.f32 %v1403_v8, %v725_v13 }
  0xff   : > { %v707_v9 = vpop.f32.mrf.mxu0  ;;  %v989_v11 = vadd.f32 %v988_v4, %v987_v2  ;;  %v1018_v12 = vadd.f32 %v1017_v7, %v1016_v5  ;;  %v961_v16 = vpop.f32.mrf.mxu1 }
 0x100   : > { %v1658_v19 = vadd.f32 %v961_v16, %v723_v3  ;;  %v724_v21 = vadd.f32 %v707_v9, %v570_v10  ;;  %v1014_v33 = vmul.f32 %v982_v25, %v982_v25  ;;  %v996_v38 = vsel %vm984_vm4, %v982_v25, 0.0 }
 0x101   : > { %v1020_v17 = vadd.f32 %v1019_v14, %v1018_v12  ;;  %v991_v23 = vadd.f32 %v990_v15, %v989_v11  ;;  %v1404_v24 = vpop.f32.mrf.mxu1  ;;  %v1288_v15 = vld [vmem:[%s1708_s2] ss:$0 sm:$0xff] }
 0x102   : > { %v992_v26 = vsel %vm984_vm4, %v1658_v19, 0.0  ;;  %v1012_v27 = vmul.f32 %v1658_v19, %v1658_v19  ;;  %v983_v32 = vadd.f32 %v1404_v24, %v726_v20  ;;  %v1027_v43 = vsel %vm984_vm4, %v1014_v33, 0.0 }
 0x103   : > { %v1022_v28 = vadd.f32 %v1021_v22, %v1020_v17  ;;  %v993_v29 = vadd.f32 %v992_v26, %v991_v23  ;;  %v964_v30 = vpop.f32.mrf.mxu1 }
 0x104   : > { %v1023_v31 = vsel %vm984_vm4, %v1012_v27, 0.0  ;;  %v981_v34 = vadd.f32 %v964_v30, %v724_v21  ;;  %v1015_v39 = vmul.f32 %v983_v32, %v983_v32  ;;  %v998_v44 = vsel %vm984_vm4, %v983_v32, 0.0 }
 0x105   : > { %v1024_v35 = vadd.f32 %v1023_v31, %v1022_v28 }
 0x106   : > { %v994_v36 = vsel %vm984_vm4, %v981_v34, 0.0  ;;  %v1013_v18 = vmul.f32 %v981_v34, %v981_v34  ;;  %v1029_v48 = vsel %vm984_vm4, %v1015_v39, 0.0 }
 0x107   : > { %v995_v37 = vadd.f32 %v994_v36, %v993_v29 }
 0x108   : > { %v1025_v40 = vsel %vm984_vm4, %v1013_v18, 0.0 }
 0x109   : > { %v997_v41 = vadd.f32 %v996_v38, %v995_v37  ;;  %v1026_v42 = vadd.f32 %v1025_v40, %v1024_v35 }
 0x10b   : > { %v999_v45 = vadd.f32 %v998_v44, %v997_v41  ;;  %v1028_v46 = vadd.f32 %v1027_v43, %v1026_v42 }
 0x10d   : > { %v1000_v49 = vrot.slane %v999_v45, 4  ;;  %v1030_v50 = vadd.f32 %v1029_v48, %v1028_v46 }
 0x10f   : > { %v1001_v51 = vadd.f32 %v1000_v49, %v999_v45  ;;  %v1031_v53 = vrot.slane %v1030_v50, 4 }
 0x111   : > { %v1002_v54 = vrot.slane %v1001_v51, 2  ;;  %v1032_v55 = vadd.f32 %v1031_v53, %v1030_v50 }
 0x113   : > { %v1003_v58 = vadd.f32 %v1002_v54, %v1001_v51  ;;  %v1033_v59 = vrot.slane %v1032_v55, 2 }
 0x115   : > { %v1004_v60 = vrot.slane %v1003_v58, 1  ;;  %v1034_v61 = vadd.f32 %v1033_v59, %v1032_v55 }
 0x117   : > { %v1005_v62 = vadd.f32 %v1004_v60, %v1003_v58  ;;  %v1035_v63 = vrot.slane %v1034_v61, 1 }
 0x119   : > { %v1007_v0 = vmul.f32 0.015625, %v1005_v62  ;;  %v1036_v1 = vadd.f32 %v1035_v63, %v1034_v61 }
 0x11b   : > { %v1037_v2 = vmul.f32 0.015625, %v1036_v1  ;;  %v1038_v3 = vmul.f32 %v1007_v0, %v1007_v0  ;;  %v1040_v6 = vsub.f32 %v1631_v47, %v1007_v0  ;;  %v1041_v7 = vsub.f32 %v1639_v57, %v1007_v0 }
 0x11c   : > { %v1042_v8 = vsub.f32 %v1633_v52, %v1007_v0  ;;  %v1043_v9 = vsub.f32 %v1637_v56, %v1007_v0  ;;  %v1044_v11 = vsub.f32 %v1658_v19, %v1007_v0  ;;  %v1045_v12 = vsub.f32 %v981_v34, %v1007_v0  ;;  %v1289_v56 = vld [vmem:[%s1709_s3] ss:$0 sm:$0xff] }
 0x11d   : > { %v1039_v4 = vsub.f32 %v1037_v2, %v1038_v3  ;;  %v1046_v13 = vsub.f32 %v982_v25, %v1007_v0  ;;  %v1047_v14 = vsub.f32 %v983_v32, %v1007_v0 }
 0x11f   : > { %v1048_v5 = vadd.f32 1e-05, %v1039_v4 }
 0x121   : > { %1438 = vrsqrt.f32 %v1048_v5 }
 0x12e   : > { %v1439_v10 = vpop.eup %1438 }
 0x12f   : > { %v1050_v16 = vmul.f32 %v1439_v10, %v1040_v6  ;;  %v1051_v17 = vmul.f32 %v1439_v10, %v1041_v7  ;;  %v1052_v20 = vmul.f32 %v1439_v10, %v1042_v8  ;;  %v1053_v47 = vmul.f32 %v1439_v10, %v1043_v9 }
 0x130   : > { %v1054_v21 = vmul.f32 %v1439_v10, %v1044_v11  ;;  %v1055_v57 = vmul.f32 %v1439_v10, %v1045_v12  ;;  %v1056_v22 = vmul.f32 %v1439_v10, %v1046_v13  ;;  %v1057_v52 = vmul.f32 %v1439_v10, %v1047_v14 }
 0x131   : > { %v1065_v19 = vmul.f32 %v1288_v15, %v1050_v16  ;;  %v1066_v23 = vmul.f32 %v1288_v15, %v1051_v17  ;;  %v1067_v24 = vmul.f32 %v1288_v15, %v1052_v20  ;;  %v1068_v25 = vmul.f32 %v1288_v15, %v1053_v47 }
 0x132   : > { %v1069_v26 = vmul.f32 %v1288_v15, %v1054_v21  ;;  %v1070_v27 = vmul.f32 %v1288_v15, %v1055_v57  ;;  %v1071_v28 = vmul.f32 %v1288_v15, %v1056_v22  ;;  %v1072_v29 = vmul.f32 %v1288_v15, %v1057_v52 }
 0x133   : > { %v1080_v30 = vadd.f32 %v1289_v56, %v1065_v19  ;;  %v1081_v31 = vadd.f32 %v1289_v56, %v1066_v23  ;;  %v1082_v32 = vadd.f32 %v1289_v56, %v1067_v24  ;;  %v1083_v34 = vadd.f32 %v1289_v56, %v1068_v25 }
 0x134   : > { %v1084_v35 = vadd.f32 %v1289_v56, %v1069_v26  ;;  %v1085_v33 = vadd.f32 %v1289_v56, %v1070_v27  ;;  %v1086_v36 = vadd.f32 %v1289_v56, %v1071_v28  ;;  %v1087_v18 = vadd.f32 %v1289_v56, %v1072_v29 }
 0x135   : > { %vm1088_vm6 = vcmp.ge.f32.partialorder %v1080_v30, 0.0  ;;  %vm1089_vm7 = vcmp.ge.f32.partialorder %v1081_v31, 0.0  ;;  %vm1090_vm8 = vcmp.ge.f32.partialorder %v1082_v32, 0.0  ;;  %vm1091_vm9 = vcmp.ge.f32.partialorder %v1083_v34, 0.0 }
 0x136   : > { %vm1092_vm10 = vcmp.ge.f32.partialorder %v1084_v35, 0.0  ;;  %vm1093_vm11 = vcmp.ge.f32.partialorder %v1085_v33, 0.0  ;;  %vm1094_vm12 = vcmp.ge.f32.partialorder %v1086_v36, 0.0  ;;  %vm1095_vm13 = vcmp.ge.f32.partialorder %v1087_v18, 0.0 }
 0x137   : > { %v1096_v37 = vmul.f32 0.2, %v1080_v30  ;;  %v1097_v38 = vmul.f32 0.2, %v1081_v31  ;;  %v1098_v39 = vmul.f32 0.2, %v1082_v32 }
 0x138   : > { %v1099_v40 = vmul.f32 0.2, %v1083_v34  ;;  %v1100_v41 = vmul.f32 0.2, %v1084_v35  ;;  %v1101_v42 = vmul.f32 0.2, %v1085_v33 }
 0x139   : > { %v1102_v43 = vmul.f32 0.2, %v1086_v36  ;;  %v1103_v44 = vmul.f32 0.2, %v1087_v18  ;;  %v1104_v45 = vsel %vm1088_vm6, %v1080_v30, %v1096_v37  ;;  %v1105_v46 = vsel %vm1089_vm7, %v1081_v31, %v1097_v38 }
 0x13a   : > { %v1106_v48 = vsel %vm1090_vm8, %v1082_v32, %v1098_v39  ;;  %v1107_v49 = vsel %vm1091_vm9, %v1083_v34, %v1099_v40  ;;  %v1108_v50 = vsel %vm1092_vm10, %v1084_v35, %v1100_v41  ;;  %v1109_v51 = vsel %vm1093_vm11, %v1085_v33, %v1101_v42 }
 0x13b   : > { %v1110_v53 = vsel %vm1094_vm12, %v1086_v36, %v1102_v43  ;;  %v1111_v54 = vsel %vm1095_vm13, %v1087_v18, %v1103_v44  ;;  %v1301_v55 = vpack.c.bf16 %v1104_v45, %v1104_v45  ;;  %v1302_v58 = vpack.c.bf16 %v1105_v46, %v1105_v46 }
 0x13c   : > { %v1303_v59 = vpack.c.bf16 %v1106_v48, %v1106_v48  ;;  %v1304_v60 = vpack.c.bf16 %v1107_v49, %v1107_v49  ;;  %v1305_v61 = vpack.c.bf16 %v1108_v50, %v1108_v50  ;;  %v1306_v62 = vpack.c.bf16 %v1109_v51, %v1109_v51 }
 0x13d   : > { %v1307_v63 = vpack.c.bf16 %v1110_v53, %v1110_v53  ;;  %v1308_v0 = vpack.c.bf16 %v1111_v54, %v1111_v54  ;;  %1145 = vst.msk [vmem:[%s197_s16] sm:$0xf] %vm1144_vm5, %v1301_v55  ;;  %1146 = vst.msk [vmem:[%s197_s16 + $0x4] sm:$0xf] %vm1144_vm5, %v1302_v58 }
 0x13e   : > { %1147 = vst.msk [vmem:[%s197_s16 + $0x8] sm:$0xf] %vm1144_vm5, %v1303_v59  ;;  %1148 = vst.msk [vmem:[%s197_s16 + $0xc] sm:$0xf] %vm1144_vm5, %v1304_v60 }
 0x13f   : > { %1149 = vst.msk [vmem:[%s197_s16 + $0x10] sm:$0xf] %vm1144_vm5, %v1305_v61  ;;  %1150 = vst.msk [vmem:[%s197_s16 + $0x14] sm:$0xf] %vm1144_vm5, %v1306_v62 }
 0x140   : > { %1151 = vst.msk [vmem:[%s197_s16 + $0x18] sm:$0xf] %vm1144_vm5, %v1307_v63  ;;  %1152 = vst.msk [vmem:[%s197_s16 + $0x1c] sm:$0xf] %vm1144_vm5, %v1308_v0 }
 0x141 PF: > { %s14_s15 = sadd.s32 1, %s1446_s15  }
 0x142   : > { %p11_p4 = scmp.ge.s32.totalorder %s14_s15, 4  }
 0x144   :  { %13 = sbr.rel (!%p11_p4) target bundleno = 1 (0x1), region = 67 }

// kernel: critic_forward.7
= control target key start
LH: loop header
LB: loop body
LE: loop exit
PB: predicated region body
PF: predicated region fallthrough
CT: control target
= control target key end

     0   :  { %s923_s23 = smov 0   ;;  %s1062_s0 = inlined_call_operand.vmem [shape: bf16[2,16,512], index: 0, kind: input, shape index: {}]   ;;  %s1063_s1 = inlined_call_operand.vmem [shape: bf16[512,64], index: 1, kind: input, shape index: {}]   ;;  %s1064_s2 = inlined_call_operand.vmem [shape: f32[1,64], index: 2, kind: input, shape index: {}]   ;;  %s1065_s3 = inlined_call_operand.vmem [shape: f32[1,64], index: 3, kind: input, shape index: {}]   ;;  %s1066_s4 = inlined_call_operand.vmem [shape: f32[16,64], index: 4, kind: input, shape index: {}]   ;;  %s1067_s5 = inlined_call_operand.<no memory space> [shape: f32[1,1], index: 5, kind: input, shape index: {}]   ;;  %s1068_s6 = inlined_call_operand.vmem [shape: f32[2,1,1], index: 6, kind: output, shape index: {}]  }
   0x1   :  { %v11_v0 = vstv %s1067_s5 }
   0x2   :  { %12 = vst [vmem:[#allocation2] sm:$0x1] %v11_v0 }
   0x3 LB: > { %s737_s24 = sadd.s32 4294967295, %s883_s23   ;;  %p741_p0 = scmp.ge.s32.totalorder %s883_s23, 1  ;;  %s883_s23 = sphi %s923_s23, %s18_s23  }
   0x4   : > { %p214_p1 = scmp.lt.s32.totalorder %s883_s23, 3 }
   0x6   : > { %p215_p2 = pnand %p741_p0, %p214_p1 }
   0x7   : > { %p242_p3 = scmp.lt.s32.totalorder (!%p215_p2), %s737_s24, 1 }
   0x8   : > { %218 = sbr.rel (%p215_p2) target bundleno = 459 (0x1cb), region = 44 }
   0xd   : > { %v837_v1 = vld [vmem:[%s1063_s1 + $0x78] sm:$0xff]   ;;  %v841_v5 = vld [vmem:[%s1063_s1 + $0x70] sm:$0xff]   ;;  %v845_v9 = vld [vmem:[%s1063_s1 + $0x68] sm:$0xff]   ;;  %s1070_s24 = smov (!%p242_p3, %s737_s24), 1  ;;  %vm613_vm0 = vcmask 523264   ;;  %vm688_vm3 = vcmask 0  }
   0xe   : > { %v838_v2 = vld [vmem:[%s1063_s1 + $0xf8] sm:$0xff]   ;;  %785 = vmatprep.subr.bf16.mxu0 %v837_v1  ;;  %v842_v6 = vld [vmem:[%s1063_s1 + $0xf0] sm:$0xff]   ;;  %v846_v10 = vld [vmem:[%s1063_s1 + $0xe8] sm:$0xff]   ;;  %s784_s8 = sshll.u32 %s1070_s24, 5  ;;  %s249_s9 = scalar_lea.vmem %s1068_s6, %s1070_s24 }
   0xf   : > { %v839_v3 = vld [vmem:[%s1063_s1 + $0x38] sm:$0xff]   ;;  %807 = vmatprep.subr.bf16.mxu1 %v838_v2  ;;  %v843_v7 = vld [vmem:[%s1063_s1 + $0x30] sm:$0xff]   ;;  %v847_v11 = vld [vmem:[%s1063_s1 + $0x28] sm:$0xff]   ;;  %s246_s17 = scalar_lea.vmem %s1062_s0, %s784_s8 }
  0x10   : > { %v840_v4 = vld [vmem:[%s1063_s1 + $0xb8] sm:$0xff]   ;;  %786 = vmatpush3.bf16.msra.mxu0 %v839_v3  ;;  %v844_v8 = vld [vmem:[%s1063_s1 + $0xb0] sm:$0xff]   ;;  %v848_v12 = vld [vmem:[%s1063_s1 + $0xa8] sm:$0xff]  }
  0x11   : > { %808 = vmatpush3.bf16.msra.mxu1 %v840_v4  ;;  %787 = vmatprep.subr.bf16.mxu0 %v841_v5  ;;  %v849_v13 = vld [vmem:[%s1063_s1 + $0x60] sm:$0xff]   ;;  %v853_v17 = vld [vmem:[%s1063_s1 + $0x58] sm:$0xff]   ;;  %v857_v21 = vld [vmem:[%s1063_s1 + $0x50] sm:$0xff]  }
  0x12   : > { %809 = vmatprep.subr.bf16.mxu1 %v842_v6  ;;  %v850_v14 = vld [vmem:[%s1063_s1 + $0xe0] sm:$0xff]   ;;  %v854_v18 = vld [vmem:[%s1063_s1 + $0xd8] sm:$0xff]   ;;  %v858_v22 = vld [vmem:[%s1063_s1 + $0xd0] sm:$0xff]  }
  0x13   : > { %v851_v15 = vld [vmem:[%s1063_s1 + $0x20] sm:$0xff]   ;;  %v855_v19 = vld [vmem:[%s1063_s1 + $0x18] sm:$0xff]   ;;  %v859_v23 = vld [vmem:[%s1063_s1 + $0x10] sm:$0xff]  }
  0x14   : > { %788 = vmatpush3.bf16.msra.mxu0 %v843_v7  ;;  %v852_v16 = vld [vmem:[%s1063_s1 + $0xa0] sm:$0xff]   ;;  %v856_v20 = vld [vmem:[%s1063_s1 + $0x98] sm:$0xff]   ;;  %v860_v24 = vld [vmem:[%s1063_s1 + $0x90] sm:$0xff]  }
  0x15   : > { %810 = vmatpush3.bf16.msra.mxu1 %v844_v8  ;;  %789 = vmatprep.subr.bf16.mxu0 %v845_v9  ;;  %v861_v25 = vld [vmem:[%s1063_s1 + $0x48] sm:$0xff]   ;;  %v865_v29 = vld [vmem:[%s1063_s1 + $0x40] sm:$0xff]  }
  0x16   : > { %811 = vmatprep.subr.bf16.mxu1 %v846_v10  ;;  %v862_v26 = vld [vmem:[%s1063_s1 + $0xc8] sm:$0xff]   ;;  %v866_v30 = vld [vmem:[%s1063_s1 + $0xc0] sm:$0xff]  }
  0x17   : > { %v863_v27 = vld [vmem:[%s1063_s1 + $0x8] sm:$0xff]   ;;  %v867_v31 = vld [vmem:[%s1063_s1] sm:$0xff]  }
  0x18   : > { %790 = vmatpush3.bf16.msra.mxu0 %v847_v11  ;;  %v864_v28 = vld [vmem:[%s1063_s1 + $0x88] sm:$0xff]   ;;  %v868_v32 = vld [vmem:[%s1063_s1 + $0x80] sm:$0xff]  }
  0x19   : > { %812 = vmatpush3.bf16.msra.mxu1 %v848_v12  ;;  %791 = vmatprep.subr.bf16.mxu0 %v849_v13  ;;  %v869_v33 = vld [vmem:[%s246_s17] ss:$16 sps:$4 sm:$0xff]   ;;  %v871_v34 = vld [vmem:[%s246_s17 + $0x4] ss:$16 sps:$4 sm:$0xff]   ;;  %v872_v35 = vld [vmem:[%s246_s17 + $0x8] ss:$16 sps:$4 sm:$0xff]  }
  0x1a   : > { %813 = vmatprep.subr.bf16.mxu1 %v850_v14  ;;  %v874_v36 = vld [vmem:[%s246_s17 + $0xc] ss:$16 sps:$4 sm:$0xff]   ;;  %563 = vmatprep.mubr.bf16.mxu0 %v871_v34 }
  0x1b   : > { %604 = vmatprep.mubr.bf16.mxu1 %v874_v36 }
  0x1c   : > { %792 = vmatpush3.bf16.msra.mxu0 %v851_v15  ;;  %v780_v15 = vld [vmem:[%s1064_s2] ss:$0 sm:$0xff] }
  0x1d   : > { %814 = vmatpush3.bf16.msra.mxu1 %v852_v16  ;;  %793 = vmatprep.subr.bf16.mxu0 %v853_v17 }
  0x1e   : > { %815 = vmatprep.subr.bf16.mxu1 %v854_v18  ;;  %v781_v18 = vld [vmem:[%s1065_s3] ss:$0 sm:$0xff] }
  0x20   : > { %794 = vmatpush3.bf16.msra.mxu0 %v855_v19 }
  0x21   : > { %816 = vmatpush3.bf16.msra.mxu1 %v856_v20  ;;  %795 = vmatprep.subr.bf16.mxu0 %v857_v21 }
  0x22   : > { %817 = vmatprep.subr.bf16.mxu1 %v858_v22 }
  0x24   : > { %796 = vmatpush3.bf16.msra.mxu0 %v859_v23  ;;  %v669_v23 = vld [vmem:[%s1066_s4] sm:$0xff] }
  0x25   : > { %818 = vmatpush3.bf16.msra.mxu1 %v860_v24  ;;  %797 = vmatprep.subr.bf16.mxu0 %v861_v25 }
  0x26   : > { %819 = vmatprep.subr.bf16.mxu1 %v862_v26 }
  0x28   : > { %798 = vmatpush3.bf16.msra.mxu0 %v863_v27 }
  0x29   : > { %820 = vmatpush3.bf16.msra.mxu1 %v864_v28  ;;  %799 = vmatprep.subr.bf16.mxu0 %v865_v29  ;;  %v670_v28 = vld [vmem:[%s1066_s4 + $0x8] sm:$0xff] }
  0x2a   : > { %821 = vmatprep.subr.bf16.mxu1 %v866_v30 }
  0x2c   : > { %800 = vmatpush3.bf16.msra.mxu0 %v867_v31 }
  0x2d   : > { %822 = vmatpush3.bf16.msra.mxu1 %v868_v32 }
  0x2f   : > { %564 = vmatmul.mubr.bf16.vlgmr.msra.gmra.mxu0 %v869_v33 }
  0x30   : > { %605 = vmatmul.mubr.bf16.vlgmr.msra.gmra.mxu1 %v872_v35 }
  0xef   : > { %v801_v37 = vpop.f32.mrf.mxu0 }
  0xf0   : > { %v823_v38 = vpop.f32.mrf.mxu1 }
  0xf1   : > { %v802_v39 = vpop.f32.mrf.mxu0 }
  0xf2   : > { %v803_v40 = vadd.f32 %v802_v39, %v801_v37  ;;  %v824_v41 = vpop.f32.mrf.mxu1 }
  0xf3   : > { %v825_v42 = vadd.f32 %v824_v41, %v823_v38  ;;  %v804_v43 = vpop.f32.mrf.mxu0  ;;  %v686_v41 = vld [vmem:[#allocation2] sm:$0x1] }
  0xf4   : > { %v826_v44 = vpop.f32.mrf.mxu1 }
  0xf5   : > { %v607_v45 = vadd.f32 %v825_v42, %v803_v40  ;;  %v805_v46 = vpop.f32.mrf.mxu0 }
  0xf6   : > { %v806_v47 = vadd.f32 %v805_v46, %v804_v43  ;;  %v827_v48 = vpop.f32.mrf.mxu1 }
  0xf7   : > { %v828_v49 = vadd.f32 %v827_v48, %v826_v44  ;;  %v625_v50 = vmul.f32 %v607_v45, %v607_v45  ;;  %v614_v52 = vsel %vm613_vm0, %v607_v45, 0.0 }
  0xf9   : > { %v610_v51 = vadd.f32 %v828_v49, %v806_v47  ;;  %v627_v56 = vsel %vm613_vm0, %v625_v50, 0.0 }
  0xfb   : > { %v615_v53 = vsel %vm613_vm0, %v610_v51, 0.0  ;;  %v626_v54 = vmul.f32 %v610_v51, %v610_v51 }
  0xfc   : > { %v616_v55 = vadd.f32 %v615_v53, %v614_v52 }
  0xfd   : > { %v628_v57 = vsel %vm613_vm0, %v626_v54, 0.0 }
  0xfe   : > { %v617_v58 = vrot.slane %v616_v55, 4  ;;  %v629_v59 = vadd.f32 %v628_v57, %v627_v56 }
 0x100   : > { %v618_v60 = vadd.f32 %v617_v58, %v616_v55  ;;  %v630_v61 = vrot.slane %v629_v59, 4 }
 0x102   : > { %v619_v62 = vrot.slane %v618_v60, 2  ;;  %v631_v63 = vadd.f32 %v630_v61, %v629_v59 }
 0x104   : > { %v620_v0 = vadd.f32 %v619_v62, %v618_v60  ;;  %v632_v1 = vrot.slane %v631_v63, 2 }
 0x106   : > { %v621_v2 = vrot.slane %v620_v0, 1  ;;  %v633_v3 = vadd.f32 %v632_v1, %v631_v63 }
 0x108   : > { %v622_v4 = vadd.f32 %v621_v2, %v620_v0  ;;  %v634_v5 = vrot.slane %v633_v3, 1 }
 0x10a   : > { %v624_v6 = vmul.f32 0.0625, %v622_v4  ;;  %v635_v7 = vadd.f32 %v634_v5, %v633_v3 }
 0x10c   : > { %v636_v8 = vmul.f32 0.0625, %v635_v7  ;;  %v637_v9 = vmul.f32 %v624_v6, %v624_v6  ;;  %v640_v12 = vsub.f32 %v610_v51, %v624_v6  ;;  %v639_v13 = vsub.f32 %v607_v45, %v624_v6 }
 0x10e   : > { %v638_v10 = vsub.f32 %v636_v8, %v637_v9 }
 0x110   : > { %v641_v11 = vadd.f32 1e-05, %v638_v10 }
 0x112   : > { %875 = vrsqrt.f32 %v641_v11 }
 0x11f   : > { %v876_v14 = vpop.eup %875 }
 0x120   : > { %v644_v16 = vmul.f32 %v876_v14, %v640_v12  ;;  %v643_v17 = vmul.f32 %v876_v14, %v639_v13 }
 0x122   : > { %v652_v19 = vmul.f32 %v780_v15, %v643_v17  ;;  %v653_v20 = vmul.f32 %v780_v15, %v644_v16 }
 0x124   : > { %v661_v21 = vadd.f32 %v781_v18, %v652_v19  ;;  %v662_v22 = vadd.f32 %v781_v18, %v653_v20 }
 0x126   : > { %vm663_vm1 = vcmp.ge.f32.partialorder %v661_v21, 0.0  ;;  %v665_v24 = vmul.f32 0.2, %v661_v21  ;;  %vm664_vm2 = vcmp.ge.f32.partialorder %v662_v22, 0.0  ;;  %v666_v25 = vmul.f32 0.2, %v662_v22 }
 0x128   : > { %v667_v26 = vsel %vm663_vm1, %v661_v21, %v665_v24  ;;  %v668_v27 = vsel %vm664_vm2, %v662_v22, %v666_v25 }
 0x129   : > { %v671_v29 = vmul.f32 %v669_v23, %v667_v26  ;;  %v672_v31 = vmul.f32 %v670_v28, %v668_v27 }
 0x12b   : > { %v673_v30 = vsel %vm613_vm0, %v671_v29, 0.0  ;;  %v676_v32 = vsel %vm613_vm0, %v672_v31, 0.0 }
 0x12c   : > { %674 = vadd.xlane.f32.xlu0 %v673_v30 }
 0x130   : > { %677 = vadd.xlane.f32.xlu0 %v676_v32 }
 0x1b5   : > { %v675_v33 = vpop.xlane.xlu0 %674 }
 0x1b9   : > { %v678_v34 = vpop.xlane.xlu0 %677 }
 0x1ba   : > { %v679_v35 = vadd.f32 %v678_v34, %v675_v33 }
 0x1bc   : > { %v680_v36 = vrot.slane %v679_v35, 4 }
 0x1be   : > { %v681_v37 = vadd.f32 %v680_v36, %v679_v35 }
 0x1c0   : > { %v682_v38 = vrot.slane %v681_v37, 2 }
 0x1c2   : > { %v683_v39 = vadd.f32 %v682_v38, %v681_v37 }
 0x1c4   : > { %v684_v40 = vrot.slane %v683_v39, 1 }
 0x1c6   : > { %v685_v42 = vadd.f32 %v684_v40, %v683_v39 }
 0x1c8   : > { %v687_v43 = vadd.f32 %v686_v41, %v685_v42 }
 0x1ca   : > { %689 = vst.msk [vmem:[%s249_s9] sm:$0x1] %vm688_vm3, %v687_v43 }
 0x1cb PF: > { %s18_s23 = sadd.s32 1, %s883_s23  }
 0x1cc   : > { %p15_p4 = scmp.ge.s32.totalorder %s18_s23, 4  }
 0x1ce   :  { %17 = sbr.rel (!%p15_p4) target bundleno = 3 (0x3), region = 74 }

</bundles_post_ra>
